<compile_context>
chip_gen: v7x
topology: tpu7x:2x2x1
jax: 0.10.0
libtpu: 0.0.40
codegen_flags: <defaults>
</compile_context>

<pallas_src>
import functools
import math

import jax
import jax.numpy as jnp
from jax.experimental import pallas as pl
from jax.experimental.pallas import tpu as pltpu

EPS = 1e-5  # PyTorch LayerNorm default eps


# ---------------------------------------------------------------------------
# Shared math helpers (used by BOTH the kernel and the pure-JAX reference so
# the quantization / accumulation behaviour matches exactly).
# ---------------------------------------------------------------------------
def _layernorm(x, w, b):
    mu = jnp.mean(x, axis=-1, keepdims=True)
    var = jnp.mean((x - mu) ** 2, axis=-1, keepdims=True)
    return (x - mu) * jax.lax.rsqrt(var + EPS) * w + b


def _erf(x):
    # Abramowitz & Stegun 7.1.26 polynomial approximation, |err| < 1.5e-7.
    a1, a2, a3, a4, a5 = (0.254829592, -0.284496736, 1.421413741,
                          -1.453152027, 1.061405429)
    p = 0.3275911
    ax = jnp.abs(x)
    t = 1.0 / (1.0 + p * ax)
    poly = ((((a5 * t + a4) * t + a3) * t + a2) * t + a1) * t
    y = 1.0 - poly * jnp.exp(-ax * ax)
    return jnp.where(x < 0, -y, y)


def _gelu(x):
    # exact (erf) GELU, matching PyTorch F.gelu(approximate='none')
    return 0.5 * x * (1.0 + _erf(x * 0.7071067811865476))


def _head_attention(xb, wq_h, bq_h, wk_h, bk_h, wv_h, bv_h, wo_h, mask, scale):
    """One attention head over the flattened (B*N, E) activation.

    xb is bf16; per-head weight slices are bf16; mask is a (BN, BN) additive
    block-diagonal mask (-1e30 across batch boundaries).  Returns the f32
    (BN, E) contribution of this head through its W_o row block.
    """
    f32, bf = jnp.float32, jnp.bfloat16
    q = jnp.dot(xb, wq_h, preferred_element_type=f32) + bq_h        # (BN, dh)
    k = jnp.dot(xb, wk_h, preferred_element_type=f32) + bk_h
    v = jnp.dot(xb, wv_h, preferred_element_type=f32) + bv_h
    s = jax.lax.dot_general(q.astype(bf), k.astype(bf),
                            (((1,), (1,)), ((), ())),
                            preferred_element_type=f32)             # (BN, BN)
    s = s * scale + mask
    s = s - jnp.max(s, axis=-1, keepdims=True)
    p = jnp.exp(s)
    p = p / jnp.sum(p, axis=-1, keepdims=True)
    hv = jnp.dot(p.astype(bf), v.astype(bf),
                 preferred_element_type=f32)                         # (BN, dh)
    return jnp.dot(hv.astype(bf), wo_h, preferred_element_type=f32)  # (BN, E)


def _block_diag_mask(batch, seq):
    bn = batch * seq
    r = jnp.arange(bn) // seq
    same = r[:, None] == r[None, :]
    return jnp.where(same, 0.0, -1e30).astype(jnp.float32)


# ---------------------------------------------------------------------------
# Fused kernel: grid = (layer, ffn_chunk)
# ---------------------------------------------------------------------------
def fused_transformer_kernel(
        patches_ref, pos_ref, mask_ref, embw_ref, embb_ref,
        wq_ref, bq_ref, wk_ref, bk_ref, wv_ref, bv_ref, wo_ref, bo_ref,
        ln1w_ref, ln1b_ref, w1_ref, b1_ref, w2_ref, b2_ref,
        ln2w_ref, ln2b_ref, fw_ref, fb_ref,
        o_ref,
        x_scr, ffn_scr,
        *, num_heads, batch, seq):
    d = pl.program_id(0)
    c = pl.program_id(1)
    nd = pl.num_programs(0)
    nc = pl.num_programs(1)

    E = x_scr.shape[-1]
    dh = E // num_heads
    scale = 1.0 / math.sqrt(dh)
    bf = jnp.bfloat16

    # ---- prologue (first step only): patch embedding + positional embedding
    @pl.when(jnp.logical_and(d == 0, c == 0))
    def _():
        x0 = jnp.dot(patches_ref[...].astype(bf), embw_ref[...],
                     preferred_element_type=jnp.float32)             # (BN, E)
        x_scr[...] = x0 + embb_ref[...] + pos_ref[...]

    # ---- multi-head self-attention + residual + norm1 (chunk 0 only) -------
    @pl.when(c == 0)
    def _():
        x = x_scr[...]                                               # (BN, E)
        xb = x.astype(bf)
        mask = mask_ref[...]
        attn = jnp.zeros(x.shape, jnp.float32)
        for h in range(num_heads):                  # static, tiny (heads = 6)
            sl = slice(h * dh, (h + 1) * dh)
            attn = attn + _head_attention(
                xb,
                wq_ref[0, :, sl], bq_ref[0, :, sl],
                wk_ref[0, :, sl], bk_ref[0, :, sl],
                wv_ref[0, :, sl], bv_ref[0, :, sl],
                wo_ref[0, sl, :],                   # sublane-aligned row block
                mask, scale)
        attn = attn + bo_ref[0]
        # dropout1 == identity (inference); residual + norm1
        x_scr[...] = _layernorm(x + attn, ln1w_ref[0], ln1b_ref[0])

    # ---- feed-forward chunk (every step): Linear -> GELU -> Linear ---------
    x1 = x_scr[...]                                                  # ln1 out
    h1 = jnp.dot(x1.astype(bf), w1_ref[0],
                 preferred_element_type=jnp.float32) + b1_ref[0]     # (BN, Fc)
    h1 = _gelu(h1)
    part = jnp.dot(h1.astype(bf), w2_ref[0],
                   preferred_element_type=jnp.float32)               # (BN, E)

    @pl.when(c == 0)
    def _():
        ffn_scr[...] = part

    @pl.when(c > 0)
    def _():
        ffn_scr[...] = ffn_scr[...] + part

    # ---- finish the layer (last chunk): residual + norm2 -------------------
    @pl.when(c == nc - 1)
    def _():
        # dropout2 == identity (inference)
        y = _layernorm(x1 + ffn_scr[...] + b2_ref[0],
                       ln2w_ref[0], ln2b_ref[0])
        x_scr[...] = y

    # ---- epilogue (last layer, last chunk): final LN + mean over sequence --
    @pl.when(jnp.logical_and(d == nd - 1, c == nc - 1))
    def _():
        z = _layernorm(x_scr[...], fw_ref[...], fb_ref[...])         # (BN, E)
        # one lane-dense store for all batch rows (sublane split by 8 is free)
        o_ref[...] = z.reshape(batch, seq, E).mean(axis=1)           # (B, E)


# ---------------------------------------------------------------------------
# Wrapper
# ---------------------------------------------------------------------------
def minimal_transformer_forward(patches, params, num_heads, ffn_chunks=2):
    B, N, P = patches.shape
    E = params["embed_w"].shape[1]
    Fh = params["w1"].shape[2]
    depth = params["wq"].shape[0]
    BN = B * N
    Fc = Fh // ffn_chunks
    assert Fh % ffn_chunks == 0 and Fc % 128 == 0

    patches2d = patches.reshape(BN, P)
    pos2d = jnp.tile(params["pos"], (B, 1))          # (B*N, E)
    mask = _block_diag_mask(B, N)                    # (BN, BN) additive mask

    def fixed(shape):        # same block every step -> DMA'd once
        return pl.BlockSpec(shape, lambda d, c: (0,) * len(shape))

    def layer(shape):        # one block per layer, prefetched a layer ahead
        return pl.BlockSpec((1,) + shape, lambda d, c: (d, 0, 0))

    in_specs = [
        fixed((BN, P)),                      # patches
        fixed((BN, E)),                      # positional embedding (tiled)
        fixed((BN, BN)),                     # block-diagonal attention mask
        fixed((P, E)), fixed((1, E)),        # embed W (bf16), b
        layer((E, E)), layer((1, E)),        # wq, bq
        layer((E, E)), layer((1, E)),        # wk, bk
        layer((E, E)), layer((1, E)),        # wv, bv
        layer((E, E)), layer((1, E)),        # wo, bo
        layer((1, E)), layer((1, E)),        # ln1 w, b
        pl.BlockSpec((1, E, Fc), lambda d, c: (d, 0, c)),   # w1 chunk
        pl.BlockSpec((1, 1, Fc), lambda d, c: (d, 0, c)),   # b1 chunk
        pl.BlockSpec((1, Fc, E), lambda d, c: (d, c, 0)),   # w2 chunk
        layer((1, E)),                       # b2 (added once, at last chunk)
        layer((1, E)), layer((1, E)),        # ln2 w, b
        fixed((1, E)), fixed((1, E)),        # final ln w, b
    ]

    kernel = functools.partial(fused_transformer_kernel,
                               num_heads=num_heads, batch=B, seq=N)

    return pl.pallas_call(
        kernel,
        out_shape=jax.ShapeDtypeStruct((B, E), jnp.float32),
        grid=(depth, ffn_chunks),
        in_specs=in_specs,
        out_specs=pl.BlockSpec((B, E), lambda d, c: (0, 0)),
        scratch_shapes=[pltpu.VMEM((BN, E), jnp.float32),   # activation
                        pltpu.VMEM((BN, E), jnp.float32)],  # FFN accumulator
        compiler_params=pltpu.CompilerParams(
            dimension_semantics=("arbitrary", "arbitrary"),
            vmem_limit_bytes=32 * 1024 * 1024),
    )(patches2d, pos2d, mask, params["embed_w"], params["embed_b"],
      params["wq"], params["bq"], params["wk"], params["bk"],
      params["wv"], params["bv"], params["wo"], params["bo"],
      params["ln1w"], params["ln1b"], params["w1"], params["b1"],
      params["w2"], params["b2"], params["ln2w"], params["ln2b"],
      params["final_ln_w"], params["final_ln_b"])


# ---------------------------------------------------------------------------
# Parameters: projection / FFN weights bf16 (stacked over depth), rest f32
# ---------------------------------------------------------------------------
def init_params(key, num_patches, patch_dim, embed_dim, depth, ffn_dim):
    E, Fh, P = embed_dim, ffn_dim, patch_dim
    ks = jax.random.split(key, 16)
    f32, bf = jnp.float32, jnp.bfloat16

    def w(k, shape, dtype=bf):
        return (jax.random.normal(k, shape, f32) * 0.02).astype(dtype)

    return {
        "embed_w": w(ks[0], (P, E)),
        "embed_b": w(ks[1], (1, E), f32),
        "pos":     w(ks[2], (num_patches, E), f32),
        "wq": w(ks[3], (depth, E, E)),   "bq": w(ks[4],  (depth, 1, E), f32),
        "wk": w(ks[5], (depth, E, E)),   "bk": w(ks[6],  (depth, 1, E), f32),
        "wv": w(ks[7], (depth, E, E)),   "bv": w(ks[8],  (depth, 1, E), f32),
        "wo": w(ks[9], (depth, E, E)),   "bo": w(ks[10], (depth, 1, E), f32),
        "w1": w(ks[11], (depth, E, Fh)), "b1": w(ks[12], (depth, 1, Fh), f32),
        "w2": w(ks[13], (depth, Fh, E)), "b2": w(ks[14], (depth, 1, E), f32),
        "ln1w": jnp.ones((depth, 1, E), f32), "ln1b": jnp.zeros((depth, 1, E), f32),
        "ln2w": jnp.ones((depth, 1, E), f32), "ln2b": jnp.zeros((depth, 1, E), f32),
        "final_ln_w": jnp.ones((1, E), f32), "final_ln_b": jnp.zeros((1, E), f32),
    }


# ---------------------------------------------------------------------------
# Pure-JAX reference (identical bf16 quantization / same helpers as kernel).
# ---------------------------------------------------------------------------
def reference_forward(patches, params, num_heads):
    B, N, P = patches.shape
    E = params["embed_w"].shape[1]
    depth = params["wq"].shape[0]
    dh = E // num_heads
    scale = 1.0 / math.sqrt(dh)
    BN = B * N
    bf = jnp.bfloat16

    x = jnp.dot(patches.reshape(BN, P).astype(bf), params["embed_w"],
                preferred_element_type=jnp.float32)
    x = x + params["embed_b"] + jnp.tile(params["pos"], (B, 1))
    mask = _block_diag_mask(B, N)

    for d in range(depth):
        xb = x.astype(bf)
        attn = jnp.zeros((BN, E), jnp.float32)
        for h in range(num_heads):
            sl = slice(h * dh, (h + 1) * dh)
            attn = attn + _head_attention(
                xb,
                params["wq"][d][:, sl], params["bq"][d][:, sl],
                params["wk"][d][:, sl], params["bk"][d][:, sl],
                params["wv"][d][:, sl], params["bv"][d][:, sl],
                params["wo"][d][sl, :], mask, scale)
        attn = attn + params["bo"][d]
        x1 = _layernorm(x + attn, params["ln1w"][d], params["ln1b"][d])
        h1 = _gelu(jnp.dot(x1.astype(bf), params["w1"][d],
                           preferred_element_type=jnp.float32) + params["b1"][d])
        ff = jnp.dot(h1.astype(bf), params["w2"][d],
                     preferred_element_type=jnp.float32) + params["b2"][d]
        x = _layernorm(x1 + ff, params["ln2w"][d], params["ln2b"][d])

    x = _layernorm(x, params["final_ln_w"], params["final_ln_b"])
    return x.reshape(B, N, E).mean(axis=1)


if __name__ == "__main__":
    # Small config consistent with the module: MinimalTransformer(num_patches=8,
    # patch_dim=32, embed_dim=384, depth=2); nhead=6 is hardcoded in the module.
    B, N, P, E, DEPTH, HEADS = 2, 8, 32, 384, 2, 6

    key = jax.random.PRNGKey(0)
    pkey, wkey = jax.random.split(key)
    patches = jax.random.normal(pkey, (B, N, P), jnp.float32)
    params = init_params(wkey, N, P, E, DEPTH, 4 * E)

    out = jax.block_until_ready(minimal_transformer_forward(patches, params, HEADS))
    ref = jax.block_until_ready(reference_forward(patches, params, HEADS))

    assert out.shape == (B, E)
    max_err = float(jnp.max(jnp.abs(out - ref)))
    assert bool(jnp.allclose(out, ref, atol=2e-3, rtol=2e-3)), f"max_err={max_err}"
    print("KERNEL_OK")
</pallas_src>

<mosaic_0001>
module attributes {stable_mosaic.version = 11 : i64} {
  func.func @fused_transformer_kernel(%arg0: i32, %arg1: i32, %arg2: memref<16x32xf32, #tpu.memory_space<vmem>>, %arg3: memref<16x384xf32, #tpu.memory_space<vmem>>, %arg4: memref<16x16xf32, #tpu.memory_space<vmem>>, %arg5: memref<32x384xbf16, #tpu.memory_space<vmem>>, %arg6: memref<1x384xf32, #tpu.memory_space<vmem>>, %arg7: memref<1x384x384xbf16, #tpu.memory_space<vmem>>, %arg8: memref<1x1x384xf32, #tpu.memory_space<vmem>>, %arg9: memref<1x384x384xbf16, #tpu.memory_space<vmem>>, %arg10: memref<1x1x384xf32, #tpu.memory_space<vmem>>, %arg11: memref<1x384x384xbf16, #tpu.memory_space<vmem>>, %arg12: memref<1x1x384xf32, #tpu.memory_space<vmem>>, %arg13: memref<1x384x384xbf16, #tpu.memory_space<vmem>>, %arg14: memref<1x1x384xf32, #tpu.memory_space<vmem>>, %arg15: memref<1x1x384xf32, #tpu.memory_space<vmem>>, %arg16: memref<1x1x384xf32, #tpu.memory_space<vmem>>, %arg17: memref<1x384x768xbf16, #tpu.memory_space<vmem>>, %arg18: memref<1x1x768xf32, #tpu.memory_space<vmem>>, %arg19: memref<1x768x384xbf16, #tpu.memory_space<vmem>>, %arg20: memref<1x1x384xf32, #tpu.memory_space<vmem>>, %arg21: memref<1x1x384xf32, #tpu.memory_space<vmem>>, %arg22: memref<1x1x384xf32, #tpu.memory_space<vmem>>, %arg23: memref<1x384xf32, #tpu.memory_space<vmem>>, %arg24: memref<1x384xf32, #tpu.memory_space<vmem>>, %arg25: memref<2x384xf32, #tpu.memory_space<vmem>>, %arg26: memref<16x384xf32, #tpu.memory_space<vmem>>, %arg27: memref<16x384xf32, #tpu.memory_space<vmem>>) attributes {dimension_semantics = [#tpu.dimension_semantics<arbitrary>, #tpu.dimension_semantics<arbitrary>], iteration_bounds = array<i64: 2, 2>, scalar_prefetch = 0 : i64, scratch_operands = 2 : i64, tpu.core_type = #tpu.core_type<tc>, window_params = [{pipeline_mode = #tpu.pipeline_mode<synchronous>, transform_indices = @transform_0, window_bounds = array<i64: 16, 32>}, {pipeline_mode = #tpu.pipeline_mode<synchronous>, transform_indices = @transform_1, window_bounds = array<i64: 16, 384>}, {pipeline_mode = #tpu.pipeline_mode<synchronous>, transform_indices = @transform_2, window_bounds = array<i64: 16, 16>}, {pipeline_mode = #tpu.pipeline_mode<synchronous>, transform_indices = @transform_3, window_bounds = array<i64: 32, 384>}, {pipeline_mode = #tpu.pipeline_mode<synchronous>, transform_indices = @transform_4, window_bounds = array<i64: 1, 384>}, {transform_indices = @transform_5, window_bounds = array<i64: 1, 384, 384>}, {transform_indices = @transform_6, window_bounds = array<i64: 1, 1, 384>}, {transform_indices = @transform_7, window_bounds = array<i64: 1, 384, 384>}, {transform_indices = @transform_8, window_bounds = array<i64: 1, 1, 384>}, {transform_indices = @transform_9, window_bounds = array<i64: 1, 384, 384>}, {transform_indices = @transform_10, window_bounds = array<i64: 1, 1, 384>}, {transform_indices = @transform_11, window_bounds = array<i64: 1, 384, 384>}, {transform_indices = @transform_12, window_bounds = array<i64: 1, 1, 384>}, {transform_indices = @transform_13, window_bounds = array<i64: 1, 1, 384>}, {transform_indices = @transform_14, window_bounds = array<i64: 1, 1, 384>}, {transform_indices = @transform_15, window_bounds = array<i64: 1, 384, 768>}, {transform_indices = @transform_16, window_bounds = array<i64: 1, 1, 768>}, {transform_indices = @transform_17, window_bounds = array<i64: 1, 768, 384>}, {transform_indices = @transform_18, window_bounds = array<i64: 1, 1, 384>}, {transform_indices = @transform_19, window_bounds = array<i64: 1, 1, 384>}, {transform_indices = @transform_20, window_bounds = array<i64: 1, 1, 384>}, {pipeline_mode = #tpu.pipeline_mode<synchronous>, transform_indices = @transform_21, window_bounds = array<i64: 1, 384>}, {pipeline_mode = #tpu.pipeline_mode<synchronous>, transform_indices = @transform_22, window_bounds = array<i64: 1, 384>}, {pipeline_mode = #tpu.pipeline_mode<synchronous>, transform_indices = @transform_23, window_bounds = array<i64: 2, 384>}]} {
    %c0_i32 = arith.constant 0 : i32
    %0 = arith.cmpi eq, %arg0, %c0_i32 : i32
    %c0_i32_0 = arith.constant 0 : i32
    %1 = arith.cmpi eq, %arg1, %c0_i32_0 : i32
    %2 = arith.andi %0, %1 : i1
    %3 = arith.extui %2 : i1 to i32
    %c0_i32_1 = arith.constant 0 : i32
    %4 = arith.cmpi ne, %3, %c0_i32_1 : i32
    scf.if %4 {
      %c0_38 = arith.constant 0 : index
      %c0_39 = arith.constant 0 : index
      %75 = vector.load %arg2[%c0_38, %c0_39] : memref<16x32xf32, #tpu.memory_space<vmem>>, vector<16x32xf32>
      %76 = arith.truncf %75 : vector<16x32xf32> to vector<16x32xbf16>
      %c0_40 = arith.constant 0 : index
      %c0_41 = arith.constant 0 : index
      %77 = vector.load %arg5[%c0_40, %c0_41] : memref<32x384xbf16, #tpu.memory_space<vmem>>, vector<32x384xbf16>
      %cst_42 = arith.constant dense<0.000000e+00> : vector<16x384xf32>
      %78 = tpu.matmul %76, %77, %cst_42 {dimension_numbers = #tpu.dot_dimension_numbers<[1], [0], [0], [1], [0, 0, 1, 1], [], []>} : vector<16x32xbf16>, vector<32x384xbf16>, vector<16x384xf32> -> vector<16x384xf32>
      %c0_43 = arith.constant 0 : index
      %c0_44 = arith.constant 0 : index
      %79 = vector.load %arg6[%c0_43, %c0_44] : memref<1x384xf32, #tpu.memory_space<vmem>>, vector<1x384xf32>
      %80 = vector.broadcast %79 : vector<1x384xf32> to vector<16x384xf32>
      %81 = arith.addf %78, %80 : vector<16x384xf32>
      %c0_45 = arith.constant 0 : index
      %c0_46 = arith.constant 0 : index
      %82 = vector.load %arg3[%c0_45, %c0_46] : memref<16x384xf32, #tpu.memory_space<vmem>>, vector<16x384xf32>
      %83 = arith.addf %81, %82 : vector<16x384xf32>
      %c0_47 = arith.constant 0 : index
      %c0_48 = arith.constant 0 : index
      %84 = vector.load %arg26[%c0_47, %c0_48] : memref<16x384xf32, #tpu.memory_space<vmem>>, vector<16x384xf32>
      tpu.vector_store %arg26[%c0_47, %c0_48], %83 {strides = array<i32>} : memref<16x384xf32, #tpu.memory_space<vmem>>, vector<16x384xf32>,
    } else {
    }
    %c0_i32_2 = arith.constant 0 : i32
    %5 = arith.cmpi eq, %arg1, %c0_i32_2 : i32
    %6 = arith.extui %5 : i1 to i32
    %c0_i32_3 = arith.constant 0 : i32
    %7 = arith.cmpi ne, %6, %c0_i32_3 : i32
    scf.if %7 {
      %c0_38 = arith.constant 0 : index
      %c0_39 = arith.constant 0 : index
      %75 = vector.load %arg26[%c0_38, %c0_39] : memref<16x384xf32, #tpu.memory_space<vmem>>, vector<16x384xf32>
      %76 = arith.truncf %75 : vector<16x384xf32> to vector<16x384xbf16>
      %c0_40 = arith.constant 0 : index
      %c0_41 = arith.constant 0 : index
      %77 = vector.load %arg4[%c0_40, %c0_41] : memref<16x16xf32, #tpu.memory_space<vmem>>, vector<16x16xf32>
      %cst_42 = arith.constant 0.000000e+00 : f32
      %78 = vector.broadcast %cst_42 : f32 to vector<16x384xf32>
      %c0_43 = arith.constant 0 : index
      %c0_44 = arith.constant 0 : index
      %c0_45 = arith.constant 0 : index
      %79 = vector.load %arg7[%c0_43, %c0_44, %c0_45] : memref<1x384x384xbf16, #tpu.memory_space<vmem>>, vector<1x384x64xbf16>
      %80 = vector.shape_cast %79 : vector<1x384x64xbf16> to vector<384x64xbf16>
      %c0_46 = arith.constant 0 : index
      %c0_47 = arith.constant 0 : index
      %c0_48 = arith.constant 0 : index
      %81 = vector.load %arg8[%c0_46, %c0_47, %c0_48] : memref<1x1x384xf32, #tpu.memory_space<vmem>>, vector<1x1x64xf32>
      %82 = vector.shape_cast %81 : vector<1x1x64xf32> to vector<1x64xf32>
      %c0_49 = arith.constant 0 : index
      %c0_50 = arith.constant 0 : index
      %c0_51 = arith.constant 0 : index
      %83 = vector.load %arg9[%c0_49, %c0_50, %c0_51] : memref<1x384x384xbf16, #tpu.memory_space<vmem>>, vector<1x384x64xbf16>
      %84 = vector.shape_cast %83 : vector<1x384x64xbf16> to vector<384x64xbf16>
      %c0_52 = arith.constant 0 : index
      %c0_53 = arith.constant 0 : index
      %c0_54 = arith.constant 0 : index
      %85 = vector.load %arg10[%c0_52, %c0_53, %c0_54] : memref<1x1x384xf32, #tpu.memory_space<vmem>>, vector<1x1x64xf32>
      %86 = vector.shape_cast %85 : vector<1x1x64xf32> to vector<1x64xf32>
      %c0_55 = arith.constant 0 : index
      %c0_56 = arith.constant 0 : index
      %c0_57 = arith.constant 0 : index
      %87 = vector.load %arg11[%c0_55, %c0_56, %c0_57] : memref<1x384x384xbf16, #tpu.memory_space<vmem>>, vector<1x384x64xbf16>
      %88 = vector.shape_cast %87 : vector<1x384x64xbf16> to vector<384x64xbf16>
      %c0_58 = arith.constant 0 : index
      %c0_59 = arith.constant 0 : index
      %c0_60 = arith.constant 0 : index
      %89 = vector.load %arg12[%c0_58, %c0_59, %c0_60] : memref<1x1x384xf32, #tpu.memory_space<vmem>>, vector<1x1x64xf32>
      %90 = vector.shape_cast %89 : vector<1x1x64xf32> to vector<1x64xf32>
      %c0_61 = arith.constant 0 : index
      %c0_62 = arith.constant 0 : index
      %c0_63 = arith.constant 0 : index
      %91 = vector.load %arg13[%c0_61, %c0_62, %c0_63] : memref<1x384x384xbf16, #tpu.memory_space<vmem>>, vector<1x64x384xbf16>
      %92 = vector.shape_cast %91 : vector<1x64x384xbf16> to vector<64x384xbf16>
      %cst_64 = arith.constant dense<0.000000e+00> : vector<16x64xf32>
      %93 = tpu.matmul %76, %80, %cst_64 {dimension_numbers = #tpu.dot_dimension_numbers<[1], [0], [0], [1], [0, 0, 1, 1], [], []>} : vector<16x384xbf16>, vector<384x64xbf16>, vector<16x64xf32> -> vector<16x64xf32>
      %94 = vector.broadcast %82 : vector<1x64xf32> to vector<16x64xf32>
      %95 = arith.addf %93, %94 : vector<16x64xf32>
      %cst_65 = arith.constant dense<0.000000e+00> : vector<16x64xf32>
      %96 = tpu.matmul %76, %84, %cst_65 {dimension_numbers = #tpu.dot_dimension_numbers<[1], [0], [0], [1], [0, 0, 1, 1], [], []>} : vector<16x384xbf16>, vector<384x64xbf16>, vector<16x64xf32> -> vector<16x64xf32>
      %97 = vector.broadcast %86 : vector<1x64xf32> to vector<16x64xf32>
      %98 = arith.addf %96, %97 : vector<16x64xf32>
      %cst_66 = arith.constant dense<0.000000e+00> : vector<16x64xf32>
      %99 = tpu.matmul %76, %88, %cst_66 {dimension_numbers = #tpu.dot_dimension_numbers<[1], [0], [0], [1], [0, 0, 1, 1], [], []>} : vector<16x384xbf16>, vector<384x64xbf16>, vector<16x64xf32> -> vector<16x64xf32>
      %100 = vector.broadcast %90 : vector<1x64xf32> to vector<16x64xf32>
      %101 = arith.addf %99, %100 : vector<16x64xf32>
      %102 = arith.truncf %95 : vector<16x64xf32> to vector<16x64xbf16>
      %103 = arith.truncf %98 : vector<16x64xf32> to vector<16x64xbf16>
      %cst_67 = arith.constant dense<0.000000e+00> : vector<16x16xf32>
      %104 = tpu.matmul %102, %103, %cst_67 {dimension_numbers = #tpu.dot_dimension_numbers<[1], [1], [0], [0], [0, 0, 1, 0], [], []>} : vector<16x64xbf16>, vector<16x64xbf16>, vector<16x16xf32> -> vector<16x16xf32>
      %cst_68 = arith.constant 1.250000e-01 : f32
      %105 = vector.broadcast %cst_68 : f32 to vector<16x16xf32>
      %106 = arith.mulf %104, %105 : vector<16x16xf32>
      %107 = arith.addf %106, %77 : vector<16x16xf32>
      %cst_69 = arith.constant dense<0xFF800000> : vector<16xf32>
      %108 = vector.multi_reduction <maximumf>, %107, %cst_69 [1] : vector<16x16xf32> to vector<16xf32>
      %109 = vector.shape_cast %108 : vector<16xf32> to vector<16x1xf32>
      %110 = vector.broadcast %109 : vector<16x1xf32> to vector<16x16xf32>
      %111 = arith.subf %107, %110 : vector<16x16xf32>
      %112 = math.exp %111 : vector<16x16xf32>
      %cst_70 = arith.constant dense<0.000000e+00> : vector<16xf32>
      %113 = vector.multi_reduction <add>, %112, %cst_70 [1] : vector<16x16xf32> to vector<16xf32>
      %114 = vector.shape_cast %113 : vector<16xf32> to vector<16x1xf32>
      %115 = vector.broadcast %114 : vector<16x1xf32> to vector<16x16xf32>
      %116 = arith.divf %112, %115 : vector<16x16xf32>
      %117 = arith.truncf %116 : vector<16x16xf32> to vector<16x16xbf16>
      %118 = arith.truncf %101 : vector<16x64xf32> to vector<16x64xbf16>
      %cst_71 = arith.constant dense<0.000000e+00> : vector<16x64xf32>
      %119 = tpu.matmul %117, %118, %cst_71 {dimension_numbers = #tpu.dot_dimension_numbers<[1], [0], [0], [1], [0, 0, 1, 1], [], []>} : vector<16x16xbf16>, vector<16x64xbf16>, vector<16x64xf32> -> vector<16x64xf32>
      %120 = arith.truncf %119 : vector<16x64xf32> to vector<16x64xbf16>
      %cst_72 = arith.constant dense<0.000000e+00> : vector<16x384xf32>
      %121 = tpu.matmul %120, %92, %cst_72 {dimension_numbers = #tpu.dot_dimension_numbers<[1], [0], [0], [1], [0, 0, 1, 1], [], []>} : vector<16x64xbf16>, vector<64x384xbf16>, vector<16x384xf32> -> vector<16x384xf32>
      %122 = arith.addf %78, %121 : vector<16x384xf32>
      %c0_73 = arith.constant 0 : index
      %c0_74 = arith.constant 0 : index
      %c64 = arith.constant 64 : index
      %123 = vector.load %arg7[%c0_73, %c0_74, %c64] : memref<1x384x384xbf16, #tpu.memory_space<vmem>>, vector<1x384x64xbf16>
      %124 = vector.shape_cast %123 : vector<1x384x64xbf16> to vector<384x64xbf16>
      %c0_75 = arith.constant 0 : index
      %c0_76 = arith.constant 0 : index
      %c64_77 = arith.constant 64 : index
      %125 = vector.load %arg8[%c0_75, %c0_76, %c64_77] : memref<1x1x384xf32, #tpu.memory_space<vmem>>, vector<1x1x64xf32>
      %126 = vector.shape_cast %125 : vector<1x1x64xf32> to vector<1x64xf32>
      %c0_78 = arith.constant 0 : index
      %c0_79 = arith.constant 0 : index
      %c64_80 = arith.constant 64 : index
      %127 = vector.load %arg9[%c0_78, %c0_79, %c64_80] : memref<1x384x384xbf16, #tpu.memory_space<vmem>>, vector<1x384x64xbf16>
      %128 = vector.shape_cast %127 : vector<1x384x64xbf16> to vector<384x64xbf16>
      %c0_81 = arith.constant 0 : index
      %c0_82 = arith.constant 0 : index
      %c64_83 = arith.constant 64 : index
      %129 = vector.load %arg10[%c0_81, %c0_82, %c64_83] : memref<1x1x384xf32, #tpu.memory_space<vmem>>, vector<1x1x64xf32>
      %130 = vector.shape_cast %129 : vector<1x1x64xf32> to vector<1x64xf32>
      %c0_84 = arith.constant 0 : index
      %c0_85 = arith.constant 0 : index
      %c64_86 = arith.constant 64 : index
      %131 = vector.load %arg11[%c0_84, %c0_85, %c64_86] : memref<1x384x384xbf16, #tpu.memory_space<vmem>>, vector<1x384x64xbf16>
      %132 = vector.shape_cast %131 : vector<1x384x64xbf16> to vector<384x64xbf16>
      %c0_87 = arith.constant 0 : index
      %c0_88 = arith.constant 0 : index
      %c64_89 = arith.constant 64 : index
      %133 = vector.load %arg12[%c0_87, %c0_88, %c64_89] : memref<1x1x384xf32, #tpu.memory_space<vmem>>, vector<1x1x64xf32>
      %134 = vector.shape_cast %133 : vector<1x1x64xf32> to vector<1x64xf32>
      %c0_90 = arith.constant 0 : index
      %c64_91 = arith.constant 64 : index
      %c0_92 = arith.constant 0 : index
      %135 = vector.load %arg13[%c0_90, %c64_91, %c0_92] : memref<1x384x384xbf16, #tpu.memory_space<vmem>>, vector<1x64x384xbf16>
      %136 = vector.shape_cast %135 : vector<1x64x384xbf16> to vector<64x384xbf16>
      %cst_93 = arith.constant dense<0.000000e+00> : vector<16x64xf32>
      %137 = tpu.matmul %76, %124, %cst_93 {dimension_numbers = #tpu.dot_dimension_numbers<[1], [0], [0], [1], [0, 0, 1, 1], [], []>} : vector<16x384xbf16>, vector<384x64xbf16>, vector<16x64xf32> -> vector<16x64xf32>
      %138 = vector.broadcast %126 : vector<1x64xf32> to vector<16x64xf32>
      %139 = arith.addf %137, %138 : vector<16x64xf32>
      %cst_94 = arith.constant dense<0.000000e+00> : vector<16x64xf32>
      %140 = tpu.matmul %76, %128, %cst_94 {dimension_numbers = #tpu.dot_dimension_numbers<[1], [0], [0], [1], [0, 0, 1, 1], [], []>} : vector<16x384xbf16>, vector<384x64xbf16>, vector<16x64xf32> -> vector<16x64xf32>
      %141 = vector.broadcast %130 : vector<1x64xf32> to vector<16x64xf32>
      %142 = arith.addf %140, %141 : vector<16x64xf32>
      %cst_95 = arith.constant dense<0.000000e+00> : vector<16x64xf32>
      %143 = tpu.matmul %76, %132, %cst_95 {dimension_numbers = #tpu.dot_dimension_numbers<[1], [0], [0], [1], [0, 0, 1, 1], [], []>} : vector<16x384xbf16>, vector<384x64xbf16>, vector<16x64xf32> -> vector<16x64xf32>
      %144 = vector.broadcast %134 : vector<1x64xf32> to vector<16x64xf32>
      %145 = arith.addf %143, %144 : vector<16x64xf32>
      %146 = arith.truncf %139 : vector<16x64xf32> to vector<16x64xbf16>
      %147 = arith.truncf %142 : vector<16x64xf32> to vector<16x64xbf16>
      %cst_96 = arith.constant dense<0.000000e+00> : vector<16x16xf32>
      %148 = tpu.matmul %146, %147, %cst_96 {dimension_numbers = #tpu.dot_dimension_numbers<[1], [1], [0], [0], [0, 0, 1, 0], [], []>} : vector<16x64xbf16>, vector<16x64xbf16>, vector<16x16xf32> -> vector<16x16xf32>
      %cst_97 = arith.constant 1.250000e-01 : f32
      %149 = vector.broadcast %cst_97 : f32 to vector<16x16xf32>
      %150 = arith.mulf %148, %149 : vector<16x16xf32>
      %151 = arith.addf %150, %77 : vector<16x16xf32>
      %cst_98 = arith.constant dense<0xFF800000> : vector<16xf32>
      %152 = vector.multi_reduction <maximumf>, %151, %cst_98 [1] : vector<16x16xf32> to vector<16xf32>
      %153 = vector.shape_cast %152 : vector<16xf32> to vector<16x1xf32>
      %154 = vector.broadcast %153 : vector<16x1xf32> to vector<16x16xf32>
      %155 = arith.subf %151, %154 : vector<16x16xf32>
      %156 = math.exp %155 : vector<16x16xf32>
      %cst_99 = arith.constant dense<0.000000e+00> : vector<16xf32>
      %157 = vector.multi_reduction <add>, %156, %cst_99 [1] : vector<16x16xf32> to vector<16xf32>
      %158 = vector.shape_cast %157 : vector<16xf32> to vector<16x1xf32>
      %159 = vector.broadcast %158 : vector<16x1xf32> to vector<16x16xf32>
      %160 = arith.divf %156, %159 : vector<16x16xf32>
      %161 = arith.truncf %160 : vector<16x16xf32> to vector<16x16xbf16>
      %162 = arith.truncf %145 : vector<16x64xf32> to vector<16x64xbf16>
      %cst_100 = arith.constant dense<0.000000e+00> : vector<16x64xf32>
      %163 = tpu.matmul %161, %162, %cst_100 {dimension_numbers = #tpu.dot_dimension_numbers<[1], [0], [0], [1], [0, 0, 1, 1], [], []>} : vector<16x16xbf16>, vector<16x64xbf16>, vector<16x64xf32> -> vector<16x64xf32>
      %164 = arith.truncf %163 : vector<16x64xf32> to vector<16x64xbf16>
      %cst_101 = arith.constant dense<0.000000e+00> : vector<16x384xf32>
      %165 = tpu.matmul %164, %136, %cst_101 {dimension_numbers = #tpu.dot_dimension_numbers<[1], [0], [0], [1], [0, 0, 1, 1], [], []>} : vector<16x64xbf16>, vector<64x384xbf16>, vector<16x384xf32> -> vector<16x384xf32>
      %166 = arith.addf %122, %165 : vector<16x384xf32>
      %c0_102 = arith.constant 0 : index
      %c0_103 = arith.constant 0 : index
      %c128 = arith.constant 128 : index
      %167 = vector.load %arg7[%c0_102, %c0_103, %c128] : memref<1x384x384xbf16, #tpu.memory_space<vmem>>, vector<1x384x64xbf16>
      %168 = vector.shape_cast %167 : vector<1x384x64xbf16> to vector<384x64xbf16>
      %c0_104 = arith.constant 0 : index
      %c0_105 = arith.constant 0 : index
      %c128_106 = arith.constant 128 : index
      %169 = vector.load %arg8[%c0_104, %c0_105, %c128_106] : memref<1x1x384xf32, #tpu.memory_space<vmem>>, vector<1x1x64xf32>
      %170 = vector.shape_cast %169 : vector<1x1x64xf32> to vector<1x64xf32>
      %c0_107 = arith.constant 0 : index
      %c0_108 = arith.constant 0 : index
      %c128_109 = arith.constant 128 : index
      %171 = vector.load %arg9[%c0_107, %c0_108, %c128_109] : memref<1x384x384xbf16, #tpu.memory_space<vmem>>, vector<1x384x64xbf16>
      %172 = vector.shape_cast %171 : vector<1x384x64xbf16> to vector<384x64xbf16>
      %c0_110 = arith.constant 0 : index
      %c0_111 = arith.constant 0 : index
      %c128_112 = arith.constant 128 : index
      %173 = vector.load %arg10[%c0_110, %c0_111, %c128_112] : memref<1x1x384xf32, #tpu.memory_space<vmem>>, vector<1x1x64xf32>
      %174 = vector.shape_cast %173 : vector<1x1x64xf32> to vector<1x64xf32>
      %c0_113 = arith.constant 0 : index
      %c0_114 = arith.constant 0 : index
      %c128_115 = arith.constant 128 : index
      %175 = vector.load %arg11[%c0_113, %c0_114, %c128_115] : memref<1x384x384xbf16, #tpu.memory_space<vmem>>, vector<1x384x64xbf16>
      %176 = vector.shape_cast %175 : vector<1x384x64xbf16> to vector<384x64xbf16>
      %c0_116 = arith.constant 0 : index
      %c0_117 = arith.constant 0 : index
      %c128_118 = arith.constant 128 : index
      %177 = vector.load %arg12[%c0_116, %c0_117, %c128_118] : memref<1x1x384xf32, #tpu.memory_space<vmem>>, vector<1x1x64xf32>
      %178 = vector.shape_cast %177 : vector<1x1x64xf32> to vector<1x64xf32>
      %c0_119 = arith.constant 0 : index
      %c128_120 = arith.constant 128 : index
      %c0_121 = arith.constant 0 : index
      %179 = vector.load %arg13[%c0_119, %c128_120, %c0_121] : memref<1x384x384xbf16, #tpu.memory_space<vmem>>, vector<1x64x384xbf16>
      %180 = vector.shape_cast %179 : vector<1x64x384xbf16> to vector<64x384xbf16>
      %cst_122 = arith.constant dense<0.000000e+00> : vector<16x64xf32>
      %181 = tpu.matmul %76, %168, %cst_122 {dimension_numbers = #tpu.dot_dimension_numbers<[1], [0], [0], [1], [0, 0, 1, 1], [], []>} : vector<16x384xbf16>, vector<384x64xbf16>, vector<16x64xf32> -> vector<16x64xf32>
      %182 = vector.broadcast %170 : vector<1x64xf32> to vector<16x64xf32>
      %183 = arith.addf %181, %182 : vector<16x64xf32>
      %cst_123 = arith.constant dense<0.000000e+00> : vector<16x64xf32>
      %184 = tpu.matmul %76, %172, %cst_123 {dimension_numbers = #tpu.dot_dimension_numbers<[1], [0], [0], [1], [0, 0, 1, 1], [], []>} : vector<16x384xbf16>, vector<384x64xbf16>, vector<16x64xf32> -> vector<16x64xf32>
      %185 = vector.broadcast %174 : vector<1x64xf32> to vector<16x64xf32>
      %186 = arith.addf %184, %185 : vector<16x64xf32>
      %cst_124 = arith.constant dense<0.000000e+00> : vector<16x64xf32>
      %187 = tpu.matmul %76, %176, %cst_124 {dimension_numbers = #tpu.dot_dimension_numbers<[1], [0], [0], [1], [0, 0, 1, 1], [], []>} : vector<16x384xbf16>, vector<384x64xbf16>, vector<16x64xf32> -> vector<16x64xf32>
      %188 = vector.broadcast %178 : vector<1x64xf32> to vector<16x64xf32>
      %189 = arith.addf %187, %188 : vector<16x64xf32>
      %190 = arith.truncf %183 : vector<16x64xf32> to vector<16x64xbf16>
      %191 = arith.truncf %186 : vector<16x64xf32> to vector<16x64xbf16>
      %cst_125 = arith.constant dense<0.000000e+00> : vector<16x16xf32>
      %192 = tpu.matmul %190, %191, %cst_125 {dimension_numbers = #tpu.dot_dimension_numbers<[1], [1], [0], [0], [0, 0, 1, 0], [], []>} : vector<16x64xbf16>, vector<16x64xbf16>, vector<16x16xf32> -> vector<16x16xf32>
      %cst_126 = arith.constant 1.250000e-01 : f32
      %193 = vector.broadcast %cst_126 : f32 to vector<16x16xf32>
      %194 = arith.mulf %192, %193 : vector<16x16xf32>
      %195 = arith.addf %194, %77 : vector<16x16xf32>
      %cst_127 = arith.constant dense<0xFF800000> : vector<16xf32>
      %196 = vector.multi_reduction <maximumf>, %195, %cst_127 [1] : vector<16x16xf32> to vector<16xf32>
      %197 = vector.shape_cast %196 : vector<16xf32> to vector<16x1xf32>
      %198 = vector.broadcast %197 : vector<16x1xf32> to vector<16x16xf32>
      %199 = arith.subf %195, %198 : vector<16x16xf32>
      %200 = math.exp %199 : vector<16x16xf32>
      %cst_128 = arith.constant dense<0.000000e+00> : vector<16xf32>
      %201 = vector.multi_reduction <add>, %200, %cst_128 [1] : vector<16x16xf32> to vector<16xf32>
      %202 = vector.shape_cast %201 : vector<16xf32> to vector<16x1xf32>
      %203 = vector.broadcast %202 : vector<16x1xf32> to vector<16x16xf32>
      %204 = arith.divf %200, %203 : vector<16x16xf32>
      %205 = arith.truncf %204 : vector<16x16xf32> to vector<16x16xbf16>
      %206 = arith.truncf %189 : vector<16x64xf32> to vector<16x64xbf16>
      %cst_129 = arith.constant dense<0.000000e+00> : vector<16x64xf32>
      %207 = tpu.matmul %205, %206, %cst_129 {dimension_numbers = #tpu.dot_dimension_numbers<[1], [0], [0], [1], [0, 0, 1, 1], [], []>} : vector<16x16xbf16>, vector<16x64xbf16>, vector<16x64xf32> -> vector<16x64xf32>
      %208 = arith.truncf %207 : vector<16x64xf32> to vector<16x64xbf16>
      %cst_130 = arith.constant dense<0.000000e+00> : vector<16x384xf32>
      %209 = tpu.matmul %208, %180, %cst_130 {dimension_numbers = #tpu.dot_dimension_numbers<[1], [0], [0], [1], [0, 0, 1, 1], [], []>} : vector<16x64xbf16>, vector<64x384xbf16>, vector<16x384xf32> -> vector<16x384xf32>
      %210 = arith.addf %166, %209 : vector<16x384xf32>
      %c0_131 = arith.constant 0 : index
      %c0_132 = arith.constant 0 : index
      %c192 = arith.constant 192 : index
      %211 = vector.load %arg7[%c0_131, %c0_132, %c192] : memref<1x384x384xbf16, #tpu.memory_space<vmem>>, vector<1x384x64xbf16>
      %212 = vector.shape_cast %211 : vector<1x384x64xbf16> to vector<384x64xbf16>
      %c0_133 = arith.constant 0 : index
      %c0_134 = arith.constant 0 : index
      %c192_135 = arith.constant 192 : index
      %213 = vector.load %arg8[%c0_133, %c0_134, %c192_135] : memref<1x1x384xf32, #tpu.memory_space<vmem>>, vector<1x1x64xf32>
      %214 = vector.shape_cast %213 : vector<1x1x64xf32> to vector<1x64xf32>
      %c0_136 = arith.constant 0 : index
      %c0_137 = arith.constant 0 : index
      %c192_138 = arith.constant 192 : index
      %215 = vector.load %arg9[%c0_136, %c0_137, %c192_138] : memref<1x384x384xbf16, #tpu.memory_space<vmem>>, vector<1x384x64xbf16>
      %216 = vector.shape_cast %215 : vector<1x384x64xbf16> to vector<384x64xbf16>
      %c0_139 = arith.constant 0 : index
      %c0_140 = arith.constant 0 : index
      %c192_141 = arith.constant 192 : index
      %217 = vector.load %arg10[%c0_139, %c0_140, %c192_141] : memref<1x1x384xf32, #tpu.memory_space<vmem>>, vector<1x1x64xf32>
      %218 = vector.shape_cast %217 : vector<1x1x64xf32> to vector<1x64xf32>
      %c0_142 = arith.constant 0 : index
      %c0_143 = arith.constant 0 : index
      %c192_144 = arith.constant 192 : index
      %219 = vector.load %arg11[%c0_142, %c0_143, %c192_144] : memref<1x384x384xbf16, #tpu.memory_space<vmem>>, vector<1x384x64xbf16>
      %220 = vector.shape_cast %219 : vector<1x384x64xbf16> to vector<384x64xbf16>
      %c0_145 = arith.constant 0 : index
      %c0_146 = arith.constant 0 : index
      %c192_147 = arith.constant 192 : index
      %221 = vector.load %arg12[%c0_145, %c0_146, %c192_147] : memref<1x1x384xf32, #tpu.memory_space<vmem>>, vector<1x1x64xf32>
      %222 = vector.shape_cast %221 : vector<1x1x64xf32> to vector<1x64xf32>
      %c0_148 = arith.constant 0 : index
      %c192_149 = arith.constant 192 : index
      %c0_150 = arith.constant 0 : index
      %223 = vector.load %arg13[%c0_148, %c192_149, %c0_150] : memref<1x384x384xbf16, #tpu.memory_space<vmem>>, vector<1x64x384xbf16>
      %224 = vector.shape_cast %223 : vector<1x64x384xbf16> to vector<64x384xbf16>
      %cst_151 = arith.constant dense<0.000000e+00> : vector<16x64xf32>
      %225 = tpu.matmul %76, %212, %cst_151 {dimension_numbers = #tpu.dot_dimension_numbers<[1], [0], [0], [1], [0, 0, 1, 1], [], []>} : vector<16x384xbf16>, vector<384x64xbf16>, vector<16x64xf32> -> vector<16x64xf32>
      %226 = vector.broadcast %214 : vector<1x64xf32> to vector<16x64xf32>
      %227 = arith.addf %225, %226 : vector<16x64xf32>
      %cst_152 = arith.constant dense<0.000000e+00> : vector<16x64xf32>
      %228 = tpu.matmul %76, %216, %cst_152 {dimension_numbers = #tpu.dot_dimension_numbers<[1], [0], [0], [1], [0, 0, 1, 1], [], []>} : vector<16x384xbf16>, vector<384x64xbf16>, vector<16x64xf32> -> vector<16x64xf32>
      %229 = vector.broadcast %218 : vector<1x64xf32> to vector<16x64xf32>
      %230 = arith.addf %228, %229 : vector<16x64xf32>
      %cst_153 = arith.constant dense<0.000000e+00> : vector<16x64xf32>
      %231 = tpu.matmul %76, %220, %cst_153 {dimension_numbers = #tpu.dot_dimension_numbers<[1], [0], [0], [1], [0, 0, 1, 1], [], []>} : vector<16x384xbf16>, vector<384x64xbf16>, vector<16x64xf32> -> vector<16x64xf32>
      %232 = vector.broadcast %222 : vector<1x64xf32> to vector<16x64xf32>
      %233 = arith.addf %231, %232 : vector<16x64xf32>
      %234 = arith.truncf %227 : vector<16x64xf32> to vector<16x64xbf16>
      %235 = arith.truncf %230 : vector<16x64xf32> to vector<16x64xbf16>
      %cst_154 = arith.constant dense<0.000000e+00> : vector<16x16xf32>
      %236 = tpu.matmul %234, %235, %cst_154 {dimension_numbers = #tpu.dot_dimension_numbers<[1], [1], [0], [0], [0, 0, 1, 0], [], []>} : vector<16x64xbf16>, vector<16x64xbf16>, vector<16x16xf32> -> vector<16x16xf32>
      %cst_155 = arith.constant 1.250000e-01 : f32
      %237 = vector.broadcast %cst_155 : f32 to vector<16x16xf32>
      %238 = arith.mulf %236, %237 : vector<16x16xf32>
      %239 = arith.addf %238, %77 : vector<16x16xf32>
      %cst_156 = arith.constant dense<0xFF800000> : vector<16xf32>
      %240 = vector.multi_reduction <maximumf>, %239, %cst_156 [1] : vector<16x16xf32> to vector<16xf32>
      %241 = vector.shape_cast %240 : vector<16xf32> to vector<16x1xf32>
      %242 = vector.broadcast %241 : vector<16x1xf32> to vector<16x16xf32>
      %243 = arith.subf %239, %242 : vector<16x16xf32>
      %244 = math.exp %243 : vector<16x16xf32>
      %cst_157 = arith.constant dense<0.000000e+00> : vector<16xf32>
      %245 = vector.multi_reduction <add>, %244, %cst_157 [1] : vector<16x16xf32> to vector<16xf32>
      %246 = vector.shape_cast %245 : vector<16xf32> to vector<16x1xf32>
      %247 = vector.broadcast %246 : vector<16x1xf32> to vector<16x16xf32>
      %248 = arith.divf %244, %247 : vector<16x16xf32>
      %249 = arith.truncf %248 : vector<16x16xf32> to vector<16x16xbf16>
      %250 = arith.truncf %233 : vector<16x64xf32> to vector<16x64xbf16>
      %cst_158 = arith.constant dense<0.000000e+00> : vector<16x64xf32>
      %251 = tpu.matmul %249, %250, %cst_158 {dimension_numbers = #tpu.dot_dimension_numbers<[1], [0], [0], [1], [0, 0, 1, 1], [], []>} : vector<16x16xbf16>, vector<16x64xbf16>, vector<16x64xf32> -> vector<16x64xf32>
      %252 = arith.truncf %251 : vector<16x64xf32> to vector<16x64xbf16>
      %cst_159 = arith.constant dense<0.000000e+00> : vector<16x384xf32>
      %253 = tpu.matmul %252, %224, %cst_159 {dimension_numbers = #tpu.dot_dimension_numbers<[1], [0], [0], [1], [0, 0, 1, 1], [], []>} : vector<16x64xbf16>, vector<64x384xbf16>, vector<16x384xf32> -> vector<16x384xf32>
      %254 = arith.addf %210, %253 : vector<16x384xf32>
      %c0_160 = arith.constant 0 : index
      %c0_161 = arith.constant 0 : index
      %c256 = arith.constant 256 : index
      %255 = vector.load %arg7[%c0_160, %c0_161, %c256] : memref<1x384x384xbf16, #tpu.memory_space<vmem>>, vector<1x384x64xbf16>
      %256 = vector.shape_cast %255 : vector<1x384x64xbf16> to vector<384x64xbf16>
      %c0_162 = arith.constant 0 : index
      %c0_163 = arith.constant 0 : index
      %c256_164 = arith.constant 256 : index
      %257 = vector.load %arg8[%c0_162, %c0_163, %c256_164] : memref<1x1x384xf32, #tpu.memory_space<vmem>>, vector<1x1x64xf32>
      %258 = vector.shape_cast %257 : vector<1x1x64xf32> to vector<1x64xf32>
      %c0_165 = arith.constant 0 : index
      %c0_166 = arith.constant 0 : index
      %c256_167 = arith.constant 256 : index
      %259 = vector.load %arg9[%c0_165, %c0_166, %c256_167] : memref<1x384x384xbf16, #tpu.memory_space<vmem>>, vector<1x384x64xbf16>
      %260 = vector.shape_cast %259 : vector<1x384x64xbf16> to vector<384x64xbf16>
      %c0_168 = arith.constant 0 : index
      %c0_169 = arith.constant 0 : index
      %c256_170 = arith.constant 256 : index
      %261 = vector.load %arg10[%c0_168, %c0_169, %c256_170] : memref<1x1x384xf32, #tpu.memory_space<vmem>>, vector<1x1x64xf32>
      %262 = vector.shape_cast %261 : vector<1x1x64xf32> to vector<1x64xf32>
      %c0_171 = arith.constant 0 : index
      %c0_172 = arith.constant 0 : index
      %c256_173 = arith.constant 256 : index
      %263 = vector.load %arg11[%c0_171, %c0_172, %c256_173] : memref<1x384x384xbf16, #tpu.memory_space<vmem>>, vector<1x384x64xbf16>
      %264 = vector.shape_cast %263 : vector<1x384x64xbf16> to vector<384x64xbf16>
      %c0_174 = arith.constant 0 : index
      %c0_175 = arith.constant 0 : index
      %c256_176 = arith.constant 256 : index
      %265 = vector.load %arg12[%c0_174, %c0_175, %c256_176] : memref<1x1x384xf32, #tpu.memory_space<vmem>>, vector<1x1x64xf32>
      %266 = vector.shape_cast %265 : vector<1x1x64xf32> to vector<1x64xf32>
      %c0_177 = arith.constant 0 : index
      %c256_178 = arith.constant 256 : index
      %c0_179 = arith.constant 0 : index
      %267 = vector.load %arg13[%c0_177, %c256_178, %c0_179] : memref<1x384x384xbf16, #tpu.memory_space<vmem>>, vector<1x64x384xbf16>
      %268 = vector.shape_cast %267 : vector<1x64x384xbf16> to vector<64x384xbf16>
      %cst_180 = arith.constant dense<0.000000e+00> : vector<16x64xf32>
      %269 = tpu.matmul %76, %256, %cst_180 {dimension_numbers = #tpu.dot_dimension_numbers<[1], [0], [0], [1], [0, 0, 1, 1], [], []>} : vector<16x384xbf16>, vector<384x64xbf16>, vector<16x64xf32> -> vector<16x64xf32>
      %270 = vector.broadcast %258 : vector<1x64xf32> to vector<16x64xf32>
      %271 = arith.addf %269, %270 : vector<16x64xf32>
      %cst_181 = arith.constant dense<0.000000e+00> : vector<16x64xf32>
      %272 = tpu.matmul %76, %260, %cst_181 {dimension_numbers = #tpu.dot_dimension_numbers<[1], [0], [0], [1], [0, 0, 1, 1], [], []>} : vector<16x384xbf16>, vector<384x64xbf16>, vector<16x64xf32> -> vector<16x64xf32>
      %273 = vector.broadcast %262 : vector<1x64xf32> to vector<16x64xf32>
      %274 = arith.addf %272, %273 : vector<16x64xf32>
      %cst_182 = arith.constant dense<0.000000e+00> : vector<16x64xf32>
      %275 = tpu.matmul %76, %264, %cst_182 {dimension_numbers = #tpu.dot_dimension_numbers<[1], [0], [0], [1], [0, 0, 1, 1], [], []>} : vector<16x384xbf16>, vector<384x64xbf16>, vector<16x64xf32> -> vector<16x64xf32>
      %276 = vector.broadcast %266 : vector<1x64xf32> to vector<16x64xf32>
      %277 = arith.addf %275, %276 : vector<16x64xf32>
      %278 = arith.truncf %271 : vector<16x64xf32> to vector<16x64xbf16>
      %279 = arith.truncf %274 : vector<16x64xf32> to vector<16x64xbf16>
      %cst_183 = arith.constant dense<0.000000e+00> : vector<16x16xf32>
      %280 = tpu.matmul %278, %279, %cst_183 {dimension_numbers = #tpu.dot_dimension_numbers<[1], [1], [0], [0], [0, 0, 1, 0], [], []>} : vector<16x64xbf16>, vector<16x64xbf16>, vector<16x16xf32> -> vector<16x16xf32>
      %cst_184 = arith.constant 1.250000e-01 : f32
      %281 = vector.broadcast %cst_184 : f32 to vector<16x16xf32>
      %282 = arith.mulf %280, %281 : vector<16x16xf32>
      %283 = arith.addf %282, %77 : vector<16x16xf32>
      %cst_185 = arith.constant dense<0xFF800000> : vector<16xf32>
      %284 = vector.multi_reduction <maximumf>, %283, %cst_185 [1] : vector<16x16xf32> to vector<16xf32>
      %285 = vector.shape_cast %284 : vector<16xf32> to vector<16x1xf32>
      %286 = vector.broadcast %285 : vector<16x1xf32> to vector<16x16xf32>
      %287 = arith.subf %283, %286 : vector<16x16xf32>
      %288 = math.exp %287 : vector<16x16xf32>
      %cst_186 = arith.constant dense<0.000000e+00> : vector<16xf32>
      %289 = vector.multi_reduction <add>, %288, %cst_186 [1] : vector<16x16xf32> to vector<16xf32>
      %290 = vector.shape_cast %289 : vector<16xf32> to vector<16x1xf32>
      %291 = vector.broadcast %290 : vector<16x1xf32> to vector<16x16xf32>
      %292 = arith.divf %288, %291 : vector<16x16xf32>
      %293 = arith.truncf %292 : vector<16x16xf32> to vector<16x16xbf16>
      %294 = arith.truncf %277 : vector<16x64xf32> to vector<16x64xbf16>
      %cst_187 = arith.constant dense<0.000000e+00> : vector<16x64xf32>
      %295 = tpu.matmul %293, %294, %cst_187 {dimension_numbers = #tpu.dot_dimension_numbers<[1], [0], [0], [1], [0, 0, 1, 1], [], []>} : vector<16x16xbf16>, vector<16x64xbf16>, vector<16x64xf32> -> vector<16x64xf32>
      %296 = arith.truncf %295 : vector<16x64xf32> to vector<16x64xbf16>
      %cst_188 = arith.constant dense<0.000000e+00> : vector<16x384xf32>
      %297 = tpu.matmul %296, %268, %cst_188 {dimension_numbers = #tpu.dot_dimension_numbers<[1], [0], [0], [1], [0, 0, 1, 1], [], []>} : vector<16x64xbf16>, vector<64x384xbf16>, vector<16x384xf32> -> vector<16x384xf32>
      %298 = arith.addf %254, %297 : vector<16x384xf32>
      %c0_189 = arith.constant 0 : index
      %c0_190 = arith.constant 0 : index
      %c320 = arith.constant 320 : index
      %299 = vector.load %arg7[%c0_189, %c0_190, %c320] : memref<1x384x384xbf16, #tpu.memory_space<vmem>>, vector<1x384x64xbf16>
      %300 = vector.shape_cast %299 : vector<1x384x64xbf16> to vector<384x64xbf16>
      %c0_191 = arith.constant 0 : index
      %c0_192 = arith.constant 0 : index
      %c320_193 = arith.constant 320 : index
      %301 = vector.load %arg8[%c0_191, %c0_192, %c320_193] : memref<1x1x384xf32, #tpu.memory_space<vmem>>, vector<1x1x64xf32>
      %302 = vector.shape_cast %301 : vector<1x1x64xf32> to vector<1x64xf32>
      %c0_194 = arith.constant 0 : index
      %c0_195 = arith.constant 0 : index
      %c320_196 = arith.constant 320 : index
      %303 = vector.load %arg9[%c0_194, %c0_195, %c320_196] : memref<1x384x384xbf16, #tpu.memory_space<vmem>>, vector<1x384x64xbf16>
      %304 = vector.shape_cast %303 : vector<1x384x64xbf16> to vector<384x64xbf16>
      %c0_197 = arith.constant 0 : index
      %c0_198 = arith.constant 0 : index
      %c320_199 = arith.constant 320 : index
      %305 = vector.load %arg10[%c0_197, %c0_198, %c320_199] : memref<1x1x384xf32, #tpu.memory_space<vmem>>, vector<1x1x64xf32>
      %306 = vector.shape_cast %305 : vector<1x1x64xf32> to vector<1x64xf32>
      %c0_200 = arith.constant 0 : index
      %c0_201 = arith.constant 0 : index
      %c320_202 = arith.constant 320 : index
      %307 = vector.load %arg11[%c0_200, %c0_201, %c320_202] : memref<1x384x384xbf16, #tpu.memory_space<vmem>>, vector<1x384x64xbf16>
      %308 = vector.shape_cast %307 : vector<1x384x64xbf16> to vector<384x64xbf16>
      %c0_203 = arith.constant 0 : index
      %c0_204 = arith.constant 0 : index
      %c320_205 = arith.constant 320 : index
      %309 = vector.load %arg12[%c0_203, %c0_204, %c320_205] : memref<1x1x384xf32, #tpu.memory_space<vmem>>, vector<1x1x64xf32>
      %310 = vector.shape_cast %309 : vector<1x1x64xf32> to vector<1x64xf32>
      %c0_206 = arith.constant 0 : index
      %c320_207 = arith.constant 320 : index
      %c0_208 = arith.constant 0 : index
      %311 = vector.load %arg13[%c0_206, %c320_207, %c0_208] : memref<1x384x384xbf16, #tpu.memory_space<vmem>>, vector<1x64x384xbf16>
      %312 = vector.shape_cast %311 : vector<1x64x384xbf16> to vector<64x384xbf16>
      %cst_209 = arith.constant dense<0.000000e+00> : vector<16x64xf32>
      %313 = tpu.matmul %76, %300, %cst_209 {dimension_numbers = #tpu.dot_dimension_numbers<[1], [0], [0], [1], [0, 0, 1, 1], [], []>} : vector<16x384xbf16>, vector<384x64xbf16>, vector<16x64xf32> -> vector<16x64xf32>
      %314 = vector.broadcast %302 : vector<1x64xf32> to vector<16x64xf32>
      %315 = arith.addf %313, %314 : vector<16x64xf32>
      %cst_210 = arith.constant dense<0.000000e+00> : vector<16x64xf32>
      %316 = tpu.matmul %76, %304, %cst_210 {dimension_numbers = #tpu.dot_dimension_numbers<[1], [0], [0], [1], [0, 0, 1, 1], [], []>} : vector<16x384xbf16>, vector<384x64xbf16>, vector<16x64xf32> -> vector<16x64xf32>
      %317 = vector.broadcast %306 : vector<1x64xf32> to vector<16x64xf32>
      %318 = arith.addf %316, %317 : vector<16x64xf32>
      %cst_211 = arith.constant dense<0.000000e+00> : vector<16x64xf32>
      %319 = tpu.matmul %76, %308, %cst_211 {dimension_numbers = #tpu.dot_dimension_numbers<[1], [0], [0], [1], [0, 0, 1, 1], [], []>} : vector<16x384xbf16>, vector<384x64xbf16>, vector<16x64xf32> -> vector<16x64xf32>
      %320 = vector.broadcast %310 : vector<1x64xf32> to vector<16x64xf32>
      %321 = arith.addf %319, %320 : vector<16x64xf32>
      %322 = arith.truncf %315 : vector<16x64xf32> to vector<16x64xbf16>
      %323 = arith.truncf %318 : vector<16x64xf32> to vector<16x64xbf16>
      %cst_212 = arith.constant dense<0.000000e+00> : vector<16x16xf32>
      %324 = tpu.matmul %322, %323, %cst_212 {dimension_numbers = #tpu.dot_dimension_numbers<[1], [1], [0], [0], [0, 0, 1, 0], [], []>} : vector<16x64xbf16>, vector<16x64xbf16>, vector<16x16xf32> -> vector<16x16xf32>
      %cst_213 = arith.constant 1.250000e-01 : f32
      %325 = vector.broadcast %cst_213 : f32 to vector<16x16xf32>
      %326 = arith.mulf %324, %325 : vector<16x16xf32>
      %327 = arith.addf %326, %77 : vector<16x16xf32>
      %cst_214 = arith.constant dense<0xFF800000> : vector<16xf32>
      %328 = vector.multi_reduction <maximumf>, %327, %cst_214 [1] : vector<16x16xf32> to vector<16xf32>
      %329 = vector.shape_cast %328 : vector<16xf32> to vector<16x1xf32>
      %330 = vector.broadcast %329 : vector<16x1xf32> to vector<16x16xf32>
      %331 = arith.subf %327, %330 : vector<16x16xf32>
      %332 = math.exp %331 : vector<16x16xf32>
      %cst_215 = arith.constant dense<0.000000e+00> : vector<16xf32>
      %333 = vector.multi_reduction <add>, %332, %cst_215 [1] : vector<16x16xf32> to vector<16xf32>
      %334 = vector.shape_cast %333 : vector<16xf32> to vector<16x1xf32>
      %335 = vector.broadcast %334 : vector<16x1xf32> to vector<16x16xf32>
      %336 = arith.divf %332, %335 : vector<16x16xf32>
      %337 = arith.truncf %336 : vector<16x16xf32> to vector<16x16xbf16>
      %338 = arith.truncf %321 : vector<16x64xf32> to vector<16x64xbf16>
      %cst_216 = arith.constant dense<0.000000e+00> : vector<16x64xf32>
      %339 = tpu.matmul %337, %338, %cst_216 {dimension_numbers = #tpu.dot_dimension_numbers<[1], [0], [0], [1], [0, 0, 1, 1], [], []>} : vector<16x16xbf16>, vector<16x64xbf16>, vector<16x64xf32> -> vector<16x64xf32>
      %340 = arith.truncf %339 : vector<16x64xf32> to vector<16x64xbf16>
      %cst_217 = arith.constant dense<0.000000e+00> : vector<16x384xf32>
      %341 = tpu.matmul %340, %312, %cst_217 {dimension_numbers = #tpu.dot_dimension_numbers<[1], [0], [0], [1], [0, 0, 1, 1], [], []>} : vector<16x64xbf16>, vector<64x384xbf16>, vector<16x384xf32> -> vector<16x384xf32>
      %342 = arith.addf %298, %341 : vector<16x384xf32>
      %c0_218 = arith.constant 0 : index
      %c0_219 = arith.constant 0 : index
      %c0_220 = arith.constant 0 : index
      %343 = vector.load %arg14[%c0_218, %c0_219, %c0_220] : memref<1x1x384xf32, #tpu.memory_space<vmem>>, vector<1x1x384xf32>
      %344 = vector.shape_cast %343 : vector<1x1x384xf32> to vector<1x384xf32>
      %345 = vector.broadcast %344 : vector<1x384xf32> to vector<16x384xf32>
      %346 = arith.addf %342, %345 : vector<16x384xf32>
      %347 = arith.addf %75, %346 : vector<16x384xf32>
      %c0_221 = arith.constant 0 : index
      %c0_222 = arith.constant 0 : index
      %c0_223 = arith.constant 0 : index
      %348 = vector.load %arg15[%c0_221, %c0_222, %c0_223] : memref<1x1x384xf32, #tpu.memory_space<vmem>>, vector<1x1x384xf32>
      %349 = vector.shape_cast %348 : vector<1x1x384xf32> to vector<1x384xf32>
      %c0_224 = arith.constant 0 : index
      %c0_225 = arith.constant 0 : index
      %c0_226 = arith.constant 0 : index
      %350 = vector.load %arg16[%c0_224, %c0_225, %c0_226] : memref<1x1x384xf32, #tpu.memory_space<vmem>>, vector<1x1x384xf32>
      %351 = vector.shape_cast %350 : vector<1x1x384xf32> to vector<1x384xf32>
      %cst_227 = arith.constant dense<0.000000e+00> : vector<16xf32>
      %352 = vector.multi_reduction <add>, %347, %cst_227 [1] : vector<16x384xf32> to vector<16xf32>
      %353 = vector.shape_cast %352 : vector<16xf32> to vector<16x1xf32>
      %cst_228 = arith.constant 3.840000e+02 : f32
      %354 = vector.broadcast %cst_228 : f32 to vector<16x1xf32>
      %355 = arith.divf %353, %354 : vector<16x1xf32>
      %356 = vector.broadcast %355 : vector<16x1xf32> to vector<16x384xf32>
      %357 = arith.subf %347, %356 : vector<16x384xf32>
      %358 = arith.mulf %357, %357 : vector<16x384xf32>
      %cst_229 = arith.constant dense<0.000000e+00> : vector<16xf32>
      %359 = vector.multi_reduction <add>, %358, %cst_229 [1] : vector<16x384xf32> to vector<16xf32>
      %360 = vector.shape_cast %359 : vector<16xf32> to vector<16x1xf32>
      %cst_230 = arith.constant 3.840000e+02 : f32
      %361 = vector.broadcast %cst_230 : f32 to vector<16x1xf32>
      %362 = arith.divf %360, %361 : vector<16x1xf32>
      %363 = vector.broadcast %355 : vector<16x1xf32> to vector<16x384xf32>
      %364 = arith.subf %347, %363 : vector<16x384xf32>
      %cst_231 = arith.constant 9.99999974E-6 : f32
      %365 = vector.broadcast %cst_231 : f32 to vector<16x1xf32>
      %366 = arith.addf %362, %365 : vector<16x1xf32>
      %367 = math.rsqrt %366 : vector<16x1xf32>
      %368 = vector.broadcast %367 : vector<16x1xf32> to vector<16x384xf32>
      %369 = arith.mulf %364, %368 : vector<16x384xf32>
      %370 = vector.broadcast %349 : vector<1x384xf32> to vector<16x384xf32>
      %371 = arith.mulf %369, %370 : vector<16x384xf32>
      %372 = vector.broadcast %351 : vector<1x384xf32> to vector<16x384xf32>
      %373 = arith.addf %371, %372 : vector<16x384xf32>
      %c0_232 = arith.constant 0 : index
      %c0_233 = arith.constant 0 : index
      %374 = vector.load %arg26[%c0_232, %c0_233] : memref<16x384xf32, #tpu.memory_space<vmem>>, vector<16x384xf32>
      tpu.vector_store %arg26[%c0_232, %c0_233], %373 {strides = array<i32>} : memref<16x384xf32, #tpu.memory_space<vmem>>, vector<16x384xf32>,
    } else {
    }
    %c0 = arith.constant 0 : index
    %c0_4 = arith.constant 0 : index
    %8 = vector.load %arg26[%c0, %c0_4] : memref<16x384xf32, #tpu.memory_space<vmem>>, vector<16x384xf32>
    %9 = arith.truncf %8 : vector<16x384xf32> to vector<16x384xbf16>
    %c0_5 = arith.constant 0 : index
    %c0_6 = arith.constant 0 : index
    %c0_7 = arith.constant 0 : index
    %10 = vector.load %arg17[%c0_5, %c0_6, %c0_7] : memref<1x384x768xbf16, #tpu.memory_space<vmem>>, vector<1x384x768xbf16>
    %11 = vector.shape_cast %10 : vector<1x384x768xbf16> to vector<384x768xbf16>
    %cst = arith.constant dense<0.000000e+00> : vector<16x768xf32>
    %12 = tpu.matmul %9, %11, %cst {dimension_numbers = #tpu.dot_dimension_numbers<[1], [0], [0], [1], [0, 0, 1, 1], [], []>} : vector<16x384xbf16>, vector<384x768xbf16>, vector<16x768xf32> -> vector<16x768xf32>
    %c0_8 = arith.constant 0 : index
    %c0_9 = arith.constant 0 : index
    %c0_10 = arith.constant 0 : index
    %13 = vector.load %arg18[%c0_8, %c0_9, %c0_10] : memref<1x1x768xf32, #tpu.memory_space<vmem>>, vector<1x1x768xf32>
    %14 = vector.shape_cast %13 : vector<1x1x768xf32> to vector<1x768xf32>
    %15 = vector.broadcast %14 : vector<1x768xf32> to vector<16x768xf32>
    %16 = arith.addf %12, %15 : vector<16x768xf32>
    %cst_11 = arith.constant 5.000000e-01 : f32
    %17 = vector.broadcast %cst_11 : f32 to vector<16x768xf32>
    %18 = arith.mulf %17, %16 : vector<16x768xf32>
    %cst_12 = arith.constant 0.707106769 : f32
    %19 = vector.broadcast %cst_12 : f32 to vector<16x768xf32>
    %20 = arith.mulf %16, %19 : vector<16x768xf32>
    %21 = math.absf %20 : vector<16x768xf32>
    %cst_13 = arith.constant 0.327591091 : f32
    %22 = vector.broadcast %cst_13 : f32 to vector<16x768xf32>
    %23 = arith.mulf %22, %21 : vector<16x768xf32>
    %cst_14 = arith.constant 1.000000e+00 : f32
    %24 = vector.broadcast %cst_14 : f32 to vector<16x768xf32>
    %25 = arith.addf %24, %23 : vector<16x768xf32>
    %cst_15 = arith.constant 1.000000e+00 : f32
    %26 = vector.broadcast %cst_15 : f32 to vector<16x768xf32>
    %27 = arith.divf %26, %25 : vector<16x768xf32>
    %cst_16 = arith.constant 1.06140542 : f32
    %28 = vector.broadcast %cst_16 : f32 to vector<16x768xf32>
    %29 = arith.mulf %28, %27 : vector<16x768xf32>
    %cst_17 = arith.constant -1.45315206 : f32
    %30 = vector.broadcast %cst_17 : f32 to vector<16x768xf32>
    %31 = arith.addf %29, %30 : vector<16x768xf32>
    %32 = arith.mulf %31, %27 : vector<16x768xf32>
    %cst_18 = arith.constant 1.42141378 : f32
    %33 = vector.broadcast %cst_18 : f32 to vector<16x768xf32>
    %34 = arith.addf %32, %33 : vector<16x768xf32>
    %35 = arith.mulf %34, %27 : vector<16x768xf32>
    %cst_19 = arith.constant -0.284496725 : f32
    %36 = vector.broadcast %cst_19 : f32 to vector<16x768xf32>
    %37 = arith.addf %35, %36 : vector<16x768xf32>
    %38 = arith.mulf %37, %27 : vector<16x768xf32>
    %cst_20 = arith.constant 0.254829586 : f32
    %39 = vector.broadcast %cst_20 : f32 to vector<16x768xf32>
    %40 = arith.addf %38, %39 : vector<16x768xf32>
    %41 = arith.mulf %40, %27 : vector<16x768xf32>
    %cst_21 = arith.constant 0.000000e+00 : f32
    %42 = vector.broadcast %cst_21 : f32 to vector<16x768xf32>
    %43 = arith.subf %42, %21 : vector<16x768xf32>
    %44 = arith.mulf %43, %21 : vector<16x768xf32>
    %45 = math.exp %44 : vector<16x768xf32>
    %46 = arith.mulf %41, %45 : vector<16x768xf32>
    %cst_22 = arith.constant 1.000000e+00 : f32
    %47 = vector.broadcast %cst_22 : f32 to vector<16x768xf32>
    %48 = arith.subf %47, %46 : vector<16x768xf32>
    %cst_23 = arith.constant 0.000000e+00 : f32
    %49 = vector.broadcast %cst_23 : f32 to vector<16x768xf32>
    %50 = arith.cmpf olt, %20, %49 : vector<16x768xf32>
    %cst_24 = arith.constant 0.000000e+00 : f32
    %51 = vector.broadcast %cst_24 : f32 to vector<16x768xf32>
    %52 = arith.subf %51, %48 : vector<16x768xf32>
    %53 = arith.select %50, %52, %48 : vector<16x768xi1>, vector<16x768xf32>
    %cst_25 = arith.constant 1.000000e+00 : f32
    %54 = vector.broadcast %cst_25 : f32 to vector<16x768xf32>
    %55 = arith.addf %54, %53 : vector<16x768xf32>
    %56 = arith.mulf %18, %55 : vector<16x768xf32>
    %57 = arith.truncf %56 : vector<16x768xf32> to vector<16x768xbf16>
    %c0_26 = arith.constant 0 : index
    %c0_27 = arith.constant 0 : index
    %c0_28 = arith.constant 0 : index
    %58 = vector.load %arg19[%c0_26, %c0_27, %c0_28] : memref<1x768x384xbf16, #tpu.memory_space<vmem>>, vector<1x768x384xbf16>
    %59 = vector.shape_cast %58 : vector<1x768x384xbf16> to vector<768x384xbf16>
    %cst_29 = arith.constant dense<0.000000e+00> : vector<16x384xf32>
    %60 = tpu.matmul %57, %59, %cst_29 {dimension_numbers = #tpu.dot_dimension_numbers<[1], [0], [0], [1], [0, 0, 1, 1], [], []>} : vector<16x768xbf16>, vector<768x384xbf16>, vector<16x384xf32> -> vector<16x384xf32>
    %c0_i32_30 = arith.constant 0 : i32
    %61 = arith.cmpi eq, %arg1, %c0_i32_30 : i32
    %62 = arith.extui %61 : i1 to i32
    %c0_i32_31 = arith.constant 0 : i32
    %63 = arith.cmpi ne, %62, %c0_i32_31 : i32
    scf.if %63 {
      %c0_38 = arith.constant 0 : index
      %c0_39 = arith.constant 0 : index
      %75 = vector.load %arg27[%c0_38, %c0_39] : memref<16x384xf32, #tpu.memory_space<vmem>>, vector<16x384xf32>
      tpu.vector_store %arg27[%c0_38, %c0_39], %60 {strides = array<i32>} : memref<16x384xf32, #tpu.memory_space<vmem>>, vector<16x384xf32>,
    } else {
    }
    %c0_i32_32 = arith.constant 0 : i32
    %64 = arith.cmpi sgt, %arg1, %c0_i32_32 : i32
    %65 = arith.extui %64 : i1 to i32
    %c0_i32_33 = arith.constant 0 : i32
    %66 = arith.cmpi ne, %65, %c0_i32_33 : i32
    scf.if %66 {
      %c0_38 = arith.constant 0 : index
      %c0_39 = arith.constant 0 : index
      %75 = vector.load %arg27[%c0_38, %c0_39] : memref<16x384xf32, #tpu.memory_space<vmem>>, vector<16x384xf32>
      %76 = arith.addf %75, %60 : vector<16x384xf32>
      %c0_40 = arith.constant 0 : index
      %c0_41 = arith.constant 0 : index
      %77 = vector.load %arg27[%c0_40, %c0_41] : memref<16x384xf32, #tpu.memory_space<vmem>>, vector<16x384xf32>
      tpu.vector_store %arg27[%c0_40, %c0_41], %76 {strides = array<i32>} : memref<16x384xf32, #tpu.memory_space<vmem>>, vector<16x384xf32>,
    } else {
    }
    %c1_i32 = arith.constant 1 : i32
    %67 = arith.cmpi eq, %arg1, %c1_i32 : i32
    %68 = arith.extui %67 : i1 to i32
    %c0_i32_34 = arith.constant 0 : i32
    %69 = arith.cmpi ne, %68, %c0_i32_34 : i32
    scf.if %69 {
      %c0_38 = arith.constant 0 : index
      %c0_39 = arith.constant 0 : index
      %75 = vector.load %arg27[%c0_38, %c0_39] : memref<16x384xf32, #tpu.memory_space<vmem>>, vector<16x384xf32>
      %76 = arith.addf %8, %75 : vector<16x384xf32>
      %c0_40 = arith.constant 0 : index
      %c0_41 = arith.constant 0 : index
      %c0_42 = arith.constant 0 : index
      %77 = vector.load %arg20[%c0_40, %c0_41, %c0_42] : memref<1x1x384xf32, #tpu.memory_space<vmem>>, vector<1x1x384xf32>
      %78 = vector.shape_cast %77 : vector<1x1x384xf32> to vector<1x384xf32>
      %79 = vector.broadcast %78 : vector<1x384xf32> to vector<16x384xf32>
      %80 = arith.addf %76, %79 : vector<16x384xf32>
      %c0_43 = arith.constant 0 : index
      %c0_44 = arith.constant 0 : index
      %c0_45 = arith.constant 0 : index
      %81 = vector.load %arg21[%c0_43, %c0_44, %c0_45] : memref<1x1x384xf32, #tpu.memory_space<vmem>>, vector<1x1x384xf32>
      %82 = vector.shape_cast %81 : vector<1x1x384xf32> to vector<1x384xf32>
      %c0_46 = arith.constant 0 : index
      %c0_47 = arith.constant 0 : index
      %c0_48 = arith.constant 0 : index
      %83 = vector.load %arg22[%c0_46, %c0_47, %c0_48] : memref<1x1x384xf32, #tpu.memory_space<vmem>>, vector<1x1x384xf32>
      %84 = vector.shape_cast %83 : vector<1x1x384xf32> to vector<1x384xf32>
      %cst_49 = arith.constant dense<0.000000e+00> : vector<16xf32>
      %85 = vector.multi_reduction <add>, %80, %cst_49 [1] : vector<16x384xf32> to vector<16xf32>
      %86 = vector.shape_cast %85 : vector<16xf32> to vector<16x1xf32>
      %cst_50 = arith.constant 3.840000e+02 : f32
      %87 = vector.broadcast %cst_50 : f32 to vector<16x1xf32>
      %88 = arith.divf %86, %87 : vector<16x1xf32>
      %89 = vector.broadcast %88 : vector<16x1xf32> to vector<16x384xf32>
      %90 = arith.subf %80, %89 : vector<16x384xf32>
      %91 = arith.mulf %90, %90 : vector<16x384xf32>
      %cst_51 = arith.constant dense<0.000000e+00> : vector<16xf32>
      %92 = vector.multi_reduction <add>, %91, %cst_51 [1] : vector<16x384xf32> to vector<16xf32>
      %93 = vector.shape_cast %92 : vector<16xf32> to vector<16x1xf32>
      %cst_52 = arith.constant 3.840000e+02 : f32
      %94 = vector.broadcast %cst_52 : f32 to vector<16x1xf32>
      %95 = arith.divf %93, %94 : vector<16x1xf32>
      %96 = vector.broadcast %88 : vector<16x1xf32> to vector<16x384xf32>
      %97 = arith.subf %80, %96 : vector<16x384xf32>
      %cst_53 = arith.constant 9.99999974E-6 : f32
      %98 = vector.broadcast %cst_53 : f32 to vector<16x1xf32>
      %99 = arith.addf %95, %98 : vector<16x1xf32>
      %100 = math.rsqrt %99 : vector<16x1xf32>
      %101 = vector.broadcast %100 : vector<16x1xf32> to vector<16x384xf32>
      %102 = arith.mulf %97, %101 : vector<16x384xf32>
      %103 = vector.broadcast %82 : vector<1x384xf32> to vector<16x384xf32>
      %104 = arith.mulf %102, %103 : vector<16x384xf32>
      %105 = vector.broadcast %84 : vector<1x384xf32> to vector<16x384xf32>
      %106 = arith.addf %104, %105 : vector<16x384xf32>
      %c0_54 = arith.constant 0 : index
      %c0_55 = arith.constant 0 : index
      %107 = vector.load %arg26[%c0_54, %c0_55] : memref<16x384xf32, #tpu.memory_space<vmem>>, vector<16x384xf32>
      tpu.vector_store %arg26[%c0_54, %c0_55], %106 {strides = array<i32>} : memref<16x384xf32, #tpu.memory_space<vmem>>, vector<16x384xf32>,
    } else {
    }
    %c1_i32_35 = arith.constant 1 : i32
    %70 = arith.cmpi eq, %arg0, %c1_i32_35 : i32
    %c1_i32_36 = arith.constant 1 : i32
    %71 = arith.cmpi eq, %arg1, %c1_i32_36 : i32
    %72 = arith.andi %70, %71 : i1
    %73 = arith.extui %72 : i1 to i32
    %c0_i32_37 = arith.constant 0 : i32
    %74 = arith.cmpi ne, %73, %c0_i32_37 : i32
    scf.if %74 {
      %c0_38 = arith.constant 0 : index
      %c0_39 = arith.constant 0 : index
      %75 = vector.load %arg26[%c0_38, %c0_39] : memref<16x384xf32, #tpu.memory_space<vmem>>, vector<16x384xf32>
      %c0_40 = arith.constant 0 : index
      %c0_41 = arith.constant 0 : index
      %76 = vector.load %arg23[%c0_40, %c0_41] : memref<1x384xf32, #tpu.memory_space<vmem>>, vector<1x384xf32>
      %c0_42 = arith.constant 0 : index
      %c0_43 = arith.constant 0 : index
      %77 = vector.load %arg24[%c0_42, %c0_43] : memref<1x384xf32, #tpu.memory_space<vmem>>, vector<1x384xf32>
      %cst_44 = arith.constant dense<0.000000e+00> : vector<16xf32>
      %78 = vector.multi_reduction <add>, %75, %cst_44 [1] : vector<16x384xf32> to vector<16xf32>
      %79 = vector.shape_cast %78 : vector<16xf32> to vector<16x1xf32>
      %cst_45 = arith.constant 3.840000e+02 : f32
      %80 = vector.broadcast %cst_45 : f32 to vector<16x1xf32>
      %81 = arith.divf %79, %80 : vector<16x1xf32>
      %82 = vector.broadcast %81 : vector<16x1xf32> to vector<16x384xf32>
      %83 = arith.subf %75, %82 : vector<16x384xf32>
      %84 = arith.mulf %83, %83 : vector<16x384xf32>
      %cst_46 = arith.constant dense<0.000000e+00> : vector<16xf32>
      %85 = vector.multi_reduction <add>, %84, %cst_46 [1] : vector<16x384xf32> to vector<16xf32>
      %86 = vector.shape_cast %85 : vector<16xf32> to vector<16x1xf32>
      %cst_47 = arith.constant 3.840000e+02 : f32
      %87 = vector.broadcast %cst_47 : f32 to vector<16x1xf32>
      %88 = arith.divf %86, %87 : vector<16x1xf32>
      %89 = vector.broadcast %81 : vector<16x1xf32> to vector<16x384xf32>
      %90 = arith.subf %75, %89 : vector<16x384xf32>
      %cst_48 = arith.constant 9.99999974E-6 : f32
      %91 = vector.broadcast %cst_48 : f32 to vector<16x1xf32>
      %92 = arith.addf %88, %91 : vector<16x1xf32>
      %93 = math.rsqrt %92 : vector<16x1xf32>
      %94 = vector.broadcast %93 : vector<16x1xf32> to vector<16x384xf32>
      %95 = arith.mulf %90, %94 : vector<16x384xf32>
      %96 = vector.broadcast %76 : vector<1x384xf32> to vector<16x384xf32>
      %97 = arith.mulf %95, %96 : vector<16x384xf32>
      %98 = vector.broadcast %77 : vector<1x384xf32> to vector<16x384xf32>
      %99 = arith.addf %97, %98 : vector<16x384xf32>
      %100 = vector.shape_cast %99 : vector<16x384xf32> to vector<2x8x384xf32>
      %cst_49 = arith.constant dense<0.000000e+00> : vector<2x384xf32>
      %101 = vector.multi_reduction <add>, %100, %cst_49 [1] : vector<2x8x384xf32> to vector<2x384xf32>
      %cst_50 = arith.constant 8.000000e+00 : f32
      %102 = vector.broadcast %cst_50 : f32 to vector<2x384xf32>
      %103 = arith.divf %101, %102 : vector<2x384xf32>
      %c0_51 = arith.constant 0 : index
      %c0_52 = arith.constant 0 : index
      %104 = vector.load %arg25[%c0_51, %c0_52] : memref<2x384xf32, #tpu.memory_space<vmem>>, vector<2x384xf32>
      tpu.vector_store %arg25[%c0_51, %c0_52], %103 {strides = array<i32>} : memref<2x384xf32, #tpu.memory_space<vmem>>, vector<2x384xf32>,
    } else {
    }
    return
  }
  func.func @transform_0(%arg0: i32, %arg1: i32) -> (i32, i32) {
    %c0_i32 = arith.constant 0 : i32
    %c0_i32_0 = arith.constant 0 : i32
    %c0_i32_1 = arith.constant 0 : i32
    return %c0_i32, %c0_i32_0 : i32, i32
  }
  func.func @transform_1(%arg0: i32, %arg1: i32) -> (i32, i32) {
    %c0_i32 = arith.constant 0 : i32
    %c0_i32_0 = arith.constant 0 : i32
    %c0_i32_1 = arith.constant 0 : i32
    return %c0_i32, %c0_i32_0 : i32, i32
  }
  func.func @transform_2(%arg0: i32, %arg1: i32) -> (i32, i32) {
    %c0_i32 = arith.constant 0 : i32
    %c0_i32_0 = arith.constant 0 : i32
    %c0_i32_1 = arith.constant 0 : i32
    return %c0_i32, %c0_i32_0 : i32, i32
  }
  func.func @transform_3(%arg0: i32, %arg1: i32) -> (i32, i32) {
    %c0_i32 = arith.constant 0 : i32
    %c0_i32_0 = arith.constant 0 : i32
    %c0_i32_1 = arith.constant 0 : i32
    return %c0_i32, %c0_i32_0 : i32, i32
  }
  func.func @transform_4(%arg0: i32, %arg1: i32) -> (i32, i32) {
    %c0_i32 = arith.constant 0 : i32
    %c0_i32_0 = arith.constant 0 : i32
    %c0_i32_1 = arith.constant 0 : i32
    return %c0_i32, %c0_i32_0 : i32, i32
  }
  func.func @transform_5(%arg0: i32, %arg1: i32) -> (i32, i32, i32) {
    %c0_i32 = arith.constant 0 : i32
    %c0_i32_0 = arith.constant 0 : i32
    %c0_i32_1 = arith.constant 0 : i32
    return %arg0, %c0_i32, %c0_i32_0 : i32, i32, i32
  }
  func.func @transform_6(%arg0: i32, %arg1: i32) -> (i32, i32, i32) {
    %c0_i32 = arith.constant 0 : i32
    %c0_i32_0 = arith.constant 0 : i32
    %c0_i32_1 = arith.constant 0 : i32
    return %arg0, %c0_i32, %c0_i32_0 : i32, i32, i32
  }
  func.func @transform_7(%arg0: i32, %arg1: i32) -> (i32, i32, i32) {
    %c0_i32 = arith.constant 0 : i32
    %c0_i32_0 = arith.constant 0 : i32
    %c0_i32_1 = arith.constant 0 : i32
    return %arg0, %c0_i32, %c0_i32_0 : i32, i32, i32
  }
  func.func @transform_8(%arg0: i32, %arg1: i32) -> (i32, i32, i32) {
    %c0_i32 = arith.constant 0 : i32
    %c0_i32_0 = arith.constant 0 : i32
    %c0_i32_1 = arith.constant 0 : i32
    return %arg0, %c0_i32, %c0_i32_0 : i32, i32, i32
  }
  func.func @transform_9(%arg0: i32, %arg1: i32) -> (i32, i32, i32) {
    %c0_i32 = arith.constant 0 : i32
    %c0_i32_0 = arith.constant 0 : i32
    %c0_i32_1 = arith.constant 0 : i32
    return %arg0, %c0_i32, %c0_i32_0 : i32, i32, i32
  }
  func.func @transform_10(%arg0: i32, %arg1: i32) -> (i32, i32, i32) {
    %c0_i32 = arith.constant 0 : i32
    %c0_i32_0 = arith.constant 0 : i32
    %c0_i32_1 = arith.constant 0 : i32
    return %arg0, %c0_i32, %c0_i32_0 : i32, i32, i32
  }
  func.func @transform_11(%arg0: i32, %arg1: i32) -> (i32, i32, i32) {
    %c0_i32 = arith.constant 0 : i32
    %c0_i32_0 = arith.constant 0 : i32
    %c0_i32_1 = arith.constant 0 : i32
    return %arg0, %c0_i32, %c0_i32_0 : i32, i32, i32
  }
  func.func @transform_12(%arg0: i32, %arg1: i32) -> (i32, i32, i32) {
    %c0_i32 = arith.constant 0 : i32
    %c0_i32_0 = arith.constant 0 : i32
    %c0_i32_1 = arith.constant 0 : i32
    return %arg0, %c0_i32, %c0_i32_0 : i32, i32, i32
  }
  func.func @transform_13(%arg0: i32, %arg1: i32) -> (i32, i32, i32) {
    %c0_i32 = arith.constant 0 : i32
    %c0_i32_0 = arith.constant 0 : i32
    %c0_i32_1 = arith.constant 0 : i32
    return %arg0, %c0_i32, %c0_i32_0 : i32, i32, i32
  }
  func.func @transform_14(%arg0: i32, %arg1: i32) -> (i32, i32, i32) {
    %c0_i32 = arith.constant 0 : i32
    %c0_i32_0 = arith.constant 0 : i32
    %c0_i32_1 = arith.constant 0 : i32
    return %arg0, %c0_i32, %c0_i32_0 : i32, i32, i32
  }
  func.func @transform_15(%arg0: i32, %arg1: i32) -> (i32, i32, i32) {
    %c0_i32 = arith.constant 0 : i32
    %c0_i32_0 = arith.constant 0 : i32
    return %arg0, %c0_i32, %arg1 : i32, i32, i32
  }
  func.func @transform_16(%arg0: i32, %arg1: i32) -> (i32, i32, i32) {
    %c0_i32 = arith.constant 0 : i32
    %c0_i32_0 = arith.constant 0 : i32
    return %arg0, %c0_i32, %arg1 : i32, i32, i32
  }
  func.func @transform_17(%arg0: i32, %arg1: i32) -> (i32, i32, i32) {
    %c0_i32 = arith.constant 0 : i32
    %c0_i32_0 = arith.constant 0 : i32
    return %arg0, %arg1, %c0_i32 : i32, i32, i32
  }
  func.func @transform_18(%arg0: i32, %arg1: i32) -> (i32, i32, i32) {
    %c0_i32 = arith.constant 0 : i32
    %c0_i32_0 = arith.constant 0 : i32
    %c0_i32_1 = arith.constant 0 : i32
    return %arg0, %c0_i32, %c0_i32_0 : i32, i32, i32
  }
  func.func @transform_19(%arg0: i32, %arg1: i32) -> (i32, i32, i32) {
    %c0_i32 = arith.constant 0 : i32
    %c0_i32_0 = arith.constant 0 : i32
    %c0_i32_1 = arith.constant 0 : i32
    return %arg0, %c0_i32, %c0_i32_0 : i32, i32, i32
  }
  func.func @transform_20(%arg0: i32, %arg1: i32) -> (i32, i32, i32) {
    %c0_i32 = arith.constant 0 : i32
    %c0_i32_0 = arith.constant 0 : i32
    %c0_i32_1 = arith.constant 0 : i32
    return %arg0, %c0_i32, %c0_i32_0 : i32, i32, i32
  }
  func.func @transform_21(%arg0: i32, %arg1: i32) -> (i32, i32) {
    %c0_i32 = arith.constant 0 : i32
    %c0_i32_0 = arith.constant 0 : i32
    %c0_i32_1 = arith.constant 0 : i32
    return %c0_i32, %c0_i32_0 : i32, i32
  }
  func.func @transform_22(%arg0: i32, %arg1: i32) -> (i32, i32) {
    %c0_i32 = arith.constant 0 : i32
    %c0_i32_0 = arith.constant 0 : i32
    %c0_i32_1 = arith.constant 0 : i32
    return %c0_i32, %c0_i32_0 : i32, i32
  }
  func.func @transform_23(%arg0: i32, %arg1: i32) -> (i32, i32) {
    %c0_i32 = arith.constant 0 : i32
    %c0_i32_0 = arith.constant 0 : i32
    %c0_i32_1 = arith.constant 0 : i32
    return %c0_i32, %c0_i32_0 : i32, i32
  }
}

</mosaic_0001>

<bundles_post_ra>
// kernel: tpu_custom_call.1
= control target key start
LH: loop header
LB: loop body
LE: loop exit
PB: predicated region body
PF: predicated region fallthrough
CT: control target
= control target key end

     0   :  { %s18153_s0 = inlined_call_operand.hbm [shape: f32[16,32], index: 0, kind: input, shape index: {}]   ;;  %s18154_s1 = inlined_call_operand.hbm [shape: f32[16,384], index: 1, kind: input, shape index: {}]   ;;  %s18155_s2 = inlined_call_operand.hbm [shape: f32[16,16], index: 2, kind: input, shape index: {}]   ;;  %s18156_s3 = inlined_call_operand.hbm [shape: bf16[32,384], index: 3, kind: input, shape index: {}]   ;;  %s18157_s4 = inlined_call_operand.hbm [shape: f32[1,384], index: 4, kind: input, shape index: {}]   ;;  %s18158_s5 = inlined_call_operand.hbm [shape: bf16[2,384,384], index: 5, kind: input, shape index: {}]   ;;  %s18159_s6 = inlined_call_operand.hbm [shape: f32[2,1,384], index: 6, kind: input, shape index: {}]   ;;  %s18160_s7 = inlined_call_operand.hbm [shape: bf16[2,384,384], index: 7, kind: input, shape index: {}]   ;;  %s18161_s8 = inlined_call_operand.hbm [shape: f32[2,1,384], index: 8, kind: input, shape index: {}]   ;;  %s18162_s9 = inlined_call_operand.hbm [shape: bf16[2,384,384], index: 9, kind: input, shape index: {}]   ;;  %s18163_s10 = inlined_call_operand.hbm [shape: f32[2,1,384], index: 10, kind: input, shape index: {}]   ;;  %s18164_s11 = inlined_call_operand.hbm [shape: bf16[2,384,384], index: 11, kind: input, shape index: {}]   ;;  %s18165_s12 = inlined_call_operand.hbm [shape: f32[2,1,384], index: 12, kind: input, shape index: {}]   ;;  %s18166_s13 = inlined_call_operand.hbm [shape: f32[2,1,384], index: 13, kind: input, shape index: {}]   ;;  %s18167_s14 = inlined_call_operand.hbm [shape: f32[2,1,384], index: 14, kind: input, shape index: {}]   ;;  %s18168_s15 = inlined_call_operand.hbm [shape: bf16[2,384,1536], index: 15, kind: input, shape index: {}]   ;;  %s18169_s16 = inlined_call_operand.hbm [shape: f32[2,1,1536], index: 16, kind: input, shape index: {}]   ;;  %s18170_s17 = inlined_call_operand.hbm [shape: bf16[2,1536,384], index: 17, kind: input, shape index: {}]   ;;  %s18171_s18 = inlined_call_operand.hbm [shape: f32[2,1,384], index: 18, kind: input, shape index: {}]   ;;  %s18172_s19 = inlined_call_operand.hbm [shape: f32[2,1,384], index: 19, kind: input, shape index: {}]   ;;  %s18173_s20 = inlined_call_operand.hbm [shape: f32[2,1,384], index: 20, kind: input, shape index: {}]   ;;  %s18174_s21 = inlined_call_operand.hbm [shape: f32[1,384], index: 21, kind: input, shape index: {}]   ;;  %s18175_s22 = inlined_call_operand.hbm [shape: f32[1,384], index: 22, kind: input, shape index: {}]   ;;  %s18176_s23 = inlined_call_operand.hbm [shape: f32[2,384], index: 23, kind: output, shape index: {}]  }
   0x1   :  { %18245 = sst [smem:[#allocation67_spill]] %s18153_s0 }
   0x2   :  { %18246 = sst [smem:[#allocation68_spill]] %s18154_s1 }
   0x3   :  { %18247 = sst [smem:[#allocation69_spill]] %s18155_s2 }
   0x4   :  { %18248 = sst [smem:[#allocation70_spill]] %s18156_s3 }
   0x5   :  { %18249 = sst [smem:[#allocation71_spill]] %s18157_s4 }
   0x6   :  { %18250 = sst [smem:[#allocation72_spill]] %s18158_s5 }
   0x7   :  { %18251 = sst [smem:[#allocation73_spill]] %s18159_s6 }
   0x8   :  { %18252 = sst [smem:[#allocation74_spill]] %s18160_s7 }
   0x9   :  { %18253 = sst [smem:[#allocation75_spill]] %s18161_s8 }
   0xa   :  { %18254 = sst [smem:[#allocation76_spill]] %s18162_s9 }
   0xb   :  { %18255 = sst [smem:[#allocation77_spill]] %s18163_s10 }
   0xc   :  { %18256 = sst [smem:[#allocation78_spill]] %s18164_s11 }
   0xd   :  { %18257 = sst [smem:[#allocation79_spill]] %s18165_s12 }
   0xe   :  { %18258 = sst [smem:[#allocation80_spill]] %s18166_s13 }
   0xf   :  { %18259 = sst [smem:[#allocation81_spill]] %s18167_s14 }
  0x10   :  { %18260 = sst [smem:[#allocation82_spill]] %s18168_s15 }
  0x11   :  { %18261 = sst [smem:[#allocation83_spill]] %s18169_s16 }
  0x12   :  { %18262 = sst [smem:[#allocation84_spill]] %s18170_s17 }
  0x13   :  { %18263 = sst [smem:[#allocation85_spill]] %s18171_s18 }
  0x14   :  { %18264 = sst [smem:[#allocation86_spill]] %s18172_s19 }
  0x15   :  { %18265 = sst [smem:[#allocation87_spill]] %s18173_s20 }
  0x16   :  { %18266 = sst [smem:[#allocation88_spill]] %s18174_s21 }
  0x17   :  { %18267 = sst [smem:[#allocation89_spill]] %s18175_s22 }
  0x18   :  { %18268 = sst [smem:[#allocation90_spill]] %s18176_s23 }
  0x19   :  { %28 = vsyncpa [#allocation5], 0 }
  0x1a   :  { %29 = vsyncpa [#allocation8], 0 }
  0x1b   :  { %30 = vsyncpa [#allocation11], 0 }
  0x1c   :  { %31 = vsyncpa [#allocation14], 0 }
  0x1d   :  { %33 = vsyncpa [#allocation14 + $0x1], 0 }
  0x1e   :  { %34 = vsyncpa [#allocation17], 0 }
  0x1f   :  { %36 = vsyncpa [#allocation17 + $0x1], 0 }
  0x20   :  { %37 = vsyncpa [#allocation20], 0 }
  0x21   :  { %39 = vsyncpa [#allocation20 + $0x1], 0 }
  0x22   :  { %40 = vsyncpa [#allocation23], 0 }
  0x23   :  { %42 = vsyncpa [#allocation23 + $0x1], 0 }
  0x24   :  { %43 = vsyncpa [#allocation26], 0 }
  0x25   :  { %45 = vsyncpa [#allocation26 + $0x1], 0 }
  0x26   :  { %46 = vsyncpa [#allocation29], 0 }
  0x27   :  { %48 = vsyncpa [#allocation29 + $0x1], 0 }
  0x28   :  { %49 = vsyncpa [#allocation32], 0 }
  0x29   :  { %51 = vsyncpa [#allocation32 + $0x1], 0 }
  0x2a   :  { %52 = vsyncpa [#allocation35], 0 }
  0x2b   :  { %54 = vsyncpa [#allocation35 + $0x1], 0 }
  0x2c   :  { %55 = vsyncpa [#allocation38], 0 }
  0x2d   :  { %56 = vsyncpa [#allocation6], 0  ;;  %s14976_s4 = smov 0   ;;  %s14978_s30 = smov 0  }
  0x2e   :  { %s14980_s24 = smov 0   ;;  %s14982_s25 = smov 0  }
  0x2f   :  { %s14984_s5 = smov 0   ;;  %s14986_s1 = smov 0  }
  0x30   :  { %s14988_s26 = smov 0   ;;  %s14990_s2 = smov 0  }
  0x31   :  { %s14992_s6 = smov 0   ;;  %s14994_s27 = smov 0  }
  0x32   :  { %s14996_s7 = smov 0  }
  0x33 LB: > { %18269 = sst [smem:[#allocation55_spill]] %s14774_s30  ;;  %s15030_s28 = sadd.s32 4294967295, %s14810_s7   ;;  %s14810_s7 = sphi %s14996_s7, %s62_s7   ;;  %s14806_s27 = sphi %s14994_s27, %s18378_s27   ;;  %s14802_s6 = sphi %s14992_s6, %s18377_s6   ;;  %s14798_s2 = sphi %s14990_s2, %s18376_s2   ;;  %s14794_s26 = sphi %s14988_s26, %s18375_s26   ;;  %s14790_s1 = sphi %s14986_s1, %s18374_s1   ;;  %s14786_s5 = sphi %s14984_s5, %s18373_s5   ;;  %s14782_s25 = sphi %s14982_s25, %s18367_s25   ;;  %s14778_s24 = sphi %s14980_s24, %s18372_s24   ;;  %s14774_s30 = sphi %s14978_s30, %s18371_s30   ;;  %s14770_s4 = sphi %s14976_s4, %s18365_s4  }
  0x34   : > { %18270 = sst [smem:[#allocation56_spill]] %s14786_s5  ;;  %s71_s29 = sadd.s32 1, %s14802_s6 }
  0x35   : > { %18271 = sst [smem:[#allocation57_spill]] %s14794_s26  ;;  %p72_p0 = scmp.ge.s32.totalorder %s71_s29, 2 }
  0x36   : > { %18272 = sst [smem:[#allocation58_spill]] %s14798_s2  ;;  %s74_s3 = sadd.s32 1, %s14806_s27 }
  0x37   : > { %18273 = sst [smem:[#allocation59_spill]] %s15030_s28  ;;  %s186_s0 = sadd.s32 1, %s14790_s1 }
  0x38   : > { %p193_p1 = scmp.ne.s32.totalorder %s14790_s1, %s14786_s5  ;;  %s18380_s29 = smov (%p72_p0, %s71_s29), 0 }
  0x39   : > { %18274 = sst [smem:[#allocation60_spill]] %s18380_s29  ;;  %s18382_s3 = smov (!%p72_p0, %s74_s3), %s14806_s27 }
  0x3a   : > { %p194_p2 = scmp.eq.s32.totalorder %s14810_s7, 0  ;;  %p199_p3 = scmp.ne.s32.totalorder %s14786_s5, %s14782_s25 }
  0x3b   : > { %p76_p4 = scmp.ge.s32.totalorder %s18382_s3, 2  ;;  %p18203_p5 = scmp.eq.s32.totalorder %s15030_s28, 0 }
  0x3c   : > { %p15045_p6 = por %p194_p2, %p193_p1  ;;  %s444_s26 = ssub.s32 %s14802_s6, %s18380_s29 }
  0x3d   : > { %s18384_s3 = smov (%p76_p4, %s18382_s3), 0  ;;  %p15055_p7 = por %p18203_p5, %p199_p3 }
  0x3e   : > { %s18275_s23 = scalar_select %p15045_p6, 1, 0 }
  0x3f   : > { %18276 = sst [smem:[#allocation61_spill]] %s18384_s3  ;;  %s448_s25 = sadd.s32 1, %s14778_s24 }
  0x40   : > { %s18277_s2 = scalar_select %p15055_p7, 1, 0 }
  0x41   : > { %s183_s5 = ssub.s32 %s14806_s27, %s18384_s3  ;;  %p455_p8 = scmp.ne.s32.totalorder %s14778_s24, %s14774_s30 }
  0x42   : > { %18278 = sst [smem:[#allocation62_spill]] %s18277_s2  ;;  %p184_p9 = scmp.eq.s32.totalorder %s183_s5, 0 }
  0x43   : > { %s445_s20 = sor.u32 %s444_s26, %s183_s5  ;;  %p15066_p11 = por %p455_p8, %p194_p2 }
  0x44   : > { %p446_p10 = scmp.eq.s32.totalorder %s445_s20, 0  ;;  %p461_p12 = scmp.ne.s32.totalorder %s14774_s30, %s14770_s4 }
  0x45   : > { %s18279_s16 = scalar_select %p15066_p11, 1, 0 }
  0x46   : > { %s15071_s29 = scalar_select %p184_p9, %s14790_s1, %s186_s0  }
  0x47   : > { %s15074_s18 = scalar_select %p446_p10, %s14778_s24, %s448_s25  }
  0x48   : > { %18280 = sst [smem:[#allocation63_spill]] %s15071_s29  ;;  %p10945_p13 = scmp.ge.s32.totalorder %s14810_s7, 1 }
  0x49   : > { %18281 = sst [smem:[#allocation64_spill]] %s15074_s18  ;;  %p669_p0 = scmp.lt.s32.totalorder %s14810_s7, 5 }
  0x4a   : > { %p15082_p1 = por %p461_p12, %p18203_p5  ;;  %s14812_s20 = smov [#allocation7]  }
  0x4b   : > { %p15086_p3 = pnand %p10945_p13, %p669_p0  ;;  %s694_s26 = sshll.u32 %s14812_s20, 4  ;;  %s695_s26 = int_to_ptr.vmem [resolvable:$true] %s694_s26 }
  0x4c   : > { %s18282_s3 = scalar_select %p15082_p1, 1, 0 }
  0x4d   : > { %s18284_s5 = scalar_select %p15086_p3, 1, 0 }
  0x4e   : > { %18283 = sst [smem:[#allocation65_spill]] %s18282_s3  ;;  %p12949_p2 = pneg %p15086_p3 }
  0x4f   : > { %18285 = sst [smem:[#allocation66_spill]] %s18284_s5  ;;  %s14813_s0 = smov [#allocation10]  }
  0x50   : > { %p15094_p4 = pnand %p12949_p2, %p18203_p5  ;;  %s720_s25 = sshll.u32 %s14813_s0, 4  ;;  %s15098_s25 = int_to_ptr.vmem [resolvable:$true] %s720_s25 }
  0x51   : > { %s18287_s3 = sld [smem:[#allocation68_spill]] }
  0x52   : > { %p15108_p9 = pneg %p15094_p4 }
  0x57   : > { %s13998_s30 = scalar_lea.hbm %s18287_s3, 768 }
  0x58   : > { %p13999_p8 = scmp.ne.s32.totalorder %s18287_s3, %s13998_s30  ;;  %p14005_p13 = scmp.lt.u32.totalorder %s13998_s30, %s18287_s3 }
  0x5a   : > { %p14001_p10 = pnand %p15108_p9, %p13999_p8 }
  0x5c   : > { %p14002_p12 = pneg %p14001_p10 }
  0x5e   : > { %p14007_p0 = pnand %p14005_p13, %p14002_p12 }
  0x60   : > { %14010 = shalt.err (!%p14007_p0)
}
  0x61   : > { %s14011_s18 = scalar_lea.vmem %s695_s26, 768  ;;  %p14019_p7 = scmp.lt.s32.totalorder %s695_s26, %s695_s26 }
  0x62   : > { %p14012_p2 = scmp.ne.s32.totalorder %s695_s26, %s14011_s18  ;;  %p14020_p3 = scmp.lt.s32.totalorder %s14011_s18, %s14011_s18 }
  0x64   : > { %p14014_p5 = pnand %p14012_p2, %p15108_p9  ;;  %p14021_p11 = por %p14020_p3, %p14019_p7 }
  0x66   : > { %p14015_p1 = pneg %p14014_p5 }
  0x68   : > { %p14022_p6 = pnand %p14021_p11, %p14015_p1 }
  0x6a   : > { %14025 = shalt.err (!%p14022_p6)
}
  0x6b   : > { %s14814_s14 = smov 384   ;;  %s14815_s2 = smov 24  }
  0x6c   : > { %12955 = dma.hbm_to_vmem [thread:$0]  (!%p15094_p4), %s18287_s3, 768, %s695_s26, [#allocation8], %s14814_s14, %s14814_s14, %s14815_s2  }
  0x6d   : > { %s18289_s5 = sld [smem:[#allocation70_spill]] }
  0x73   : > { %s18290_s12 = smov %s18289_s5  ;;  %s14026_s10 = scalar_lea.hbm %s18289_s5, 768 }
  0x74   : > { %p14027_p5 = scmp.ne.s32.totalorder %s18290_s12, %s14026_s10  ;;  %p14033_p11 = scmp.lt.u32.totalorder %s14026_s10, %s18290_s12 }
  0x76   : > { %p14029_p7 = pnand %p14027_p5, %p15108_p9 }
  0x78   : > { %p14030_p6 = pneg %p14029_p7 }
  0x7a   : > { %p14035_p1 = pnand %p14033_p11, %p14030_p6 }
  0x7c   : > { %14038 = shalt.err (!%p14035_p1)
}
  0x7d   : > { %s14039_s26 = scalar_lea.vmem %s15098_s25, 768  ;;  %p14047_p12 = scmp.lt.s32.totalorder %s15098_s25, %s15098_s25 }
  0x7e   : > { %p14040_p3 = scmp.ne.s32.totalorder %s15098_s25, %s14039_s26  ;;  %p14048_p13 = scmp.lt.s32.totalorder %s14039_s26, %s14039_s26 }
  0x80   : > { %p14042_p8 = pnand %p14040_p3, %p15108_p9  ;;  %p14049_p0 = por %p14048_p13, %p14047_p12 }
  0x82   : > { %p14043_p10 = pneg %p14042_p8 }
  0x84   : > { %p14050_p2 = pnand %p14049_p0, %p14043_p10 }
  0x86   : > { %14053 = shalt.err (!%p14050_p2)
}
  0x87   : > { %s14816_s8 = smov 192   ;;  %s14817_s10 = smov 12  }
  0x88   : > { %12961 = dma.hbm_to_vmem [thread:$0]  (!%p15094_p4), %s18290_s12, 768, %s15098_s25, [#allocation11], %s14816_s8, %s14816_s8, %s14817_s10  }
  0x89   : > { %s14818_s5 = smov [#allocation37]   ;;  %s18291_s21 = sld [smem:[#allocation88_spill]] }
  0x8a   : > { %s745_s14 = sshll.u32 %s14818_s5, 4  ;;  %s746_s14 = int_to_ptr.vmem [resolvable:$true] %s745_s14 }
  0x8f   : > { %s14054_s30 = scalar_lea.hbm %s18291_s21, 48 }
  0x90   : > { %p14055_p5 = scmp.ne.s32.totalorder %s18291_s21, %s14054_s30  ;;  %p14061_p11 = scmp.lt.u32.totalorder %s14054_s30, %s18291_s21 }
  0x92   : > { %p14057_p7 = pnand %p14055_p5, %p15108_p9 }
  0x94   : > { %p14058_p6 = pneg %p14057_p7 }
  0x96   : > { %p14063_p1 = pnand %p14061_p11, %p14058_p6 }
  0x98   : > { %14066 = shalt.err (!%p14063_p1)
}
  0x99   : > { %s14067_s25 = scalar_lea.vmem %s746_s14, 48  ;;  %s14074_s8 = scalar_lea.vmem %s746_s14, 64 }
  0x9a   : > { %p14068_p3 = scmp.ne.s32.totalorder %s746_s14, %s14067_s25  ;;  %p14075_p12 = scmp.lt.s32.totalorder %s746_s14, %s746_s14 }
  0x9b   : > { %p14076_p13 = scmp.lt.s32.totalorder %s14074_s8, %s14067_s25 }
  0x9c   : > { %p14070_p8 = pnand %p14068_p3, %p15108_p9 }
  0x9d   : > { %p14077_p0 = por %p14076_p13, %p14075_p12 }
  0x9e   : > { %p14071_p10 = pneg %p14070_p8 }
  0xa0   : > { %p14078_p2 = pnand %p14077_p0, %p14071_p10 }
  0xa2   : > { %14081 = shalt.err (!%p14078_p2)
}
  0xa3   : > { %12967 = dma.hbm_to_vmem [thread:$0]  (!%p15094_p4), %s18291_s21, 48, %s746_s14, [#allocation38]  }
  0xa4   : > { %s14819_s19 = smov [#allocation4]   ;;  %s18292_s30 = sld [smem:[#allocation67_spill]] }
  0xa5   : > { %s681_s5 = sshll.u32 %s14819_s19, 4  ;;  %s682_s5 = int_to_ptr.vmem [resolvable:$true] %s681_s5 }
  0xaa   : > { %s18293_s29 = smov %s18292_s30  ;;  %s14082_s0 = scalar_lea.hbm %s18292_s30, 256 }
  0xab   : > { %p14083_p5 = scmp.ne.s32.totalorder %s18293_s29, %s14082_s0  ;;  %p14089_p11 = scmp.lt.u32.totalorder %s14082_s0, %s18293_s29 }
  0xad   : > { %p14085_p7 = pnand %p14083_p5, %p15108_p9 }
  0xaf   : > { %p14086_p6 = pneg %p14085_p7 }
  0xb1   : > { %p14091_p1 = pnand %p14089_p11, %p14086_p6 }
  0xb3   : > { %14094 = shalt.err (!%p14091_p1)
}
  0xb4   : > { %s14095_s14 = scalar_lea.vmem %s682_s5, 256  ;;  %p14103_p12 = scmp.lt.s32.totalorder %s682_s5, %s682_s5 }
  0xb5   : > { %p14096_p3 = scmp.ne.s32.totalorder %s682_s5, %s14095_s14  ;;  %p14104_p13 = scmp.lt.s32.totalorder %s14095_s14, %s14095_s14 }
  0xb7   : > { %p14098_p8 = pnand %p14096_p3, %p15108_p9  ;;  %p14105_p0 = por %p14104_p13, %p14103_p12 }
  0xb9   : > { %p14099_p10 = pneg %p14098_p8 }
  0xbb   : > { %p14106_p2 = pnand %p14105_p0, %p14099_p10 }
  0xbd   : > { %14109 = shalt.err (!%p14106_p2)
}
  0xbe   : > { %s14820_s10 = smov 128   ;;  %s14821_s17 = smov 8  }
  0xbf   : > { %12952 = dma.hbm_to_vmem [thread:$0]  (!%p15094_p4), %s18293_s29, 256, %s682_s5, [#allocation5], %s14820_s10, %s14820_s10, %s14821_s17  }
  0xc0   : > { %s14822_s28 = smov [#allocation9]   ;;  %s14823_s0 = smov [#allocation12]  }
  0xc1   : > { %s707_s30 = sshll.u32 %s14822_s28, 4  ;;  %s734_s18 = sshll.u32 %s14823_s0, 4  ;;  %s708_s30 = int_to_ptr.vmem [resolvable:$true] %s707_s30  ;;  %s735_s18 = int_to_ptr.vmem [resolvable:$true] %s734_s18 }
  0xc2   : > { %s18294_s8 = sld [smem:[#allocation69_spill]] }
  0xc8   : > { %s14110_s14 = scalar_lea.hbm %s18294_s8, 256 }
  0xc9   : > { %p14111_p5 = scmp.ne.s32.totalorder %s18294_s8, %s14110_s14  ;;  %p14117_p11 = scmp.lt.u32.totalorder %s14110_s14, %s18294_s8 }
  0xcb   : > { %p14113_p7 = pnand %p14111_p5, %p15108_p9 }
  0xcd   : > { %p14114_p6 = pneg %p14113_p7 }
  0xcf   : > { %p14119_p1 = pnand %p14117_p11, %p14114_p6 }
  0xd1   : > { %14122 = shalt.err (!%p14119_p1)
}
  0xd2   : > { %s14123_s5 = scalar_lea.vmem %s708_s30, 256  ;;  %p14131_p12 = scmp.lt.s32.totalorder %s708_s30, %s708_s30 }
  0xd3   : > { %p14124_p3 = scmp.ne.s32.totalorder %s708_s30, %s14123_s5  ;;  %p14132_p13 = scmp.lt.s32.totalorder %s14123_s5, %s14123_s5 }
  0xd5   : > { %p14126_p8 = pnand %p14124_p3, %p15108_p9  ;;  %p14133_p0 = por %p14132_p13, %p14131_p12 }
  0xd7   : > { %p14127_p10 = pneg %p14126_p8 }
  0xd9   : > { %p14134_p2 = pnand %p14133_p0, %p14127_p10 }
  0xdb   : > { %14137 = shalt.err (!%p14134_p2)
}
  0xdc   : > { %12958 = dma.hbm_to_vmem [thread:$0]  (!%p15094_p4), %s18294_s8, 256, %s708_s30, [#allocation8], %s14820_s10, %s14820_s10, %s14821_s17  }
  0xdd   : > { %s18295_s19 = sld [smem:[#allocation71_spill]] }
  0xe3   : > { %s14138_s2 = scalar_lea.hbm %s18295_s19, 48 }
  0xe4   : > { %p14139_p5 = scmp.ne.s32.totalorder %s18295_s19, %s14138_s2  ;;  %p14145_p11 = scmp.lt.u32.totalorder %s14138_s2, %s18295_s19 }
  0xe6   : > { %p14141_p7 = pnand %p14139_p5, %p15108_p9 }
  0xe8   : > { %p14142_p6 = pneg %p14141_p7 }
  0xea   : > { %p14147_p1 = pnand %p14145_p11, %p14142_p6 }
  0xec   : > { %14150 = shalt.err (!%p14147_p1)
}
  0xed   : > { %s14151_s14 = scalar_lea.vmem %s735_s18, 48  ;;  %s14158_s10 = scalar_lea.vmem %s735_s18, 64 }
  0xee   : > { %p14152_p3 = scmp.ne.s32.totalorder %s735_s18, %s14151_s14  ;;  %p14159_p12 = scmp.lt.s32.totalorder %s735_s18, %s735_s18 }
  0xef   : > { %p14160_p13 = scmp.lt.s32.totalorder %s14158_s10, %s14151_s14 }
  0xf0   : > { %p14154_p8 = pnand %p14152_p3, %p15108_p9 }
  0xf1   : > { %p14161_p0 = por %p14160_p13, %p14159_p12 }
  0xf2   : > { %p14155_p10 = pneg %p14154_p8 }
  0xf4   : > { %p14162_p2 = pnand %p14161_p0, %p14155_p10 }
  0xf6   : > { %14165 = shalt.err (!%p14162_p2)
}
  0xf7   : > { %12964 = dma.hbm_to_vmem [thread:$0]  (!%p15094_p4), %s18295_s19, 48, %s735_s18, [#allocation11]  }
  0xf8   : > { %s14824_s5 = smov [#allocation39]   ;;  %s18296_s22 = sld [smem:[#allocation89_spill]] }
  0xf9   : > { %s756_s12 = sshll.u32 %s14824_s5, 4  ;;  %s757_s12 = int_to_ptr.vmem [resolvable:$true] %s756_s12 }
  0xfe   : > { %s14166_s21 = scalar_lea.hbm %s18296_s22, 48 }
  0xff   : > { %p14167_p5 = scmp.ne.s32.totalorder %s18296_s22, %s14166_s21  ;;  %p14173_p11 = scmp.lt.u32.totalorder %s14166_s21, %s18296_s22 }
 0x101   : > { %p14169_p7 = pnand %p14167_p5, %p15108_p9 }
 0x103   : > { %p14170_p6 = pneg %p14169_p7 }
 0x105   : > { %p14175_p1 = pnand %p14173_p11, %p14170_p6 }
 0x107   : > { %14178 = shalt.err (!%p14175_p1)
}
 0x108   : > { %s14179_s18 = scalar_lea.vmem %s757_s12, 48  ;;  %s14186_s25 = scalar_lea.vmem %s757_s12, 64 }
 0x109   : > { %p14180_p3 = scmp.ne.s32.totalorder %s757_s12, %s14179_s18  ;;  %p14187_p12 = scmp.lt.s32.totalorder %s757_s12, %s757_s12 }
 0x10a   : > { %p14188_p13 = scmp.lt.s32.totalorder %s14186_s25, %s14179_s18 }
 0x10b   : > { %p14182_p8 = pnand %p14180_p3, %p15108_p9 }
 0x10c   : > { %p14189_p0 = por %p14188_p13, %p14187_p12 }
 0x10d   : > { %p14183_p10 = pneg %p14182_p8 }
 0x10f   : > { %p14190_p2 = pnand %p14189_p0, %p14183_p10 }
 0x111   : > { %14193 = shalt.err (!%p14190_p2)
}
 0x112   : > { %12970 = dma.hbm_to_vmem [thread:$0]  (!%p15094_p4), %s18296_s22, 48, %s757_s12, [#allocation38]  }
 0x113   : > { %p10953_p5 = scmp.ge.s32.totalorder %s14810_s7, 4 }
 0x114   : > { %s15239_s20 = sand.u32 (!%p10953_p5), 1, %s14810_s7   ;;  %s769_s17 = sand.u32 (!%p10953_p5), 1, %s14790_s1  }
 0x115   : > { %763 = sbr.rel (%p10953_p5) target bundleno = 725 (0x2d5), region = 44  ;;  %s18297_s12 = sld [smem:[#allocation72_spill]] (!%p10953_p5) }
 0x116   : > { %s15242_s30 = smul.u32 (!%p10953_p5), 576, %s769_s17  ;;  %s18221_s0 = scalar_lea.sflag (!%p10953_p5), [#allocation14], %s15239_s20 }
 0x117   : > { %s15245_s5 = smul.u32 (!%p10953_p5), 9216, %s14806_s27  ;;  %p18298_p9 = scmp.ne.s32.totalorder (!%p10953_p5), %s18275_s23, 0 }
 0x118   : > { %s771_s21 = scalar_lea.vmem (!%p10953_p5), [#allocation13], %s15242_s30  ;;  %s15256_s28 = smul.u32 (!%p10953_p5), 3, %s769_s17 }
 0x119   : > { %s778_s2 = sshll.u32 (!%p10953_p5), %s771_s21, 4  ;;  %s15254_s2 = int_to_ptr.vmem [resolvable:$true] %s778_s2 }
 0x11b   : > { %s15251_s15 = scalar_lea.hbm (!%p10953_p5), %s18297_s12, %s15245_s5  ;;  %s14198_s14 = scalar_lea.hbm (!%p10953_p5), %s18297_s12, 18432 }
 0x11c   : > { %s14194_s26 = scalar_lea.hbm %s15251_s15, 9216  ;;  %p14199_p11 = scmp.lt.u32.totalorder %s15251_s15, %s18297_s12 }
 0x11d   : > { %p14195_p4 = scmp.ne.s32.totalorder %s15251_s15, %s14194_s26  ;;  %p14200_p1 = scmp.lt.u32.totalorder %s14198_s14, %s14194_s26 }
 0x11e   : > { %p14202_p8 = scmp.lt.u32.totalorder %s14194_s26, %s15251_s15 }
 0x11f   : > { %p14196_p7 = pnand %p14195_p4, %p18298_p9  ;;  %p14201_p3 = por %p14200_p1, %p14199_p11 }
 0x121   : > { %p14197_p6 = pneg %p14196_p7  ;;  %p14203_p10 = por %p14202_p8, %p14201_p3 }
 0x123   : > { %p14204_p12 = pnand %p14203_p10, %p14197_p6 }
 0x125   : > { %14207 = shalt.err (!%p14204_p12)
}
 0x126   : > { %s14208_s17 = scalar_lea.vmem %s15254_s2, 9216  ;;  %s14825_s3 = smov [#allocation13]  }
 0x127   : > { %p14209_p13 = scmp.ne.s32.totalorder %s15254_s2, %s14208_s17  ;;  %s14212_s21 = sshll.u32 %s14825_s3, 4  ;;  %s14213_s21 = int_to_ptr.vmem [resolvable:$false] %s14212_s21 }
 0x128   : > { %s14214_s18 = scalar_lea.vmem %s14213_s21, 18432  ;;  %p14215_p5 = scmp.lt.s32.totalorder %s15254_s2, %s14213_s21 }
 0x129   : > { %p14210_p0 = pnand %p14209_p13, %p18298_p9  ;;  %p14216_p4 = scmp.lt.s32.totalorder %s14214_s18, %s14208_s17 }
 0x12b   : > { %p14211_p2 = pneg %p14210_p0  ;;  %p14217_p7 = por %p14216_p4, %p14215_p5 }
 0x12d   : > { %p14218_p11 = pnand %p14217_p7, %p14211_p2 }
 0x12f   : > { %14221 = shalt.err (!%p14218_p11)
}
 0x130   : > { %s18224_s26 = smov 192   ;;  %s18225_s25 = smov 12  }
 0x131   : > { %12899 = dma.hbm_to_vmem [thread:$0]  (%p18298_p9), %s15251_s15, 9216, %s15254_s2, %s18221_s0, %s18224_s26, %s18224_s26, %s18225_s25  }
 0x132   : > { %s18299_s4 = sld [smem:[#allocation74_spill]]  ;;  %s811_s21 = scalar_lea.vmem [#allocation16], %s15242_s30 }
 0x133   : > { %s818_s18 = sshll.u32 %s811_s21, 4  ;;  %s18220_s8 = scalar_lea.sflag [#allocation17], %s15239_s20  ;;  %s15292_s18 = int_to_ptr.vmem [resolvable:$true] %s818_s18 }
 0x138   : > { %s18300_s17 = smov %s18299_s4  ;;  %s15289_s3 = scalar_lea.hbm %s18299_s4, %s15245_s5 }
 0x139   : > { %s14222_s12 = scalar_lea.hbm %s15289_s3, 9216  ;;  %s14226_s14 = scalar_lea.hbm %s18300_s17, 18432 }
 0x13a   : > { %p14223_p6 = scmp.ne.s32.totalorder %s15289_s3, %s14222_s12  ;;  %p14227_p8 = scmp.lt.u32.totalorder %s15289_s3, %s18300_s17 }
 0x13b   : > { %p14228_p10 = scmp.lt.u32.totalorder %s14226_s14, %s14222_s12  ;;  %p14230_p13 = scmp.lt.u32.totalorder %s14222_s12, %s15289_s3 }
 0x13c   : > { %p14224_p1 = pnand %p14223_p6, %p18298_p9 }
 0x13d   : > { %p14229_p12 = por %p14228_p10, %p14227_p8 }
 0x13e   : > { %p14225_p3 = pneg %p14224_p1 }
 0x13f   : > { %p14231_p0 = por %p14230_p13, %p14229_p12 }
 0x141   : > { %p14232_p2 = pnand %p14231_p0, %p14225_p3 }
 0x143   : > { %14235 = shalt.err (!%p14232_p2)
}
 0x144   : > { %s14236_s21 = scalar_lea.vmem %s15292_s18, 9216  ;;  %s14828_s15 = smov [#allocation16]  }
 0x145   : > { %p14237_p5 = scmp.ne.s32.totalorder %s15292_s18, %s14236_s21  ;;  %s14240_s2 = sshll.u32 %s14828_s15, 4  ;;  %s14241_s2 = int_to_ptr.vmem [resolvable:$false] %s14240_s2 }
 0x146   : > { %s14242_s10 = scalar_lea.vmem %s14241_s2, 18432  ;;  %p14243_p11 = scmp.lt.s32.totalorder %s15292_s18, %s14241_s2 }
 0x147   : > { %p14238_p4 = pnand %p14237_p5, %p18298_p9  ;;  %p14244_p6 = scmp.lt.s32.totalorder %s14242_s10, %s14236_s21 }
 0x149   : > { %p14239_p7 = pneg %p14238_p4  ;;  %p14245_p1 = por %p14244_p6, %p14243_p11 }
 0x14b   : > { %p14246_p8 = pnand %p14245_p1, %p14239_p7 }
 0x14d   : > { %14249 = shalt.err (!%p14246_p8)
}
 0x14e   : > { %12901 = dma.hbm_to_vmem [thread:$0]  (%p18298_p9), %s15289_s3, 9216, %s15292_s18, %s18220_s8, %s18224_s26, %s18224_s26, %s18225_s25  }
 0x14f   : > { %s18301_s9 = sld [smem:[#allocation76_spill]]  ;;  %s851_s21 = scalar_lea.vmem [#allocation19], %s15242_s30 }
 0x150   : > { %s858_s15 = sshll.u32 %s851_s21, 4  ;;  %s18223_s2 = scalar_lea.sflag [#allocation20], %s15239_s20  ;;  %s15328_s15 = int_to_ptr.vmem [resolvable:$true] %s858_s15 }
 0x155   : > { %s15325_s4 = scalar_lea.hbm %s18301_s9, %s15245_s5  ;;  %s14254_s12 = scalar_lea.hbm %s18301_s9, 18432 }
 0x156   : > { %s14250_s10 = scalar_lea.hbm %s15325_s4, 9216  ;;  %p14255_p13 = scmp.lt.u32.totalorder %s15325_s4, %s18301_s9 }
 0x157   : > { %p14251_p3 = scmp.ne.s32.totalorder %s15325_s4, %s14250_s10  ;;  %p14256_p0 = scmp.lt.u32.totalorder %s14254_s12, %s14250_s10 }
 0x158   : > { %p14258_p5 = scmp.lt.u32.totalorder %s14250_s10, %s15325_s4 }
 0x159   : > { %p14252_p10 = pnand %p14251_p3, %p18298_p9  ;;  %p14257_p2 = por %p14256_p0, %p14255_p13 }
 0x15b   : > { %p14253_p12 = pneg %p14252_p10  ;;  %p14259_p4 = por %p14258_p5, %p14257_p2 }
 0x15d   : > { %p14260_p7 = pnand %p14259_p4, %p14253_p12 }
 0x15f   : > { %14263 = shalt.err (!%p14260_p7)
}
 0x160   : > { %s14264_s21 = scalar_lea.vmem %s15328_s15, 9216  ;;  %s14829_s3 = smov [#allocation19]  }
 0x161   : > { %p14265_p11 = scmp.ne.s32.totalorder %s15328_s15, %s14264_s21  ;;  %s14268_s18 = sshll.u32 %s14829_s3, 4  ;;  %s14269_s18 = int_to_ptr.vmem [resolvable:$false] %s14268_s18 }
 0x162   : > { %s14270_s8 = scalar_lea.vmem %s14269_s18, 18432  ;;  %p14271_p8 = scmp.lt.s32.totalorder %s15328_s15, %s14269_s18 }
 0x163   : > { %p14266_p6 = pnand %p14265_p11, %p18298_p9  ;;  %p14272_p3 = scmp.lt.s32.totalorder %s14270_s8, %s14264_s21 }
 0x165   : > { %p14267_p1 = pneg %p14266_p6  ;;  %p14273_p10 = por %p14272_p3, %p14271_p8 }
 0x167   : > { %p14274_p13 = pnand %p14273_p10, %p14267_p1 }
 0x169   : > { %14277 = shalt.err (!%p14274_p13)
}
 0x16a   : > { %12903 = dma.hbm_to_vmem [thread:$0]  (%p18298_p9), %s15325_s4, 9216, %s15328_s15, %s18223_s2, %s18224_s26, %s18224_s26, %s18225_s25  }
 0x16b   : > { %s18302_s11 = sld [smem:[#allocation78_spill]]  ;;  %s891_s21 = scalar_lea.vmem [#allocation22], %s15242_s30 }
 0x16c   : > { %s898_s3 = sshll.u32 %s891_s21, 4  ;;  %s15367_s18 = smul.u32 48, %s14806_s27  ;;  %s15364_s3 = int_to_ptr.vmem [resolvable:$true] %s898_s3 }
 0x16d   : > { %s18222_s8 = scalar_lea.sflag [#allocation23], %s15239_s20 }
 0x171   : > { %s15361_s14 = scalar_lea.hbm %s18302_s11, %s15245_s5  ;;  %s14282_s5 = scalar_lea.hbm %s18302_s11, 18432 }
 0x172   : > { %s14278_s0 = scalar_lea.hbm %s15361_s14, 9216  ;;  %p14283_p5 = scmp.lt.u32.totalorder %s15361_s14, %s18302_s11 }
 0x173   : > { %p14279_p12 = scmp.ne.s32.totalorder %s15361_s14, %s14278_s0  ;;  %p14284_p4 = scmp.lt.u32.totalorder %s14282_s5, %s14278_s0 }
 0x174   : > { %p14286_p11 = scmp.lt.u32.totalorder %s14278_s0, %s15361_s14 }
 0x175   : > { %p14280_p0 = pnand %p14279_p12, %p18298_p9  ;;  %p14285_p7 = por %p14284_p4, %p14283_p5 }
 0x177   : > { %p14281_p2 = pneg %p14280_p0  ;;  %p14287_p6 = por %p14286_p11, %p14285_p7 }
 0x179   : > { %p14288_p1 = pnand %p14287_p6, %p14281_p2 }
 0x17b   : > { %14291 = shalt.err (!%p14288_p1)
}
 0x17c   : > { %s14292_s30 = scalar_lea.vmem %s15364_s3, 9216  ;;  %s14830_s21 = smov [#allocation22]  }
 0x17d   : > { %p14293_p8 = scmp.ne.s32.totalorder %s15364_s3, %s14292_s30  ;;  %s14296_s4 = sshll.u32 %s14830_s21, 4  ;;  %s14297_s4 = int_to_ptr.vmem [resolvable:$false] %s14296_s4 }
 0x17e   : > { %s14298_s15 = scalar_lea.vmem %s14297_s4, 18432  ;;  %p14299_p13 = scmp.lt.s32.totalorder %s15364_s3, %s14297_s4 }
 0x17f   : > { %p14294_p3 = pnand %p14293_p8, %p18298_p9  ;;  %p14300_p12 = scmp.lt.s32.totalorder %s14298_s15, %s14292_s30 }
 0x181   : > { %p14295_p10 = pneg %p14294_p3  ;;  %p14301_p0 = por %p14300_p12, %p14299_p13 }
 0x183   : > { %p14302_p5 = pnand %p14301_p0, %p14295_p10 }
 0x185   : > { %14305 = shalt.err (!%p14302_p5)
}
 0x186   : > { %12905 = dma.hbm_to_vmem [thread:$0]  (%p18298_p9), %s15361_s14, 9216, %s15364_s3, %s18222_s8, %s18224_s26, %s18224_s26, %s18225_s25  }
 0x187   : > { %s18303_s13 = sld [smem:[#allocation80_spill]]  ;;  %s931_s12 = scalar_lea.vmem [#allocation25], %s15256_s28 }
 0x188   : > { %s939_s30 = sshll.u32 %s931_s12, 4  ;;  %s18227_s21 = scalar_lea.sflag [#allocation26], %s15239_s20  ;;  %s940_s30 = int_to_ptr.vmem [resolvable:$true] %s939_s30 }
 0x18d   : > { %s15400_s10 = scalar_lea.hbm %s18303_s13, %s15367_s18  ;;  %s14310_s3 = scalar_lea.hbm %s18303_s13, 96 }
 0x18e   : > { %s14306_s4 = scalar_lea.hbm %s15400_s10, 48  ;;  %p14311_p11 = scmp.lt.u32.totalorder %s15400_s10, %s18303_s13 }
 0x18f   : > { %p14307_p2 = scmp.ne.s32.totalorder %s15400_s10, %s14306_s4  ;;  %p14312_p6 = scmp.lt.u32.totalorder %s14310_s3, %s14306_s4 }
 0x190   : > { %p14314_p8 = scmp.lt.u32.totalorder %s14306_s4, %s15400_s10 }
 0x191   : > { %p14308_p4 = pnand %p14307_p2, %p18298_p9  ;;  %p14313_p1 = por %p14312_p6, %p14311_p11 }
 0x193   : > { %p14309_p7 = pneg %p14308_p4  ;;  %p14315_p3 = por %p14314_p8, %p14313_p1 }
 0x195   : > { %p14316_p10 = pnand %p14315_p3, %p14309_p7 }
 0x197   : > { %14319 = shalt.err (!%p14316_p10)
}
 0x198   : > { %s14320_s12 = scalar_lea.vmem %s940_s30, 48  ;;  %s14831_s8 = smov [#allocation25]  }
 0x199   : > { %p14321_p13 = scmp.ne.s32.totalorder %s940_s30, %s14320_s12  ;;  %s14324_s2 = sshll.u32 %s14831_s8, 4  ;;  %s14325_s2 = int_to_ptr.vmem [resolvable:$false] %s14324_s2 }
 0x19a   : > { %s14326_s15 = scalar_lea.vmem %s14325_s2, 96  ;;  %p14327_p5 = scmp.lt.s32.totalorder %s940_s30, %s14325_s2 }
 0x19b   : > { %p14322_p12 = pnand %p14321_p13, %p18298_p9  ;;  %p14328_p2 = scmp.lt.s32.totalorder %s14326_s15, %s14320_s12 }
 0x19d   : > { %p14323_p0 = pneg %p14322_p12  ;;  %p14329_p4 = por %p14328_p2, %p14327_p5 }
 0x19f   : > { %p14330_p6 = pnand %p14329_p4, %p14323_p0 }
 0x1a1   : > { %14333 = shalt.err (!%p14330_p6)
}
 0x1a2   : > { %12907 = dma.hbm_to_vmem [thread:$0]  (%p18298_p9), %s15400_s10, 48, %s940_s30, %s18227_s21  }
 0x1a3   : > { %s18228_s8 = sand.u32 1, %s14778_s24   ;;  %s18226_s2 = smul.u32 6, %s14802_s6 }
 0x1a4   : > { %s15427_s4 = smul.u32 1152, %s18228_s8  ;;  %s18304_s25 = sld [smem:[#allocation82_spill]] }
 0x1a5   : > { %s12869_s14 = smul.u32 576, %s14806_s27  ;;  %s18236_s10 = scalar_lea.sflag [#allocation29], %s15239_s20 }
 0x1a6   : > { %s969_s0 = scalar_lea.vmem [#allocation28], %s15427_s4  ;;  %p18306_p11 = scmp.ne.s32.totalorder %s18279_s16, 0 }
 0x1a7   : > { %s975_s3 = sadd.s32 %s12869_s14, %s18226_s2  ;;  %s978_s5 = sshll.u32 %s969_s0, 4  ;;  %s15435_s5 = int_to_ptr.vmem [resolvable:$true] %s978_s5 }
 0x1a8   : > { %s10964_s12 = sshll.u32 %s975_s3, 6 }
 0x1aa   : > { %s18305_s9 = smov %s18304_s25  ;;  %s15440_s11 = scalar_lea.hbm %s18304_s25, %s10964_s12 }
 0x1ab   : > { %s14334_s30 = scalar_lea.hbm %s15440_s11, 18432  ;;  %s14338_s3 = scalar_lea.hbm %s18305_s9, 73728 }
 0x1ac   : > { %p14335_p7 = scmp.ne.s32.totalorder %s15440_s11, %s14334_s30  ;;  %p14339_p3 = scmp.lt.u32.totalorder %s15440_s11, %s18305_s9 }
 0x1ad   : > { %p14340_p10 = scmp.lt.u32.totalorder %s14338_s3, %s14334_s30  ;;  %p14342_p12 = scmp.lt.u32.totalorder %s14334_s30, %s15440_s11 }
 0x1ae   : > { %p14336_p1 = pnand %p14335_p7, %p18306_p11 }
 0x1af   : > { %p14341_p13 = por %p14340_p10, %p14339_p3 }
 0x1b0   : > { %p14337_p8 = pneg %p14336_p1 }
 0x1b1   : > { %p14343_p0 = por %p14342_p12, %p14341_p13 }
 0x1b3   : > { %p14344_p5 = pnand %p14343_p0, %p14337_p8 }
 0x1b5   : > { %14347 = shalt.err (!%p14344_p5)
}
 0x1b6   : > { %s14348_s26 = scalar_lea.vmem %s15435_s5, 18432  ;;  %s14832_s25 = smov [#allocation28]  }
 0x1b7   : > { %p14349_p2 = scmp.ne.s32.totalorder %s15435_s5, %s14348_s26  ;;  %s14352_s2 = sshll.u32 %s14832_s25, 4  ;;  %s14353_s2 = int_to_ptr.vmem [resolvable:$false] %s14352_s2 }
 0x1b8   : > { %s14354_s21 = scalar_lea.vmem %s14353_s2, 36864  ;;  %p14355_p7 = scmp.lt.s32.totalorder %s15435_s5, %s14353_s2 }
 0x1b9   : > { %p14350_p4 = pnand %p14349_p2, %p18306_p11  ;;  %p14356_p1 = scmp.lt.s32.totalorder %s14354_s21, %s14348_s26 }
 0x1bb   : > { %p14351_p6 = pneg %p14350_p4  ;;  %p14357_p3 = por %p14356_p1, %p14355_p7 }
 0x1bd   : > { %p14358_p10 = pnand %p14357_p3, %p14351_p6 }
 0x1bf   : > { %14361 = shalt.err (!%p14358_p10)
}
 0x1c0   : > { %s14833_s8 = smov 768   ;;  %s14834_s12 = smov 384  }
 0x1c1   : > { %s14835_s15 = smov 24   ;;  %s12978_s30 = smul.u32 288, %s14802_s6 }
 0x1c2   : > { %12909 = dma.hbm_to_vmem [thread:$0]  (%p18306_p11), %s15440_s11, 18432, %s15435_s5, %s18236_s10, %s14833_s8, %s14834_s12, %s14835_s15  }
 0x1c3   : > { %s1013_s0 = scalar_lea.vmem [#allocation31], %s15427_s4  ;;  %s1020_s26 = sadd.s32 %s12978_s30, %s12869_s14 }
 0x1c4   : > { %s1023_s3 = sshll.u32 %s1013_s0, 4  ;;  %s10966_s25 = sshll.u32 %s1020_s26, 6  ;;  %s15468_s3 = int_to_ptr.vmem [resolvable:$true] %s1023_s3 }
 0x1c5   : > { %s18307_s9 = sld [smem:[#allocation86_spill]]  ;;  %s18308_s22 = sld [smem:[#allocation84_spill]] }
 0x1c6   : > { %s1056_s11 = scalar_lea.vmem [#allocation34], %s15256_s28  ;;  %s18235_s5 = scalar_lea.sflag [#allocation32], %s15239_s20 }
 0x1c7   : > { %s15484_s4 = sshll.u32 %s1056_s11, 4  ;;  %s1065_s4 = int_to_ptr.vmem [resolvable:$true] %s15484_s4 }
 0x1cb   : > { %s15476_s13 = scalar_lea.hbm %s18307_s9, %s15367_s18  ;;  %s15481_s29 = scalar_lea.hbm %s18308_s22, %s10966_s25 }
 0x1cc   : > { %s14362_s14 = scalar_lea.hbm %s15481_s29, 18432  ;;  %s14366_s15 = scalar_lea.hbm %s18308_s22, 73728 }
 0x1cd   : > { %p14363_p8 = scmp.ne.s32.totalorder %s15481_s29, %s14362_s14  ;;  %p14367_p0 = scmp.lt.u32.totalorder %s15481_s29, %s18308_s22 }
 0x1ce   : > { %p14368_p5 = scmp.lt.u32.totalorder %s14366_s15, %s14362_s14  ;;  %p14370_p4 = scmp.lt.u32.totalorder %s14362_s14, %s15481_s29 }
 0x1cf   : > { %p14364_p13 = pnand %p14363_p8, %p18306_p11 }
 0x1d0   : > { %p14369_p2 = por %p14368_p5, %p14367_p0 }
 0x1d1   : > { %p14365_p12 = pneg %p14364_p13 }
 0x1d2   : > { %p14371_p6 = por %p14370_p4, %p14369_p2 }
 0x1d4   : > { %p14372_p7 = pnand %p14371_p6, %p14365_p12 }
 0x1d6   : > { %14375 = shalt.err (!%p14372_p7)
}
 0x1d7   : > { %s14376_s30 = scalar_lea.vmem %s15468_s3, 18432  ;;  %s14836_s0 = smov [#allocation31]  }
 0x1d8   : > { %p14377_p1 = scmp.ne.s32.totalorder %s15468_s3, %s14376_s30  ;;  %s14380_s26 = sshll.u32 %s14836_s0, 4  ;;  %s14381_s26 = int_to_ptr.vmem [resolvable:$false] %s14380_s26 }
 0x1d9   : > { %s14382_s25 = scalar_lea.vmem %s14381_s26, 36864  ;;  %p14383_p8 = scmp.lt.s32.totalorder %s15468_s3, %s14381_s26 }
 0x1da   : > { %p14378_p3 = pnand %p14377_p1, %p18306_p11  ;;  %p14384_p13 = scmp.lt.s32.totalorder %s14382_s25, %s14376_s30 }
 0x1dc   : > { %p14379_p10 = pneg %p14378_p3  ;;  %p14385_p0 = por %p14384_p13, %p14383_p8 }
 0x1de   : > { %p14386_p5 = pnand %p14385_p0, %p14379_p10 }
 0x1e0   : > { %14389 = shalt.err (!%p14386_p5)
}
 0x1e1   : > { %s18309_s2 = smov 12   ;;  %s18310_s21 = smov 192  }
 0x1e2   : > { %12911 = dma.hbm_to_vmem [thread:$0]  (%p18306_p11), %s15481_s29, 18432, %s15468_s3, %s18235_s5, %s18310_s21, %s18310_s21, %s18309_s2  }
 0x1e3   : > { %s18234_s11 = scalar_lea.sflag [#allocation35], %s15239_s20  ;;  %s14390_s14 = scalar_lea.hbm %s15476_s13, 48 }
 0x1e4   : > { %p14391_p12 = scmp.ne.s32.totalorder %s15476_s13, %s14390_s14  ;;  %s14394_s15 = scalar_lea.hbm %s18307_s9, 96 }
 0x1e5   : > { %p14395_p6 = scmp.lt.u32.totalorder %s15476_s13, %s18307_s9  ;;  %p14396_p7 = scmp.lt.u32.totalorder %s14394_s15, %s14390_s14 }
 0x1e6   : > { %p14392_p2 = pnand %p14391_p12, %p18298_p9  ;;  %p14398_p3 = scmp.lt.u32.totalorder %s14390_s14, %s15476_s13 }
 0x1e7   : > { %p14397_p1 = por %p14396_p7, %p14395_p6 }
 0x1e8   : > { %p14393_p4 = pneg %p14392_p2 }
 0x1e9   : > { %p14399_p10 = por %p14398_p3, %p14397_p1 }
 0x1eb   : > { %p14400_p8 = pnand %p14399_p10, %p14393_p4 }
 0x1ed   : > { %14403 = shalt.err (!%p14400_p8)
}
 0x1ee   : > { %s14404_s29 = scalar_lea.vmem %s1065_s4, 48  ;;  %s14837_s3 = smov [#allocation34]  }
 0x1ef   : > { %p14405_p13 = scmp.ne.s32.totalorder %s1065_s4, %s14404_s29  ;;  %s14408_s30 = sshll.u32 %s14837_s3, 4  ;;  %s14409_s30 = int_to_ptr.vmem [resolvable:$false] %s14408_s30 }
 0x1f0   : > { %s14410_s0 = scalar_lea.vmem %s14409_s30, 96  ;;  %p14411_p12 = scmp.lt.s32.totalorder %s1065_s4, %s14409_s30 }
 0x1f1   : > { %p14406_p0 = pnand %p14405_p13, %p18298_p9  ;;  %p14412_p2 = scmp.lt.s32.totalorder %s14410_s0, %s14404_s29 }
 0x1f3   : > { %p14407_p5 = pneg %p14406_p0  ;;  %p14413_p11 = por %p14412_p2, %p14411_p12 }
 0x1f5   : > { %p14414_p6 = pnand %p14413_p11, %p14407_p5 }
 0x1f7   : > { %14417 = shalt.err (!%p14414_p6)
}
 0x1f8   : > { %12913 = dma.hbm_to_vmem [thread:$0]  (%p18298_p9), %s15476_s13, 48, %s1065_s4, %s18234_s11  }
 0x1f9   : > { %s18311_s2 = sld [smem:[#allocation73_spill]]  ;;  %s792_s8 = scalar_lea.vmem [#allocation15], %s15256_s28 }
 0x1fa   : > { %s800_s12 = sshll.u32 %s792_s8, 4  ;;  %s801_s12 = int_to_ptr.vmem [resolvable:$true] %s800_s12 }
 0x1ff   : > { %s18312_s21 = smov %s18311_s2  ;;  %s15538_s14 = scalar_lea.hbm %s18311_s2, %s15367_s18 }
 0x200   : > { %s14418_s15 = scalar_lea.hbm %s15538_s14, 48  ;;  %s14422_s13 = scalar_lea.hbm %s18312_s21, 96 }
 0x201   : > { %p14419_p11 = scmp.ne.s32.totalorder %s15538_s14, %s14418_s15  ;;  %p14423_p1 = scmp.lt.u32.totalorder %s15538_s14, %s18312_s21 }
 0x202   : > { %p14424_p3 = scmp.lt.u32.totalorder %s14422_s13, %s14418_s15  ;;  %p14426_p8 = scmp.lt.u32.totalorder %s14418_s15, %s15538_s14 }
 0x203   : > { %p14420_p4 = pnand %p14419_p11, %p18298_p9 }
 0x204   : > { %p14425_p10 = por %p14424_p3, %p14423_p1 }
 0x205   : > { %p14421_p7 = pneg %p14420_p4 }
 0x206   : > { %p14427_p13 = por %p14426_p8, %p14425_p10 }
 0x208   : > { %p14428_p0 = pnand %p14427_p13, %p14421_p7 }
 0x20a   : > { %14431 = shalt.err (!%p14428_p0)
}
 0x20b   : > { %s14432_s3 = scalar_lea.vmem %s801_s12, 48  ;;  %s14838_s30 = smov [#allocation15]  }
 0x20c   : > { %p14433_p5 = scmp.ne.s32.totalorder %s801_s12, %s14432_s3  ;;  %s14436_s0 = sshll.u32 %s14838_s30, 4  ;;  %s14437_s0 = int_to_ptr.vmem [resolvable:$false] %s14436_s0 }
 0x20d   : > { %s14438_s26 = scalar_lea.vmem %s14437_s0, 96  ;;  %p14439_p6 = scmp.lt.s32.totalorder %s801_s12, %s14437_s0 }
 0x20e   : > { %p14434_p12 = pnand %p14433_p5, %p18298_p9  ;;  %p14440_p11 = scmp.lt.s32.totalorder %s14438_s26, %s14432_s3 }
 0x210   : > { %p14435_p2 = pneg %p14434_p12  ;;  %p14441_p4 = por %p14440_p11, %p14439_p6 }
 0x212   : > { %p14442_p1 = pnand %p14441_p4, %p14435_p2 }
 0x214   : > { %14445 = shalt.err (!%p14442_p1)
}
 0x215   : > { %s18313_s25 = scalar_lea.sflag [#allocation14], %s15239_s20  ;;  %s18314_s15 = sld [smem:[#allocation75_spill]] }
 0x216   : > { %12900 = dma.hbm_to_vmem [thread:$0]  (%p18298_p9), %s15538_s14, 48, %s801_s12, %s18313_s25  }
 0x217   : > { %s832_s17 = scalar_lea.vmem [#allocation18], %s15256_s28 }
 0x218   : > { %s840_s13 = sshll.u32 %s832_s17, 4  ;;  %s841_s13 = int_to_ptr.vmem [resolvable:$true] %s840_s13 }
 0x21b   : > { %s15564_s19 = scalar_lea.hbm %s18314_s15, %s15367_s18  ;;  %s14450_s14 = scalar_lea.hbm %s18314_s15, 96 }
 0x21c   : > { %s14446_s4 = scalar_lea.hbm %s15564_s19, 48  ;;  %p14451_p8 = scmp.lt.u32.totalorder %s15564_s19, %s18314_s15 }
 0x21d   : > { %p14447_p7 = scmp.ne.s32.totalorder %s15564_s19, %s14446_s4  ;;  %p14452_p13 = scmp.lt.u32.totalorder %s14450_s14, %s14446_s4 }
 0x21e   : > { %p14454_p5 = scmp.lt.u32.totalorder %s14446_s4, %s15564_s19 }
 0x21f   : > { %p14448_p3 = pnand %p14447_p7, %p18298_p9  ;;  %p14453_p0 = por %p14452_p13, %p14451_p8 }
 0x221   : > { %p14449_p10 = pneg %p14448_p3  ;;  %p14455_p12 = por %p14454_p5, %p14453_p0 }
 0x223   : > { %p14456_p2 = pnand %p14455_p12, %p14449_p10 }
 0x225   : > { %14459 = shalt.err (!%p14456_p2)
}
 0x226   : > { %s14460_s0 = scalar_lea.vmem %s841_s13, 48  ;;  %s14839_s26 = smov [#allocation18]  }
 0x227   : > { %p14461_p6 = scmp.ne.s32.totalorder %s841_s13, %s14460_s0  ;;  %s14464_s25 = sshll.u32 %s14839_s26, 4  ;;  %s14465_s25 = int_to_ptr.vmem [resolvable:$false] %s14464_s25 }
 0x228   : > { %s14466_s2 = scalar_lea.vmem %s14465_s25, 96  ;;  %p14467_p1 = scmp.lt.s32.totalorder %s841_s13, %s14465_s25 }
 0x229   : > { %p14462_p11 = pnand %p14461_p6, %p18298_p9  ;;  %p14468_p7 = scmp.lt.s32.totalorder %s14466_s2, %s14460_s0 }
 0x22b   : > { %p14463_p4 = pneg %p14462_p11  ;;  %p14469_p3 = por %p14468_p7, %p14467_p1 }
 0x22d   : > { %p14470_p8 = pnand %p14469_p3, %p14463_p4 }
 0x22f   : > { %14473 = shalt.err (!%p14470_p8)
}
 0x230   : > { %s18315_s8 = scalar_lea.sflag [#allocation17], %s15239_s20  ;;  %s18316_s29 = sld [smem:[#allocation77_spill]] }
 0x231   : > { %12902 = dma.hbm_to_vmem [thread:$0]  (%p18298_p9), %s15564_s19, 48, %s841_s13, %s18315_s8  }
 0x232   : > { %s872_s14 = scalar_lea.vmem [#allocation21], %s15256_s28 }
 0x233   : > { %s880_s12 = sshll.u32 %s872_s14, 4  ;;  %s881_s12 = int_to_ptr.vmem [resolvable:$true] %s880_s12 }
 0x236   : > { %s15590_s3 = scalar_lea.hbm %s18316_s29, %s15367_s18  ;;  %s14478_s19 = scalar_lea.hbm %s18316_s29, 96 }
 0x237   : > { %s14474_s30 = scalar_lea.hbm %s15590_s3, 48  ;;  %p14479_p5 = scmp.lt.u32.totalorder %s15590_s3, %s18316_s29 }
 0x238   : > { %p14475_p10 = scmp.ne.s32.totalorder %s15590_s3, %s14474_s30  ;;  %p14480_p12 = scmp.lt.u32.totalorder %s14478_s19, %s14474_s30 }
 0x239   : > { %p14482_p6 = scmp.lt.u32.totalorder %s14474_s30, %s15590_s3 }
 0x23a   : > { %p14476_p13 = pnand %p14475_p10, %p18298_p9  ;;  %p14481_p2 = por %p14480_p12, %p14479_p5 }
 0x23c   : > { %p14477_p0 = pneg %p14476_p13  ;;  %p14483_p11 = por %p14482_p6, %p14481_p2 }
 0x23e   : > { %p14484_p4 = pnand %p14483_p11, %p14477_p0 }
 0x240   : > { %14487 = shalt.err (!%p14484_p4)
}
 0x241   : > { %s14488_s2 = scalar_lea.vmem %s881_s12, 48  ;;  %s14840_s8 = smov [#allocation21]  }
 0x242   : > { %p14489_p1 = scmp.ne.s32.totalorder %s881_s12, %s14488_s2  ;;  %s14492_s17 = sshll.u32 %s14840_s8, 4  ;;  %s14493_s17 = int_to_ptr.vmem [resolvable:$false] %s14492_s17 }
 0x243   : > { %s14494_s4 = scalar_lea.vmem %s14493_s17, 96  ;;  %p14495_p8 = scmp.lt.s32.totalorder %s881_s12, %s14493_s17 }
 0x244   : > { %p14490_p7 = pnand %p14489_p1, %p18298_p9  ;;  %p14496_p10 = scmp.lt.s32.totalorder %s14494_s4, %s14488_s2 }
 0x246   : > { %p14491_p3 = pneg %p14490_p7  ;;  %p14497_p13 = por %p14496_p10, %p14495_p8 }
 0x248   : > { %p14498_p5 = pnand %p14497_p13, %p14491_p3 }
 0x24a   : > { %14501 = shalt.err (!%p14498_p5)
}
 0x24b   : > { %s18317_s14 = scalar_lea.sflag [#allocation20], %s15239_s20  ;;  %s18318_s26 = sld [smem:[#allocation79_spill]] }
 0x24c   : > { %12904 = dma.hbm_to_vmem [thread:$0]  (%p18298_p9), %s15590_s3, 48, %s881_s12, %s18317_s14  }
 0x24d   : > { %s912_s25 = scalar_lea.vmem [#allocation24], %s15256_s28 }
 0x24e   : > { %s920_s2 = sshll.u32 %s912_s25, 4  ;;  %s921_s2 = int_to_ptr.vmem [resolvable:$true] %s920_s2 }
 0x251   : > { %s18319_s19 = smov %s18318_s26  ;;  %s15616_s13 = scalar_lea.hbm %s18318_s26, %s15367_s18 }
 0x252   : > { %s14502_s8 = scalar_lea.hbm %s15616_s13, 48  ;;  %s14506_s3 = scalar_lea.hbm %s18319_s19, 96 }
 0x253   : > { %p14503_p0 = scmp.ne.s32.totalorder %s15616_s13, %s14502_s8  ;;  %p14507_p6 = scmp.lt.u32.totalorder %s15616_s13, %s18319_s19 }
 0x254   : > { %p14508_p11 = scmp.lt.u32.totalorder %s14506_s3, %s14502_s8  ;;  %p14510_p1 = scmp.lt.u32.totalorder %s14502_s8, %s15616_s13 }
 0x255   : > { %p14504_p12 = pnand %p14503_p0, %p18298_p9 }
 0x256   : > { %p14509_p4 = por %p14508_p11, %p14507_p6 }
 0x257   : > { %p14505_p2 = pneg %p14504_p12 }
 0x258   : > { %p14511_p7 = por %p14510_p1, %p14509_p4 }
 0x25a   : > { %p14512_p3 = pnand %p14511_p7, %p14505_p2 }
 0x25c   : > { %14515 = shalt.err (!%p14512_p3)
}
 0x25d   : > { %s14516_s30 = scalar_lea.vmem %s921_s2, 48  ;;  %s14841_s0 = smov [#allocation24]  }
 0x25e   : > { %p14517_p8 = scmp.ne.s32.totalorder %s921_s2, %s14516_s30  ;;  %s14520_s26 = sshll.u32 %s14841_s0, 4  ;;  %s14521_s26 = int_to_ptr.vmem [resolvable:$false] %s14520_s26 }
 0x25f   : > { %s14522_s25 = scalar_lea.vmem %s14521_s26, 96  ;;  %p14523_p5 = scmp.lt.s32.totalorder %s921_s2, %s14521_s26 }
 0x260   : > { %p14518_p10 = pnand %p14517_p8, %p18298_p9  ;;  %p14524_p0 = scmp.lt.s32.totalorder %s14522_s25, %s14516_s30 }
 0x262   : > { %p14519_p13 = pneg %p14518_p10  ;;  %p14525_p12 = por %p14524_p0, %p14523_p5 }
 0x264   : > { %p14526_p6 = pnand %p14525_p12, %p14519_p13 }
 0x266   : > { %14529 = shalt.err (!%p14526_p6)
}
 0x267   : > { %s18320_s8 = scalar_lea.sflag [#allocation23], %s15239_s20  ;;  %s18321_s3 = sld [smem:[#allocation81_spill]] }
 0x268   : > { %12906 = dma.hbm_to_vmem [thread:$0]  (%p18298_p9), %s15616_s13, 48, %s921_s2, %s18320_s8  }
 0x269   : > { %s950_s14 = scalar_lea.vmem [#allocation27], %s15256_s28  ;;  %s18322_s0 = sand.u32 1, %s14778_s24  }
 0x26a   : > { %s958_s30 = sshll.u32 %s950_s14, 4  ;;  %s15647_s26 = smul.u32 6, %s18322_s0  ;;  %s959_s30 = int_to_ptr.vmem [resolvable:$true] %s958_s30 }
 0x26d   : > { %s15642_s12 = scalar_lea.hbm %s18321_s3, %s15367_s18  ;;  %s14534_s8 = scalar_lea.hbm %s18321_s3, 96 }
 0x26e   : > { %s14530_s25 = scalar_lea.hbm %s15642_s12, 48  ;;  %p14535_p1 = scmp.lt.u32.totalorder %s15642_s12, %s18321_s3 }
 0x26f   : > { %p14531_p2 = scmp.ne.s32.totalorder %s15642_s12, %s14530_s25  ;;  %p14536_p7 = scmp.lt.u32.totalorder %s14534_s8, %s14530_s25 }
 0x270   : > { %p14538_p8 = scmp.lt.u32.totalorder %s14530_s25, %s15642_s12 }
 0x271   : > { %p14532_p11 = pnand %p14531_p2, %p18298_p9  ;;  %p14537_p3 = por %p14536_p7, %p14535_p1 }
 0x273   : > { %p14533_p4 = pneg %p14532_p11  ;;  %p14539_p10 = por %p14538_p8, %p14537_p3 }
 0x275   : > { %p14540_p13 = pnand %p14539_p10, %p14533_p4 }
 0x277   : > { %14543 = shalt.err (!%p14540_p13)
}
 0x278   : > { %s14544_s14 = scalar_lea.vmem %s959_s30, 48  ;;  %s14842_s0 = smov [#allocation27]  }
 0x279   : > { %p14545_p5 = scmp.ne.s32.totalorder %s959_s30, %s14544_s14  ;;  %s14548_s11 = sshll.u32 %s14842_s0, 4  ;;  %s14549_s11 = int_to_ptr.vmem [resolvable:$false] %s14548_s11 }
 0x27a   : > { %s14550_s13 = scalar_lea.vmem %s14549_s11, 96  ;;  %p14551_p6 = scmp.lt.s32.totalorder %s959_s30, %s14549_s11 }
 0x27b   : > { %p14546_p0 = pnand %p14545_p5, %p18298_p9  ;;  %p14552_p2 = scmp.lt.s32.totalorder %s14550_s13, %s14544_s14 }
 0x27d   : > { %p14547_p12 = pneg %p14546_p0  ;;  %p14553_p11 = por %p14552_p2, %p14551_p6 }
 0x27f   : > { %p14554_p1 = pnand %p14553_p11, %p14547_p12 }
 0x281   : > { %14557 = shalt.err (!%p14554_p1)
}
 0x282   : > { %s18323_s25 = scalar_lea.sflag [#allocation26], %s15239_s20  ;;  %s12871_s2 = smul.u32 12, %s14806_s27 }
 0x283   : > { %12908 = dma.hbm_to_vmem [thread:$0]  (%p18298_p9), %s15642_s12, 48, %s959_s30, %s18323_s25  }
 0x284   : > { %s992_s8 = scalar_lea.vmem [#allocation30], %s15647_s26  ;;  %s18324_s11 = smul.u32 6, %s14802_s6 }
 0x285   : > { %s1002_s17 = sshll.u32 %s992_s8, 4  ;;  %s18325_s5 = sld [smem:[#allocation85_spill]]  ;;  %s15672_s17 = int_to_ptr.vmem [resolvable:$true] %s1002_s17 }
 0x286   : > { %s998_s4 = sadd.s32 %s12871_s2, %s18324_s11  ;;  %s18327_s19 = sld [smem:[#allocation83_spill]] }
 0x287   : > { %s10965_s14 = sshll.u32 %s998_s4, 4  ;;  %s1037_s12 = scalar_lea.vmem [#allocation33], %s15256_s28 }
 0x288   : > { %s1045_s30 = sshll.u32 %s1037_s12, 4  ;;  %p18328_p7 = scmp.ne.s32.totalorder %s18279_s16, 0  ;;  %s1046_s30 = int_to_ptr.vmem [resolvable:$true] %s1045_s30 }
 0x28b   : > { %s18326_s10 = smov %s18325_s5  ;;  %s15678_s3 = scalar_lea.hbm %s18325_s5, %s15367_s18 }
 0x28c   : > { %s15683_s21 = scalar_lea.hbm %s18327_s19, %s10965_s14  ;;  %s14562_s5 = scalar_lea.hbm %s18327_s19, 384 }
 0x28d   : > { %s14558_s26 = scalar_lea.hbm %s15683_s21, 96  ;;  %p14563_p10 = scmp.lt.u32.totalorder %s15683_s21, %s18327_s19 }
 0x28e   : > { %p14559_p4 = scmp.ne.s32.totalorder %s15683_s21, %s14558_s26  ;;  %p14564_p13 = scmp.lt.u32.totalorder %s14562_s5, %s14558_s26 }
 0x28f   : > { %p14566_p0 = scmp.lt.u32.totalorder %s14558_s26, %s15683_s21 }
 0x290   : > { %p14560_p3 = pnand %p14559_p4, %p18328_p7  ;;  %p14565_p5 = por %p14564_p13, %p14563_p10 }
 0x292   : > { %p14561_p8 = pneg %p14560_p3  ;;  %p14567_p12 = por %p14566_p0, %p14565_p5 }
 0x294   : > { %p14568_p6 = pnand %p14567_p12, %p14561_p8 }
 0x296   : > { %14571 = shalt.err (!%p14568_p6)
}
 0x297   : > { %s14572_s9 = scalar_lea.vmem %s15672_s17, 96  ;;  %s14843_s15 = smov [#allocation30]  }
 0x298   : > { %p14573_p2 = scmp.ne.s32.totalorder %s15672_s17, %s14572_s9  ;;  %s14576_s4 = sshll.u32 %s14843_s15, 4  ;;  %s14577_s4 = int_to_ptr.vmem [resolvable:$false] %s14576_s4 }
 0x299   : > { %s14578_s14 = scalar_lea.vmem %s14577_s4, 192  ;;  %p14579_p4 = scmp.lt.s32.totalorder %s15672_s17, %s14577_s4 }
 0x29a   : > { %p14574_p11 = pnand %p14573_p2, %p18328_p7  ;;  %p14580_p3 = scmp.lt.s32.totalorder %s14578_s14, %s14572_s9 }
 0x29c   : > { %p14575_p1 = pneg %p14574_p11  ;;  %p14581_p10 = por %p14580_p3, %p14579_p4 }
 0x29e   : > { %p14582_p13 = pnand %p14581_p10, %p14575_p1 }
 0x2a0   : > { %14585 = shalt.err (!%p14582_p13)
}
 0x2a1   : > { %s18329_s0 = scalar_lea.sflag [#allocation29], %s15239_s20  ;;  %s14586_s13 = scalar_lea.hbm %s15678_s3, 48 }
 0x2a2   : > { %12910 = dma.hbm_to_vmem [thread:$0]  (%p18328_p7), %s15683_s21, 96, %s15672_s17, %s18329_s0  }
 0x2a3   : > { %p14587_p8 = scmp.ne.s32.totalorder %s15678_s3, %s14586_s13  ;;  %s14590_s16 = scalar_lea.hbm %s18326_s10, 96 }
 0x2a4   : > { %p14591_p12 = scmp.lt.u32.totalorder %s15678_s3, %s18326_s10  ;;  %p14592_p6 = scmp.lt.u32.totalorder %s14590_s16, %s14586_s13 }
 0x2a5   : > { %p14588_p5 = pnand %p14587_p8, %p18298_p9  ;;  %p14594_p11 = scmp.lt.u32.totalorder %s14586_s13, %s15678_s3 }
 0x2a6   : > { %p14593_p2 = por %p14592_p6, %p14591_p12 }
 0x2a7   : > { %p14589_p0 = pneg %p14588_p5 }
 0x2a8   : > { %p14595_p1 = por %p14594_p11, %p14593_p2 }
 0x2aa   : > { %p14596_p4 = pnand %p14595_p1, %p14589_p0 }
 0x2ac   : > { %14599 = shalt.err (!%p14596_p4)
}
 0x2ad   : > { %s14600_s21 = scalar_lea.vmem %s1046_s30, 48  ;;  %s14844_s17 = smov [#allocation33]  }
 0x2ae   : > { %p14601_p7 = scmp.ne.s32.totalorder %s1046_s30, %s14600_s21  ;;  %s14604_s5 = sshll.u32 %s14844_s17, 4  ;;  %s14605_s5 = int_to_ptr.vmem [resolvable:$false] %s14604_s5 }
 0x2af   : > { %s14606_s8 = scalar_lea.vmem %s14605_s5, 96  ;;  %p14607_p13 = scmp.lt.s32.totalorder %s1046_s30, %s14605_s5 }
 0x2b0   : > { %p14602_p3 = pnand %p14601_p7, %p18298_p9  ;;  %p14608_p8 = scmp.lt.s32.totalorder %s14606_s8, %s14600_s21 }
 0x2b2   : > { %p14603_p10 = pneg %p14602_p3  ;;  %p14609_p5 = por %p14608_p8, %p14607_p13 }
 0x2b4   : > { %p14610_p6 = pnand %p14609_p5, %p14603_p10 }
 0x2b6   : > { %14613 = shalt.err (!%p14610_p6)
}
 0x2b7   : > { %s18330_s11 = scalar_lea.sflag [#allocation32], %s15239_s20  ;;  %s18331_s4 = sld [smem:[#allocation87_spill]] }
 0x2b8   : > { %12912 = dma.hbm_to_vmem [thread:$0]  (%p18298_p9), %s15678_s3, 48, %s1046_s30, %s18330_s11  }
 0x2b9   : > { %s1075_s13 = scalar_lea.vmem [#allocation36], %s15256_s28 }
 0x2ba   : > { %s1083_s12 = sshll.u32 %s1075_s13, 4  ;;  %s1084_s12 = int_to_ptr.vmem [resolvable:$true] %s1083_s12 }
 0x2bd   : > { %s18332_s14 = smov %s18331_s4  ;;  %s15732_s0 = scalar_lea.hbm %s18331_s4, %s15367_s18 }
 0x2be   : > { %s14614_s26 = scalar_lea.hbm %s15732_s0, 48  ;;  %s14618_s3 = scalar_lea.hbm %s18332_s14, 96 }
 0x2bf   : > { %p14615_p0 = scmp.ne.s32.totalorder %s15732_s0, %s14614_s26  ;;  %p14619_p11 = scmp.lt.u32.totalorder %s15732_s0, %s18332_s14 }
 0x2c0   : > { %p14620_p1 = scmp.lt.u32.totalorder %s14618_s3, %s14614_s26  ;;  %p14622_p7 = scmp.lt.u32.totalorder %s14614_s26, %s15732_s0 }
 0x2c1   : > { %p14616_p12 = pnand %p14615_p0, %p18298_p9 }
 0x2c2   : > { %p14621_p4 = por %p14620_p1, %p14619_p11 }
 0x2c3   : > { %p14617_p2 = pneg %p14616_p12 }
 0x2c4   : > { %p14623_p3 = por %p14622_p7, %p14621_p4 }
 0x2c6   : > { %p14624_p10 = pnand %p14623_p3, %p14617_p2 }
 0x2c8   : > { %14627 = shalt.err (!%p14624_p10)
}
 0x2c9   : > { %s14628_s28 = scalar_lea.vmem %s1084_s12, 48  ;;  %s14845_s18 = smov [#allocation36]  }
 0x2ca   : > { %p14629_p13 = scmp.ne.s32.totalorder %s1084_s12, %s14628_s28  ;;  %s14632_s21 = sshll.u32 %s14845_s18, 4  ;;  %s14633_s21 = int_to_ptr.vmem [resolvable:$false] %s14632_s21 }
 0x2cb   : > { %s14634_s17 = scalar_lea.vmem %s14633_s21, 96  ;;  %p14635_p6 = scmp.lt.s32.totalorder %s1084_s12, %s14633_s21 }
 0x2cc   : > { %p14630_p8 = pnand %p14629_p13, %p18298_p9  ;;  %p14636_p0 = scmp.lt.s32.totalorder %s14634_s17, %s14628_s28 }
 0x2ce   : > { %p14631_p5 = pneg %p14630_p8  ;;  %p14637_p12 = por %p14636_p0, %p14635_p6 }
 0x2d0   : > { %p14638_p1 = pnand %p14637_p12, %p14631_p5 }
 0x2d2   : > { %14641 = shalt.err (!%p14638_p1)
}
 0x2d3   : > { %s18333_s5 = scalar_lea.sflag [#allocation35], %s15239_s20 }
 0x2d4   : > { %12914 = dma.hbm_to_vmem [thread:$0]  (%p18298_p9), %s15732_s0, 48, %s1084_s12, %s18333_s5  }
 0x2d5 PF: > { %s18334_s8 = sld [smem:[#allocation66_spill]] }
 0x2db   : > { %p18335_p2 = scmp.ne.s32.totalorder %s18334_s8, 0 }
 0x2dc   : > { %s18336_s11 = sld [smem:[#allocation59_spill]] (!%p18335_p2) }
 0x2dd   : > { %1092 = sbr.rel (%p18335_p2) target bundleno = 9121 (0x23a1), region = 112 }
 0x2e2   : > { %p18337_p11 = scmp.eq.s32.totalorder (!%p18335_p2), %s18336_s11, 0 }
 0x2e4   : > { %14713 = dma.done.wait (%p18337_p11), [#allocation5], 256   ;;  %p18338_p4 = pmov %p18337_p11 }
 0x2e6   : > { %14715 = vsyncadd (%p18338_p4), [#allocation5], 4294967040  ;;  %p18339_p7 = pmov %p18338_p4 }
 0x2e7   : > { %p18340_p3 = pmov %p18338_p4 }
 0x2e8   : > { %14717 = dma.done.wait (%p18339_p7), [#allocation8], 1024  }
 0x2e9   : > { %14719 = vsyncadd (%p18340_p3), [#allocation8], 4294966272  ;;  %p18341_p10 = pmov %p18340_p3 }
 0x2ea   : > { %p18342_p9 = pmov %p18340_p3 }
 0x2eb   : > { %14721 = dma.done.wait (%p18341_p10), [#allocation11], 816  }
 0x2ec   : > { %14723 = vsyncadd (%p18342_p9), [#allocation11], 4294966480  ;;  %s18343_s23 = sld [smem:[#allocation56_spill]]  ;;  %s15769_s9 = sand.u32 1, %s18336_s11  }
 0x2ed   : > { %s18344_s20 = sld [smem:[#allocation62_spill]]  ;;  %s1115_s0 = scalar_lea.sflag [#allocation14], %s15769_s9 }
 0x2f2   : > { %s1116_s15 = sand.u32 1, %s18343_s23  }
 0x2f3   : > { %s12881_s4 = smul.u32 576, %s1116_s15  ;;  %p18345_p13 = scmp.ne.s32.totalorder %s18344_s20, 0 }
 0x2f5   : > { %s15773_s13 = scalar_lea.vmem [#allocation13], %s12881_s4 }
 0x2f6   : > { %14725 = dma.done.wait (%p18345_p13), %s1115_s0, 9264  }
 0x2f7   : > { %14727 = vsyncadd (%p18345_p13), %s1115_s0, 4294958032  ;;  %s15779_s12 = smul.u32 3, %s1116_s15  ;;  %s1133_s16 = scalar_lea.sflag [#allocation17], %s15769_s9 }
 0x2f8   : > { %s15785_s25 = scalar_lea.vmem [#allocation16], %s12881_s4 }
 0x2f9   : > { %s15782_s26 = scalar_lea.vmem [#allocation15], %s15779_s12 }
 0x2fa   : > { %14729 = dma.done.wait (%p18345_p13), %s1133_s16, 9264  }
 0x2fb   : > { %14731 = vsyncadd (%p18345_p13), %s1133_s16, 4294958032  ;;  %s15792_s3 = scalar_lea.vmem [#allocation18], %s15779_s12  ;;  %s1151_s30 = scalar_lea.sflag [#allocation20], %s15769_s9 }
 0x2fc   : > { %s15795_s2 = scalar_lea.vmem [#allocation19], %s12881_s4 }
 0x2fd   : > { %14733 = dma.done.wait (%p18345_p13), %s1151_s30, 9264  }
 0x2fe   : > { %14735 = vsyncadd (%p18345_p13), %s1151_s30, 4294958032  ;;  %s15802_s28 = scalar_lea.vmem [#allocation21], %s15779_s12  ;;  %s1169_s18 = scalar_lea.sflag [#allocation23], %s15769_s9 }
 0x2ff   : > { %s15805_s21 = scalar_lea.vmem [#allocation22], %s12881_s4 }
 0x300   : > { %14737 = dma.done.wait (%p18345_p13), %s1169_s18, 9264  }
 0x301   : > { %14739 = vsyncadd (%p18345_p13), %s1169_s18, 4294958032  ;;  %s1187_s5 = scalar_lea.sflag [#allocation26], %s15769_s9 }
 0x302   : > { %14741 = dma.done.wait (%p18345_p13), %s1187_s5, 96  }
 0x303   : > { %14743 = vsyncadd (%p18345_p13), %s1187_s5, 4294967200  ;;  %s18346_s23 = sld [smem:[#allocation55_spill]]  ;;  %s18347_s15 = sld [smem:[#allocation65_spill]] }
 0x304   : > { %s1199_s16 = scalar_lea.vmem [#allocation27], %s15779_s12  ;;  %s1205_s30 = scalar_lea.sflag [#allocation29], %s15769_s9 }
 0x309   : > { %s1206_s4 = sand.u32 1, %s18346_s23   ;;  %p18348_p8 = scmp.ne.s32.totalorder %s18347_s15, 0 }
 0x30a   : > { %s12883_s0 = smul.u32 1152, %s1206_s4 }
 0x30c   : > { %s15821_s18 = scalar_lea.vmem [#allocation28], %s12883_s0 }
 0x30d   : > { %14745 = dma.done.wait (%p18348_p8), %s1205_s30, 18528  }
 0x30e   : > { %14747 = vsyncadd (%p18348_p8), %s1205_s30, 4294948768  ;;  %s15827_s8 = smul.u32 6, %s1206_s4  ;;  %s1223_s17 = scalar_lea.sflag [#allocation32], %s15769_s9 }
 0x30f   : > { %s15831_s10 = scalar_lea.vmem [#allocation31], %s12883_s0 }
 0x310   : > { %s1217_s5 = scalar_lea.vmem [#allocation30], %s15827_s8 }
 0x311   : > { %14749 = dma.done.wait (%p18348_p8), %s1223_s17, 18432  }
 0x312   : > { %14751 = vsyncadd (%p18348_p8), %s1223_s17, 4294948864  ;;  %s1235_s23 = scalar_lea.vmem [#allocation33], %s15779_s12 }
 0x313   : > { %14753 = dma.done.wait (%p18345_p13), %s1223_s17, 48  }
 0x314   : > { %14755 = vsyncadd (%p18345_p13), %s1223_s17, 4294967248  ;;  %s1241_s4 = scalar_lea.sflag [#allocation35], %s15769_s9  ;;  %s1244_s30 = scalar_lea.vmem [#allocation34], %s15779_s12 }
 0x315   : > { %14757 = dma.done.wait (%p18345_p13), %s1241_s4, 96  }
 0x316   : > { %14759 = vsyncadd (%p18345_p13), %s1241_s4, 4294967200  ;;  %s1253_s15 = scalar_lea.vmem [#allocation36], %s15779_s12  ;;  %p18349_p5 = pmov %p18340_p3 }
 0x317   : > { %p18350_p6 = pmov %p18340_p3 }
 0x318   : > { %14761 = dma.done.wait (%p18349_p5), [#allocation38], 96  }
 0x319   : > { %14763 = vsyncadd (%p18350_p6), [#allocation38], 4294967200  ;;  %s18351_s0 = sld [smem:[#allocation58_spill]]  ;;  %s18352_s17 = sld [smem:[#allocation57_spill]] }
 0x31f   : > { %p1398_p0 = scmp.eq.s32.totalorder %s18351_s0, 0  ;;  %p1399_p12 = scmp.eq.s32.totalorder %s18352_s17, 0 }
 0x321   : > { %p1400_p1 = pnand %p1399_p12, %p1398_p0 }
 0x322   : > { %v13104_v0 = vld [vmem:[#allocation10 + $0x4] ss:$12 sps:$4 sm:$0xff] (!%p1400_p1)   ;;  %v14846_v1 = vmov (!%p1400_p1), 0.0   ;;  %v13106_v2 = vld [vmem:[#allocation10 + $0x8] ss:$12 sps:$4 sm:$0xff] (!%p1400_p1)   ;;  %vm14847_vm0 = vmmov (!%p1400_p1), 0   ;;  %v1417_v11 = vlaneseq (!%p1400_p1) }
 0x323   : > { %1403 = sbr.rel (%p1400_p1) target bundleno = 1032 (0x408), region = 208  ;;  %12284 = vmatprep.subr.bf16.mxu1 (!%p1400_p1), %v14846_v1  ;;  %12288 = vmatprep.mubr.msk.bf16.mxu1 (!%p1400_p1), %vm14847_vm0, %v14846_v1  ;;  %v13107_v3 = vld [vmem:[#allocation10] ss:$12 sps:$4 sm:$0xff] (!%p1400_p1)   ;;  %v13108_v4 = vld [vmem:[#allocation10 + $0x1c] ss:$12 sps:$4 sm:$0xff] (!%p1400_p1)   ;;  %v14848_v5 = vmov (!%p1400_p1), 0  }
 0x324   : > { %1468 = vmatprep.subr.bf16.mxu0 (!%p1400_p1), %v13104_v0  ;;  %12285 = vmatpush3.bf16.msra.mxu1 (!%p1400_p1), %v13106_v2  ;;  %v13110_v6 = vld [vmem:[#allocation10 + $0x20] ss:$12 sps:$4 sm:$0xff] (!%p1400_p1)   ;;  %v13111_v7 = vld [vmem:[#allocation10 + $0x18] ss:$12 sps:$4 sm:$0xff] (!%p1400_p1)   ;;  %v1404_v8 = vld [vmem:[#allocation4] sm:$0xff] (!%p1400_p1)  ;;  %vm1464_vm1 = vcmask (!%p1400_p1), 261120  }
 0x325   : > { %1500 = vmatprep.mubr.bf16.mxu0 (!%p1400_p1), %v14848_v5  ;;  %1469 = vmatpush1.bf16.msra.mxu0 (!%p1400_p1), %v13107_v3  ;;  %v1405_v9 = vld [vmem:[#allocation4 + $0x8] sm:$0xff] (!%p1400_p1)  ;;  %v1418_v12 = vshrl.u32 (!%p1400_p1), %v1417_v11, 7  ;;  %v1415_v14 = vld [vmem:[#allocation12] sm:$0x7] (!%p1400_p1)  ;;  %v1552_v24 = vld [vmem:[#allocation7] sm:$0xff] (!%p1400_p1) }
 0x326   : > { %12286 = vmatprep.subr.bf16.mxu1 (!%p1400_p1), %v14846_v1  ;;  %1470 = vmatprep.subr.bf16.mxu0 (!%p1400_p1), %v13108_v4  ;;  %v1406_v10 = vpack.c.bf16 (!%p1400_p1), %v1405_v9, %v1404_v8  ;;  %v1554_v21 = vld [vmem:[#allocation7 + $0x10] sm:$0xff] (!%p1400_p1)  ;;  %v1553_v28 = vld [vmem:[#allocation7 + $0x8] sm:$0xff] (!%p1400_p1)  ;;  %v1555_v35 = vld [vmem:[#allocation7 + $0x18] sm:$0xff] (!%p1400_p1) }
 0x327   : > { %v1427_v13 = vsub.s32 (!%p1400_p1), 2, %v1418_v12  ;;  %v1419_v15 = vsub.s32 (!%p1400_p1), 0, %v1418_v12  ;;  %v1423_v16 = vsub.s32 (!%p1400_p1), 1, %v1418_v12  ;;  %v1557_v30 = vld [vmem:[#allocation7 + $0x28] sm:$0xff] (!%p1400_p1)  ;;  %v1556_v40 = vld [vmem:[#allocation7 + $0x20] sm:$0xff] (!%p1400_p1) }
 0x328   : > { %12287 = vmatpush3.bf16.msra.mxu1 (!%p1400_p1), %v13110_v6 }
 0x329   : > { %1471 = vmatpush1.bf16.msra.mxu0 (!%p1400_p1), %v13111_v7  ;;  %v1428_v17 = vrot.slane (!%p1400_p1), %v1415_v14, %v1427_v13  ;;  %v1420_v18 = vrot.slane (!%p1400_p1), %v1415_v14, %v1419_v15  ;;  %v1424_v19 = vrot.slane (!%p1400_p1), %v1415_v14, %v1423_v16 }
 0x32b   : > { %12289 = vmatmul.mubr.msk.bf16.vlgmr.msra.gmra.mrb[0].mxu1 %vm1464_vm1, %v1406_v10 }
 0x32c   : > { %10984 = vmatmul.mubr.msk.bf16.vlgmr.msra.gmra.mrb[0].mxu0 %vm1464_vm1, %v1406_v10 }
 0x3fe   : > { %v1545_v20 = vpop.f32.mrb[0].mxu1 }
 0x3ff   : > { %v1546_v22 = vadd.f32 %v1545_v20, %v1428_v17  ;;  %v1502_v23 = vpop.f32.mrb[0].mxu0  ;;  %v12290_v25 = vpop.f32.mrb[1].mxu1 }
 0x400   : > { %v1503_v26 = vadd.f32 %v1502_v23, %v1420_v18  ;;  %v1504_v27 = vpop.f32.mrb[1].mxu0  ;;  %v1548_v29 = vpop.f32.mrb[2].mxu1 }
 0x401   : > { %v1560_v31 = vadd.f32 %v1554_v21, %v1546_v22  ;;  %v1505_v32 = vadd.f32 %v1504_v27, %v1424_v19  ;;  %v1549_v33 = vadd.f32 %v1548_v29, %v1428_v17  ;;  %v1506_v34 = vpop.f32.mrb[2].mxu0  ;;  %v12291_v36 = vpop.f32.mrb[3].mxu1 }
 0x402   : > { %v1558_v37 = vadd.f32 %v1552_v24, %v1503_v26  ;;  %v1507_v38 = vadd.f32 %v1506_v34, %v1420_v18  ;;  %v1508_v39 = vpop.f32.mrb[3].mxu0 }
 0x403   : > { %1566 = vst [vmem:[#allocation2 + $0x10] sm:$0xff] %v1560_v31  ;;  %v1559_v41 = vadd.f32 %v1553_v28, %v1505_v32  ;;  %v1563_v42 = vadd.f32 %v1557_v30, %v1549_v33  ;;  %v1509_v43 = vadd.f32 %v1508_v39, %v1424_v19 }
 0x404   : > { %1564 = vst [vmem:[#allocation2] sm:$0xff] %v1558_v37  ;;  %v1561_v44 = vadd.f32 %v1555_v35, %v1507_v38 }
 0x405   : > { %1565 = vst [vmem:[#allocation2 + $0x8] sm:$0xff] %v1559_v41  ;;  %1569 = vst [vmem:[#allocation2 + $0x28] sm:$0xff] %v1563_v42  ;;  %v1562_v45 = vadd.f32 %v1556_v40, %v1509_v43 }
 0x406   : > { %1567 = vst [vmem:[#allocation2 + $0x18] sm:$0xff] %v1561_v44 }
 0x407   : > { %1568 = vst [vmem:[#allocation2 + $0x20] sm:$0xff] %v1562_v45 }
 0x408 PF: > { %s18353_s11 = sld [smem:[#allocation57_spill]] }
 0x40e   : > { %p10986_p2 = scmp.ne.s32.totalorder %s18353_s11, 0 }
 0x40f   : > { %v13112_v46 = vld [vmem:[%s15773_s13 + $0xc0] ss:$12 sps:$4 sm:$0xff] (!%p10986_p2)   ;;  %v18243_v48 = vmov (!%p10986_p2), 0.0   ;;  %v13115_v50 = vld [vmem:[%s15773_s13 + $0xd8] ss:$12 sps:$4 sm:$0xff] (!%p10986_p2)   ;;  %vm14850_vm2 = vmmov (!%p10986_p2), 0  }
 0x410   : > { %1572 = sbr.rel (%p10986_p2) target bundleno = 7659 (0x1deb), region = 212  ;;  %v13113_v47 = vld [vmem:[%s15773_s13] ss:$12 sps:$4 sm:$0xff] (!%p10986_p2)   ;;  %11606 = vmatprep.subr.bf16.mxu0 (!%p10986_p2), %v13112_v46  ;;  %12292 = vmatprep.subr.bf16.mxu1 (!%p10986_p2), %v18243_v48  ;;  %v13116_v51 = vld [vmem:[%s15773_s13 + $0x18] ss:$12 sps:$4 sm:$0xff] (!%p10986_p2)   ;;  %vm2445_vm3 = vcmask (!%p10986_p2), 523264  }
 0x411   : > { %11607 = vmatpush3.bf16.msra.mxu0 (!%p10986_p2), %v13113_v47  ;;  %v13114_v49 = vld [vmem:[%s15773_s13 + $0x180] ss:$12 sps:$4 sm:$0xff] (!%p10986_p2)   ;;  %v13117_v52 = vld [vmem:[%s15773_s13 + $0x198] ss:$12 sps:$4 sm:$0xff] (!%p10986_p2)   ;;  %v13118_v53 = vld [vmem:[%s15773_s13 + $0xf0] ss:$12 sps:$4 sm:$0xff] (!%p10986_p2)   ;;  %12308 = vmatprep.mubr.msk.bf16.mxu1 (!%p10986_p2), %vm14850_vm2, %v18243_v48 }
 0x412   : > { %12293 = vmatpush3.bf16.msra.mxu1 (!%p10986_p2), %v13114_v49  ;;  %11608 = vmatprep.subr.bf16.mxu0 (!%p10986_p2), %v13115_v50  ;;  %v13119_v54 = vld [vmem:[%s15773_s13 + $0x30] ss:$12 sps:$4 sm:$0xff] (!%p10986_p2)   ;;  %v13121_v56 = vld [vmem:[%s15773_s13 + $0x108] ss:$12 sps:$4 sm:$0xff] (!%p10986_p2)   ;;  %v13124_v59 = vld [vmem:[%s15773_s13 + $0x120] ss:$12 sps:$4 sm:$0xff] (!%p10986_p2)  }
 0x413   : > { %12294 = vmatprep.subr.bf16.mxu1 (!%p10986_p2), %v18243_v48  ;;  %v13120_v55 = vld [vmem:[%s15773_s13 + $0x1b0] ss:$12 sps:$4 sm:$0xff] (!%p10986_p2)   ;;  %v13122_v57 = vld [vmem:[%s15773_s13 + $0x48] ss:$12 sps:$4 sm:$0xff] (!%p10986_p2)   ;;  %v13125_v60 = vld [vmem:[%s15773_s13 + $0x60] ss:$12 sps:$4 sm:$0xff] (!%p10986_p2)  }
 0x414   : > { %v13123_v58 = vld [vmem:[%s15773_s13 + $0x1c8] ss:$12 sps:$4 sm:$0xff] (!%p10986_p2)   ;;  %v13127_v61 = vld [vmem:[%s15773_s13 + $0x138] ss:$12 sps:$4 sm:$0xff] (!%p10986_p2)   ;;  %v13126_v62 = vld [vmem:[%s15773_s13 + $0x1e0] ss:$12 sps:$4 sm:$0xff] (!%p10986_p2)  }
 0x415   : > { %11609 = vmatpush3.bf16.msra.mxu0 (!%p10986_p2), %v13116_v51  ;;  %v13128_v63 = vld [vmem:[%s15773_s13 + $0x78] ss:$12 sps:$4 sm:$0xff] (!%p10986_p2)   ;;  %v13130_v1 = vld [vmem:[%s15773_s13 + $0x150] ss:$12 sps:$4 sm:$0xff] (!%p10986_p2)   ;;  %v13133_v5 = vld [vmem:[%s15773_s13 + $0x168] ss:$12 sps:$4 sm:$0xff] (!%p10986_p2)  }
 0x416   : > { %12295 = vmatpush3.bf16.msra.mxu1 (!%p10986_p2), %v13117_v52  ;;  %11610 = vmatprep.subr.bf16.mxu0 (!%p10986_p2), %v13118_v53  ;;  %v1574_v0 = vld [vmem:[#allocation2 + $0x8] sm:$0xff] (!%p10986_p2)  ;;  %v13131_v3 = vld [vmem:[%s15773_s13 + $0x90] ss:$12 sps:$4 sm:$0xff] (!%p10986_p2)   ;;  %v1576_v11 = vld [vmem:[#allocation2 + $0x18] sm:$0xff] (!%p10986_p2)  ;;  %s14851_s20 = smov (!%p10986_p2), 64   ;;  %vm2497_vm4 = vcmask (!%p10986_p2), 130048  }
 0x417   : > { %12296 = vmatprep.subr.bf16.mxu1 %v18243_v48  ;;  %v13129_v2 = vld [vmem:[%s15773_s13 + $0x1f8] ss:$12 sps:$4 sm:$0xff]   ;;  %v1577_v4 = vld [vmem:[#allocation2 + $0x20] sm:$0xff]  ;;  %v13134_v8 = vld [vmem:[%s15773_s13 + $0xa8] ss:$12 sps:$4 sm:$0xff]   ;;  %s18355_s9 = scalar_lea.vmem [#allocation24], %s15779_s12 }
 0x418   : > { %v15885_v6 = vpack.c.bf16 %v1577_v4, %v1574_v0  ;;  %v13132_v7 = vld [vmem:[%s15773_s13 + $0x210] ss:$12 sps:$4 sm:$0xff]   ;;  %v13135_v9 = vld [vmem:[%s15773_s13 + $0x228] ss:$12 sps:$4 sm:$0xff]   ;;  %v15943_v40 = vld [vmem:[%s15795_s2 + $0xc0] ss:$12 sps:$4 sm:$0xff]  }
 0x419   : > { %11611 = vmatpush3.bf16.msra.mxu0 %v13119_v54  ;;  %v1573_v10 = vld [vmem:[#allocation2] sm:$0xff]  ;;  %v13136_v12 = vld [vmem:[%s15785_s25 + $0xc0] ss:$12 sps:$4 sm:$0xff]   ;;  %v15946_v41 = vld [vmem:[%s15795_s2] ss:$12 sps:$4 sm:$0xff]  }
 0x41a   : > { %11612 = vmatprep.subr.bf16.mxu0 %v13121_v56  ;;  %12297 = vmatpush3.bf16.msra.mxu1 %v13120_v55  ;;  %v1575_v13 = vld [vmem:[#allocation2 + $0x10] sm:$0xff]  ;;  %v1578_v14 = vld [vmem:[#allocation2 + $0x28] sm:$0xff]  ;;  %v15896_v15 = vpack.c.bf16 %v1576_v11, %v1573_v10  ;;  %v15974_v49 = vld [vmem:[%s15795_s2 + $0x108] ss:$12 sps:$4 sm:$0xff]  }
 0x41b   : > { %12298 = vmatprep.subr.bf16.mxu1 %v18243_v48  ;;  %1929 = vmatprep.mubr.bf16.mxu0 %v15885_v6  ;;  %v13137_v16 = vld [vmem:[%s15785_s25] ss:$12 sps:$4 sm:$0xff]   ;;  %v15899_v17 = vpack.c.bf16 %v1578_v14, %v1575_v13  ;;  %v13139_v18 = vld [vmem:[%s15785_s25 + $0xd8] ss:$12 sps:$4 sm:$0xff]   ;;  %v13142_v21 = vld [vmem:[%s15785_s25 + $0xf0] ss:$12 sps:$4 sm:$0xff]  }
 0x41c   : > { %v13138_v19 = vld [vmem:[%s15785_s25 + $0x180] ss:$12 sps:$4 sm:$0xff]   ;;  %v13140_v20 = vld [vmem:[%s15785_s25 + $0x18] ss:$12 sps:$4 sm:$0xff]   ;;  %v13143_v23 = vld [vmem:[%s15785_s25 + $0x30] ss:$12 sps:$4 sm:$0xff]  }
 0x41d   : > { %11613 = vmatpush3.bf16.msra.mxu0 %v13122_v57  ;;  %v13141_v22 = vld [vmem:[%s15785_s25 + $0x198] ss:$12 sps:$4 sm:$0xff]   ;;  %v13145_v24 = vld [vmem:[%s15785_s25 + $0x108] ss:$12 sps:$4 sm:$0xff]   ;;  %v13144_v25 = vld [vmem:[%s15785_s25 + $0x1b0] ss:$12 sps:$4 sm:$0xff]  }
 0x41e   : > { %11614 = vmatprep.subr.bf16.mxu0 %v13124_v59  ;;  %12299 = vmatpush3.bf16.msra.mxu1 %v13123_v58  ;;  %v13146_v26 = vld [vmem:[%s15785_s25 + $0x48] ss:$12 sps:$4 sm:$0xff]   ;;  %v13148_v27 = vld [vmem:[%s15785_s25 + $0x120] ss:$12 sps:$4 sm:$0xff]   ;;  %v13151_v31 = vld [vmem:[%s15785_s25 + $0x138] ss:$12 sps:$4 sm:$0xff]  }
 0x41f   : > { %12300 = vmatprep.subr.bf16.mxu1 %v18243_v48  ;;  %v13147_v28 = vld [vmem:[%s15785_s25 + $0x1c8] ss:$12 sps:$4 sm:$0xff]   ;;  %v13149_v29 = vld [vmem:[%s15785_s25 + $0x60] ss:$12 sps:$4 sm:$0xff]   ;;  %v13152_v32 = vld [vmem:[%s15785_s25 + $0x78] ss:$12 sps:$4 sm:$0xff]  }
 0x420   : > { %v13150_v30 = vld [vmem:[%s15785_s25 + $0x1e0] ss:$12 sps:$4 sm:$0xff]   ;;  %v13154_v33 = vld [vmem:[%s15785_s25 + $0x150] ss:$12 sps:$4 sm:$0xff]   ;;  %v13153_v34 = vld [vmem:[%s15785_s25 + $0x1f8] ss:$12 sps:$4 sm:$0xff]  }
 0x421   : > { %11615 = vmatpush3.bf16.msra.mxu0 %v13125_v60  ;;  %v13155_v35 = vld [vmem:[%s15785_s25 + $0x90] ss:$12 sps:$4 sm:$0xff]   ;;  %v13157_v36 = vld [vmem:[%s15785_s25 + $0x168] ss:$12 sps:$4 sm:$0xff]  }
 0x422   : > { %11616 = vmatprep.subr.bf16.mxu0 %v13127_v61  ;;  %12301 = vmatpush3.bf16.msra.mxu1 %v13126_v62  ;;  %v13156_v37 = vld [vmem:[%s15785_s25 + $0x210] ss:$12 sps:$4 sm:$0xff]   ;;  %v13158_v38 = vld [vmem:[%s15785_s25 + $0xa8] ss:$12 sps:$4 sm:$0xff]  }
 0x423   : > { %12302 = vmatprep.subr.bf16.mxu1 %v18243_v48  ;;  %v13159_v39 = vld [vmem:[%s15785_s25 + $0x228] ss:$12 sps:$4 sm:$0xff]   ;;  %v15977_v50 = vld [vmem:[%s15795_s2 + $0x48] ss:$12 sps:$4 sm:$0xff]  }
 0x424   : > { %v15951_v42 = vld [vmem:[%s15795_s2 + $0xd8] ss:$12 sps:$4 sm:$0xff]   ;;  %v15957_v44 = vld [vmem:[%s15795_s2 + $0xf0] ss:$12 sps:$4 sm:$0xff]   ;;  %v15960_v45 = vld [vmem:[%s15795_s2 + $0x180] ss:$12 sps:$4 sm:$0xff]  }
 0x425   : > { %11617 = vmatpush3.bf16.msra.mxu0 %v13128_v63  ;;  %v15954_v43 = vld [vmem:[%s15795_s2 + $0x18] ss:$12 sps:$4 sm:$0xff]   ;;  %v15966_v46 = vld [vmem:[%s15795_s2 + $0x30] ss:$12 sps:$4 sm:$0xff]   ;;  %v15983_v52 = vld [vmem:[%s15795_s2 + $0x120] ss:$12 sps:$4 sm:$0xff]  }
 0x426   : > { %11618 = vmatprep.subr.bf16.mxu0 %v13130_v1  ;;  %12303 = vmatpush3.bf16.msra.mxu1 %v13129_v2  ;;  %v15969_v47 = vld [vmem:[%s15795_s2 + $0x198] ss:$12 sps:$4 sm:$0xff]   ;;  %v15980_v51 = vld [vmem:[%s15795_s2 + $0x1b0] ss:$12 sps:$4 sm:$0xff]   ;;  %v15990_v53 = vld [vmem:[%s15795_s2 + $0x60] ss:$12 sps:$4 sm:$0xff]  }
 0x427   : > { %12304 = vmatprep.subr.bf16.mxu1 %v18243_v48  ;;  %v15993_v54 = vld [vmem:[%s15795_s2 + $0x1c8] ss:$12 sps:$4 sm:$0xff]   ;;  %v15996_v55 = vld [vmem:[%s15795_s2 + $0x138] ss:$12 sps:$4 sm:$0xff]   ;;  %v16006_v57 = vld [vmem:[%s15795_s2 + $0x1e0] ss:$12 sps:$4 sm:$0xff]  }
 0x428   : > { %v16003_v56 = vld [vmem:[%s15795_s2 + $0x78] ss:$12 sps:$4 sm:$0xff]   ;;  %v16009_v58 = vld [vmem:[%s15795_s2 + $0x150] ss:$12 sps:$4 sm:$0xff]   ;;  %v16024_v60 = vld [vmem:[%s15795_s2 + $0x168] ss:$12 sps:$4 sm:$0xff]  }
 0x429   : > { %11619 = vmatpush3.bf16.msra.mxu0 %v13131_v3  ;;  %v16020_v59 = vld [vmem:[%s15795_s2 + $0x90] ss:$12 sps:$4 sm:$0xff]   ;;  %v16027_v61 = vld [vmem:[%s15795_s2 + $0x1f8] ss:$12 sps:$4 sm:$0xff]   ;;  %v16030_v62 = vld [vmem:[%s15795_s2 + $0xa8] ss:$12 sps:$4 sm:$0xff]  }
 0x42a   : > { %11620 = vmatprep.subr.bf16.mxu0 %v13133_v5  ;;  %12305 = vmatpush3.bf16.msra.mxu1 %v13132_v7  ;;  %v16037_v63 = vld [vmem:[%s15795_s2 + $0x210] ss:$12 sps:$4 sm:$0xff]   ;;  %v16046_v0 = vld [vmem:[%s15795_s2 + $0x228] ss:$12 sps:$4 sm:$0xff]  }
 0x42b   : > { %12306 = vmatprep.subr.bf16.mxu1 %v18243_v48  ;;  %v16054_v3 = vld [vmem:[%s15782_s26] ss:$0 sm:$0xff] }
 0x42d   : > { %11621 = vmatpush3.bf16.msra.mxu0 %v13134_v8 }
 0x42e   : > { %11637 = vmatprep.subr.bf16.mxu0 %v13136_v12  ;;  %12307 = vmatpush3.bf16.msra.mxu1 %v13135_v9 }
 0x42f   : > { %12312 = vmatprep.subr.bf16.mxu1 %v18243_v48 }
 0x430   : > { %1930 = vmatmul.mubr.bf16.vlgmr.msra.gmra.mrb[0].mxu0 %v15896_v15 }
 0x431   : > { %11638 = vmatpush3.bf16.msra.mxu0 %v13137_v16  ;;  %2161 = vmatprep.mubr.bf16.mxu0 %v15885_v6 }
 0x432   : > { %12309 = vmatmul.mubr.bf16.vlgmr.msra.gmra.mrb[0].mxu1 %v15899_v17  ;;  %11639 = vmatprep.subr.bf16.mxu0 %v13139_v18 }
 0x433   : > { %12313 = vmatpush3.bf16.msra.mxu1 %v13138_v19  ;;  %12328 = vmatprep.mubr.msk.bf16.mxu1 %vm14850_vm2, %v18243_v48 }
 0x434   : > { %12314 = vmatprep.subr.bf16.mxu1 %v18243_v48 }
 0x435   : > { %11640 = vmatpush3.bf16.msra.mxu0 %v13140_v20 }
 0x436   : > { %11641 = vmatprep.subr.bf16.mxu0 %v13142_v21 }
 0x437   : > { %12315 = vmatpush3.bf16.msra.mxu1 %v13141_v22  ;;  %v16059_v22 = vld [vmem:[%s15792_s3] ss:$0 sm:$0xff] }
 0x438   : > { %12316 = vmatprep.subr.bf16.mxu1 %v18243_v48 }
 0x439   : > { %11642 = vmatpush3.bf16.msra.mxu0 %v13143_v23 }
 0x43a   : > { %11643 = vmatprep.subr.bf16.mxu0 %v13145_v24 }
 0x43b   : > { %12317 = vmatpush3.bf16.msra.mxu1 %v13144_v25 }
 0x43c   : > { %12318 = vmatprep.subr.bf16.mxu1 %v18243_v48 }
 0x43d   : > { %11644 = vmatpush3.bf16.msra.mxu0 %v13146_v26 }
 0x43e   : > { %11645 = vmatprep.subr.bf16.mxu0 %v13148_v27 }
 0x43f   : > { %12319 = vmatpush3.bf16.msra.mxu1 %v13147_v28 }
 0x440   : > { %12320 = vmatprep.subr.bf16.mxu1 %v18243_v48 }
 0x441   : > { %11646 = vmatpush3.bf16.msra.mxu0 %v13149_v29 }
 0x442   : > { %11647 = vmatprep.subr.bf16.mxu0 %v13151_v31 }
 0x443   : > { %12321 = vmatpush3.bf16.msra.mxu1 %v13150_v30 }
 0x444   : > { %12322 = vmatprep.subr.bf16.mxu1 %v18243_v48 }
 0x445   : > { %11648 = vmatpush3.bf16.msra.mxu0 %v13152_v32 }
 0x446   : > { %11649 = vmatprep.subr.bf16.mxu0 %v13154_v33 }
 0x447   : > { %12323 = vmatpush3.bf16.msra.mxu1 %v13153_v34 }
 0x448   : > { %12324 = vmatprep.subr.bf16.mxu1 %v18243_v48 }
 0x449   : > { %11650 = vmatpush3.bf16.msra.mxu0 %v13155_v35 }
 0x44a   : > { %11651 = vmatprep.subr.bf16.mxu0 %v13157_v36 }
 0x44b   : > { %12325 = vmatpush3.bf16.msra.mxu1 %v13156_v37 }
 0x44c   : > { %12326 = vmatprep.subr.bf16.mxu1 %v18243_v48 }
 0x44d   : > { %11652 = vmatpush3.bf16.msra.mxu0 %v13158_v38 }
 0x44e   : > { %11668 = vmatprep.subr.bf16.mxu0 %v15943_v40 }
 0x44f   : > { %12327 = vmatpush3.bf16.msra.mxu1 %v13159_v39  ;;  %v16067_v39 = vld [vmem:[%s15802_s28] ss:$0 sm:$0xff] }
 0x450   : > { %2162 = vmatmul.mubr.bf16.vlgmr.msra.gmra.mrb[4].mxu0 %v15896_v15  ;;  %12332 = vmatprep.subr.bf16.mxu1 %v18243_v48 }
 0x451   : > { %2393 = vmatprep.mubr.bf16.mxu0 %v15885_v6  ;;  %11669 = vmatpush3.bf16.msra.mxu0 %v15946_v41 }
 0x452   : > { %12329 = vmatmul.mubr.bf16.vlgmr.msra.gmra.mrb[4].mxu1 %v15899_v17  ;;  %11670 = vmatprep.subr.bf16.mxu0 %v15951_v42 }
 0x453   : > { %12348 = vmatprep.mubr.msk.bf16.mxu1 %vm14850_vm2, %v18243_v48  ;;  %12333 = vmatpush3.bf16.msra.mxu1 %v15960_v45 }
 0x454   : > { %12334 = vmatprep.subr.bf16.mxu1 %v18243_v48 }
 0x455   : > { %11671 = vmatpush3.bf16.msra.mxu0 %v15954_v43 }
 0x456   : > { %11672 = vmatprep.subr.bf16.mxu0 %v15957_v44 }
 0x457   : > { %12335 = vmatpush3.bf16.msra.mxu1 %v15969_v47 }
 0x458   : > { %12336 = vmatprep.subr.bf16.mxu1 %v18243_v48 }
 0x459   : > { %11673 = vmatpush3.bf16.msra.mxu0 %v15966_v46 }
 0x45a   : > { %11674 = vmatprep.subr.bf16.mxu0 %v15974_v49 }
 0x45b   : > { %12337 = vmatpush3.bf16.msra.mxu1 %v15980_v51 }
 0x45c   : > { %12338 = vmatprep.subr.bf16.mxu1 %v18243_v48 }
 0x45d   : > { %11675 = vmatpush3.bf16.msra.mxu0 %v15977_v50 }
 0x45e   : > { %11676 = vmatprep.subr.bf16.mxu0 %v15983_v52 }
 0x45f   : > { %12339 = vmatpush3.bf16.msra.mxu1 %v15993_v54 }
 0x460   : > { %12340 = vmatprep.subr.bf16.mxu1 %v18243_v48 }
 0x461   : > { %11677 = vmatpush3.bf16.msra.mxu0 %v15990_v53 }
 0x462   : > { %11678 = vmatprep.subr.bf16.mxu0 %v15996_v55 }
 0x463   : > { %12341 = vmatpush3.bf16.msra.mxu1 %v16006_v57 }
 0x464   : > { %12342 = vmatprep.subr.bf16.mxu1 %v18243_v48 }
 0x465   : > { %11679 = vmatpush3.bf16.msra.mxu0 %v16003_v56 }
 0x466   : > { %11680 = vmatprep.subr.bf16.mxu0 %v16009_v58 }
 0x467   : > { %12343 = vmatpush3.bf16.msra.mxu1 %v16027_v61 }
 0x468   : > { %12344 = vmatprep.subr.bf16.mxu1 %v18243_v48 }
 0x469   : > { %11681 = vmatpush3.bf16.msra.mxu0 %v16020_v59 }
 0x46a   : > { %11682 = vmatprep.subr.bf16.mxu0 %v16024_v60 }
 0x46b   : > { %12345 = vmatpush3.bf16.msra.mxu1 %v16037_v63 }
 0x46c   : > { %12346 = vmatprep.subr.bf16.mxu1 %v18243_v48 }
 0x46d   : > { %11683 = vmatpush3.bf16.msra.mxu0 %v16030_v62 }
 0x46e   : > { %12352 = vmatprep.subr.bf16.mxu0 %v18243_v48 }
 0x46f   : > { %12347 = vmatpush3.bf16.msra.mxu1 %v16046_v0 }
 0x470   : > { %2394 = vmatmul.mubr.bf16.vlgmr.msra.gmra.mrb[8].mxu0 %v15896_v15  ;;  %12358 = vmatprep.subr.bf16.mxu1 %v18243_v48 }
 0x471   : > { %12354 = vmatprep.mubr.msk.bf16.mxu0 %vm14850_vm2, %v18243_v48 }
 0x472   : > { %12349 = vmatmul.mubr.bf16.vlgmr.msra.gmra.mrb[8].mxu1 %v15899_v17 }
 0x473   : > { %12360 = vmatprep.mubr.msk.bf16.mxu1 %vm14850_vm2, %v18243_v48 }
 0x503   : > { %v11622_v1 = vpop.f32.mrb[0].mxu0 }
 0x504   : > { %v11623_v2 = vpop.f32.mrb[1].mxu0 }
 0x505   : > { %v11624_v4 = vadd.f32 %v11623_v2, %v11622_v1  ;;  %v11625_v5 = vpop.f32.mrb[2].mxu0  ;;  %v1972_v7 = vpop.f32.mrb[0].mxu1 }
 0x506   : > { %v11626_v8 = vpop.f32.mrb[3].mxu0  ;;  %v12310_v9 = vpop.f32.mrb[1].mxu1 }
 0x507   : > { %v11627_v10 = vadd.f32 %v11626_v8, %v11625_v5  ;;  %v1932_v11 = vadd.f32 %v11624_v4, %v16054_v3  ;;  %v1975_v12 = vpop.f32.mrb[2].mxu1 }
 0x508   : > { %v12311_v13 = vpop.f32.mrb[3].mxu1 }
 0x509   : > { %v1973_v14 = vadd.f32 %v1972_v7, %v1932_v11  ;;  %v1935_v16 = vadd.f32 %v11627_v10, %v16054_v3 }
 0x50b   : > { %v1976_v18 = vadd.f32 %v1975_v12, %v1935_v16 }
 0x50d   : > { %v2443_v19 = vpack.c.bf16 %v1976_v18, %v1973_v14  ;;  %v13476_v18 = vld [vmem:[%s15773_s13] ss:$12 sps:$4 sm:$0xff]  }
 0x50e   : > { %2583 = vrot.lane.b32.xlu1 %v13476_v18, %s14851_s20  ;;  %v13497_v18 = vld [vmem:[%s15773_s13 + $0x210] ss:$12 sps:$4 sm:$0xff]  }
 0x523   : > { %v11653_v20 = vpop.f32.mrb[4].mxu0 }
 0x524   : > { %v11654_v21 = vpop.f32.mrb[5].mxu0 }
 0x525   : > { %v11655_v23 = vadd.f32 %v11654_v21, %v11653_v20  ;;  %v11656_v24 = vpop.f32.mrb[6].mxu0  ;;  %v2204_v25 = vpop.f32.mrb[4].mxu1  ;;  %v13478_v20 = vld [vmem:[%s15773_s13 + $0x18] ss:$12 sps:$4 sm:$0xff]   ;;  %v13479_v21 = vld [vmem:[%s15773_s13 + $0xf0] ss:$12 sps:$4 sm:$0xff]  }
 0x526   : > { %v11657_v26 = vpop.f32.mrb[7].mxu0  ;;  %v12330_v27 = vpop.f32.mrb[5].mxu1 }
 0x527   : > { %v2164_v28 = vadd.f32 %v11655_v23, %v16059_v22  ;;  %v11658_v29 = vadd.f32 %v11657_v26, %v11656_v24  ;;  %v2207_v30 = vpop.f32.mrb[6].mxu1  ;;  %v13480_v23 = vld [vmem:[%s15773_s13 + $0x198] ss:$12 sps:$4 sm:$0xff]   ;;  %v13481_v24 = vld [vmem:[%s15773_s13 + $0x48] ss:$12 sps:$4 sm:$0xff]  }
 0x528   : > { %v12331_v31 = vpop.f32.mrb[7].mxu1  ;;  %v13483_v26 = vld [vmem:[%s15773_s13 + $0x1c8] ss:$12 sps:$4 sm:$0xff]   ;;  %v13484_v27 = vld [vmem:[%s15773_s13 + $0x78] ss:$12 sps:$4 sm:$0xff]  }
 0x529   : > { %v2205_v32 = vadd.f32 %v2204_v25, %v2164_v28  ;;  %v2167_v33 = vadd.f32 %v11658_v29, %v16059_v22  ;;  %v13482_v25 = vld [vmem:[%s15773_s13 + $0x120] ss:$12 sps:$4 sm:$0xff]   ;;  %v13485_v28 = vld [vmem:[%s15773_s13 + $0x150] ss:$12 sps:$4 sm:$0xff]   ;;  %v13486_v29 = vld [vmem:[%s15773_s13 + $0x1f8] ss:$12 sps:$4 sm:$0xff]  }
 0x52a   : > { %v16094_v31 = vld [vmem:[#allocation9] sm:$0xff] }
 0x52b   : > { %v2208_v34 = vadd.f32 %v2207_v30, %v2167_v33 }
 0x52d   : > { %v2444_v35 = vpack.c.bf16 %v2208_v34, %v2205_v32 }
 0x52f   : > { %v2450_v36 = vsel %vm2445_vm3, %v2444_v35, 0  ;;  %v16096_v35 = vld [vmem:[#allocation9 + $0x8] sm:$0xff] }
 0x530   : > { %12353 = vmatpush3.bf16.xpose.msra.mxu0 %v2450_v36 }
 0x537   : > { %12355 = vmatmul.mubr.msk.bf16.vlgmr.msra.gmra.mrb[12].mxu0 %vm2445_vm3, %v2443_v19  ;;  %v13477_v19 = vld [vmem:[%s15773_s13 + $0xd8] ss:$12 sps:$4 sm:$0xff]  }
 0x538   : > { %2690 = vmatprep.mubr.bf16.mxu0 %v15885_v6  ;;  %2601 = vrot.lane.b32.xlu1 %v13477_v19, %s14851_s20  ;;  %v13498_v19 = vld [vmem:[%s15785_s25] ss:$12 sps:$4 sm:$0xff]  }
 0x53c   : > { %2585 = vrot.lane.b32.xlu1 %v13478_v20, %s14851_s20  ;;  %v13499_v20 = vld [vmem:[%s15785_s25 + $0xd8] ss:$12 sps:$4 sm:$0xff]  }
 0x540   : > { %2603 = vrot.lane.b32.xlu1 %v13479_v21, %s14851_s20  ;;  %v13500_v21 = vld [vmem:[%s15785_s25 + $0x180] ss:$12 sps:$4 sm:$0xff]  }
 0x543   : > { %v11684_v37 = vpop.f32.mrb[8].mxu0 }
 0x544   : > { %v11685_v38 = vpop.f32.mrb[9].mxu0  ;;  %2617 = vrot.lane.b32.xlu1 %v13480_v23, %s14851_s20  ;;  %v13501_v23 = vld [vmem:[%s15785_s25 + $0x30] ss:$12 sps:$4 sm:$0xff]  }
 0x545   : > { %v11686_v1 = vadd.f32 %v11685_v38, %v11684_v37  ;;  %v11687_v2 = vpop.f32.mrb[10].mxu0  ;;  %v2436_v9 = vpop.f32.mrb[8].mxu1 }
 0x546   : > { %v11688_v4 = vpop.f32.mrb[11].mxu0  ;;  %v12350_v11 = vpop.f32.mrb[9].mxu1 }
 0x547   : > { %v11689_v5 = vadd.f32 %v11688_v4, %v11687_v2  ;;  %v2396_v7 = vadd.f32 %v11686_v1, %v16067_v39  ;;  %v2439_v12 = vpop.f32.mrb[10].mxu1  ;;  %v13492_v11 = vld [vmem:[%s15773_s13 + $0x60] ss:$12 sps:$4 sm:$0xff]  }
 0x548   : > { %v12351_v14 = vpop.f32.mrb[11].mxu1  ;;  %2589 = vrot.lane.b32.xlu1 %v13481_v24, %s14851_s20  ;;  %v13502_v24 = vld [vmem:[%s15785_s25 + $0x108] ss:$12 sps:$4 sm:$0xff]  }
 0x549   : > { %v2399_v8 = vadd.f32 %v11689_v5, %v16067_v39  ;;  %v2437_v10 = vadd.f32 %v2436_v9, %v2396_v7  ;;  %v13487_v5 = vld [vmem:[%s15773_s13 + $0xc0] ss:$12 sps:$4 sm:$0xff]   ;;  %v13490_v9 = vld [vmem:[%s15773_s13 + $0x108] ss:$12 sps:$4 sm:$0xff]   ;;  %v13495_v14 = vld [vmem:[%s15773_s13 + $0x90] ss:$12 sps:$4 sm:$0xff]  }
 0x54a   : > { %v13488_v7 = vld [vmem:[%s15773_s13 + $0x180] ss:$12 sps:$4 sm:$0xff]  }
 0x54b   : > { %v2440_v13 = vadd.f32 %v2439_v12, %v2399_v8  ;;  %v13489_v8 = vld [vmem:[%s15773_s13 + $0x30] ss:$12 sps:$4 sm:$0xff]   ;;  %v13493_v12 = vld [vmem:[%s15773_s13 + $0x138] ss:$12 sps:$4 sm:$0xff]  }
 0x54c   : > { %2607 = vrot.lane.b32.xlu1 %v13482_v25, %s14851_s20  ;;  %v13503_v25 = vld [vmem:[%s15785_s25 + $0x1b0] ss:$12 sps:$4 sm:$0xff]  }
 0x54d   : > { %v2521_v16 = vpack.c.bf16 %v2440_v13, %v2437_v10  ;;  %v13491_v10 = vld [vmem:[%s15773_s13 + $0x1b0] ss:$12 sps:$4 sm:$0xff]   ;;  %v13494_v13 = vld [vmem:[%s15773_s13 + $0x1e0] ss:$12 sps:$4 sm:$0xff]  }
 0x54f   : > { %12359 = vmatpush3.bf16.msra.mxu1 %v2521_v16  ;;  %v13496_v16 = vld [vmem:[%s15773_s13 + $0x168] ss:$12 sps:$4 sm:$0xff]  }
 0x550   : > { %12364 = vmatprep.subr.bf16.mxu1 %v18243_v48  ;;  %2621 = vrot.lane.b32.xlu1 %v13483_v26, %s14851_s20  ;;  %v13504_v26 = vld [vmem:[%s15785_s25 + $0x60] ss:$12 sps:$4 sm:$0xff]  }
 0x554   : > { %2593 = vrot.lane.b32.xlu1 %v13484_v27, %s14851_s20  ;;  %v13505_v27 = vld [vmem:[%s15785_s25 + $0x138] ss:$12 sps:$4 sm:$0xff]  }
 0x558   : > { %2611 = vrot.lane.b32.xlu1 %v13485_v28, %s14851_s20  ;;  %v13506_v28 = vld [vmem:[%s15785_s25 + $0x1e0] ss:$12 sps:$4 sm:$0xff]  }
 0x55c   : > { %2625 = vrot.lane.b32.xlu1 %v13486_v29, %s14851_s20  ;;  %v13507_v29 = vld [vmem:[%s15785_s25 + $0x90] ss:$12 sps:$4 sm:$0xff]  }
 0x60a   : > { %v2486_v30 = vpop.f32.mrb[12].mxu0 }
 0x60b   : > { %v2493_v32 = vmul.f32 0.125, %v2486_v30  ;;  %v12356_v33 = vpop.f32.mrb[13].mxu0  ;;  %v13508_v30 = vld [vmem:[%s15785_s25 + $0x168] ss:$12 sps:$4 sm:$0xff]  }
 0x60c   : > { %v2489_v34 = vpop.f32.mrb[14].mxu0  ;;  %v2584_v33 = vpop.permute.xlu1 %2583 }
 0x60d   : > { %v2494_v36 = vmul.f32 0.125, %v2489_v34  ;;  %v12357_v37 = vpop.f32.mrb[15].mxu0  ;;  %v16099_v38 = vadd.f32 %v2493_v32, %v16094_v31  ;;  %v13509_v32 = vld [vmem:[%s15785_s25 + $0x210] ss:$12 sps:$4 sm:$0xff]  }
 0x60f   : > { %v2498_v1 = vsel %vm2497_vm4, %v16099_v38, -inf  ;;  %v16104_v2 = vadd.f32 %v2494_v36, %v16096_v35 }
 0x610   : > { %2499 = vmax.xlane.f32.xlu0 %v2498_v1  ;;  %v2602_v34 = vpop.permute.xlu1 %2601 }
 0x611   : > { %v2501_v4 = vsel %vm2497_vm4, %v16104_v2, -inf }
 0x614   : > { %2502 = vmax.xlane.f32.xlu0 %v2501_v4  ;;  %v2586_v36 = vpop.permute.xlu1 %2585 }
 0x618   : > { %v2604_v37 = vpop.permute.xlu1 %2603 }
 0x62a   : > { %2599 = vrot.lane.b32.xlu0 %v13487_v5, %s14851_s20 }
 0x62e   : > { %2615 = vrot.lane.b32.xlu0 %v13488_v7, %s14851_s20 }
 0x632   : > { %2587 = vrot.lane.b32.xlu0 %v13489_v8, %s14851_s20 }
 0x636   : > { %2605 = vrot.lane.b32.xlu0 %v13490_v9, %s14851_s20 }
 0x63a   : > { %2619 = vrot.lane.b32.xlu0 %v13491_v10, %s14851_s20 }
 0x63e   : > { %2591 = vrot.lane.b32.xlu0 %v13492_v11, %s14851_s20 }
 0x642   : > { %2609 = vrot.lane.b32.xlu0 %v13493_v12, %s14851_s20 }
 0x646   : > { %2623 = vrot.lane.b32.xlu0 %v13494_v13, %s14851_s20 }
 0x64a   : > { %2595 = vrot.lane.b32.xlu0 %v13495_v14, %s14851_s20  ;;  %v13510_v14 = vld [vmem:[%s15773_s13 + $0xa8] ss:$12 sps:$4 sm:$0xff]  }
 0x64e   : > { %2613 = vrot.lane.b32.xlu0 %v13496_v16, %s14851_s20 }
 0x652   : > { %2627 = vrot.lane.b32.xlu0 %v13497_v18, %s14851_s20 }
 0x656   : > { %2740 = vrot.lane.b32.xlu0 %v13498_v19, %s14851_s20  ;;  %v13513_v19 = vld [vmem:[%s15785_s25 + $0x18] ss:$12 sps:$4 sm:$0xff]  }
 0x65a   : > { %2758 = vrot.lane.b32.xlu0 %v13499_v20, %s14851_s20 }
 0x65e   : > { %2772 = vrot.lane.b32.xlu0 %v13500_v21, %s14851_s20  ;;  %v13514_v21 = vld [vmem:[%s15785_s25 + $0xf0] ss:$12 sps:$4 sm:$0xff]  }
 0x662   : > { %2744 = vrot.lane.b32.xlu0 %v13501_v23, %s14851_s20  ;;  %v13515_v23 = vld [vmem:[%s15785_s25 + $0x198] ss:$12 sps:$4 sm:$0xff]  }
 0x666   : > { %2762 = vrot.lane.b32.xlu0 %v13502_v24, %s14851_s20  ;;  %v13516_v24 = vld [vmem:[%s15785_s25 + $0x48] ss:$12 sps:$4 sm:$0xff]  }
 0x66a   : > { %2776 = vrot.lane.b32.xlu0 %v13503_v25, %s14851_s20  ;;  %v13517_v25 = vld [vmem:[%s15785_s25 + $0x120] ss:$12 sps:$4 sm:$0xff]  }
 0x66e   : > { %2748 = vrot.lane.b32.xlu0 %v13504_v26, %s14851_s20  ;;  %v13518_v26 = vld [vmem:[%s15785_s25 + $0x1c8] ss:$12 sps:$4 sm:$0xff]  }
 0x672   : > { %2766 = vrot.lane.b32.xlu0 %v13505_v27, %s14851_s20  ;;  %v13519_v27 = vld [vmem:[%s15785_s25 + $0x78] ss:$12 sps:$4 sm:$0xff]  }
 0x676   : > { %2780 = vrot.lane.b32.xlu0 %v13506_v28, %s14851_s20  ;;  %v13520_v28 = vld [vmem:[%s15785_s25 + $0x150] ss:$12 sps:$4 sm:$0xff]  }
 0x67a   : > { %2752 = vrot.lane.b32.xlu0 %v13507_v29, %s14851_s20  ;;  %v13521_v29 = vld [vmem:[%s15785_s25 + $0x1f8] ss:$12 sps:$4 sm:$0xff]  }
 0x67e   : > { %2770 = vrot.lane.b32.xlu0 %v13508_v30, %s14851_s20  ;;  %v13522_v30 = vld [vmem:[%s15785_s25 + $0xa8] ss:$12 sps:$4 sm:$0xff]  }
 0x682   : > { %2784 = vrot.lane.b32.xlu0 %v13509_v32, %s14851_s20  ;;  %v13523_v32 = vld [vmem:[%s15785_s25 + $0x228] ss:$12 sps:$4 sm:$0xff]  }
 0x686   : > { %2913 = vrot.lane.b32.xlu0 %v15943_v40, %s14851_s20 }
 0x68a   : > { %2915 = vrot.lane.b32.xlu0 %v15951_v42, %s14851_s20  ;;  %v16169_v42 = vpop.permute.xlu1 %2617 }
 0x68e   : > { %2917 = vrot.lane.b32.xlu0 %v15957_v44, %s14851_s20  ;;  %v2590_v7 = vpop.permute.xlu1 %2589 }
 0x692   : > { %2919 = vrot.lane.b32.xlu0 %v15974_v49, %s14851_s20 }
 0x696   : > { %2921 = vrot.lane.b32.xlu0 %v15983_v52, %s14851_s20 }
 0x69a   : > { %2923 = vrot.lane.b32.xlu0 %v15996_v55, %s14851_s20 }
 0x69d   : > { %v2500_v40 = vpop.xlane.xlu0 %2499 }
 0x69e   : > { %v2504_v1 = vsub.f32 %v16099_v38, %v2500_v40  ;;  %2925 = vrot.lane.b32.xlu0 %v16009_v58, %s14851_s20  ;;  %v2608_v58 = vpop.permute.xlu1 %2607 }
 0x6a0   : > { %v2506_v44 = vmul.f32 1.442695, %v2504_v1 }
 0x6a1   : > { %v2503_v4 = vpop.xlane.xlu0 %2502 }
 0x6a2   : > { %13424 = vpow2.f32 %v2506_v44  ;;  %v2505_v49 = vsub.f32 %v16104_v2, %v2503_v4  ;;  %2927 = vrot.lane.b32.xlu0 %v16024_v60, %s14851_s20  ;;  %v16190_v9 = vpop.permute.xlu1 %2621 }
 0x6a4   : > { %v2508_v52 = vmul.f32 1.442695, %v2505_v49 }
 0x6a5   : > { %v2600_v5 = vpop.permute.xlu0 %2599 }
 0x6a6   : > { %13426 = vpow2.f32 %v2508_v52  ;;  %11703 = vmatprep.subr.bf16.mxu0 %v2600_v5  ;;  %2812 = vrot.lane.b32.xlu0 %v16059_v22, %s14851_s20  ;;  %v2594_v10 = vpop.permute.xlu1 %2593 }
 0x6a7   : > { %11704 = vmatpush3.bf16.msra.mxu0 %v2584_v33 }
 0x6a8   : > { %11705 = vmatprep.subr.bf16.mxu0 %v2602_v34 }
 0x6a9   : > { %v16176_v55 = vpop.permute.xlu0 %2615 }
 0x6aa   : > { %2929 = vrot.lane.b32.xlu0 %v15960_v45, %s14851_s20  ;;  %v2612_v13 = vpop.permute.xlu1 %2611 }
 0x6ab   : > { %11706 = vmatpush3.bf16.msra.mxu0 %v2586_v36 }
 0x6ac   : > { %v16180_v38 = vpop.eup %13424  ;;  %11707 = vmatprep.subr.bf16.mxu0 %v2604_v37 }
 0x6ad   : > { %v2510_v60 = vsel %vm2497_vm4, %v16180_v38, 0.0  ;;  %v2588_v2 = vpop.permute.xlu0 %2587 }
 0x6ae   : > { %2511 = vadd.xlane.f32.xlu1 %v2510_v60  ;;  %2933 = vrot.lane.b32.xlu0 %v15980_v51, %s14851_s20 }
 0x6af   : > { %11708 = vmatpush3.bf16.msra.mxu0 %v2588_v2 }
 0x6b0   : > { %v16186_v22 = vpop.eup %13426 }
 0x6b1   : > { %v2513_v8 = vsel %vm2497_vm4, %v16186_v22, 0.0  ;;  %v2606_v45 = vpop.permute.xlu0 %2605 }
 0x6b2   : > { %2514 = vadd.xlane.f32.xlu1 %v2513_v8  ;;  %11709 = vmatprep.subr.bf16.mxu0 %v2606_v45 }
 0x6b3   : > { %11710 = vmatpush3.bf16.msra.mxu0 %v2590_v7  ;;  %2937 = vrot.lane.b32.xlu0 %v16006_v57, %s14851_s20  ;;  %v13511_v57 = vld [vmem:[%s15785_s25 + $0xc0] ss:$12 sps:$4 sm:$0xff]  }
 0x6b4   : > { %11711 = vmatprep.subr.bf16.mxu0 %v2608_v58 }
 0x6b5   : > { %v16194_v51 = vpop.permute.xlu0 %2619 }
 0x6b7   : > { %2941 = vrot.lane.b32.xlu0 %v16037_v63, %s14851_s20  ;;  %v13512_v63 = vld [vmem:[%s15773_s13 + $0x228] ss:$12 sps:$4 sm:$0xff]  }
 0x6b9   : > { %v2592_v11 = vpop.permute.xlu0 %2591 }
 0x6ba   : > { %11712 = vmatpush3.bf16.msra.mxu0 %v2592_v11 }
 0x6bd   : > { %v2610_v12 = vpop.permute.xlu0 %2609 }
 0x6be   : > { %11713 = vmatprep.subr.bf16.mxu0 %v2610_v12 }
 0x6bf   : > { %11714 = vmatpush3.bf16.msra.mxu0 %v2594_v10 }
 0x6c0   : > { %11715 = vmatprep.subr.bf16.mxu0 %v2612_v13 }
 0x6c1   : > { %v16202_v16 = vpop.permute.xlu0 %2623 }
 0x6c3   : > { %2597 = vrot.lane.b32.xlu1 %v13510_v14, %s14851_s20 }
 0x6c5   : > { %v2596_v18 = vpop.permute.xlu0 %2595 }
 0x6c6   : > { %11716 = vmatpush3.bf16.msra.mxu0 %v2596_v18 }
 0x6c7   : > { %2756 = vrot.lane.b32.xlu1 %v13511_v57, %s14851_s20 }
 0x6c9   : > { %v2614_v20 = vpop.permute.xlu0 %2613 }
 0x6ca   : > { %11717 = vmatprep.subr.bf16.mxu0 %v2614_v20 }
 0x6cb   : > { %2629 = vrot.lane.b32.xlu1 %v13512_v63, %s14851_s20 }
 0x6cf   : > { %2742 = vrot.lane.b32.xlu1 %v13513_v19, %s14851_s20 }
 0x6d3   : > { %2760 = vrot.lane.b32.xlu1 %v13514_v21, %s14851_s20 }
 0x6d7   : > { %2774 = vrot.lane.b32.xlu1 %v13515_v23, %s14851_s20 }
 0x6db   : > { %2746 = vrot.lane.b32.xlu1 %v13516_v24, %s14851_s20 }
 0x6df   : > { %2764 = vrot.lane.b32.xlu1 %v13517_v25, %s14851_s20 }
 0x6e3   : > { %2778 = vrot.lane.b32.xlu1 %v13518_v26, %s14851_s20 }
 0x6e7   : > { %2750 = vrot.lane.b32.xlu1 %v13519_v27, %s14851_s20 }
 0x6eb   : > { %2768 = vrot.lane.b32.xlu1 %v13520_v28, %s14851_s20 }
 0x6ef   : > { %2782 = vrot.lane.b32.xlu1 %v13521_v29, %s14851_s20 }
 0x6f3   : > { %2754 = vrot.lane.b32.xlu1 %v13522_v30, %s14851_s20 }
 0x6f7   : > { %2786 = vrot.lane.b32.xlu1 %v13523_v32, %s14851_s20 }
 0x6fb   : > { %2897 = vrot.lane.b32.xlu1 %v15946_v41, %s14851_s20  ;;  %v2628_v41 = vpop.permute.xlu0 %2627 }
 0x6ff   : > { %2899 = vrot.lane.b32.xlu1 %v15954_v43, %s14851_s20  ;;  %v2741_v43 = vpop.permute.xlu0 %2740 }
 0x703   : > { %2901 = vrot.lane.b32.xlu1 %v15966_v46, %s14851_s20  ;;  %v2759_v46 = vpop.permute.xlu0 %2758 }
 0x707   : > { %2903 = vrot.lane.b32.xlu1 %v15977_v50, %s14851_s20  ;;  %v2626_v50 = vpop.permute.xlu1 %2625 }
 0x70b   : > { %2905 = vrot.lane.b32.xlu1 %v15990_v53, %s14851_s20 }
 0x70f   : > { %2907 = vrot.lane.b32.xlu1 %v16003_v56, %s14851_s20  ;;  %v16254_v56 = vpop.permute.xlu0 %2772 }
 0x713   : > { %2909 = vrot.lane.b32.xlu1 %v16020_v59, %s14851_s20 }
 0x717   : > { %2911 = vrot.lane.b32.xlu1 %v16030_v62, %s14851_s20 }
 0x71b   : > { %2655 = vrot.lane.b32.xlu1 %v16054_v3, %s14851_s20 }
 0x71f   : > { %2931 = vrot.lane.b32.xlu1 %v15969_v47, %s14851_s20  ;;  %v2745_v47 = vpop.permute.xlu0 %2744 }
 0x723   : > { %2935 = vrot.lane.b32.xlu1 %v15993_v54, %s14851_s20 }
 0x727   : > { %2939 = vrot.lane.b32.xlu1 %v16027_v61, %s14851_s20  ;;  %v2763_v61 = vpop.permute.xlu0 %2762 }
 0x72b   : > { %2943 = vrot.lane.b32.xlu1 %v16046_v0, %s14851_s20  ;;  %v2777_v40 = vpop.permute.xlu0 %2776 }
 0x72f   : > { %v2749_v4 = vpop.permute.xlu0 %2748 }
 0x733   : > { %v2767_v52 = vpop.permute.xlu0 %2766 }
 0x73b   : > { %v2512_v53 = vpop.xlane.xlu1 %2511 }
 0x73c   : > { %13428 = vrcp.f32 %v2512_v53 }
 0x73f   : > { %v2515_v59 = vpop.xlane.xlu1 %2514 }
 0x740   : > { %13430 = vrcp.f32 %v2515_v59 }
 0x743   : > { %v2598_v62 = vpop.permute.xlu1 %2597 }
 0x744   : > { %11718 = vmatpush3.bf16.msra.mxu0 %v2598_v62 }
 0x746   : > { %v13429_v3 = vpop.eup %13428 }
 0x747   : > { %v2757_v54 = vpop.permute.xlu1 %2756  ;;  %2691 = vmatmul.mubr.bf16.vlgmr.msra.gmra.mrb[16].mxu0 %v15896_v15  ;;  %v2517_v33 = vmul.f32 %v13429_v3, %v16180_v38 }
 0x748   : > { %11734 = vmatprep.subr.bf16.mxu0 %v2757_v54  ;;  %2847 = vmatprep.mubr.bf16.mxu0 %v15885_v6 }
 0x749   : > { %11735 = vmatpush3.bf16.msra.mxu0 %v2741_v43 }
 0x74a   : > { %v13431_v0 = vpop.eup %13430  ;;  %11736 = vmatprep.subr.bf16.mxu0 %v2759_v46 }
 0x74b   : > { %v2519_v34 = vmul.f32 %v13431_v0, %v16186_v22  ;;  %v2630_v36 = vpop.permute.xlu1 %2629 }
 0x74d   : > { %v2520_v37 = vpack.c.bf16 %v2519_v34, %v2517_v33 }
 0x74f   : > { %12361 = vmatmul.mubr.msk.bf16.vlgmr.msra.gmra.mrb[12].mxu1 %vm2497_vm4, %v2520_v37  ;;  %v2743_v1 = vpop.permute.xlu1 %2742 }
 0x750   : > { %12365 = vmatpush3.bf16.msra.mxu1 %v16176_v55  ;;  %11737 = vmatpush3.bf16.msra.mxu0 %v2743_v1  ;;  %v2781_v55 = vpop.permute.xlu0 %2780 }
 0x751   : > { %12366 = vmatprep.subr.bf16.mxu1 %v18243_v48  ;;  %12380 = vmatprep.mubr.msk.bf16.mxu1 %vm14850_vm2, %v18243_v48 }
 0x753   : > { %v2761_v44 = vpop.permute.xlu1 %2760 }
 0x754   : > { %12367 = vmatpush3.bf16.msra.mxu1 %v16169_v42  ;;  %11738 = vmatprep.subr.bf16.mxu0 %v2761_v44  ;;  %v2753_v58 = vpop.permute.xlu0 %2752 }
 0x755   : > { %12368 = vmatprep.subr.bf16.mxu1 %v18243_v48  ;;  %11739 = vmatpush3.bf16.msra.mxu0 %v2745_v47 }
 0x756   : > { %11740 = vmatprep.subr.bf16.mxu0 %v2763_v61 }
 0x757   : > { %v2775_v49 = vpop.permute.xlu1 %2774 }
 0x758   : > { %12369 = vmatpush3.bf16.msra.mxu1 %v16194_v51  ;;  %v2771_v2 = vpop.permute.xlu0 %2770 }
 0x759   : > { %12370 = vmatprep.subr.bf16.mxu1 %v18243_v48 }
 0x75b   : > { %v2747_v5 = vpop.permute.xlu1 %2746 }
 0x75c   : > { %12371 = vmatpush3.bf16.msra.mxu1 %v16190_v9  ;;  %11741 = vmatpush3.bf16.msra.mxu0 %v2747_v5  ;;  %v2785_v45 = vpop.permute.xlu0 %2784 }
 0x75d   : > { %12372 = vmatprep.subr.bf16.mxu1 %v18243_v48 }
 0x75f   : > { %v2765_v7 = vpop.permute.xlu1 %2764 }
 0x760   : > { %12373 = vmatpush3.bf16.msra.mxu1 %v16202_v16  ;;  %11742 = vmatprep.subr.bf16.mxu0 %v2765_v7  ;;  %v2914_v51 = vpop.permute.xlu0 %2913 }
 0x761   : > { %12374 = vmatprep.subr.bf16.mxu1 %v18243_v48  ;;  %11743 = vmatpush3.bf16.msra.mxu0 %v2749_v4 }
 0x762   : > { %11744 = vmatprep.subr.bf16.mxu0 %v2767_v52 }
 0x763   : > { %v2779_v42 = vpop.permute.xlu1 %2778 }
 0x764   : > { %12375 = vmatpush3.bf16.msra.mxu1 %v2626_v50  ;;  %v2916_v13 = vpop.permute.xlu0 %2915 }
 0x765   : > { %12376 = vmatprep.subr.bf16.mxu1 %v18243_v48 }
 0x767   : > { %v2751_v38 = vpop.permute.xlu1 %2750 }
 0x768   : > { %12377 = vmatpush3.bf16.msra.mxu1 %v2628_v41  ;;  %11745 = vmatpush3.bf16.msra.mxu0 %v2751_v38  ;;  %v2918_v57 = vpop.permute.xlu0 %2917 }
 0x769   : > { %12378 = vmatprep.subr.bf16.mxu1 %v18243_v48 }
 0x76b   : > { %v2769_v60 = vpop.permute.xlu1 %2768 }
 0x76c   : > { %12379 = vmatpush3.bf16.msra.mxu1 %v2630_v36  ;;  %11746 = vmatprep.subr.bf16.mxu0 %v2769_v60  ;;  %v2920_v63 = vpop.permute.xlu0 %2919 }
 0x76d   : > { %12384 = vmatprep.subr.bf16.mxu1 %v18243_v48  ;;  %11747 = vmatpush3.bf16.msra.mxu0 %v2753_v58 }
 0x76e   : > { %11748 = vmatprep.subr.bf16.mxu0 %v2771_v2 }
 0x76f   : > { %12381 = vmatmul.mubr.bf16.vlgmr.msra.gmra.mrb[16].mxu1 %v15899_v17  ;;  %v2783_v22 = vpop.permute.xlu1 %2782 }
 0x770   : > { %12385 = vmatpush3.bf16.msra.mxu1 %v16254_v56  ;;  %12400 = vmatprep.mubr.msk.bf16.mxu1 %vm14850_vm2, %v18243_v48  ;;  %v2922_v18 = vpop.permute.xlu0 %2921 }
 0x771   : > { %12386 = vmatprep.subr.bf16.mxu1 %v18243_v48 }
 0x773   : > { %v2755_v8 = vpop.permute.xlu1 %2754 }
 0x774   : > { %12387 = vmatpush3.bf16.msra.mxu1 %v2775_v49  ;;  %11749 = vmatpush3.bf16.msra.mxu0 %v2755_v8  ;;  %v2924_v20 = vpop.permute.xlu0 %2923 }
 0x775   : > { %12388 = vmatprep.subr.bf16.mxu1 %v18243_v48  ;;  %11765 = vmatprep.subr.bf16.mxu0 %v2914_v51 }
 0x777   : > { %2848 = vmatmul.mubr.bf16.vlgmr.msra.gmra.mrb[20].mxu0 %v15896_v15  ;;  %v2787_v9 = vpop.permute.xlu1 %2786 }
 0x778   : > { %12389 = vmatpush3.bf16.msra.mxu1 %v2777_v40  ;;  %3004 = vmatprep.mubr.bf16.mxu0 %v15885_v6  ;;  %v2926_v23 = vpop.permute.xlu0 %2925 }
 0x779   : > { %12390 = vmatprep.subr.bf16.mxu1 %v18243_v48 }
 0x77b   : > { %v2898_v10 = vpop.permute.xlu1 %2897 }
 0x77c   : > { %12391 = vmatpush3.bf16.msra.mxu1 %v2779_v42  ;;  %11766 = vmatpush3.bf16.msra.mxu0 %v2898_v10  ;;  %v2928_v24 = vpop.permute.xlu0 %2927 }
 0x77d   : > { %12392 = vmatprep.subr.bf16.mxu1 %v18243_v48  ;;  %11767 = vmatprep.subr.bf16.mxu0 %v2916_v13 }
 0x77f   : > { %v2900_v11 = vpop.permute.xlu1 %2899 }
 0x780   : > { %12393 = vmatpush3.bf16.msra.mxu1 %v2781_v55  ;;  %11768 = vmatpush3.bf16.msra.mxu0 %v2900_v11  ;;  %v2813_v49 = vpop.permute.xlu0 %2812 }
 0x781   : > { %12394 = vmatprep.subr.bf16.mxu1 %v18243_v48  ;;  %11769 = vmatprep.subr.bf16.mxu0 %v2918_v57 }
 0x783   : > { %v2902_v12 = vpop.permute.xlu1 %2901 }
 0x784   : > { %12395 = vmatpush3.bf16.msra.mxu1 %v2783_v22  ;;  %11770 = vmatpush3.bf16.msra.mxu0 %v2902_v12  ;;  %v2930_v12 = vpop.permute.xlu0 %2929 }
 0x785   : > { %12396 = vmatprep.subr.bf16.mxu1 %v18243_v48  ;;  %11771 = vmatprep.subr.bf16.mxu0 %v2920_v63 }
 0x787   : > { %v2904_v14 = vpop.permute.xlu1 %2903 }
 0x788   : > { %12397 = vmatpush3.bf16.msra.mxu1 %v2785_v45  ;;  %11772 = vmatpush3.bf16.msra.mxu0 %v2904_v14  ;;  %v2934_v14 = vpop.permute.xlu0 %2933 }
 0x789   : > { %12398 = vmatprep.subr.bf16.mxu1 %v18243_v48  ;;  %11773 = vmatprep.subr.bf16.mxu0 %v2922_v18 }
 0x78b   : > { %v2906_v16 = vpop.permute.xlu1 %2905 }
 0x78c   : > { %12399 = vmatpush3.bf16.msra.mxu1 %v2787_v9  ;;  %11774 = vmatpush3.bf16.msra.mxu0 %v2906_v16  ;;  %v2938_v16 = vpop.permute.xlu0 %2937 }
 0x78d   : > { %12404 = vmatprep.subr.bf16.mxu1 %v18243_v48  ;;  %11775 = vmatprep.subr.bf16.mxu0 %v2924_v20 }
 0x78f   : > { %12401 = vmatmul.mubr.bf16.vlgmr.msra.gmra.mrb[20].mxu1 %v15899_v17  ;;  %v2908_v19 = vpop.permute.xlu1 %2907 }
 0x790   : > { %12420 = vmatprep.mubr.msk.bf16.mxu1 %vm14850_vm2, %v18243_v48  ;;  %11776 = vmatpush3.bf16.msra.mxu0 %v2908_v19  ;;  %v2942_v18 = vpop.permute.xlu0 %2941 }
 0x791   : > { %11777 = vmatprep.subr.bf16.mxu0 %v2926_v23  ;;  %12405 = vmatpush3.bf16.msra.mxu1 %v2930_v12  ;;  %v16349_v12 = vld [vmem:[%s15773_s13 + $0x4] ss:$12 sps:$4 sm:$0xff]  }
 0x792   : > { %12406 = vmatprep.subr.bf16.mxu1 %v18243_v48 }
 0x793   : > { %v2910_v21 = vpop.permute.xlu1 %2909 }
 0x794   : > { %11778 = vmatpush3.bf16.msra.mxu0 %v2910_v21 }
 0x795   : > { %11779 = vmatprep.subr.bf16.mxu0 %v2928_v24 }
 0x797   : > { %v2912_v25 = vpop.permute.xlu1 %2911 }
 0x798   : > { %11780 = vmatpush3.bf16.msra.mxu0 %v2912_v25 }
 0x799   : > { %12424 = vmatprep.subr.bf16.mxu0 %v18243_v48 }
 0x79b   : > { %3005 = vmatmul.mubr.bf16.vlgmr.msra.gmra.mrb[24].mxu0 %v15896_v15  ;;  %v2656_v56 = vpop.permute.xlu1 %2655 }
 0x79c   : > { %12426 = vmatprep.mubr.msk.bf16.mxu0 %vm14850_vm2, %v18243_v48 }
 0x79f   : > { %v2932_v13 = vpop.permute.xlu1 %2931 }
 0x7a0   : > { %12407 = vmatpush3.bf16.msra.mxu1 %v2932_v13  ;;  %v16354_v13 = vld [vmem:[%s15773_s13 + $0xdc] ss:$12 sps:$4 sm:$0xff]  }
 0x7a1   : > { %12408 = vmatprep.subr.bf16.mxu1 %v18243_v48 }
 0x7a3   : > { %v2936_v57 = vpop.permute.xlu1 %2935 }
 0x7a4   : > { %12409 = vmatpush3.bf16.msra.mxu1 %v2934_v14  ;;  %v16359_v14 = vld [vmem:[%s15773_s13 + $0x1c] ss:$12 sps:$4 sm:$0xff]  }
 0x7a5   : > { %12410 = vmatprep.subr.bf16.mxu1 %v18243_v48 }
 0x7a7   : > { %v2940_v63 = vpop.permute.xlu1 %2939 }
 0x7a8   : > { %12411 = vmatpush3.bf16.msra.mxu1 %v2936_v57  ;;  %v16364_v57 = vld [vmem:[%s15773_s13 + $0xf4] ss:$12 sps:$4 sm:$0xff]  }
 0x7a9   : > { %12412 = vmatprep.subr.bf16.mxu1 %v18243_v48 }
 0x7ab   : > { %v2944_v19 = vpop.permute.xlu1 %2943 }
 0x7ac   : > { %12413 = vmatpush3.bf16.msra.mxu1 %v2938_v16  ;;  %v16369_v16 = vld [vmem:[%s15773_s13 + $0x19c] ss:$12 sps:$4 sm:$0xff]  }
 0x7ad   : > { %12414 = vmatprep.subr.bf16.mxu1 %v18243_v48 }
 0x7b0   : > { %12415 = vmatpush3.bf16.msra.mxu1 %v2940_v63  ;;  %v16374_v63 = vld [vmem:[%s15773_s13 + $0x4c] ss:$12 sps:$4 sm:$0xff]  }
 0x7b1   : > { %12416 = vmatprep.subr.bf16.mxu1 %v18243_v48 }
 0x7b4   : > { %12417 = vmatpush3.bf16.msra.mxu1 %v2942_v18  ;;  %v16379_v18 = vld [vmem:[%s15773_s13 + $0x124] ss:$12 sps:$4 sm:$0xff]  }
 0x7b5   : > { %12418 = vmatprep.subr.bf16.mxu1 %v18243_v48 }
 0x7b8   : > { %12419 = vmatpush3.bf16.msra.mxu1 %v2944_v19  ;;  %v16384_v19 = vld [vmem:[%s15773_s13 + $0x1cc] ss:$12 sps:$4 sm:$0xff]  }
 0x7b9   : > { %12430 = vmatprep.subr.bf16.mxu1 %v18243_v48 }
 0x7bb   : > { %12421 = vmatmul.mubr.bf16.vlgmr.msra.gmra.mrb[24].mxu1 %v15899_v17 }
 0x7bc   : > { %12432 = vmatprep.mubr.msk.bf16.mxu1 %vm14850_vm2, %v18243_v48 }
 0x81a   : > { %v11719_v26 = vpop.f32.mrb[16].mxu0 }
 0x81b   : > { %v11720_v27 = vpop.f32.mrb[17].mxu0 }
 0x81c   : > { %v11721_v28 = vadd.f32 %v11720_v27, %v11719_v26  ;;  %v11722_v29 = vpop.f32.mrb[18].mxu0 }
 0x81d   : > { %v11723_v30 = vpop.f32.mrb[19].mxu0 }
 0x81e   : > { %v11724_v32 = vadd.f32 %v11723_v30, %v11722_v29  ;;  %v2693_v59 = vadd.f32 %v11721_v28, %v2656_v56 }
 0x820   : > { %v2696_v61 = vadd.f32 %v11724_v32, %v2656_v56 }
 0x822   : > { %v2559_v41 = vpop.f32.mrb[12].mxu1 }
 0x823   : > { %v12362_v43 = vpop.f32.mrb[13].mxu1 }
 0x824   : > { %v2562_v46 = vpop.f32.mrb[14].mxu1 }
 0x825   : > { %v16297_v50 = vpack.c.bf16 %v2562_v46, %v2559_v41  ;;  %v12363_v53 = vpop.f32.mrb[15].mxu1 }
 0x842   : > { %v2733_v47 = vpop.f32.mrb[16].mxu1 }
 0x843   : > { %v2734_v62 = vadd.f32 %v2733_v47, %v2693_v59  ;;  %v12382_v54 = vpop.f32.mrb[17].mxu1 }
 0x844   : > { %v2736_v3 = vpop.f32.mrb[18].mxu1 }
 0x845   : > { %v2737_v0 = vadd.f32 %v2736_v3, %v2696_v61  ;;  %v12383_v33 = vpop.f32.mrb[19].mxu1 }
 0x846   : > { %v13186_v33 = vld [vmem:[%s15805_s21 + $0x64] ss:$12 sps:$4 sm:$0xff]  }
 0x847   : > { %v3054_v34 = vpack.c.bf16 %v2737_v0, %v2734_v62  ;;  %v13184_v0 = vld [vmem:[%s15805_s21 + $0x60] ss:$12 sps:$4 sm:$0xff]  }
 0x84a   : > { %v11750_v36 = vpop.f32.mrb[20].mxu0 }
 0x84b   : > { %v11751_v37 = vpop.f32.mrb[21].mxu0 }
 0x84c   : > { %v11752_v40 = vadd.f32 %v11751_v37, %v11750_v36  ;;  %v11753_v1 = vpop.f32.mrb[22].mxu0  ;;  %v13188_v36 = vld [vmem:[%s15805_s21 + $0x78] ss:$12 sps:$4 sm:$0xff]   ;;  %v13194_v37 = vld [vmem:[%s15805_s21 + $0x94] ss:$12 sps:$4 sm:$0xff]  }
 0x84d   : > { %v11754_v44 = vpop.f32.mrb[23].mxu0 }
 0x84e   : > { %v11755_v4 = vadd.f32 %v11754_v44, %v11753_v1  ;;  %v2850_v52 = vadd.f32 %v11752_v40, %v2813_v49  ;;  %v13192_v40 = vld [vmem:[%s15805_s21 + $0x90] ss:$12 sps:$4 sm:$0xff]  }
 0x850   : > { %v2853_v42 = vadd.f32 %v11755_v4, %v2813_v49 }
 0x862   : > { %v2890_v5 = vpop.f32.mrb[20].mxu1 }
 0x863   : > { %v2891_v7 = vadd.f32 %v2890_v5, %v2850_v52  ;;  %v12402_v55 = vpop.f32.mrb[21].mxu1 }
 0x864   : > { %v2893_v58 = vpop.f32.mrb[22].mxu1 }
 0x865   : > { %v2894_v38 = vadd.f32 %v2893_v58, %v2853_v42  ;;  %v12403_v60 = vpop.f32.mrb[23].mxu1 }
 0x866   : > { %v13187_v60 = vld [vmem:[%s15805_s21 + $0x68] ss:$12 sps:$4 sm:$0xff]  }
 0x867   : > { %v3055_v2 = vpack.c.bf16 %v2894_v38, %v2891_v7 }
 0x869   : > { %v3060_v22 = vsel %vm2445_vm3, %v3055_v2, 0 }
 0x86a   : > { %12425 = vmatpush3.bf16.xpose.msra.mxu0 %v3060_v22  ;;  %v13191_v22 = vld [vmem:[%s15805_s21 + $0x80] ss:$12 sps:$4 sm:$0xff]  }
 0x86b   : > { %3243 = vmatprep.subr.bf16.mxu0 %v13186_v33  ;;  %v13204_v33 = vld [vmem:[%s15805_s21 + $0x18] ss:$12 sps:$4 sm:$0xff]  }
 0x86e   : > { %v11781_v8 = vpop.f32.mrb[24].mxu0 }
 0x86f   : > { %v11782_v45 = vpop.f32.mrb[25].mxu0 }
 0x870   : > { %v16301_v9 = vadd.f32 %v11782_v45, %v11781_v8  ;;  %v11784_v51 = vpop.f32.mrb[26].mxu0  ;;  %v13195_v8 = vld [vmem:[%s15805_s21 + $0x98] ss:$12 sps:$4 sm:$0xff]  }
 0x871   : > { %12427 = vmatmul.mubr.msk.bf16.vlgmr.msra.gmra.mrb[28].mxu0 %vm2445_vm3, %v3054_v34  ;;  %v11785_v10 = vpop.f32.mrb[27].mxu0  ;;  %v13190_v34 = vld [vmem:[%s15805_s21 + $0x7c] ss:$12 sps:$4 sm:$0xff]   ;;  %v13198_v45 = vld [vmem:[%s15805_s21 + $0xac] ss:$12 sps:$4 sm:$0xff]  }
 0x872   : > { %v16303_v11 = vadd.f32 %v11785_v10, %v11784_v51  ;;  %3244 = vmatpush1.bf16.msra.mxu0 %v13184_v0  ;;  %v13199_v51 = vld [vmem:[%s15805_s21 + $0xb0] ss:$12 sps:$4 sm:$0xff]  }
 0x873   : > { %3245 = vmatprep.subr.bf16.mxu0 %v13190_v34  ;;  %v13202_v10 = vld [vmem:[%s15805_s21 + $0x4] ss:$12 sps:$4 sm:$0xff]   ;;  %v13206_v0 = vld [vmem:[%s15805_s21 + $0x1c] ss:$12 sps:$4 sm:$0xff]   ;;  %v13207_v34 = vld [vmem:[%s15805_s21 + $0x20] ss:$12 sps:$4 sm:$0xff]  }
 0x876   : > { %3246 = vmatpush1.bf16.msra.mxu0 %v13188_v36  ;;  %v13210_v36 = vld [vmem:[%s15805_s21 + $0x34] ss:$12 sps:$4 sm:$0xff]  }
 0x877   : > { %3247 = vmatprep.subr.bf16.mxu0 %v13194_v37  ;;  %v13208_v37 = vld [vmem:[%s15805_s21 + $0x30] ss:$12 sps:$4 sm:$0xff]  }
 0x87a   : > { %3248 = vmatpush1.bf16.msra.mxu0 %v13192_v40  ;;  %v13211_v40 = vld [vmem:[%s15805_s21 + $0x38] ss:$12 sps:$4 sm:$0xff]  }
 0x87b   : > { %3249 = vmatprep.subr.bf16.mxu0 %v13198_v45  ;;  %v16587_v45 = vld [vmem:[%s15785_s25 + $0x34] ss:$12 sps:$4 sm:$0xff]  }
 0x88e   : > { %v3047_v62 = vpop.f32.mrb[24].mxu1 }
 0x88f   : > { %v12422_v54 = vpop.f32.mrb[25].mxu1 }
 0x890   : > { %v3050_v61 = vpop.f32.mrb[26].mxu1  ;;  %v13203_v54 = vld [vmem:[%s15805_s21 + $0x8] ss:$12 sps:$4 sm:$0xff]  }
 0x891   : > { %v12423_v3 = vpop.f32.mrb[27].mxu1 }
 0x944   : > { %v3096_v20 = vpop.f32.mrb[28].mxu0 }
 0x945   : > { %v3103_v21 = vmul.f32 0.125, %v3096_v20  ;;  %v12428_v23 = vpop.f32.mrb[29].mxu0  ;;  %v16389_v20 = vld [vmem:[%s15773_s13 + $0x7c] ss:$12 sps:$4 sm:$0xff]  }
 0x946   : > { %v3099_v24 = vpop.f32.mrb[30].mxu0  ;;  %v16399_v23 = vld [vmem:[%s15773_s13 + $0x1fc] ss:$12 sps:$4 sm:$0xff]  }
 0x947   : > { %v3104_v25 = vmul.f32 0.125, %v3099_v24  ;;  %v12429_v26 = vpop.f32.mrb[31].mxu0  ;;  %v3105_v27 = vadd.f32 %v3103_v21, %v16094_v31  ;;  %v16394_v21 = vld [vmem:[%s15773_s13 + $0x154] ss:$12 sps:$4 sm:$0xff]   ;;  %v16404_v24 = vld [vmem:[%s15773_s13 + $0xac] ss:$12 sps:$4 sm:$0xff]  }
 0x948   : > { %v16414_v26 = vld [vmem:[%s15773_s13 + $0x22c] ss:$12 sps:$4 sm:$0xff]  }
 0x949   : > { %v3107_v28 = vsel %vm2497_vm4, %v3105_v27, -inf  ;;  %v3106_v29 = vadd.f32 %v3104_v25, %v16096_v35  ;;  %v16409_v25 = vld [vmem:[%s15785_s25 + $0xc4] ss:$12 sps:$4 sm:$0xff]  }
 0x94a   : > { %3108 = vmax.xlane.f32.xlu0 %v3107_v28  ;;  %v16424_v28 = vld [vmem:[%s15785_s25 + $0xf4] ss:$12 sps:$4 sm:$0xff]  }
 0x94b   : > { %v3110_v30 = vsel %vm2497_vm4, %v3106_v29, -inf }
 0x94c   : > { %3111 = vmax.xlane.f32.xlu1 %v3110_v30  ;;  %v16434_v30 = vld [vmem:[%s15785_s25 + $0x4c] ss:$12 sps:$4 sm:$0xff]  }
 0x9d7   : > { %v3109_v32 = vpop.xlane.xlu0 %3108 }
 0x9d8   : > { %v3113_v41 = vsub.f32 %v3105_v27, %v3109_v32  ;;  %v16419_v27 = vld [vmem:[%s15785_s25 + $0x1c] ss:$12 sps:$4 sm:$0xff]   ;;  %v16439_v32 = vld [vmem:[%s15785_s25 + $0x124] ss:$12 sps:$4 sm:$0xff]  }
 0x9d9   : > { %v3112_v43 = vpop.xlane.xlu1 %3111 }
 0x9da   : > { %v3115_v46 = vmul.f32 1.442695, %v3113_v41  ;;  %v3114_v53 = vsub.f32 %v3106_v29, %v3112_v43  ;;  %v16429_v29 = vld [vmem:[%s15785_s25 + $0x19c] ss:$12 sps:$4 sm:$0xff]   ;;  %v16444_v41 = vld [vmem:[%s15785_s25 + $0x1cc] ss:$12 sps:$4 sm:$0xff]  }
 0x9db   : > { %v16449_v43 = vld [vmem:[%s15785_s25 + $0x7c] ss:$12 sps:$4 sm:$0xff]  }
 0x9dc   : > { %13432 = vpow2.f32 %v3115_v46  ;;  %v3117_v56 = vmul.f32 1.442695, %v3114_v53  ;;  %v16454_v46 = vld [vmem:[%s15785_s25 + $0x154] ss:$12 sps:$4 sm:$0xff]   ;;  %v16459_v53 = vld [vmem:[%s15785_s25 + $0x1fc] ss:$12 sps:$4 sm:$0xff]  }
 0x9de   : > { %13434 = vpow2.f32 %v3117_v56  ;;  %v16464_v56 = vld [vmem:[%s15785_s25 + $0xac] ss:$12 sps:$4 sm:$0xff]  }
 0x9e6   : > { %v13433_v31 = vpop.eup %13432 }
 0x9e7   : > { %v3119_v59 = vsel %vm2497_vm4, %v13433_v31, 0.0 }
 0x9e8   : > { %v13435_v35 = vpop.eup %13434  ;;  %3120 = vadd.xlane.f32.xlu0 %v3119_v59 }
 0x9e9   : > { %v3122_v47 = vsel %vm2497_vm4, %v13435_v35, 0.0 }
 0x9ec   : > { %3123 = vadd.xlane.f32.xlu0 %v3122_v47 }
 0xa02   : > { %2969 = vrot.lane.b32.xlu0 %v16067_v39, %s14851_s20 }
 0xa06   : > { %4632 = vrot.lane.b32.xlu0 %v16349_v12, %s14851_s20 }
 0xa0a   : > { %4650 = vrot.lane.b32.xlu0 %v16354_v13, %s14851_s20 }
 0xa0e   : > { %4634 = vrot.lane.b32.xlu0 %v16359_v14, %s14851_s20 }
 0xa12   : > { %4652 = vrot.lane.b32.xlu0 %v16364_v57, %s14851_s20 }
 0xa16   : > { %4666 = vrot.lane.b32.xlu0 %v16369_v16, %s14851_s20 }
 0xa1a   : > { %4638 = vrot.lane.b32.xlu0 %v16374_v63, %s14851_s20 }
 0xa1e   : > { %4656 = vrot.lane.b32.xlu0 %v16379_v18, %s14851_s20 }
 0xa22   : > { %4670 = vrot.lane.b32.xlu0 %v16384_v19, %s14851_s20 }
 0xa26   : > { %4642 = vrot.lane.b32.xlu0 %v16389_v20, %s14851_s20 }
 0xa2a   : > { %4660 = vrot.lane.b32.xlu0 %v16394_v21, %s14851_s20 }
 0xa2e   : > { %4674 = vrot.lane.b32.xlu0 %v16399_v23, %s14851_s20 }
 0xa32   : > { %4646 = vrot.lane.b32.xlu0 %v16404_v24, %s14851_s20 }
 0xa36   : > { %4805 = vrot.lane.b32.xlu0 %v16409_v25, %s14851_s20 }
 0xa3a   : > { %4678 = vrot.lane.b32.xlu0 %v16414_v26, %s14851_s20 }
 0xa3e   : > { %4791 = vrot.lane.b32.xlu0 %v16419_v27, %s14851_s20 }
 0xa42   : > { %4809 = vrot.lane.b32.xlu0 %v16424_v28, %s14851_s20 }
 0xa46   : > { %4823 = vrot.lane.b32.xlu0 %v16429_v29, %s14851_s20 }
 0xa4a   : > { %4795 = vrot.lane.b32.xlu0 %v16434_v30, %s14851_s20 }
 0xa4e   : > { %4813 = vrot.lane.b32.xlu0 %v16439_v32, %s14851_s20 }
 0xa52   : > { %4827 = vrot.lane.b32.xlu0 %v16444_v41, %s14851_s20 }
 0xa56   : > { %4799 = vrot.lane.b32.xlu0 %v16449_v43, %s14851_s20 }
 0xa5a   : > { %4817 = vrot.lane.b32.xlu0 %v16454_v46, %s14851_s20 }
 0xa5e   : > { %4831 = vrot.lane.b32.xlu0 %v16459_v53, %s14851_s20 }
 0xa62   : > { %4803 = vrot.lane.b32.xlu0 %v16464_v56, %s14851_s20 }
 0xa75   : > { %v3121_v1 = vpop.xlane.xlu0 %3120 }
 0xa76   : > { %13436 = vrcp.f32 %v3121_v1  ;;  %v13214_v1 = vld [vmem:[%s15805_s21 + $0x4c] ss:$12 sps:$4 sm:$0xff]  }
 0xa79   : > { %v3124_v44 = vpop.xlane.xlu0 %3123 }
 0xa7a   : > { %13438 = vrcp.f32 %v3124_v44  ;;  %v13212_v44 = vld [vmem:[%s15805_s21 + $0x48] ss:$12 sps:$4 sm:$0xff]  }
 0xa7d   : > { %v2970_v4 = vpop.permute.xlu0 %2969 }
 0xa7e   : > { %v3007_v39 = vadd.f32 %v16301_v9, %v2970_v4  ;;  %v3010_v49 = vadd.f32 %v16303_v11, %v2970_v4  ;;  %v13196_v9 = vld [vmem:[%s15805_s21 + $0xa8] ss:$12 sps:$4 sm:$0xff]   ;;  %v14852_v11 = vmov 0   ;;  %v13215_v4 = vld [vmem:[%s15805_s21 + $0x50] ss:$12 sps:$4 sm:$0xff]  }
 0xa7f   : > { %3250 = vmatpush1.bf16.msra.mxu0 %v13196_v9  ;;  %3275 = vmatprep.mubr.bf16.mxu0 %v14852_v11  ;;  %v16590_v9 = vld [vmem:[%s15785_s25 + $0x1b4] ss:$12 sps:$4 sm:$0xff]  }
 0xa80   : > { %v3048_v52 = vadd.f32 %v3047_v62, %v3007_v39  ;;  %v3051_v5 = vadd.f32 %v3050_v61, %v3010_v49  ;;  %v13437_v7 = vpop.eup %13436  ;;  %3394 = vmatprep.subr.bf16.mxu0 %v13202_v10  ;;  %v13200_v62 = vld [vmem:[%s15805_s21] ss:$12 sps:$4 sm:$0xff]   ;;  %v16604_v10 = vld [vmem:[%s15785_s25 + $0x64] ss:$12 sps:$4 sm:$0xff]  }
 0xa81   : > { %v3126_v58 = vmul.f32 %v13437_v7, %v13433_v31  ;;  %v16469_v31 = vld [vmem:[%s15785_s25 + $0x22c] ss:$12 sps:$4 sm:$0xff]  }
 0xa82   : > { %v3130_v55 = vpack.c.bf16 %v3051_v5, %v3048_v52  ;;  %4835 = vrot.lane.b32.xlu0 %v16469_v31, %s14851_s20  ;;  %v16493_v39 = vld [vmem:[%s15773_s13 + $0xc4] ss:$12 sps:$4 sm:$0xff]   ;;  %v16517_v52 = vld [vmem:[%s15773_s13 + $0x1b4] ss:$12 sps:$4 sm:$0xff]   ;;  %v16522_v5 = vld [vmem:[%s15773_s13 + $0x10c] ss:$12 sps:$4 sm:$0xff]  }
 0xa83   : > { %v16496_v49 = vld [vmem:[%s15773_s13 + $0x184] ss:$12 sps:$4 sm:$0xff]  }
 0xa84   : > { %v13439_v42 = vpop.eup %13438  ;;  %12431 = vmatpush3.bf16.msra.mxu1 %v3130_v55  ;;  %v16531_v7 = vld [vmem:[%s15773_s13 + $0x64] ss:$12 sps:$4 sm:$0xff]  }
 0xa85   : > { %v3128_v38 = vmul.f32 %v13439_v42, %v13435_v35  ;;  %12436 = vmatprep.subr.bf16.mxu1 %v18243_v48  ;;  %v16534_v55 = vld [vmem:[%s15773_s13 + $0x1e4] ss:$12 sps:$4 sm:$0xff]   ;;  %v16539_v42 = vld [vmem:[%s15773_s13 + $0x13c] ss:$12 sps:$4 sm:$0xff]  }
 0xa87   : > { %v3129_v2 = vpack.c.bf16 %v3128_v38, %v3126_v58  ;;  %v16548_v58 = vld [vmem:[%s15773_s13 + $0x94] ss:$12 sps:$4 sm:$0xff]  }
 0xa88   : > { %v16551_v38 = vld [vmem:[%s15773_s13 + $0x214] ss:$12 sps:$4 sm:$0xff]  }
 0xa89   : > { %12433 = vmatmul.mubr.msk.bf16.vlgmr.msra.gmra.mrb[28].mxu1 %vm2497_vm4, %v3129_v2  ;;  %v16565_v2 = vld [vmem:[%s15785_s25 + $0x4] ss:$12 sps:$4 sm:$0xff]  }
 0xa8a   : > { %12437 = vmatpush3.bf16.msra.mxu1 %v13187_v60  ;;  %12444 = vmatprep.mubr.msk.bf16.mxu1 %vm14850_vm2, %v18243_v48  ;;  %v16556_v60 = vld [vmem:[%s15773_s13 + $0x16c] ss:$12 sps:$4 sm:$0xff]  }
 0xa8b   : > { %12438 = vmatprep.subr.bf16.mxu1 %v18243_v48 }
 0xa8e   : > { %12439 = vmatpush3.bf16.msra.mxu1 %v13191_v22  ;;  %v16568_v22 = vld [vmem:[%s15785_s25 + $0x184] ss:$12 sps:$4 sm:$0xff]  }
 0xa8f   : > { %12440 = vmatprep.subr.bf16.mxu1 %v18243_v48 }
 0xa92   : > { %12441 = vmatpush3.bf16.msra.mxu1 %v13195_v8  ;;  %v16573_v8 = vld [vmem:[%s15785_s25 + $0xdc] ss:$12 sps:$4 sm:$0xff]  }
 0xa93   : > { %12442 = vmatprep.subr.bf16.mxu1 %v18243_v48 }
 0xa96   : > { %12443 = vmatpush3.bf16.msra.mxu1 %v13199_v51  ;;  %v16595_v51 = vld [vmem:[%s15785_s25 + $0x10c] ss:$12 sps:$4 sm:$0xff]  }
 0xa97   : > { %12448 = vmatprep.subr.bf16.mxu1 %v18243_v48 }
 0xb5c   : > { %v3168_v59 = vpop.f32.mrb[28].mxu1 }
 0xb5d   : > { %v12434_v35 = vpop.f32.mrb[29].mxu1 }
 0xb5e   : > { %v3171_v47 = vpop.f32.mrb[30].mxu1  ;;  %v13285_v35 = vld [vmem:[%s15795_s2 + $0xac] ss:$12 sps:$4 sm:$0xff]  }
 0xb5f   : > { %v3175_v61 = vpack.c.bf16 %v3171_v47, %v3168_v59  ;;  %v12435_v3 = vpop.f32.mrb[31].mxu1  ;;  %v13284_v59 = vld [vmem:[%s15795_s2 + $0x1fc] ss:$12 sps:$4 sm:$0xff]   ;;  %v16712_v47 = vld [vmem:[%s15795_s2 + $0x214] ss:$12 sps:$4 sm:$0xff]  }
 0xb61   : > { %11078 = vmatmul.mubr.msk.bf16.vlgmr.msra.gmra.mrb[32].mxu0 %vm2445_vm3, %v3175_v61  ;;  %12445 = vmatmul.mubr.msk.bf16.vlgmr.msra.gmra.mrb[32].mxu1 %vm2445_vm3, %v3175_v61 }
 0xb62   : > { %3395 = vmatpush1.bf16.msra.mxu0 %v13200_v62  ;;  %12449 = vmatpush3.bf16.msra.mxu1 %v13203_v54  ;;  %v11094_v62 = vld [vmem:[%s15782_s26 + $0x1] ss:$0 sm:$0xff] }
 0xb63   : > { %3396 = vmatprep.subr.bf16.mxu0 %v13206_v0  ;;  %12450 = vmatprep.subr.bf16.mxu1 %v18243_v48  ;;  %v13287_v54 = vld [vmem:[%s15795_s2 + $0x22c] ss:$12 sps:$4 sm:$0xff]  }
 0xb64   : > { %3426 = vmatprep.mubr.bf16.mxu0 %v14852_v11  ;;  %12456 = vmatprep.mubr.msk.bf16.mxu1 %vm14850_vm2, %v18243_v48 }
 0xb66   : > { %3397 = vmatpush1.bf16.msra.mxu0 %v13204_v33  ;;  %12451 = vmatpush3.bf16.msra.mxu1 %v13207_v34 }
 0xb67   : > { %3398 = vmatprep.subr.bf16.mxu0 %v13210_v36  ;;  %12452 = vmatprep.subr.bf16.mxu1 %v18243_v48 }
 0xb6a   : > { %3399 = vmatpush1.bf16.msra.mxu0 %v13208_v37  ;;  %12453 = vmatpush3.bf16.msra.mxu1 %v13211_v40 }
 0xb6b   : > { %3400 = vmatprep.subr.bf16.mxu0 %v13214_v1  ;;  %12454 = vmatprep.subr.bf16.mxu1 %v18243_v48 }
 0xb6e   : > { %3401 = vmatpush1.bf16.msra.mxu0 %v13212_v44  ;;  %12455 = vmatpush3.bf16.msra.mxu1 %v13215_v4 }
 0xb6f   : > { %11810 = vmatprep.subr.bf16.mxu0 %v16493_v39  ;;  %12460 = vmatprep.subr.bf16.mxu1 %v18243_v48 }
 0xb71   : > { %11092 = vmatmul.mubr.msk.bf16.vlgmr.msra.gmra.mrb[32].mxu0 %vm2445_vm3, %v16297_v50  ;;  %12457 = vmatmul.mubr.msk.bf16.vlgmr.msra.gmra.mrb[36].mxu1 %vm2445_vm3, %v16297_v50  ;;  %v16514_v50 = vld [vmem:[%s15773_s13 + $0x34] ss:$12 sps:$4 sm:$0xff]  }
 0xb72   : > { %11811 = vmatpush3.bf16.msra.mxu0 %v16349_v12  ;;  %12461 = vmatpush3.bf16.msra.mxu1 %v16496_v49  ;;  %v16607_v12 = vld [vmem:[%s15785_s25 + $0x1e4] ss:$12 sps:$4 sm:$0xff]  }
 0xb73   : > { %11812 = vmatprep.subr.bf16.mxu0 %v16354_v13  ;;  %12462 = vmatprep.subr.bf16.mxu1 %v18243_v48  ;;  %v16612_v13 = vld [vmem:[%s15785_s25 + $0x13c] ss:$12 sps:$4 sm:$0xff]  }
 0xb74   : > { %3823 = vmatprep.mubr.bf16.mxu0 %v15885_v6  ;;  %12476 = vmatprep.mubr.msk.bf16.mxu1 %vm14850_vm2, %v18243_v48 }
 0xb76   : > { %11813 = vmatpush3.bf16.msra.mxu0 %v16359_v14  ;;  %12463 = vmatpush3.bf16.msra.mxu1 %v16369_v16  ;;  %v16621_v14 = vld [vmem:[%s15785_s25 + $0x94] ss:$12 sps:$4 sm:$0xff]   ;;  %v16629_v16 = vld [vmem:[%s15785_s25 + $0x16c] ss:$12 sps:$4 sm:$0xff]  }
 0xb77   : > { %11814 = vmatprep.subr.bf16.mxu0 %v16364_v57  ;;  %12464 = vmatprep.subr.bf16.mxu1 %v18243_v48  ;;  %v16624_v57 = vld [vmem:[%s15785_s25 + $0x214] ss:$12 sps:$4 sm:$0xff]  }
 0xb7a   : > { %11815 = vmatpush3.bf16.msra.mxu0 %v16514_v50  ;;  %12465 = vmatpush3.bf16.msra.mxu1 %v16517_v52 }
 0xb7b   : > { %11816 = vmatprep.subr.bf16.mxu0 %v16522_v5  ;;  %12466 = vmatprep.subr.bf16.mxu1 %v18243_v48 }
 0xb7e   : > { %11817 = vmatpush3.bf16.msra.mxu0 %v16374_v63  ;;  %12467 = vmatpush3.bf16.msra.mxu1 %v16384_v19  ;;  %v16644_v63 = vld [vmem:[%s15795_s2 + $0xc4] ss:$12 sps:$4 sm:$0xff]   ;;  %v16650_v19 = vld [vmem:[%s15795_s2 + $0xdc] ss:$12 sps:$4 sm:$0xff]  }
 0xb7f   : > { %11818 = vmatprep.subr.bf16.mxu0 %v16379_v18  ;;  %12468 = vmatprep.subr.bf16.mxu1 %v18243_v48  ;;  %v13265_v18 = vld [vmem:[%s15795_s2 + $0x4] ss:$12 sps:$4 sm:$0xff]  }
 0xb80   : > { %4946 = vrot.lane.b32.xlu0 %v13265_v18, %s14851_s20 }
 0xb82   : > { %11819 = vmatpush3.bf16.msra.mxu0 %v16531_v7  ;;  %12469 = vmatpush3.bf16.msra.mxu1 %v16534_v55 }
 0xb83   : > { %11820 = vmatprep.subr.bf16.mxu0 %v16539_v42  ;;  %12470 = vmatprep.subr.bf16.mxu1 %v18243_v48 }
 0xb86   : > { %11821 = vmatpush3.bf16.msra.mxu0 %v16389_v20  ;;  %12471 = vmatpush3.bf16.msra.mxu1 %v16399_v23  ;;  %v13267_v20 = vld [vmem:[%s15795_s2 + $0x1c] ss:$12 sps:$4 sm:$0xff]   ;;  %v16657_v23 = vld [vmem:[%s15795_s2 + $0x184] ss:$12 sps:$4 sm:$0xff]  }
 0xb87   : > { %11822 = vmatprep.subr.bf16.mxu0 %v16394_v21  ;;  %12472 = vmatprep.subr.bf16.mxu1 %v18243_v48  ;;  %v16654_v21 = vld [vmem:[%s15795_s2 + $0xf4] ss:$12 sps:$4 sm:$0xff]  }
 0xb88   : > { %4948 = vrot.lane.b32.xlu0 %v13267_v20, %s14851_s20 }
 0xb8a   : > { %11823 = vmatpush3.bf16.msra.mxu0 %v16548_v58  ;;  %12473 = vmatpush3.bf16.msra.mxu1 %v16551_v38 }
 0xb8b   : > { %11824 = vmatprep.subr.bf16.mxu0 %v16556_v60  ;;  %12474 = vmatprep.subr.bf16.mxu1 %v18243_v48 }
 0xb8e   : > { %11825 = vmatpush3.bf16.msra.mxu0 %v16404_v24  ;;  %12475 = vmatpush3.bf16.msra.mxu1 %v16414_v26  ;;  %v13270_v24 = vld [vmem:[%s15795_s2 + $0x34] ss:$12 sps:$4 sm:$0xff]   ;;  %v16666_v26 = vld [vmem:[%s15795_s2 + $0x10c] ss:$12 sps:$4 sm:$0xff]  }
 0xb8f   : > { %11841 = vmatprep.subr.bf16.mxu0 %v16409_v25  ;;  %12480 = vmatprep.subr.bf16.mxu1 %v18243_v48  ;;  %v13272_v25 = vld [vmem:[%s15795_s2 + $0x19c] ss:$12 sps:$4 sm:$0xff]  }
 0xb90   : > { %4950 = vrot.lane.b32.xlu0 %v13270_v24, %s14851_s20 }
 0xb91   : > { %3824 = vmatmul.mubr.bf16.vlgmr.msra.gmra.mrb[36].mxu0 %v15896_v15  ;;  %12477 = vmatmul.mubr.bf16.vlgmr.msra.gmra.mrb[40].mxu1 %v15899_v17 }
 0xb92   : > { %11842 = vmatpush3.bf16.msra.mxu0 %v16565_v2  ;;  %12481 = vmatpush3.bf16.msra.mxu1 %v16568_v22 }
 0xb93   : > { %11843 = vmatprep.subr.bf16.mxu0 %v16573_v8  ;;  %12482 = vmatprep.subr.bf16.mxu1 %v18243_v48 }
 0xb94   : > { %4055 = vmatprep.mubr.bf16.mxu0 %v15885_v6  ;;  %12496 = vmatprep.mubr.msk.bf16.mxu1 %vm14850_vm2, %v18243_v48 }
 0xb96   : > { %11844 = vmatpush3.bf16.msra.mxu0 %v16419_v27  ;;  %12483 = vmatpush3.bf16.msra.mxu1 %v16429_v29  ;;  %v13273_v27 = vld [vmem:[%s15795_s2 + $0x4c] ss:$12 sps:$4 sm:$0xff]   ;;  %v16676_v29 = vld [vmem:[%s15795_s2 + $0x124] ss:$12 sps:$4 sm:$0xff]  }
 0xb97   : > { %11845 = vmatprep.subr.bf16.mxu0 %v16424_v28  ;;  %12484 = vmatprep.subr.bf16.mxu1 %v18243_v48  ;;  %v16671_v28 = vld [vmem:[%s15795_s2 + $0x1b4] ss:$12 sps:$4 sm:$0xff]  }
 0xb98   : > { %4952 = vrot.lane.b32.xlu0 %v13273_v27, %s14851_s20 }
 0xb9a   : > { %11846 = vmatpush3.bf16.msra.mxu0 %v16587_v45  ;;  %12485 = vmatpush3.bf16.msra.mxu1 %v16590_v9 }
 0xb9b   : > { %11847 = vmatprep.subr.bf16.mxu0 %v16595_v51  ;;  %12486 = vmatprep.subr.bf16.mxu1 %v18243_v48 }
 0xb9e   : > { %11848 = vmatpush3.bf16.msra.mxu0 %v16434_v30  ;;  %12487 = vmatpush3.bf16.msra.mxu1 %v16444_v41  ;;  %v13276_v30 = vld [vmem:[%s15795_s2 + $0x64] ss:$12 sps:$4 sm:$0xff]   ;;  %v16685_v41 = vld [vmem:[%s15795_s2 + $0x13c] ss:$12 sps:$4 sm:$0xff]  }
 0xb9f   : > { %11849 = vmatprep.subr.bf16.mxu0 %v16439_v32  ;;  %12488 = vmatprep.subr.bf16.mxu1 %v18243_v48  ;;  %v13278_v32 = vld [vmem:[%s15795_s2 + $0x1cc] ss:$12 sps:$4 sm:$0xff]  }
 0xba0   : > { %4954 = vrot.lane.b32.xlu0 %v13276_v30, %s14851_s20 }
 0xba2   : > { %11850 = vmatpush3.bf16.msra.mxu0 %v16604_v10  ;;  %12489 = vmatpush3.bf16.msra.mxu1 %v16607_v12 }
 0xba3   : > { %11851 = vmatprep.subr.bf16.mxu0 %v16612_v13  ;;  %12490 = vmatprep.subr.bf16.mxu1 %v18243_v48 }
 0xba6   : > { %11852 = vmatpush3.bf16.msra.mxu0 %v16449_v43  ;;  %12491 = vmatpush3.bf16.msra.mxu1 %v16459_v53  ;;  %v13279_v43 = vld [vmem:[%s15795_s2 + $0x7c] ss:$12 sps:$4 sm:$0xff]   ;;  %v16695_v53 = vld [vmem:[%s15795_s2 + $0x154] ss:$12 sps:$4 sm:$0xff]  }
 0xba7   : > { %11853 = vmatprep.subr.bf16.mxu0 %v16454_v46  ;;  %12492 = vmatprep.subr.bf16.mxu1 %v18243_v48  ;;  %v16690_v46 = vld [vmem:[%s15795_s2 + $0x1e4] ss:$12 sps:$4 sm:$0xff]  }
 0xba8   : > { %4956 = vrot.lane.b32.xlu0 %v13279_v43, %s14851_s20 }
 0xbaa   : > { %11854 = vmatpush3.bf16.msra.mxu0 %v16621_v14  ;;  %12493 = vmatpush3.bf16.msra.mxu1 %v16624_v57 }
 0xbab   : > { %11855 = vmatprep.subr.bf16.mxu0 %v16629_v16  ;;  %12494 = vmatprep.subr.bf16.mxu1 %v18243_v48 }
 0xbae   : > { %11856 = vmatpush3.bf16.msra.mxu0 %v16464_v56  ;;  %12495 = vmatpush3.bf16.msra.mxu1 %v16469_v31  ;;  %v13282_v56 = vld [vmem:[%s15795_s2 + $0x94] ss:$12 sps:$4 sm:$0xff]   ;;  %v16704_v31 = vld [vmem:[%s15795_s2 + $0x16c] ss:$12 sps:$4 sm:$0xff]  }
 0xbaf   : > { %12500 = vmatprep.subr.bf16.mxu1 %v18243_v48  ;;  %11872 = vmatprep.subr.bf16.mxu0 %v16644_v63 }
 0xbb0   : > { %4958 = vrot.lane.b32.xlu0 %v13282_v56, %s14851_s20 }
 0xbb1   : > { %4056 = vmatmul.mubr.bf16.vlgmr.msra.gmra.mrb[40].mxu0 %v15896_v15  ;;  %12497 = vmatmul.mubr.bf16.vlgmr.msra.gmra.mrb[44].mxu1 %v15899_v17 }
 0xbb2   : > { %4287 = vmatprep.mubr.bf16.mxu0 %v15885_v6  ;;  %12516 = vmatprep.mubr.msk.bf16.mxu1 %vm14850_vm2, %v18243_v48 }
 0xbb3   : > { %11873 = vmatpush3.bf16.msra.mxu0 %v13265_v18  ;;  %12501 = vmatpush3.bf16.msra.mxu1 %v16657_v23 }
 0xbb4   : > { %11874 = vmatprep.subr.bf16.mxu0 %v16650_v19  ;;  %12502 = vmatprep.subr.bf16.mxu1 %v18243_v48 }
 0xbb5   : > { %4960 = vrot.lane.b32.xlu0 %v13285_v35, %s14851_s20 }
 0xbb7   : > { %11875 = vmatpush3.bf16.msra.mxu0 %v13267_v20  ;;  %12503 = vmatpush3.bf16.msra.mxu1 %v13272_v25 }
 0xbb8   : > { %11876 = vmatprep.subr.bf16.mxu0 %v16654_v21  ;;  %12504 = vmatprep.subr.bf16.mxu1 %v18243_v48 }
 0xbb9   : > { %4704 = vrot.lane.b32.xlu0 %v11094_v62, %s14851_s20 }
 0xbbb   : > { %11877 = vmatpush3.bf16.msra.mxu0 %v13270_v24  ;;  %12505 = vmatpush3.bf16.msra.mxu1 %v16671_v28 }
 0xbbc   : > { %11878 = vmatprep.subr.bf16.mxu0 %v16666_v26  ;;  %12506 = vmatprep.subr.bf16.mxu1 %v18243_v48 }
 0xbbd   : > { %4980 = vrot.lane.b32.xlu0 %v13272_v25, %s14851_s20 }
 0xbbf   : > { %11879 = vmatpush3.bf16.msra.mxu0 %v13273_v27  ;;  %12507 = vmatpush3.bf16.msra.mxu1 %v13278_v32 }
 0xbc0   : > { %11880 = vmatprep.subr.bf16.mxu0 %v16676_v29  ;;  %12508 = vmatprep.subr.bf16.mxu1 %v18243_v48 }
 0xbc1   : > { %4984 = vrot.lane.b32.xlu0 %v13278_v32, %s14851_s20 }
 0xbc3   : > { %11881 = vmatpush3.bf16.msra.mxu0 %v13276_v30  ;;  %12509 = vmatpush3.bf16.msra.mxu1 %v16690_v46 }
 0xbc4   : > { %11882 = vmatprep.subr.bf16.mxu0 %v16685_v41  ;;  %12510 = vmatprep.subr.bf16.mxu1 %v18243_v48 }
 0xbc5   : > { %4988 = vrot.lane.b32.xlu0 %v13284_v59, %s14851_s20 }
 0xbc7   : > { %11883 = vmatpush3.bf16.msra.mxu0 %v13279_v43  ;;  %12511 = vmatpush3.bf16.msra.mxu1 %v13284_v59 }
 0xbc8   : > { %11884 = vmatprep.subr.bf16.mxu0 %v16695_v53  ;;  %12512 = vmatprep.subr.bf16.mxu1 %v18243_v48 }
 0xbc9   : > { %4992 = vrot.lane.b32.xlu0 %v13287_v54, %s14851_s20 }
 0xbcb   : > { %11885 = vmatpush3.bf16.msra.mxu0 %v13282_v56  ;;  %12513 = vmatpush3.bf16.msra.mxu1 %v16712_v47 }
 0xbcc   : > { %11886 = vmatprep.subr.bf16.mxu0 %v16704_v31  ;;  %12514 = vmatprep.subr.bf16.mxu1 %v18243_v48 }
 0xbcf   : > { %11887 = vmatpush3.bf16.msra.mxu0 %v13285_v35  ;;  %12515 = vmatpush3.bf16.msra.mxu1 %v13287_v54 }
 0xbd0   : > { %12520 = vmatprep.subr.bf16.mxu0 %v18243_v48  ;;  %12526 = vmatprep.subr.bf16.mxu1 %v18243_v48 }
 0xbd2   : > { %4288 = vmatmul.mubr.bf16.vlgmr.msra.gmra.mrb[44].mxu0 %v15896_v15  ;;  %12517 = vmatmul.mubr.bf16.vlgmr.msra.gmra.mrb[48].mxu1 %v15899_v17 }
 0xbd3   : > { %12522 = vmatprep.mubr.msk.bf16.mxu0 %vm14850_vm2, %v18243_v48  ;;  %12528 = vmatprep.mubr.msk.bf16.mxu1 %vm14850_vm2, %v18243_v48 }
 0xc34   : > { %v3320_v61 = vpop.f32.mrb[32].mxu1 }
 0xc35   : > { %v12446_v3 = vpop.f32.mrb[33].mxu1 }
 0xc36   : > { %v3323_v0 = vpop.f32.mrb[34].mxu1 }
 0xc37   : > { %v12447_v33 = vpop.f32.mrb[35].mxu1 }
 0xc44   : > { %v3471_v34 = vpop.f32.mrb[36].mxu1 }
 0xc45   : > { %v16732_v36 = vadd.f32 %v3471_v34, %v3320_v61  ;;  %v12458_v37 = vpop.f32.mrb[37].mxu1 }
 0xc46   : > { %v3474_v40 = vpop.f32.mrb[38].mxu1  ;;  %v16737_v37 = vld [vmem:[%s15792_s3 + $0x1] ss:$0 sm:$0xff] }
 0xc47   : > { %v16734_v1 = vadd.f32 %v3474_v40, %v3323_v0  ;;  %v12459_v44 = vpop.f32.mrb[39].mxu1 }
 0xc64   : > { %v11826_v4 = vpop.f32.mrb[36].mxu0  ;;  %v3866_v18 = vpop.f32.mrb[40].mxu1 }
 0xc65   : > { %v11827_v20 = vpop.f32.mrb[37].mxu0  ;;  %v12478_v24 = vpop.f32.mrb[41].mxu1 }
 0xc66   : > { %v11828_v25 = vadd.f32 %v11827_v20, %v11826_v4  ;;  %v11829_v27 = vpop.f32.mrb[38].mxu0  ;;  %v3869_v30 = vpop.f32.mrb[42].mxu1 }
 0xc67   : > { %v11830_v32 = vpop.f32.mrb[39].mxu0  ;;  %v12479_v43 = vpop.f32.mrb[43].mxu1 }
 0xc68   : > { %v11831_v56 = vadd.f32 %v11830_v32, %v11829_v27  ;;  %v3826_v59 = vadd.f32 %v11828_v25, %v11094_v62 }
 0xc6a   : > { %v3867_v35 = vadd.f32 %v3866_v18, %v3826_v59  ;;  %v3829_v54 = vadd.f32 %v11831_v56, %v11094_v62 }
 0xc6c   : > { %v3870_v61 = vadd.f32 %v3869_v30, %v3829_v54 }
 0xc6e   : > { %v4337_v3 = vpack.c.bf16 %v3870_v61, %v3867_v35  ;;  %v16745_v35 = vld [vmem:[%s15802_s28 + $0x1] ss:$0 sm:$0xff] }
 0xc84   : > { %v11857_v33 = vpop.f32.mrb[40].mxu0  ;;  %v4098_v0 = vpop.f32.mrb[44].mxu1 }
 0xc85   : > { %v11858_v34 = vpop.f32.mrb[41].mxu0  ;;  %v12498_v40 = vpop.f32.mrb[45].mxu1 }
 0xc86   : > { %v11859_v44 = vadd.f32 %v11858_v34, %v11857_v33  ;;  %v11860_v48 = vpop.f32.mrb[42].mxu0  ;;  %v4101_v4 = vpop.f32.mrb[46].mxu1 }
 0xc87   : > { %v11861_v20 = vpop.f32.mrb[43].mxu0  ;;  %v12499_v24 = vpop.f32.mrb[47].mxu1 }
 0xc88   : > { %v4058_v43 = vadd.f32 %v11859_v44, %v16737_v37  ;;  %v11862_v27 = vadd.f32 %v11861_v20, %v11860_v48 }
 0xc8a   : > { %v4099_v25 = vadd.f32 %v4098_v0, %v4058_v43  ;;  %v4061_v62 = vadd.f32 %v11862_v27, %v16737_v37  ;;  %v18354_v27 = vmov 0.0  }
 0xc8c   : > { %v4102_v18 = vadd.f32 %v4101_v4, %v4061_v62 }
 0xc8e   : > { %v4338_v30 = vpack.c.bf16 %v4102_v18, %v4099_v25 }
 0xc90   : > { %v4343_v32 = vsel %vm2445_vm3, %v4338_v30, 0 }
 0xc91   : > { %12521 = vmatpush3.bf16.xpose.msra.mxu0 %v4343_v32 }
 0xc98   : > { %12523 = vmatmul.mubr.msk.bf16.vlgmr.msra.gmra.mrb[48].mxu0 %vm2445_vm3, %v4337_v3 }
 0xc99   : > { %4558 = vmatprep.mubr.bf16.mxu0 %v14852_v11 }
 0xca5   : > { %v11888_v56 = vpop.f32.mrb[44].mxu0  ;;  %v4330_v40 = vpop.f32.mrb[48].mxu1 }
 0xca6   : > { %v11889_v59 = vpop.f32.mrb[45].mxu0  ;;  %v12518_v4 = vpop.f32.mrb[49].mxu1 }
 0xca7   : > { %v11890_v54 = vadd.f32 %v11889_v59, %v11888_v56  ;;  %v11891_v61 = vpop.f32.mrb[46].mxu0  ;;  %v4333_v20 = vpop.f32.mrb[50].mxu1  ;;  %v16750_v59 = vld [vmem:[#allocation9] sm:$0xff] }
 0xca8   : > { %v11892_v33 = vpop.f32.mrb[47].mxu0  ;;  %v12519_v3 = vpop.f32.mrb[51].mxu1 }
 0xca9   : > { %v11893_v48 = vadd.f32 %v11892_v33, %v11891_v61  ;;  %v4290_v0 = vadd.f32 %v11890_v54, %v16745_v35  ;;  %v16754_v33 = vld [vmem:[#allocation9 + $0x8] sm:$0xff] }
 0xcab   : > { %v4293_v34 = vadd.f32 %v11893_v48, %v16745_v35  ;;  %v4331_v44 = vadd.f32 %v4330_v40, %v4290_v0 }
 0xcad   : > { %v4334_v24 = vadd.f32 %v4333_v20, %v4293_v34 }
 0xcaf   : > { %v4413_v43 = vpack.c.bf16 %v4334_v24, %v4331_v44 }
 0xcb1   : > { %12527 = vmatpush3.bf16.msra.mxu1 %v4413_v43 }
 0xcb2   : > { %12532 = vmatprep.subr.bf16.mxu1 %v18354_v27 }
 0xd6b   : > { %v4379_v25 = vpop.f32.mrb[48].mxu0 }
 0xd6c   : > { %v4386_v62 = vmul.f32 0.125, %v4379_v25  ;;  %v12524_v18 = vpop.f32.mrb[49].mxu0 }
 0xd6d   : > { %v4382_v30 = vpop.f32.mrb[50].mxu0  ;;  %v13288_v18 = vld [vmem:[%s15805_s21 + $0xc0] ss:$12 sps:$4 sm:$0xff]  }
 0xd6e   : > { %v4387_v32 = vmul.f32 0.125, %v4382_v30  ;;  %v12525_v56 = vpop.f32.mrb[51].mxu0  ;;  %v4388_v54 = vadd.f32 %v16750_v59, %v4386_v62  ;;  %v13290_v30 = vld [vmem:[%s15805_s21 + $0xc4] ss:$12 sps:$4 sm:$0xff]  }
 0xd6f   : > { %4526 = vmatprep.subr.bf16.mxu0 %v13290_v30  ;;  %v13291_v56 = vld [vmem:[%s15805_s21 + $0xd8] ss:$12 sps:$4 sm:$0xff]  }
 0xd70   : > { %v4390_v61 = vsel %vm2497_vm4, %v4388_v54, -inf  ;;  %v4389_v48 = vadd.f32 %v16754_v33, %v4387_v32  ;;  %v13293_v32 = vld [vmem:[%s15805_s21 + $0xdc] ss:$12 sps:$4 sm:$0xff]   ;;  %4527 = vmatpush1.bf16.msra.mxu0 %v13288_v18 }
 0xd71   : > { %4391 = vmax.xlane.f32.xlu1 %v4390_v61  ;;  %4528 = vmatprep.subr.bf16.mxu0 %v13293_v32 }
 0xd72   : > { %v4393_v0 = vsel %vm2497_vm4, %v4389_v48, -inf }
 0xd74   : > { %4529 = vmatpush1.bf16.msra.mxu0 %v13291_v56 }
 0xd75   : > { %4394 = vmax.xlane.f32.xlu1 %v4393_v0 }
 0xdfe   : > { %v4392_v34 = vpop.xlane.xlu1 %4391 }
 0xdff   : > { %v4396_v40 = vsub.f32 %v4388_v54, %v4392_v34 }
 0xe01   : > { %v4398_v44 = vmul.f32 1.442695, %v4396_v40 }
 0xe02   : > { %v4395_v4 = vpop.xlane.xlu1 %4394 }
 0xe03   : > { %13440 = vpow2.f32 %v4398_v44  ;;  %v4397_v20 = vsub.f32 %v4389_v48, %v4395_v4 }
 0xe05   : > { %v4400_v24 = vmul.f32 1.442695, %v4397_v20 }
 0xe07   : > { %13442 = vpow2.f32 %v4400_v24 }
 0xe0d   : > { %v16758_v3 = vpop.eup %13440 }
 0xe0e   : > { %v4402_v43 = vsel %vm2497_vm4, %v16758_v3, 0.0 }
 0xe0f   : > { %4403 = vadd.xlane.f32.xlu1 %v4402_v43 }
 0xe11   : > { %v13443_v25 = vpop.eup %13442 }
 0xe12   : > { %v4405_v62 = vsel %vm2497_vm4, %v13443_v25, 0.0 }
 0xe13   : > { %4406 = vadd.xlane.f32.xlu1 %v4405_v62 }
 0xe24   : > { %4648 = vrot.lane.b32.xlu1 %v16493_v39, %s14851_s20  ;;  %v13296_v39 = vld [vmem:[%s15805_s21 + $0xf4] ss:$12 sps:$4 sm:$0xff]  }
 0xe25   : > { %4530 = vmatprep.subr.bf16.mxu0 %v13296_v39 }
 0xe28   : > { %4664 = vrot.lane.b32.xlu1 %v16496_v49, %s14851_s20  ;;  %v13294_v49 = vld [vmem:[%s15805_s21 + $0xf0] ss:$12 sps:$4 sm:$0xff]  }
 0xe29   : > { %4531 = vmatpush1.bf16.msra.mxu0 %v13294_v49 }
 0xe2c   : > { %4636 = vrot.lane.b32.xlu1 %v16514_v50, %s14851_s20  ;;  %v13299_v50 = vld [vmem:[%s15805_s21 + $0x10c] ss:$12 sps:$4 sm:$0xff]  }
 0xe2d   : > { %4532 = vmatprep.subr.bf16.mxu0 %v13299_v50 }
 0xe30   : > { %4654 = vrot.lane.b32.xlu1 %v16522_v5, %s14851_s20  ;;  %v13297_v5 = vld [vmem:[%s15805_s21 + $0x108] ss:$12 sps:$4 sm:$0xff]  }
 0xe31   : > { %4533 = vmatpush1.bf16.msra.mxu0 %v13297_v5 }
 0xe34   : > { %4668 = vrot.lane.b32.xlu1 %v16517_v52, %s14851_s20 }
 0xe38   : > { %4640 = vrot.lane.b32.xlu1 %v16531_v7, %s14851_s20 }
 0xe3c   : > { %4658 = vrot.lane.b32.xlu1 %v16539_v42, %s14851_s20 }
 0xe40   : > { %4672 = vrot.lane.b32.xlu1 %v16534_v55, %s14851_s20 }
 0xe44   : > { %4644 = vrot.lane.b32.xlu1 %v16548_v58, %s14851_s20 }
 0xe48   : > { %4662 = vrot.lane.b32.xlu1 %v16556_v60, %s14851_s20 }
 0xe4c   : > { %4676 = vrot.lane.b32.xlu1 %v16551_v38, %s14851_s20 }
 0xe50   : > { %4789 = vrot.lane.b32.xlu1 %v16565_v2, %s14851_s20  ;;  %v13300_v2 = vld [vmem:[%s15805_s21 + $0xc8] ss:$12 sps:$4 sm:$0xff]  }
 0xe54   : > { %4807 = vrot.lane.b32.xlu1 %v16573_v8, %s14851_s20  ;;  %v13301_v8 = vld [vmem:[%s15805_s21 + $0xe0] ss:$12 sps:$4 sm:$0xff]  }
 0xe58   : > { %4821 = vrot.lane.b32.xlu1 %v16568_v22, %s14851_s20 }
 0xe5c   : > { %4793 = vrot.lane.b32.xlu1 %v16587_v45, %s14851_s20  ;;  %v13302_v45 = vld [vmem:[%s15805_s21 + $0xf8] ss:$12 sps:$4 sm:$0xff]  }
 0xe60   : > { %4811 = vrot.lane.b32.xlu1 %v16595_v51, %s14851_s20  ;;  %v4633_v51 = vpop.permute.xlu0 %4632 }
 0xe64   : > { %4825 = vrot.lane.b32.xlu1 %v16590_v9, %s14851_s20  ;;  %v13303_v9 = vld [vmem:[%s15805_s21 + $0x110] ss:$12 sps:$4 sm:$0xff]  }
 0xe68   : > { %4797 = vrot.lane.b32.xlu1 %v16604_v10, %s14851_s20  ;;  %v4651_v10 = vpop.permute.xlu0 %4650 }
 0xe6c   : > { %4815 = vrot.lane.b32.xlu1 %v16612_v13, %s14851_s20 }
 0xe70   : > { %4829 = vrot.lane.b32.xlu1 %v16607_v12, %s14851_s20  ;;  %v4635_v12 = vpop.permute.xlu0 %4634 }
 0xe74   : > { %4801 = vrot.lane.b32.xlu1 %v16621_v14, %s14851_s20  ;;  %v4653_v14 = vpop.permute.xlu0 %4652 }
 0xe78   : > { %4819 = vrot.lane.b32.xlu1 %v16629_v16, %s14851_s20  ;;  %v4667_v16 = vpop.permute.xlu0 %4666 }
 0xe7c   : > { %4833 = vrot.lane.b32.xlu1 %v16624_v57, %s14851_s20 }
 0xe80   : > { %4962 = vrot.lane.b32.xlu1 %v16644_v63, %s14851_s20 }
 0xe84   : > { %4964 = vrot.lane.b32.xlu1 %v16650_v19, %s14851_s20  ;;  %v4639_v19 = vpop.permute.xlu0 %4638 }
 0xe88   : > { %4966 = vrot.lane.b32.xlu1 %v16654_v21, %s14851_s20 }
 0xe8c   : > { %4968 = vrot.lane.b32.xlu1 %v16666_v26, %s14851_s20 }
 0xe90   : > { %4970 = vrot.lane.b32.xlu1 %v16676_v29, %s14851_s20 }
 0xe94   : > { %4972 = vrot.lane.b32.xlu1 %v16685_v41, %s14851_s20 }
 0xe98   : > { %4974 = vrot.lane.b32.xlu1 %v16695_v53, %s14851_s20 }
 0xe9c   : > { %v4404_v52 = vpop.xlane.xlu1 %4403  ;;  %4976 = vrot.lane.b32.xlu1 %v16704_v31, %s14851_s20 }
 0xe9d   : > { %13444 = vrcp.f32 %v4404_v52 }
 0xea0   : > { %v4407_v7 = vpop.xlane.xlu1 %4406  ;;  %4861 = vrot.lane.b32.xlu1 %v16737_v37, %s14851_s20 }
 0xea1   : > { %13446 = vrcp.f32 %v4407_v7 }
 0xea4   : > { %v4649_v55 = vpop.permute.xlu1 %4648  ;;  %4978 = vrot.lane.b32.xlu1 %v16657_v23, %s14851_s20  ;;  %v4657_v23 = vpop.permute.xlu0 %4656 }
 0xea5   : > { %11912 = vmatprep.subr.bf16.mxu0 %v4649_v55 }
 0xea7   : > { %v13445_v42 = vpop.eup %13444 }
 0xea8   : > { %4982 = vrot.lane.b32.xlu1 %v16671_v28, %s14851_s20  ;;  %v4409_v38 = vmul.f32 %v13445_v42, %v16758_v3  ;;  %v4665_v13 = vpop.permute.xlu1 %4664  ;;  %v4671_v28 = vpop.permute.xlu0 %4670 }
 0xeab   : > { %v13447_v58 = vpop.eup %13446 }
 0xeac   : > { %v4411_v60 = vmul.f32 %v13447_v58, %v13443_v25  ;;  %4986 = vrot.lane.b32.xlu1 %v16690_v46, %s14851_s20  ;;  %v4637_v57 = vpop.permute.xlu1 %4636  ;;  %v4643_v41 = vpop.permute.xlu0 %4642 }
 0xeae   : > { %v4412_v22 = vpack.c.bf16 %v4411_v60, %v4409_v38 }
 0xeb0   : > { %12529 = vmatmul.mubr.msk.bf16.vlgmr.msra.gmra.mrb[52].mxu1 %vm2497_vm4, %v4412_v22  ;;  %4990 = vrot.lane.b32.xlu1 %v16712_v47, %s14851_s20  ;;  %v4655_v63 = vpop.permute.xlu1 %4654  ;;  %v4661_v53 = vpop.permute.xlu0 %4660 }
 0xeb1   : > { %12533 = vmatpush3.bf16.msra.mxu1 %v13300_v2  ;;  %12540 = vmatprep.mubr.msk.bf16.mxu1 %vm14850_vm2, %v18354_v27 }
 0xeb2   : > { %12534 = vmatprep.subr.bf16.mxu1 %v18354_v27 }
 0xeb4   : > { %v4669_v21 = vpop.permute.xlu1 %4668  ;;  %v4675_v47 = vpop.permute.xlu0 %4674 }
 0xeb5   : > { %12535 = vmatpush3.bf16.msra.mxu1 %v13301_v8 }
 0xeb6   : > { %12536 = vmatprep.subr.bf16.mxu1 %v18354_v27 }
 0xeb8   : > { %v4641_v26 = vpop.permute.xlu1 %4640  ;;  %v4647_v54 = vpop.permute.xlu0 %4646 }
 0xeb9   : > { %12537 = vmatpush3.bf16.msra.mxu1 %v13302_v45 }
 0xeba   : > { %12538 = vmatprep.subr.bf16.mxu1 %v18354_v27 }
 0xebc   : > { %v4659_v29 = vpop.permute.xlu1 %4658  ;;  %v4806_v48 = vpop.permute.xlu0 %4805 }
 0xebd   : > { %12539 = vmatpush3.bf16.msra.mxu1 %v13303_v9 }
 0xebe   : > { %12544 = vmatprep.subr.bf16.mxu1 %v18354_v27 }
 0xec0   : > { %v4673_v46 = vpop.permute.xlu1 %4672  ;;  %v4679_v34 = vpop.permute.xlu0 %4678 }
 0xec4   : > { %v4645_v31 = vpop.permute.xlu1 %4644  ;;  %v4792_v43 = vpop.permute.xlu0 %4791 }
 0xec8   : > { %v4663_v37 = vpop.permute.xlu1 %4662  ;;  %v4810_v62 = vpop.permute.xlu0 %4809 }
 0xecc   : > { %v4677_v61 = vpop.permute.xlu1 %4676  ;;  %v4824_v30 = vpop.permute.xlu0 %4823 }
 0xed0   : > { %v4790_v0 = vpop.permute.xlu1 %4789  ;;  %v4796_v56 = vpop.permute.xlu0 %4795 }
 0xed4   : > { %v4808_v40 = vpop.permute.xlu1 %4807  ;;  %v4814_v49 = vpop.permute.xlu0 %4813 }
 0xed8   : > { %v4822_v25 = vpop.permute.xlu1 %4821  ;;  %v4828_v5 = vpop.permute.xlu0 %4827 }
 0xedc   : > { %v4794_v18 = vpop.permute.xlu1 %4793  ;;  %v4800_v7 = vpop.permute.xlu0 %4799 }
 0xee0   : > { %v4812_v32 = vpop.permute.xlu1 %4811  ;;  %v4818_v42 = vpop.permute.xlu0 %4817 }
 0xee4   : > { %v4826_v39 = vpop.permute.xlu1 %4825  ;;  %v4832_v38 = vpop.permute.xlu0 %4831 }
 0xee8   : > { %v4798_v50 = vpop.permute.xlu1 %4797  ;;  %v4804_v2 = vpop.permute.xlu0 %4803 }
 0xeec   : > { %v4816_v52 = vpop.permute.xlu1 %4815  ;;  %v4836_v8 = vpop.permute.xlu0 %4835 }
 0xef0   : > { %v4830_v55 = vpop.permute.xlu1 %4829  ;;  %v4947_v45 = vpop.permute.xlu0 %4946 }
 0xef4   : > { %v4802_v58 = vpop.permute.xlu1 %4801  ;;  %v4949_v9 = vpop.permute.xlu0 %4948 }
 0xef8   : > { %v4820_v60 = vpop.permute.xlu1 %4819 }
 0xefc   : > { %v4834_v22 = vpop.permute.xlu1 %4833 }
 0xf83   : > { %v4451_v44 = vpop.f32.mrb[52].mxu1 }
 0xf84   : > { %v12530_v4 = vpop.f32.mrb[53].mxu1 }
 0xf85   : > { %v4454_v20 = vpop.f32.mrb[54].mxu1 }
 0xf86   : > { %v4458_v24 = vpack.c.bf16 %v4454_v20, %v4451_v44  ;;  %v12531_v3 = vpop.f32.mrb[55].mxu1 }
 0xf88   : > { %11183 = vmatmul.mubr.msk.bf16.vlgmr.msra.gmra.mrb[32].mxu0 %vm2445_vm3, %v4458_v24  ;;  %12541 = vmatmul.mubr.msk.bf16.vlgmr.msra.gmra.mrb[56].mxu1 %vm2445_vm3, %v4458_v24 }
 0xf89   : > { %11913 = vmatpush3.bf16.msra.mxu0 %v4633_v51  ;;  %12545 = vmatpush3.bf16.msra.mxu1 %v4665_v13  ;;  %v4951_v51 = vpop.permute.xlu0 %4950 }
 0xf8a   : > { %11914 = vmatprep.subr.bf16.mxu0 %v4651_v10  ;;  %12546 = vmatprep.subr.bf16.mxu1 %v18354_v27  ;;  %v4963_v10 = vpop.permute.xlu1 %4962 }
 0xf8b   : > { %4739 = vmatprep.mubr.bf16.mxu0 %v15885_v6  ;;  %12560 = vmatprep.mubr.msk.bf16.mxu1 %vm14850_vm2, %v18354_v27 }
 0xf8d   : > { %11915 = vmatpush3.bf16.msra.mxu0 %v4635_v12  ;;  %12547 = vmatpush3.bf16.msra.mxu1 %v4667_v16  ;;  %v4953_v13 = vpop.permute.xlu0 %4952 }
 0xf8e   : > { %11916 = vmatprep.subr.bf16.mxu0 %v4653_v14  ;;  %12548 = vmatprep.subr.bf16.mxu1 %v18354_v27  ;;  %v4965_v12 = vpop.permute.xlu1 %4964 }
 0xf91   : > { %11917 = vmatpush3.bf16.msra.mxu0 %v4637_v57  ;;  %12549 = vmatpush3.bf16.msra.mxu1 %v4669_v21  ;;  %v4955_v57 = vpop.permute.xlu0 %4954 }
 0xf92   : > { %11918 = vmatprep.subr.bf16.mxu0 %v4655_v63  ;;  %12550 = vmatprep.subr.bf16.mxu1 %v18354_v27  ;;  %v4967_v14 = vpop.permute.xlu1 %4966 }
 0xf95   : > { %11919 = vmatpush3.bf16.msra.mxu0 %v4639_v19  ;;  %12551 = vmatpush3.bf16.msra.mxu1 %v4671_v28  ;;  %v4957_v19 = vpop.permute.xlu0 %4956 }
 0xf96   : > { %11920 = vmatprep.subr.bf16.mxu0 %v4657_v23  ;;  %12552 = vmatprep.subr.bf16.mxu1 %v18354_v27  ;;  %v4969_v16 = vpop.permute.xlu1 %4968 }
 0xf99   : > { %11921 = vmatpush3.bf16.msra.mxu0 %v4641_v26  ;;  %12553 = vmatpush3.bf16.msra.mxu1 %v4673_v46  ;;  %v4959_v23 = vpop.permute.xlu0 %4958 }
 0xf9a   : > { %11922 = vmatprep.subr.bf16.mxu0 %v4659_v29  ;;  %12554 = vmatprep.subr.bf16.mxu1 %v18354_v27  ;;  %v4971_v63 = vpop.permute.xlu1 %4970 }
 0xf9d   : > { %11923 = vmatpush3.bf16.msra.mxu0 %v4643_v41  ;;  %12555 = vmatpush3.bf16.msra.mxu1 %v4675_v47  ;;  %v4961_v29 = vpop.permute.xlu0 %4960 }
 0xf9e   : > { %11924 = vmatprep.subr.bf16.mxu0 %v4661_v53  ;;  %12556 = vmatprep.subr.bf16.mxu1 %v18354_v27  ;;  %v4973_v21 = vpop.permute.xlu1 %4972 }
 0xfa1   : > { %11925 = vmatpush3.bf16.msra.mxu0 %v4645_v31  ;;  %12557 = vmatpush3.bf16.msra.mxu1 %v4677_v61  ;;  %v4705_v46 = vpop.permute.xlu0 %4704 }
 0xfa2   : > { %11926 = vmatprep.subr.bf16.mxu0 %v4663_v37  ;;  %12558 = vmatprep.subr.bf16.mxu1 %v18354_v27  ;;  %v4975_v26 = vpop.permute.xlu1 %4974 }
 0xfa5   : > { %11927 = vmatpush3.bf16.msra.mxu0 %v4647_v54  ;;  %12559 = vmatpush3.bf16.msra.mxu1 %v4679_v34  ;;  %v4981_v31 = vpop.permute.xlu0 %4980 }
 0xfa6   : > { %11943 = vmatprep.subr.bf16.mxu0 %v4806_v48  ;;  %12564 = vmatprep.subr.bf16.mxu1 %v18354_v27  ;;  %v4977_v28 = vpop.permute.xlu1 %4976 }
 0xfa8   : > { %4740 = vmatmul.mubr.bf16.vlgmr.msra.gmra.mrb[52].mxu0 %v15896_v15  ;;  %12561 = vmatmul.mubr.bf16.vlgmr.msra.gmra.mrb[60].mxu1 %v15899_v17 }
 0xfa9   : > { %11944 = vmatpush3.bf16.msra.mxu0 %v4790_v0  ;;  %12565 = vmatpush3.bf16.msra.mxu1 %v4822_v25  ;;  %v4985_v37 = vpop.permute.xlu0 %4984 }
 0xfaa   : > { %11945 = vmatprep.subr.bf16.mxu0 %v4808_v40  ;;  %12566 = vmatprep.subr.bf16.mxu1 %v18354_v27  ;;  %v4862_v41 = vpop.permute.xlu1 %4861 }
 0xfab   : > { %4896 = vmatprep.mubr.bf16.mxu0 %v15885_v6  ;;  %12580 = vmatprep.mubr.msk.bf16.mxu1 %vm14850_vm2, %v18354_v27 }
 0xfad   : > { %11946 = vmatpush3.bf16.msra.mxu0 %v4792_v43  ;;  %12567 = vmatpush3.bf16.msra.mxu1 %v4824_v30  ;;  %v4989_v61 = vpop.permute.xlu0 %4988 }
 0xfae   : > { %11947 = vmatprep.subr.bf16.mxu0 %v4810_v62  ;;  %12568 = vmatprep.subr.bf16.mxu1 %v18354_v27  ;;  %v4979_v53 = vpop.permute.xlu1 %4978 }
 0xfb1   : > { %11948 = vmatpush3.bf16.msra.mxu0 %v4794_v18  ;;  %12569 = vmatpush3.bf16.msra.mxu1 %v4826_v39  ;;  %v4993_v0 = vpop.permute.xlu0 %4992 }
 0xfb2   : > { %11949 = vmatprep.subr.bf16.mxu0 %v4812_v32  ;;  %12570 = vmatprep.subr.bf16.mxu1 %v18354_v27  ;;  %v4983_v47 = vpop.permute.xlu1 %4982 }
 0xfb5   : > { %11950 = vmatpush3.bf16.msra.mxu0 %v4796_v56  ;;  %12571 = vmatpush3.bf16.msra.mxu1 %v4828_v5 }
 0xfb6   : > { %11951 = vmatprep.subr.bf16.mxu0 %v4814_v49  ;;  %12572 = vmatprep.subr.bf16.mxu1 %v18354_v27  ;;  %v4987_v54 = vpop.permute.xlu1 %4986 }
 0xfb9   : > { %11952 = vmatpush3.bf16.msra.mxu0 %v4798_v50  ;;  %12573 = vmatpush3.bf16.msra.mxu1 %v4830_v55 }
 0xfba   : > { %11953 = vmatprep.subr.bf16.mxu0 %v4816_v52  ;;  %12574 = vmatprep.subr.bf16.mxu1 %v18354_v27  ;;  %v4991_v48 = vpop.permute.xlu1 %4990 }
 0xfbd   : > { %11954 = vmatpush3.bf16.msra.mxu0 %v4800_v7  ;;  %12575 = vmatpush3.bf16.msra.mxu1 %v4832_v38 }
 0xfbe   : > { %11955 = vmatprep.subr.bf16.mxu0 %v4818_v42  ;;  %12576 = vmatprep.subr.bf16.mxu1 %v18354_v27 }
 0xfc1   : > { %11956 = vmatpush3.bf16.msra.mxu0 %v4802_v58  ;;  %12577 = vmatpush3.bf16.msra.mxu1 %v4834_v22 }
 0xfc2   : > { %11957 = vmatprep.subr.bf16.mxu0 %v4820_v60  ;;  %12578 = vmatprep.subr.bf16.mxu1 %v18354_v27 }
 0xfc5   : > { %11958 = vmatpush3.bf16.msra.mxu0 %v4804_v2  ;;  %12579 = vmatpush3.bf16.msra.mxu1 %v4836_v8 }
 0xfc6   : > { %12584 = vmatprep.subr.bf16.mxu1 %v18354_v27  ;;  %11974 = vmatprep.subr.bf16.mxu0 %v4963_v10 }
 0xfc8   : > { %4897 = vmatmul.mubr.bf16.vlgmr.msra.gmra.mrb[56].mxu0 %v15896_v15  ;;  %12581 = vmatmul.mubr.bf16.vlgmr.msra.gmra.mrb[64].mxu1 %v15899_v17 }
 0xfc9   : > { %5053 = vmatprep.mubr.bf16.mxu0 %v15885_v6  ;;  %12600 = vmatprep.mubr.msk.bf16.mxu1 %vm14850_vm2, %v18354_v27 }
 0xfca   : > { %11975 = vmatpush3.bf16.msra.mxu0 %v4947_v45  ;;  %12585 = vmatpush3.bf16.msra.mxu1 %v4979_v53 }
 0xfcb   : > { %11976 = vmatprep.subr.bf16.mxu0 %v4965_v12  ;;  %12586 = vmatprep.subr.bf16.mxu1 %v18354_v27 }
 0xfce   : > { %11977 = vmatpush3.bf16.msra.mxu0 %v4949_v9  ;;  %12587 = vmatpush3.bf16.msra.mxu1 %v4981_v31 }
 0xfcf   : > { %11978 = vmatprep.subr.bf16.mxu0 %v4967_v14  ;;  %12588 = vmatprep.subr.bf16.mxu1 %v18354_v27 }
 0xfd2   : > { %11979 = vmatpush3.bf16.msra.mxu0 %v4951_v51  ;;  %12589 = vmatpush3.bf16.msra.mxu1 %v4983_v47 }
 0xfd3   : > { %11980 = vmatprep.subr.bf16.mxu0 %v4969_v16  ;;  %12590 = vmatprep.subr.bf16.mxu1 %v18354_v27 }
 0xfd6   : > { %11981 = vmatpush3.bf16.msra.mxu0 %v4953_v13  ;;  %12591 = vmatpush3.bf16.msra.mxu1 %v4985_v37 }
 0xfd7   : > { %11982 = vmatprep.subr.bf16.mxu0 %v4971_v63  ;;  %12592 = vmatprep.subr.bf16.mxu1 %v18354_v27 }
 0xfda   : > { %11983 = vmatpush3.bf16.msra.mxu0 %v4955_v57  ;;  %12593 = vmatpush3.bf16.msra.mxu1 %v4987_v54 }
 0xfdb   : > { %11984 = vmatprep.subr.bf16.mxu0 %v4973_v21  ;;  %12594 = vmatprep.subr.bf16.mxu1 %v18354_v27 }
 0xfde   : > { %11985 = vmatpush3.bf16.msra.mxu0 %v4957_v19  ;;  %12595 = vmatpush3.bf16.msra.mxu1 %v4989_v61 }
 0xfdf   : > { %11986 = vmatprep.subr.bf16.mxu0 %v4975_v26  ;;  %12596 = vmatprep.subr.bf16.mxu1 %v18354_v27 }
 0xfe2   : > { %11987 = vmatpush3.bf16.msra.mxu0 %v4959_v23  ;;  %12597 = vmatpush3.bf16.msra.mxu1 %v4991_v48 }
 0xfe3   : > { %11988 = vmatprep.subr.bf16.mxu0 %v4977_v28  ;;  %12598 = vmatprep.subr.bf16.mxu1 %v18354_v27 }
 0xfe6   : > { %11989 = vmatpush3.bf16.msra.mxu0 %v4961_v29  ;;  %12599 = vmatpush3.bf16.msra.mxu1 %v4993_v0 }
 0xfe7   : > { %12604 = vmatprep.subr.bf16.mxu0 %v18354_v27  ;;  %12610 = vmatprep.subr.bf16.mxu1 %v18354_v27 }
 0xfe9   : > { %5054 = vmatmul.mubr.bf16.vlgmr.msra.gmra.mrb[60].mxu0 %v15896_v15  ;;  %12601 = vmatmul.mubr.bf16.vlgmr.msra.gmra.mrb[68].mxu1 %v15899_v17 }
 0xfea   : > { %12606 = vmatprep.mubr.msk.bf16.mxu0 %vm14850_vm2, %v18354_v27  ;;  %12612 = vmatprep.mubr.msk.bf16.mxu1 %vm14850_vm2, %v18354_v27 }
0x105b   : > { %v4603_v34 = vpop.f32.mrb[56].mxu1 }
0x105c   : > { %v16902_v40 = vadd.f32 %v4603_v34, %v16732_v36  ;;  %v12542_v44 = vpop.f32.mrb[57].mxu1 }
0x105d   : > { %v4606_v4 = vpop.f32.mrb[58].mxu1 }
0x105e   : > { %v16905_v20 = vadd.f32 %v4606_v4, %v16734_v1  ;;  %v12543_v24 = vpop.f32.mrb[59].mxu1 }
0x107b   : > { %v11928_v3 = vpop.f32.mrb[52].mxu0  ;;  %v4782_v43 = vpop.f32.mrb[60].mxu1 }
0x107c   : > { %v11929_v25 = vpop.f32.mrb[53].mxu0  ;;  %v12562_v62 = vpop.f32.mrb[61].mxu1 }
0x107d   : > { %v11930_v18 = vadd.f32 %v11929_v25, %v11928_v3  ;;  %v11931_v30 = vpop.f32.mrb[54].mxu0  ;;  %v4785_v32 = vpop.f32.mrb[62].mxu1 }
0x107e   : > { %v11932_v56 = vpop.f32.mrb[55].mxu0  ;;  %v12563_v39 = vpop.f32.mrb[63].mxu1 }
0x107f   : > { %v4742_v49 = vadd.f32 %v11930_v18, %v4705_v46  ;;  %v11933_v50 = vadd.f32 %v11932_v56, %v11931_v30 }
0x1081   : > { %v4783_v5 = vadd.f32 %v4782_v43, %v4742_v49  ;;  %v4745_v36 = vadd.f32 %v11933_v50, %v4705_v46  ;;  %v13304_v50 = vld [vmem:[%s15805_s21 + $0x120] ss:$12 sps:$4 sm:$0xff]  }
0x1083   : > { %v4786_v52 = vadd.f32 %v4785_v32, %v4745_v36  ;;  %v13310_v36 = vld [vmem:[%s15805_s21 + $0x13c] ss:$12 sps:$4 sm:$0xff]  }
0x1085   : > { %v5103_v7 = vpack.c.bf16 %v4786_v52, %v4783_v5  ;;  %v13306_v5 = vld [vmem:[%s15805_s21 + $0x124] ss:$12 sps:$4 sm:$0xff]  }
0x1086   : > { %v13308_v52 = vld [vmem:[%s15805_s21 + $0x138] ss:$12 sps:$4 sm:$0xff]  }
0x109b   : > { %v11959_v55 = vpop.f32.mrb[56].mxu0  ;;  %v4939_v42 = vpop.f32.mrb[64].mxu1 }
0x109c   : > { %v11960_v1 = vpop.f32.mrb[57].mxu0  ;;  %v12582_v58 = vpop.f32.mrb[65].mxu1 }
0x109d   : > { %v11961_v38 = vadd.f32 %v11960_v1, %v11959_v55  ;;  %v11962_v60 = vpop.f32.mrb[58].mxu0  ;;  %v4942_v2 = vpop.f32.mrb[66].mxu1  ;;  %v13312_v55 = vld [vmem:[%s15805_s21 + $0x150] ss:$12 sps:$4 sm:$0xff]  }
0x109e   : > { %v11963_v22 = vpop.f32.mrb[59].mxu0  ;;  %v12583_v8 = vpop.f32.mrb[67].mxu1 }
0x109f   : > { %v4899_v45 = vadd.f32 %v11961_v38, %v4862_v41  ;;  %v11964_v9 = vadd.f32 %v11963_v22, %v11962_v60  ;;  %v13307_v22 = vld [vmem:[%s15805_s21 + $0x128] ss:$12 sps:$4 sm:$0xff]  }
0x10a1   : > { %v4902_v51 = vadd.f32 %v11964_v9, %v4862_v41  ;;  %v4940_v10 = vadd.f32 %v4939_v42, %v4899_v45  ;;  %v13311_v45 = vld [vmem:[%s15805_s21 + $0x140] ss:$12 sps:$4 sm:$0xff]   ;;  %v13315_v9 = vld [vmem:[%s15805_s21 + $0x158] ss:$12 sps:$4 sm:$0xff]  }
0x10a3   : > { %v4943_v12 = vadd.f32 %v4942_v2, %v4902_v51  ;;  %v13318_v51 = vld [vmem:[%s15805_s21 + $0x16c] ss:$12 sps:$4 sm:$0xff]  }
0x10a5   : > { %v5104_v13 = vpack.c.bf16 %v4943_v12, %v4940_v10  ;;  %v13316_v10 = vld [vmem:[%s15805_s21 + $0x168] ss:$12 sps:$4 sm:$0xff]   ;;  %v13319_v12 = vld [vmem:[%s15805_s21 + $0x170] ss:$12 sps:$4 sm:$0xff]  }
0x10a7   : > { %v5109_v14 = vsel %vm2445_vm3, %v5104_v13, 0  ;;  %v13320_v13 = vld [vmem:[%s15773_s13 + $0xc8] ss:$12 sps:$4 sm:$0xff]  }
0x10a8   : > { %12605 = vmatpush3.bf16.xpose.msra.mxu0 %v5109_v14  ;;  %v13323_v14 = vld [vmem:[%s15773_s13 + $0xe0] ss:$12 sps:$4 sm:$0xff]  }
0x10a9   : > { %5292 = vmatprep.subr.bf16.mxu0 %v13306_v5  ;;  %v17099_v5 = vld [vmem:[%s15773_s13 + $0x218] ss:$12 sps:$4 sm:$0xff]  }
0x10af   : > { %12607 = vmatmul.mubr.msk.bf16.vlgmr.msra.gmra.mrb[64].mxu0 %vm2445_vm3, %v5103_v7  ;;  %v13314_v7 = vld [vmem:[%s15805_s21 + $0x154] ss:$12 sps:$4 sm:$0xff]  }
0x10b0   : > { %5324 = vmatprep.mubr.bf16.mxu0 %v14852_v11  ;;  %5293 = vmatpush1.bf16.msra.mxu0 %v13304_v50  ;;  %v17096_v50 = vld [vmem:[%s15773_s13 + $0x98] ss:$12 sps:$4 sm:$0xff]  }
0x10b1   : > { %5294 = vmatprep.subr.bf16.mxu0 %v13310_v36  ;;  %v17104_v36 = vld [vmem:[%s15773_s13 + $0x170] ss:$12 sps:$4 sm:$0xff]  }
0x10b4   : > { %5295 = vmatpush1.bf16.msra.mxu0 %v13308_v52  ;;  %v17113_v52 = vld [vmem:[%s15785_s25 + $0x8] ss:$12 sps:$4 sm:$0xff]  }
0x10b5   : > { %5296 = vmatprep.subr.bf16.mxu0 %v13314_v7  ;;  %v17116_v7 = vld [vmem:[%s15785_s25 + $0x188] ss:$12 sps:$4 sm:$0xff]  }
0x10b8   : > { %5297 = vmatpush1.bf16.msra.mxu0 %v13312_v55  ;;  %v17121_v55 = vld [vmem:[%s15785_s25 + $0xe0] ss:$12 sps:$4 sm:$0xff]  }
0x10b9   : > { %5298 = vmatprep.subr.bf16.mxu0 %v13318_v51  ;;  %v13369_v51 = vld [vmem:[%s15795_s2 + $0x8] ss:$12 sps:$4 sm:$0xff]  }
0x10bc   : > { %v11990_v57 = vpop.f32.mrb[60].mxu0  ;;  %v5096_v61 = vpop.f32.mrb[68].mxu1  ;;  %5299 = vmatpush1.bf16.msra.mxu0 %v13316_v10  ;;  %v17198_v10 = vld [vmem:[%s15795_s2 + $0xe0] ss:$12 sps:$4 sm:$0xff]  }
0x10bd   : > { %v11991_v16 = vpop.f32.mrb[61].mxu0  ;;  %v12602_v48 = vpop.f32.mrb[69].mxu1  ;;  %12014 = vmatprep.subr.bf16.mxu0 %v13320_v13 }
0x10be   : > { %v11992_v63 = vadd.f32 %v11991_v16, %v11990_v57  ;;  %v11993_v19 = vpop.f32.mrb[62].mxu0  ;;  %v5099_v0 = vpop.f32.mrb[70].mxu1  ;;  %v16943_v57 = vld [vmem:[%s15773_s13 + $0x20] ss:$12 sps:$4 sm:$0xff]   ;;  %v13322_v16 = vld [vmem:[%s15773_s13 + $0x188] ss:$12 sps:$4 sm:$0xff]  }
0x10bf   : > { %v11994_v21 = vpop.f32.mrb[63].mxu0  ;;  %v12603_v34 = vpop.f32.mrb[71].mxu1  ;;  %v17016_v48 = vld [vmem:[%s15785_s25 + $0x50] ss:$12 sps:$4 sm:$0xff]  }
0x10c0   : > { %v11995_v23 = vadd.f32 %v11994_v21, %v11993_v19  ;;  %v16952_v19 = vld [vmem:[%s15773_s13 + $0x38] ss:$12 sps:$4 sm:$0xff]   ;;  %v13325_v21 = vld [vmem:[%s15773_s13 + $0x1a0] ss:$12 sps:$4 sm:$0xff]  }
0x10c1   : > { %v17026_v34 = vld [vmem:[%s15785_s25 + $0x1d0] ss:$12 sps:$4 sm:$0xff]  }
0x1182   : > { %v5145_v26 = vpop.f32.mrb[64].mxu0 }
0x1183   : > { %v5152_v28 = vmul.f32 0.125, %v5145_v26  ;;  %v12608_v29 = vpop.f32.mrb[65].mxu0  ;;  %v16964_v26 = vld [vmem:[%s15773_s13 + $0x128] ss:$12 sps:$4 sm:$0xff]  }
0x1184   : > { %v5148_v41 = vpop.f32.mrb[66].mxu0  ;;  %v16971_v29 = vld [vmem:[%s15773_s13 + $0x80] ss:$12 sps:$4 sm:$0xff]  }
0x1185   : > { %v5154_v46 = vadd.f32 %v16750_v59, %v5152_v28  ;;  %v5153_v53 = vmul.f32 0.125, %v5148_v41  ;;  %v12609_v31 = vpop.f32.mrb[67].mxu0  ;;  %v13331_v28 = vld [vmem:[%s15773_s13 + $0x1d0] ss:$12 sps:$4 sm:$0xff]   ;;  %v16976_v41 = vld [vmem:[%s15773_s13 + $0x158] ss:$12 sps:$4 sm:$0xff]  }
0x1186   : > { %v16991_v31 = vld [vmem:[%s15785_s25 + $0xc8] ss:$12 sps:$4 sm:$0xff]  }
0x1187   : > { %v5155_v47 = vadd.f32 %v16754_v33, %v5153_v53  ;;  %v5156_v37 = vsel %vm2497_vm4, %v5154_v46, -inf  ;;  %v16986_v53 = vld [vmem:[%s15773_s13 + $0xb0] ss:$12 sps:$4 sm:$0xff]  }
0x1188   : > { %5157 = vmax.xlane.f32.xlu1 %v5156_v37  ;;  %v17001_v37 = vld [vmem:[%s15785_s25 + $0x20] ss:$12 sps:$4 sm:$0xff]  }
0x1189   : > { %v5159_v54 = vsel %vm2497_vm4, %v5155_v47, -inf }
0x118a   : > { %5160 = vmax.xlane.f32.xlu0 %v5159_v54  ;;  %v17006_v54 = vld [vmem:[%s15785_s25 + $0xf8] ss:$12 sps:$4 sm:$0xff]  }
0x1199   : > { %5018 = vrot.lane.b32.xlu1 %v16745_v35, %s14851_s20 }
0x119d   : > { %6552 = vrot.lane.b32.xlu1 %v13320_v13, %s14851_s20  ;;  %v17202_v13 = vld [vmem:[%s15795_s2 + $0xf8] ss:$12 sps:$4 sm:$0xff]  }
0x11a1   : > { %6554 = vrot.lane.b32.xlu1 %v13323_v14, %s14851_s20 }
0x11a5   : > { %6538 = vrot.lane.b32.xlu1 %v16943_v57, %s14851_s20 }
0x11a9   : > { %6568 = vrot.lane.b32.xlu1 %v13322_v16, %s14851_s20 }
0x1215   : > { %v5158_v44 = vpop.xlane.xlu1 %5157 }
0x1216   : > { %v5162_v4 = vsub.f32 %v5154_v46, %v5158_v44  ;;  %v16981_v46 = vld [vmem:[%s15773_s13 + $0x200] ss:$12 sps:$4 sm:$0xff]   ;;  %v17031_v44 = vld [vmem:[%s15785_s25 + $0x80] ss:$12 sps:$4 sm:$0xff]  }
0x1217   : > { %v5161_v59 = vpop.xlane.xlu0 %5160 }
0x1218   : > { %v5164_v24 = vmul.f32 1.442695, %v5162_v4  ;;  %v5163_v3 = vsub.f32 %v5155_v47, %v5161_v59  ;;  %v16996_v47 = vld [vmem:[%s15773_s13 + $0x230] ss:$12 sps:$4 sm:$0xff]  }
0x1219   : > { %v5019_v43 = vpop.permute.xlu1 %5018  ;;  %v17036_v4 = vld [vmem:[%s15785_s25 + $0x158] ss:$12 sps:$4 sm:$0xff]   ;;  %v17041_v59 = vld [vmem:[%s15785_s25 + $0x200] ss:$12 sps:$4 sm:$0xff]  }
0x121a   : > { %13448 = vpow2.f32 %v5164_v24  ;;  %v5166_v33 = vmul.f32 1.442695, %v5163_v3  ;;  %v5056_v25 = vadd.f32 %v11992_v63, %v5019_v43  ;;  %v5059_v62 = vadd.f32 %v11995_v23, %v5019_v43  ;;  %v13326_v63 = vld [vmem:[%s15773_s13 + $0xf8] ss:$12 sps:$4 sm:$0xff]   ;;  %v16959_v23 = vld [vmem:[%s15773_s13 + $0x50] ss:$12 sps:$4 sm:$0xff]  }
0x121b   : > { %6556 = vrot.lane.b32.xlu1 %v13326_v63, %s14851_s20  ;;  %v17046_v24 = vld [vmem:[%s15785_s25 + $0xb0] ss:$12 sps:$4 sm:$0xff]  }
0x121c   : > { %13450 = vpow2.f32 %v5166_v33  ;;  %v5097_v18 = vadd.f32 %v5096_v61, %v5056_v25  ;;  %v5100_v35 = vadd.f32 %v5099_v0, %v5059_v62  ;;  %v17011_v61 = vld [vmem:[%s15785_s25 + $0x1a0] ss:$12 sps:$4 sm:$0xff]   ;;  %v17021_v0 = vld [vmem:[%s15785_s25 + $0x128] ss:$12 sps:$4 sm:$0xff]   ;;  %v17051_v3 = vld [vmem:[%s15785_s25 + $0x230] ss:$12 sps:$4 sm:$0xff]  }
0x121d   : > { %v17056_v62 = vld [vmem:[%s15773_s13 + $0x8] ss:$12 sps:$4 sm:$0xff]  }
0x121e   : > { %v5179_v30 = vpack.c.bf16 %v5100_v35, %v5097_v18 }
0x121f   : > { %6540 = vrot.lane.b32.xlu1 %v16952_v19, %s14851_s20 }
0x1220   : > { %12611 = vmatpush3.bf16.msra.mxu1 %v5179_v30  ;;  %v17067_v30 = vld [vmem:[%s15773_s13 + $0x1b8] ss:$12 sps:$4 sm:$0xff]  }
0x1221   : > { %12616 = vmatprep.subr.bf16.mxu1 %v18354_v27 }
0x1223   : > { %6570 = vrot.lane.b32.xlu1 %v13325_v21, %s14851_s20 }
0x1224   : > { %v13449_v32 = vpop.eup %13448 }
0x1225   : > { %v5168_v56 = vsel %vm2497_vm4, %v13449_v32, 0.0 }
0x1226   : > { %v13451_v39 = vpop.eup %13450  ;;  %5169 = vadd.xlane.f32.xlu0 %v5168_v56  ;;  %v17079_v56 = vld [vmem:[%s15773_s13 + $0x68] ss:$12 sps:$4 sm:$0xff]  }
0x1227   : > { %v5171_v49 = vsel %vm2497_vm4, %v13451_v39, 0.0  ;;  %6542 = vrot.lane.b32.xlu1 %v16959_v23, %s14851_s20 }
0x122a   : > { %5172 = vadd.xlane.f32.xlu0 %v5171_v49  ;;  %v17087_v49 = vld [vmem:[%s15773_s13 + $0x140] ss:$12 sps:$4 sm:$0xff]  }
0x122b   : > { %6560 = vrot.lane.b32.xlu1 %v16964_v26, %s14851_s20 }
0x122f   : > { %6574 = vrot.lane.b32.xlu1 %v13331_v28, %s14851_s20 }
0x1233   : > { %6546 = vrot.lane.b32.xlu1 %v16971_v29, %s14851_s20 }
0x1237   : > { %6564 = vrot.lane.b32.xlu1 %v16976_v41, %s14851_s20 }
0x123b   : > { %6578 = vrot.lane.b32.xlu1 %v16981_v46, %s14851_s20 }
0x123f   : > { %6550 = vrot.lane.b32.xlu1 %v16986_v53, %s14851_s20 }
0x1243   : > { %6709 = vrot.lane.b32.xlu1 %v16991_v31, %s14851_s20 }
0x1247   : > { %6582 = vrot.lane.b32.xlu1 %v16996_v47, %s14851_s20 }
0x124b   : > { %6695 = vrot.lane.b32.xlu1 %v17001_v37, %s14851_s20 }
0x124f   : > { %6713 = vrot.lane.b32.xlu1 %v17006_v54, %s14851_s20 }
0x1253   : > { %6727 = vrot.lane.b32.xlu1 %v17011_v61, %s14851_s20 }
0x1257   : > { %6699 = vrot.lane.b32.xlu1 %v17016_v48, %s14851_s20 }
0x125b   : > { %6717 = vrot.lane.b32.xlu1 %v17021_v0, %s14851_s20 }
0x125f   : > { %6731 = vrot.lane.b32.xlu1 %v17026_v34, %s14851_s20 }
0x1263   : > { %6703 = vrot.lane.b32.xlu1 %v17031_v44, %s14851_s20 }
0x1267   : > { %6721 = vrot.lane.b32.xlu1 %v17036_v4, %s14851_s20 }
0x126b   : > { %6735 = vrot.lane.b32.xlu1 %v17041_v59, %s14851_s20 }
0x126f   : > { %6707 = vrot.lane.b32.xlu1 %v17046_v24, %s14851_s20 }
0x1273   : > { %6739 = vrot.lane.b32.xlu1 %v17051_v3, %s14851_s20 }
0x1277   : > { %6850 = vrot.lane.b32.xlu1 %v13369_v51, %s14851_s20 }
0x12b3   : > { %v5170_v42 = vpop.xlane.xlu0 %5169 }
0x12b4   : > { %13452 = vrcp.f32 %v5170_v42  ;;  %v17135_v42 = vld [vmem:[%s15785_s25 + $0x38] ss:$12 sps:$4 sm:$0xff]  }
0x12b7   : > { %v5173_v1 = vpop.xlane.xlu0 %5172 }
0x12b8   : > { %13454 = vrcp.f32 %v5173_v1  ;;  %v17138_v1 = vld [vmem:[%s15785_s25 + $0x1b8] ss:$12 sps:$4 sm:$0xff]  }
0x12be   : > { %v13453_v58 = vpop.eup %13452 }
0x12bf   : > { %v5175_v60 = vmul.f32 %v13453_v58, %v13449_v32  ;;  %v17071_v32 = vld [vmem:[%s15773_s13 + $0x110] ss:$12 sps:$4 sm:$0xff]   ;;  %v17143_v58 = vld [vmem:[%s15785_s25 + $0x110] ss:$12 sps:$4 sm:$0xff]  }
0x12c2   : > { %v13455_v38 = vpop.eup %13454 }
0x12c3   : > { %v5177_v2 = vmul.f32 %v13455_v38, %v13451_v39  ;;  %v17082_v39 = vld [vmem:[%s15773_s13 + $0x1e8] ss:$12 sps:$4 sm:$0xff]   ;;  %v17152_v38 = vld [vmem:[%s15785_s25 + $0x68] ss:$12 sps:$4 sm:$0xff]   ;;  %s18356_s13 = scalar_lea.vmem [#allocation25], %s15779_s12 }
0x12c5   : > { %v5178_v8 = vpack.c.bf16 %v5177_v2, %v5175_v60  ;;  %v17155_v60 = vld [vmem:[%s15785_s25 + $0x1e8] ss:$12 sps:$4 sm:$0xff]   ;;  %v17160_v2 = vld [vmem:[%s15785_s25 + $0x140] ss:$12 sps:$4 sm:$0xff]  }
0x12c7   : > { %12613 = vmatmul.mubr.msk.bf16.vlgmr.msra.gmra.mrb[72].mxu1 %vm2497_vm4, %v5178_v8  ;;  %v17172_v8 = vld [vmem:[%s15785_s25 + $0x218] ss:$12 sps:$4 sm:$0xff]  }
0x12c8   : > { %12617 = vmatpush3.bf16.msra.mxu1 %v13307_v22  ;;  %12624 = vmatprep.mubr.msk.bf16.mxu1 %vm14850_vm2, %v18354_v27  ;;  %v17169_v22 = vld [vmem:[%s15785_s25 + $0x98] ss:$12 sps:$4 sm:$0xff]  }
0x12c9   : > { %12618 = vmatprep.subr.bf16.mxu1 %v18354_v27 }
0x12cc   : > { %12619 = vmatpush3.bf16.msra.mxu1 %v13311_v45  ;;  %v17177_v45 = vld [vmem:[%s15785_s25 + $0x170] ss:$12 sps:$4 sm:$0xff]  }
0x12cd   : > { %12620 = vmatprep.subr.bf16.mxu1 %v18354_v27 }
0x12d0   : > { %12621 = vmatpush3.bf16.msra.mxu1 %v13315_v9  ;;  %v17192_v9 = vld [vmem:[%s15795_s2 + $0xc8] ss:$12 sps:$4 sm:$0xff]  }
0x12d1   : > { %12622 = vmatprep.subr.bf16.mxu1 %v18354_v27 }
0x12d4   : > { %12623 = vmatpush3.bf16.msra.mxu1 %v13319_v12  ;;  %v13371_v12 = vld [vmem:[%s15795_s2 + $0x20] ss:$12 sps:$4 sm:$0xff]  }
0x12d5   : > { %12628 = vmatprep.subr.bf16.mxu1 %v18354_v27  ;;  %6852 = vrot.lane.b32.xlu1 %v13371_v12, %s14851_s20 }
0x139a   : > { %v5217_v43 = vpop.f32.mrb[72].mxu1 }
0x139b   : > { %v12614_v33 = vpop.f32.mrb[73].mxu1 }
0x139c   : > { %v5220_v25 = vpop.f32.mrb[74].mxu1 }
0x139d   : > { %v5224_v18 = vpack.c.bf16 %v5220_v25, %v5217_v43  ;;  %v12615_v35 = vpop.f32.mrb[75].mxu1 }
0x139f   : > { %11199 = vmatmul.mubr.msk.bf16.vlgmr.msra.gmra.mrb[32].mxu0 %vm2445_vm3, %v5224_v18  ;;  %12625 = vmatmul.mubr.msk.bf16.vlgmr.msra.gmra.mrb[76].mxu1 %vm2445_vm3, %v5224_v18 }
0x13a0   : > { %12015 = vmatpush3.bf16.msra.mxu0 %v17056_v62  ;;  %12629 = vmatpush3.bf16.msra.mxu1 %v13322_v16  ;;  %v13376_v16 = vld [vmem:[%s15795_s2 + $0x1a0] ss:$12 sps:$4 sm:$0xff]  }
0x13a1   : > { %12016 = vmatprep.subr.bf16.mxu0 %v13323_v14  ;;  %12630 = vmatprep.subr.bf16.mxu1 %v18354_v27  ;;  %v17205_v14 = vld [vmem:[%s15795_s2 + $0x188] ss:$12 sps:$4 sm:$0xff]  }
0x13a2   : > { %5727 = vmatprep.mubr.bf16.mxu0 %v15885_v6  ;;  %12644 = vmatprep.mubr.msk.bf16.mxu1 %vm14850_vm2, %v18354_v27 }
0x13a4   : > { %12017 = vmatpush3.bf16.msra.mxu0 %v16943_v57  ;;  %12631 = vmatpush3.bf16.msra.mxu1 %v13325_v21  ;;  %v13374_v57 = vld [vmem:[%s15795_s2 + $0x38] ss:$12 sps:$4 sm:$0xff]  }
0x13a5   : > { %12018 = vmatprep.subr.bf16.mxu0 %v13326_v63  ;;  %12632 = vmatprep.subr.bf16.mxu1 %v18354_v27  ;;  %v17214_v63 = vld [vmem:[%s15795_s2 + $0x110] ss:$12 sps:$4 sm:$0xff]   ;;  %v17219_v21 = vld [vmem:[%s15795_s2 + $0x1b8] ss:$12 sps:$4 sm:$0xff]  }
0x13a6   : > { %6854 = vrot.lane.b32.xlu1 %v13374_v57, %s14851_s20 }
0x13a8   : > { %12019 = vmatpush3.bf16.msra.mxu0 %v16952_v19  ;;  %12633 = vmatpush3.bf16.msra.mxu1 %v17067_v30  ;;  %v13377_v19 = vld [vmem:[%s15795_s2 + $0x50] ss:$12 sps:$4 sm:$0xff]  }
0x13a9   : > { %12020 = vmatprep.subr.bf16.mxu0 %v17071_v32  ;;  %12634 = vmatprep.subr.bf16.mxu1 %v18354_v27 }
0x13aa   : > { %6856 = vrot.lane.b32.xlu1 %v13377_v19, %s14851_s20 }
0x13ac   : > { %12021 = vmatpush3.bf16.msra.mxu0 %v16959_v23  ;;  %12635 = vmatpush3.bf16.msra.mxu1 %v13331_v28  ;;  %v17224_v23 = vld [vmem:[%s15795_s2 + $0x128] ss:$12 sps:$4 sm:$0xff]   ;;  %v13382_v28 = vld [vmem:[%s15795_s2 + $0x1d0] ss:$12 sps:$4 sm:$0xff]  }
0x13ad   : > { %12022 = vmatprep.subr.bf16.mxu0 %v16964_v26  ;;  %12636 = vmatprep.subr.bf16.mxu1 %v18354_v27  ;;  %v13380_v26 = vld [vmem:[%s15795_s2 + $0x68] ss:$12 sps:$4 sm:$0xff]  }
0x13ae   : > { %6858 = vrot.lane.b32.xlu1 %v13380_v26, %s14851_s20 }
0x13b0   : > { %12023 = vmatpush3.bf16.msra.mxu0 %v17079_v56  ;;  %12637 = vmatpush3.bf16.msra.mxu1 %v17082_v39 }
0x13b1   : > { %12024 = vmatprep.subr.bf16.mxu0 %v17087_v49  ;;  %12638 = vmatprep.subr.bf16.mxu1 %v18354_v27 }
0x13b4   : > { %12025 = vmatpush3.bf16.msra.mxu0 %v16971_v29  ;;  %12639 = vmatpush3.bf16.msra.mxu1 %v16981_v46  ;;  %v17233_v29 = vld [vmem:[%s15795_s2 + $0x140] ss:$12 sps:$4 sm:$0xff]   ;;  %v17238_v46 = vld [vmem:[%s15795_s2 + $0x1e8] ss:$12 sps:$4 sm:$0xff]  }
0x13b5   : > { %12026 = vmatprep.subr.bf16.mxu0 %v16976_v41  ;;  %12640 = vmatprep.subr.bf16.mxu1 %v18354_v27  ;;  %v13383_v41 = vld [vmem:[%s15795_s2 + $0x80] ss:$12 sps:$4 sm:$0xff]  }
0x13b6   : > { %6860 = vrot.lane.b32.xlu1 %v13383_v41, %s14851_s20 }
0x13b8   : > { %12027 = vmatpush3.bf16.msra.mxu0 %v17096_v50  ;;  %12641 = vmatpush3.bf16.msra.mxu1 %v17099_v5 }
0x13b9   : > { %12028 = vmatprep.subr.bf16.mxu0 %v17104_v36  ;;  %12642 = vmatprep.subr.bf16.mxu1 %v18354_v27 }
0x13bc   : > { %12029 = vmatpush3.bf16.msra.mxu0 %v16986_v53  ;;  %12643 = vmatpush3.bf16.msra.mxu1 %v16996_v47  ;;  %v17243_v53 = vld [vmem:[%s15795_s2 + $0x158] ss:$12 sps:$4 sm:$0xff]   ;;  %v17252_v47 = vld [vmem:[%s15795_s2 + $0x170] ss:$12 sps:$4 sm:$0xff]  }
0x13bd   : > { %12045 = vmatprep.subr.bf16.mxu0 %v16991_v31  ;;  %12648 = vmatprep.subr.bf16.mxu1 %v18354_v27  ;;  %v13386_v31 = vld [vmem:[%s15795_s2 + $0x98] ss:$12 sps:$4 sm:$0xff]  }
0x13be   : > { %6862 = vrot.lane.b32.xlu1 %v13386_v31, %s14851_s20 }
0x13bf   : > { %5728 = vmatmul.mubr.bf16.vlgmr.msra.gmra.mrb[68].mxu0 %v15896_v15  ;;  %12645 = vmatmul.mubr.bf16.vlgmr.msra.gmra.mrb[80].mxu1 %v15899_v17 }
0x13c0   : > { %12046 = vmatpush3.bf16.msra.mxu0 %v17113_v52  ;;  %12649 = vmatpush3.bf16.msra.mxu1 %v17116_v7 }
0x13c1   : > { %12047 = vmatprep.subr.bf16.mxu0 %v17121_v55  ;;  %12650 = vmatprep.subr.bf16.mxu1 %v18354_v27 }
0x13c2   : > { %5959 = vmatprep.mubr.bf16.mxu0 %v15885_v6  ;;  %12664 = vmatprep.mubr.msk.bf16.mxu1 %vm14850_vm2, %v18354_v27 }
0x13c4   : > { %12048 = vmatpush3.bf16.msra.mxu0 %v17001_v37  ;;  %12651 = vmatpush3.bf16.msra.mxu1 %v17011_v61  ;;  %v13388_v37 = vld [vmem:[%s15795_s2 + $0x200] ss:$12 sps:$4 sm:$0xff]   ;;  %v17260_v61 = vld [vmem:[%s15795_s2 + $0x218] ss:$12 sps:$4 sm:$0xff]  }
0x13c5   : > { %12049 = vmatprep.subr.bf16.mxu0 %v17006_v54  ;;  %12652 = vmatprep.subr.bf16.mxu1 %v18354_v27  ;;  %v13389_v54 = vld [vmem:[%s15795_s2 + $0xb0] ss:$12 sps:$4 sm:$0xff]  }
0x13c6   : > { %6864 = vrot.lane.b32.xlu1 %v13389_v54, %s14851_s20 }
0x13c8   : > { %12050 = vmatpush3.bf16.msra.mxu0 %v17135_v42  ;;  %12653 = vmatpush3.bf16.msra.mxu1 %v17138_v1 }
0x13c9   : > { %12051 = vmatprep.subr.bf16.mxu0 %v17143_v58  ;;  %12654 = vmatprep.subr.bf16.mxu1 %v18354_v27 }
0x13cc   : > { %12052 = vmatpush3.bf16.msra.mxu0 %v17016_v48  ;;  %12655 = vmatpush3.bf16.msra.mxu1 %v17026_v34  ;;  %v11201_v48 = vld [vmem:[%s15782_s26 + $0x2] ss:$0 sm:$0xff] }
0x13cd   : > { %12053 = vmatprep.subr.bf16.mxu0 %v17021_v0  ;;  %12656 = vmatprep.subr.bf16.mxu1 %v18354_v27  ;;  %v13391_v0 = vld [vmem:[%s15795_s2 + $0x230] ss:$12 sps:$4 sm:$0xff]  }
0x13ce   : > { %6608 = vrot.lane.b32.xlu1 %v11201_v48, %s14851_s20 }
0x13d0   : > { %12054 = vmatpush3.bf16.msra.mxu0 %v17152_v38  ;;  %12657 = vmatpush3.bf16.msra.mxu1 %v17155_v60 }
0x13d1   : > { %12055 = vmatprep.subr.bf16.mxu0 %v17160_v2  ;;  %12658 = vmatprep.subr.bf16.mxu1 %v18354_v27 }
0x13d2   : > { %6884 = vrot.lane.b32.xlu1 %v13376_v16, %s14851_s20 }
0x13d4   : > { %12056 = vmatpush3.bf16.msra.mxu0 %v17031_v44  ;;  %12659 = vmatpush3.bf16.msra.mxu1 %v17041_v59 }
0x13d5   : > { %12057 = vmatprep.subr.bf16.mxu0 %v17036_v4  ;;  %12660 = vmatprep.subr.bf16.mxu1 %v18354_v27 }
0x13d6   : > { %6888 = vrot.lane.b32.xlu1 %v13382_v28, %s14851_s20 }
0x13d8   : > { %12058 = vmatpush3.bf16.msra.mxu0 %v17169_v22  ;;  %12661 = vmatpush3.bf16.msra.mxu1 %v17172_v8 }
0x13d9   : > { %12059 = vmatprep.subr.bf16.mxu0 %v17177_v45  ;;  %12662 = vmatprep.subr.bf16.mxu1 %v18354_v27 }
0x13da   : > { %6892 = vrot.lane.b32.xlu1 %v13388_v37, %s14851_s20 }
0x13dc   : > { %12060 = vmatpush3.bf16.msra.mxu0 %v17046_v24  ;;  %12663 = vmatpush3.bf16.msra.mxu1 %v17051_v3 }
0x13dd   : > { %12668 = vmatprep.subr.bf16.mxu1 %v18354_v27  ;;  %12076 = vmatprep.subr.bf16.mxu0 %v17192_v9 }
0x13de   : > { %6896 = vrot.lane.b32.xlu1 %v13391_v0, %s14851_s20 }
0x13df   : > { %5960 = vmatmul.mubr.bf16.vlgmr.msra.gmra.mrb[72].mxu0 %v15896_v15  ;;  %12665 = vmatmul.mubr.bf16.vlgmr.msra.gmra.mrb[84].mxu1 %v15899_v17 }
0x13e0   : > { %6191 = vmatprep.mubr.bf16.mxu0 %v15885_v6  ;;  %12684 = vmatprep.mubr.msk.bf16.mxu1 %vm14850_vm2, %v18354_v27 }
0x13e1   : > { %12077 = vmatpush3.bf16.msra.mxu0 %v13369_v51  ;;  %12669 = vmatpush3.bf16.msra.mxu1 %v17205_v14 }
0x13e2   : > { %12078 = vmatprep.subr.bf16.mxu0 %v17198_v10  ;;  %12670 = vmatprep.subr.bf16.mxu1 %v18354_v27 }
0x13e5   : > { %12079 = vmatpush3.bf16.msra.mxu0 %v13371_v12  ;;  %12671 = vmatpush3.bf16.msra.mxu1 %v13376_v16 }
0x13e6   : > { %12080 = vmatprep.subr.bf16.mxu0 %v17202_v13  ;;  %12672 = vmatprep.subr.bf16.mxu1 %v18354_v27 }
0x13e9   : > { %12081 = vmatpush3.bf16.msra.mxu0 %v13374_v57  ;;  %12673 = vmatpush3.bf16.msra.mxu1 %v17219_v21 }
0x13ea   : > { %12082 = vmatprep.subr.bf16.mxu0 %v17214_v63  ;;  %12674 = vmatprep.subr.bf16.mxu1 %v18354_v27 }
0x13ed   : > { %12083 = vmatpush3.bf16.msra.mxu0 %v13377_v19  ;;  %12675 = vmatpush3.bf16.msra.mxu1 %v13382_v28 }
0x13ee   : > { %12084 = vmatprep.subr.bf16.mxu0 %v17224_v23  ;;  %12676 = vmatprep.subr.bf16.mxu1 %v18354_v27 }
0x13f1   : > { %12085 = vmatpush3.bf16.msra.mxu0 %v13380_v26  ;;  %12677 = vmatpush3.bf16.msra.mxu1 %v17238_v46 }
0x13f2   : > { %12086 = vmatprep.subr.bf16.mxu0 %v17233_v29  ;;  %12678 = vmatprep.subr.bf16.mxu1 %v18354_v27 }
0x13f5   : > { %12087 = vmatpush3.bf16.msra.mxu0 %v13383_v41  ;;  %12679 = vmatpush3.bf16.msra.mxu1 %v13388_v37 }
0x13f6   : > { %12088 = vmatprep.subr.bf16.mxu0 %v17243_v53  ;;  %12680 = vmatprep.subr.bf16.mxu1 %v18354_v27 }
0x13f9   : > { %12089 = vmatpush3.bf16.msra.mxu0 %v13386_v31  ;;  %12681 = vmatpush3.bf16.msra.mxu1 %v17260_v61 }
0x13fa   : > { %12090 = vmatprep.subr.bf16.mxu0 %v17252_v47  ;;  %12682 = vmatprep.subr.bf16.mxu1 %v18354_v27 }
0x13fd   : > { %12091 = vmatpush3.bf16.msra.mxu0 %v13389_v54  ;;  %12683 = vmatpush3.bf16.msra.mxu1 %v13391_v0  ;;  %v17287_v0 = vld [vmem:[%s15792_s3 + $0x2] ss:$0 sm:$0xff] }
0x13fe   : > { %12688 = vmatprep.subr.bf16.mxu0 %v18354_v27  ;;  %12694 = vmatprep.subr.bf16.mxu1 %v18354_v27 }
0x1400   : > { %6192 = vmatmul.mubr.bf16.vlgmr.msra.gmra.mrb[76].mxu0 %v15896_v15  ;;  %12685 = vmatmul.mubr.bf16.vlgmr.msra.gmra.mrb[88].mxu1 %v15899_v17 }
0x1401   : > { %12690 = vmatprep.mubr.msk.bf16.mxu0 %vm14850_vm2, %v18354_v27  ;;  %12696 = vmatprep.mubr.msk.bf16.mxu1 %vm14850_vm2, %v18354_v27 }
0x1472   : > { %v5369_v34 = vpop.f32.mrb[76].mxu1 }
0x1473   : > { %v17281_v44 = vadd.f32 %v5369_v34, %v16902_v40  ;;  %v12626_v4 = vpop.f32.mrb[77].mxu1 }
0x1474   : > { %v5372_v59 = vpop.f32.mrb[78].mxu1 }
0x1475   : > { %v17284_v24 = vadd.f32 %v5372_v59, %v16905_v20  ;;  %v12627_v3 = vpop.f32.mrb[79].mxu1 }
0x1492   : > { %v12030_v43 = vpop.f32.mrb[68].mxu0  ;;  %v5770_v33 = vpop.f32.mrb[80].mxu1 }
0x1493   : > { %v12031_v25 = vpop.f32.mrb[69].mxu0  ;;  %v12646_v18 = vpop.f32.mrb[81].mxu1 }
0x1494   : > { %v12032_v35 = vadd.f32 %v12031_v25, %v12030_v43  ;;  %v12033_v51 = vpop.f32.mrb[70].mxu0  ;;  %v5773_v12 = vpop.f32.mrb[82].mxu1 }
0x1495   : > { %v12034_v57 = vpop.f32.mrb[71].mxu0  ;;  %v12647_v16 = vpop.f32.mrb[83].mxu1 }
0x1496   : > { %v12035_v19 = vadd.f32 %v12034_v57, %v12033_v51  ;;  %v5730_v26 = vadd.f32 %v12032_v35, %v11201_v48 }
0x1498   : > { %v5771_v40 = vadd.f32 %v5770_v33, %v5730_v26  ;;  %v5733_v28 = vadd.f32 %v12035_v19, %v11201_v48  ;;  %v17295_v26 = vld [vmem:[%s15802_s28 + $0x2] ss:$0 sm:$0xff] }
0x149a   : > { %v5774_v41 = vadd.f32 %v5773_v12, %v5733_v28 }
0x149c   : > { %v6241_v31 = vpack.c.bf16 %v5774_v41, %v5771_v40 }
0x14b2   : > { %v12061_v37 = vpop.f32.mrb[72].mxu0  ;;  %v6002_v20 = vpop.f32.mrb[84].mxu1 }
0x14b3   : > { %v12062_v54 = vpop.f32.mrb[73].mxu0  ;;  %v12666_v34 = vpop.f32.mrb[85].mxu1 }
0x14b4   : > { %v12063_v4 = vadd.f32 %v12062_v54, %v12061_v37  ;;  %v12064_v59 = vpop.f32.mrb[74].mxu0  ;;  %v6005_v3 = vpop.f32.mrb[86].mxu1 }
0x14b5   : > { %v12065_v43 = vpop.f32.mrb[75].mxu0  ;;  %v12667_v25 = vpop.f32.mrb[87].mxu1 }
0x14b6   : > { %v5962_v18 = vadd.f32 %v12063_v4, %v17287_v0  ;;  %v12066_v51 = vadd.f32 %v12065_v43, %v12064_v59 }
0x14b8   : > { %v6003_v35 = vadd.f32 %v6002_v20, %v5962_v18  ;;  %v5965_v48 = vadd.f32 %v12066_v51, %v17287_v0 }
0x14ba   : > { %v6006_v33 = vadd.f32 %v6005_v3, %v5965_v48 }
0x14bc   : > { %v6242_v12 = vpack.c.bf16 %v6006_v33, %v6003_v35  ;;  %v17300_v33 = vld [vmem:[#allocation9] sm:$0xff] }
0x14be   : > { %v6247_v57 = vsel %vm2445_vm3, %v6242_v12, 0 }
0x14bf   : > { %12689 = vmatpush3.bf16.xpose.msra.mxu0 %v6247_v57 }
0x14c6   : > { %12691 = vmatmul.mubr.msk.bf16.vlgmr.msra.gmra.mrb[80].mxu0 %vm2445_vm3, %v6241_v31 }
0x14c7   : > { %6462 = vmatprep.mubr.bf16.mxu0 %v14852_v11 }
0x14d3   : > { %v12092_v16 = vpop.f32.mrb[76].mxu0  ;;  %v6234_v34 = vpop.f32.mrb[88].mxu1 }
0x14d4   : > { %v12093_v19 = vpop.f32.mrb[77].mxu0  ;;  %v12686_v59 = vpop.f32.mrb[89].mxu1 }
0x14d5   : > { %v12094_v40 = vadd.f32 %v12093_v19, %v12092_v16  ;;  %v12095_v28 = vpop.f32.mrb[78].mxu0  ;;  %v6237_v3 = vpop.f32.mrb[90].mxu1  ;;  %v17303_v19 = vld [vmem:[#allocation9 + $0x8] sm:$0xff] }
0x14d6   : > { %v12096_v41 = vpop.f32.mrb[79].mxu0  ;;  %v12687_v31 = vpop.f32.mrb[91].mxu1 }
0x14d7   : > { %v12097_v37 = vadd.f32 %v12096_v41, %v12095_v28  ;;  %v6194_v20 = vadd.f32 %v12094_v40, %v17295_v26 }
0x14d9   : > { %v6197_v54 = vadd.f32 %v12097_v37, %v17295_v26  ;;  %v6235_v4 = vadd.f32 %v6234_v34, %v6194_v20 }
0x14db   : > { %v6238_v43 = vadd.f32 %v6237_v3, %v6197_v54 }
0x14dd   : > { %v6317_v25 = vpack.c.bf16 %v6238_v43, %v6235_v4 }
0x14df   : > { %12695 = vmatpush3.bf16.msra.mxu1 %v6317_v25 }
0x14e0   : > { %12700 = vmatprep.subr.bf16.mxu1 %v18354_v27 }
0x1599   : > { %v6283_v18 = vpop.f32.mrb[80].mxu0 }
0x159a   : > { %v6290_v51 = vmul.f32 0.125, %v6283_v18  ;;  %v12692_v35 = vpop.f32.mrb[81].mxu0  ;;  %v13392_v18 = vld [vmem:[%s15805_s21 + $0x180] ss:$12 sps:$4 sm:$0xff]  }
0x159b   : > { %v6286_v48 = vpop.f32.mrb[82].mxu0  ;;  %v13397_v35 = vld [vmem:[%s15805_s21 + $0x19c] ss:$12 sps:$4 sm:$0xff]  }
0x159c   : > { %v6292_v12 = vadd.f32 %v17300_v33, %v6290_v51  ;;  %v6291_v57 = vmul.f32 0.125, %v6286_v48  ;;  %v12693_v16 = vpop.f32.mrb[83].mxu0  ;;  %v13394_v51 = vld [vmem:[%s15805_s21 + $0x184] ss:$12 sps:$4 sm:$0xff]  }
0x159d   : > { %6430 = vmatprep.subr.bf16.mxu0 %v13394_v51  ;;  %v13395_v48 = vld [vmem:[%s15805_s21 + $0x198] ss:$12 sps:$4 sm:$0xff]  }
0x159e   : > { %v6293_v40 = vadd.f32 %v17303_v19, %v6291_v57  ;;  %v6294_v28 = vsel %vm2497_vm4, %v6292_v12, -inf  ;;  %6431 = vmatpush1.bf16.msra.mxu0 %v13392_v18  ;;  %v13403_v57 = vld [vmem:[%s15805_s21 + $0x1cc] ss:$12 sps:$4 sm:$0xff]  }
0x159f   : > { %6295 = vmax.xlane.f32.xlu0 %v6294_v28  ;;  %6432 = vmatprep.subr.bf16.mxu0 %v13397_v35 }
0x15a0   : > { %v6297_v41 = vsel %vm2497_vm4, %v6293_v40, -inf }
0x15a2   : > { %6433 = vmatpush1.bf16.msra.mxu0 %v13395_v48 }
0x15a3   : > { %6298 = vmax.xlane.f32.xlu0 %v6297_v41 }
0x162c   : > { %v6296_v37 = vpop.xlane.xlu0 %6295 }
0x162d   : > { %v6300_v20 = vsub.f32 %v6292_v12, %v6296_v37  ;;  %v13400_v12 = vld [vmem:[%s15805_s21 + $0x1b4] ss:$12 sps:$4 sm:$0xff]  }
0x162e   : > { %6434 = vmatprep.subr.bf16.mxu0 %v13400_v12 }
0x162f   : > { %v6302_v54 = vmul.f32 1.442695, %v6300_v20 }
0x1630   : > { %v6299_v34 = vpop.xlane.xlu0 %6298 }
0x1631   : > { %13456 = vpow2.f32 %v6302_v54  ;;  %v6301_v4 = vsub.f32 %v6293_v40, %v6299_v34 }
0x1633   : > { %v6304_v59 = vmul.f32 1.442695, %v6301_v4 }
0x1635   : > { %13458 = vpow2.f32 %v6304_v59 }
0x163b   : > { %v17308_v3 = vpop.eup %13456 }
0x163c   : > { %v6306_v43 = vsel %vm2497_vm4, %v17308_v3, 0.0 }
0x163d   : > { %6307 = vadd.xlane.f32.xlu0 %v6306_v43 }
0x163f   : > { %v13459_v31 = vpop.eup %13458 }
0x1640   : > { %v6309_v25 = vsel %vm2497_vm4, %v13459_v31, 0.0 }
0x1641   : > { %6310 = vadd.xlane.f32.xlu0 %v6309_v25 }
0x1657   : > { %6536 = vrot.lane.b32.xlu0 %v17056_v62, %s14851_s20  ;;  %v13398_v62 = vld [vmem:[%s15805_s21 + $0x1b0] ss:$12 sps:$4 sm:$0xff]  }
0x1658   : > { %6435 = vmatpush1.bf16.msra.mxu0 %v13398_v62 }
0x1659   : > { %6436 = vmatprep.subr.bf16.mxu0 %v13403_v57 }
0x165b   : > { %6558 = vrot.lane.b32.xlu0 %v17071_v32, %s14851_s20  ;;  %v13401_v32 = vld [vmem:[%s15805_s21 + $0x1c8] ss:$12 sps:$4 sm:$0xff]  }
0x165c   : > { %6437 = vmatpush1.bf16.msra.mxu0 %v13401_v32 }
0x165f   : > { %6572 = vrot.lane.b32.xlu0 %v17067_v30, %s14851_s20  ;;  %v6553_v30 = vpop.permute.xlu1 %6552 }
0x1660   : > { %12116 = vmatprep.subr.bf16.mxu0 %v6553_v30 }
0x1663   : > { %6544 = vrot.lane.b32.xlu0 %v17079_v56, %s14851_s20 }
0x1667   : > { %6562 = vrot.lane.b32.xlu0 %v17087_v49, %s14851_s20 }
0x166b   : > { %6576 = vrot.lane.b32.xlu0 %v17082_v39, %s14851_s20 }
0x166f   : > { %6548 = vrot.lane.b32.xlu0 %v17096_v50, %s14851_s20 }
0x1673   : > { %6566 = vrot.lane.b32.xlu0 %v17104_v36, %s14851_s20 }
0x1677   : > { %6580 = vrot.lane.b32.xlu0 %v17099_v5, %s14851_s20 }
0x167b   : > { %6693 = vrot.lane.b32.xlu0 %v17113_v52, %s14851_s20  ;;  %v13404_v52 = vld [vmem:[%s15805_s21 + $0x188] ss:$12 sps:$4 sm:$0xff]  }
0x167f   : > { %6711 = vrot.lane.b32.xlu0 %v17121_v55, %s14851_s20  ;;  %v13405_v55 = vld [vmem:[%s15805_s21 + $0x1a0] ss:$12 sps:$4 sm:$0xff]  }
0x1683   : > { %6725 = vrot.lane.b32.xlu0 %v17116_v7, %s14851_s20 }
0x1687   : > { %6697 = vrot.lane.b32.xlu0 %v17135_v42, %s14851_s20  ;;  %v13406_v42 = vld [vmem:[%s15805_s21 + $0x1b8] ss:$12 sps:$4 sm:$0xff]  }
0x168b   : > { %6715 = vrot.lane.b32.xlu0 %v17143_v58, %s14851_s20  ;;  %v6555_v58 = vpop.permute.xlu1 %6554 }
0x168f   : > { %6729 = vrot.lane.b32.xlu0 %v17138_v1, %s14851_s20  ;;  %v13407_v1 = vld [vmem:[%s15805_s21 + $0x1d0] ss:$12 sps:$4 sm:$0xff]  }
0x1693   : > { %6701 = vrot.lane.b32.xlu0 %v17152_v38, %s14851_s20  ;;  %v6539_v38 = vpop.permute.xlu1 %6538 }
0x1697   : > { %6719 = vrot.lane.b32.xlu0 %v17160_v2, %s14851_s20 }
0x169b   : > { %6733 = vrot.lane.b32.xlu0 %v17155_v60, %s14851_s20  ;;  %v6569_v60 = vpop.permute.xlu1 %6568 }
0x169f   : > { %6705 = vrot.lane.b32.xlu0 %v17169_v22, %s14851_s20  ;;  %v6557_v2 = vpop.permute.xlu1 %6556 }
0x16a3   : > { %6723 = vrot.lane.b32.xlu0 %v17177_v45, %s14851_s20  ;;  %v6541_v22 = vpop.permute.xlu1 %6540 }
0x16a7   : > { %6737 = vrot.lane.b32.xlu0 %v17172_v8, %s14851_s20  ;;  %v6571_v45 = vpop.permute.xlu1 %6570 }
0x16ab   : > { %6866 = vrot.lane.b32.xlu0 %v17192_v9, %s14851_s20 }
0x16af   : > { %6868 = vrot.lane.b32.xlu0 %v17198_v10, %s14851_s20  ;;  %v6543_v10 = vpop.permute.xlu1 %6542 }
0x16b3   : > { %6870 = vrot.lane.b32.xlu0 %v17202_v13, %s14851_s20 }
0x16b7   : > { %6872 = vrot.lane.b32.xlu0 %v17214_v63, %s14851_s20 }
0x16bb   : > { %6874 = vrot.lane.b32.xlu0 %v17224_v23, %s14851_s20 }
0x16bf   : > { %6876 = vrot.lane.b32.xlu0 %v17233_v29, %s14851_s20 }
0x16c3   : > { %6878 = vrot.lane.b32.xlu0 %v17243_v53, %s14851_s20 }
0x16c7   : > { %6880 = vrot.lane.b32.xlu0 %v17252_v47, %s14851_s20 }
0x16ca   : > { %v6308_v56 = vpop.xlane.xlu0 %6307 }
0x16cb   : > { %6765 = vrot.lane.b32.xlu0 %v17287_v0, %s14851_s20  ;;  %13460 = vrcp.f32 %v6308_v56 }
0x16ce   : > { %v6311_v39 = vpop.xlane.xlu0 %6310 }
0x16cf   : > { %13462 = vrcp.f32 %v6311_v39  ;;  %6882 = vrot.lane.b32.xlu0 %v17205_v14, %s14851_s20  ;;  %v6561_v14 = vpop.permute.xlu1 %6560 }
0x16d2   : > { %v6537_v8 = vpop.permute.xlu0 %6536 }
0x16d3   : > { %6886 = vrot.lane.b32.xlu0 %v17219_v21, %s14851_s20  ;;  %v6575_v21 = vpop.permute.xlu1 %6574 }
0x16d5   : > { %v13461_v49 = vpop.eup %13460 }
0x16d6   : > { %v6313_v5 = vmul.f32 %v13461_v49, %v17308_v3  ;;  %v6559_v9 = vpop.permute.xlu0 %6558 }
0x16d7   : > { %6890 = vrot.lane.b32.xlu0 %v17238_v46, %s14851_s20  ;;  %v6547_v29 = vpop.permute.xlu1 %6546 }
0x16d9   : > { %v13463_v50 = vpop.eup %13462 }
0x16da   : > { %v6315_v36 = vmul.f32 %v13463_v50, %v13459_v31  ;;  %v6573_v13 = vpop.permute.xlu0 %6572 }
0x16db   : > { %6894 = vrot.lane.b32.xlu0 %v17260_v61, %s14851_s20  ;;  %v6565_v53 = vpop.permute.xlu1 %6564 }
0x16dc   : > { %v6316_v7 = vpack.c.bf16 %v6315_v36, %v6313_v5 }
0x16de   : > { %12697 = vmatmul.mubr.msk.bf16.vlgmr.msra.gmra.mrb[92].mxu1 %vm2497_vm4, %v6316_v7  ;;  %v6545_v63 = vpop.permute.xlu0 %6544 }
0x16df   : > { %12701 = vmatpush3.bf16.msra.mxu1 %v13404_v52  ;;  %12708 = vmatprep.mubr.msk.bf16.mxu1 %vm14850_vm2, %v18354_v27  ;;  %v6579_v61 = vpop.permute.xlu1 %6578 }
0x16e0   : > { %12702 = vmatprep.subr.bf16.mxu1 %v18354_v27 }
0x16e2   : > { %v6563_v23 = vpop.permute.xlu0 %6562 }
0x16e3   : > { %12703 = vmatpush3.bf16.msra.mxu1 %v13405_v55  ;;  %v6551_v16 = vpop.permute.xlu1 %6550 }
0x16e4   : > { %12704 = vmatprep.subr.bf16.mxu1 %v18354_v27 }
0x16e6   : > { %v6577_v46 = vpop.permute.xlu0 %6576 }
0x16e7   : > { %12705 = vmatpush3.bf16.msra.mxu1 %v13406_v42  ;;  %v6710_v28 = vpop.permute.xlu1 %6709 }
0x16e8   : > { %12706 = vmatprep.subr.bf16.mxu1 %v18354_v27 }
0x16ea   : > { %v6549_v47 = vpop.permute.xlu0 %6548 }
0x16eb   : > { %12707 = vmatpush3.bf16.msra.mxu1 %v13407_v1  ;;  %v6583_v37 = vpop.permute.xlu1 %6582 }
0x16ec   : > { %12712 = vmatprep.subr.bf16.mxu1 %v18354_v27 }
0x16ee   : > { %v6567_v0 = vpop.permute.xlu0 %6566 }
0x16ef   : > { %v6696_v43 = vpop.permute.xlu1 %6695 }
0x16f2   : > { %v6581_v40 = vpop.permute.xlu0 %6580 }
0x16f3   : > { %v6714_v25 = vpop.permute.xlu1 %6713 }
0x16f6   : > { %v6694_v41 = vpop.permute.xlu0 %6693 }
0x16f7   : > { %v6728_v51 = vpop.permute.xlu1 %6727 }
0x16fa   : > { %v6712_v20 = vpop.permute.xlu0 %6711 }
0x16fb   : > { %v6700_v48 = vpop.permute.xlu1 %6699 }
0x16fe   : > { %v6726_v31 = vpop.permute.xlu0 %6725 }
0x16ff   : > { %v6718_v62 = vpop.permute.xlu1 %6717 }
0x1702   : > { %v6698_v18 = vpop.permute.xlu0 %6697 }
0x1703   : > { %v6732_v32 = vpop.permute.xlu1 %6731 }
0x1706   : > { %v6716_v35 = vpop.permute.xlu0 %6715 }
0x1707   : > { %v6704_v56 = vpop.permute.xlu1 %6703 }
0x170a   : > { %v6730_v12 = vpop.permute.xlu0 %6729 }
0x170b   : > { %v6722_v49 = vpop.permute.xlu1 %6721 }
0x170e   : > { %v6702_v57 = vpop.permute.xlu0 %6701 }
0x170f   : > { %v6736_v5 = vpop.permute.xlu1 %6735 }
0x1712   : > { %v6720_v30 = vpop.permute.xlu0 %6719 }
0x1713   : > { %v6708_v52 = vpop.permute.xlu1 %6707 }
0x1716   : > { %v6734_v39 = vpop.permute.xlu0 %6733 }
0x1717   : > { %v6740_v55 = vpop.permute.xlu1 %6739 }
0x171a   : > { %v6706_v50 = vpop.permute.xlu0 %6705 }
0x171b   : > { %v6851_v42 = vpop.permute.xlu1 %6850 }
0x171e   : > { %v6724_v36 = vpop.permute.xlu0 %6723 }
0x171f   : > { %v6853_v1 = vpop.permute.xlu1 %6852 }
0x1722   : > { %v6738_v7 = vpop.permute.xlu0 %6737 }
0x17b1   : > { %v6355_v54 = vpop.f32.mrb[92].mxu1 }
0x17b2   : > { %v12698_v34 = vpop.f32.mrb[93].mxu1 }
0x17b3   : > { %v6358_v4 = vpop.f32.mrb[94].mxu1 }
0x17b4   : > { %v6362_v59 = vpack.c.bf16 %v6358_v4, %v6355_v54  ;;  %v12699_v3 = vpop.f32.mrb[95].mxu1 }
0x17b6   : > { %11290 = vmatmul.mubr.msk.bf16.vlgmr.msra.gmra.mrb[32].mxu0 %vm2445_vm3, %v6362_v59  ;;  %12709 = vmatmul.mubr.msk.bf16.vlgmr.msra.gmra.mrb[96].mxu1 %vm2445_vm3, %v6362_v59 }
0x17b7   : > { %12117 = vmatpush3.bf16.msra.mxu0 %v6537_v8  ;;  %12713 = vmatpush3.bf16.msra.mxu1 %v6569_v60 }
0x17b8   : > { %12118 = vmatprep.subr.bf16.mxu0 %v6555_v58  ;;  %12714 = vmatprep.subr.bf16.mxu1 %v18354_v27  ;;  %v6855_v58 = vpop.permute.xlu1 %6854 }
0x17b9   : > { %6643 = vmatprep.mubr.bf16.mxu0 %v15885_v6  ;;  %12728 = vmatprep.mubr.msk.bf16.mxu1 %vm14850_vm2, %v18354_v27 }
0x17bb   : > { %12119 = vmatpush3.bf16.msra.mxu0 %v6539_v38  ;;  %12715 = vmatpush3.bf16.msra.mxu1 %v6571_v45  ;;  %v6867_v38 = vpop.permute.xlu0 %6866 }
0x17bc   : > { %12120 = vmatprep.subr.bf16.mxu0 %v6557_v2  ;;  %12716 = vmatprep.subr.bf16.mxu1 %v18354_v27  ;;  %v6857_v2 = vpop.permute.xlu1 %6856 }
0x17bf   : > { %12121 = vmatpush3.bf16.msra.mxu0 %v6541_v22  ;;  %12717 = vmatpush3.bf16.msra.mxu1 %v6573_v13  ;;  %v6869_v60 = vpop.permute.xlu0 %6868 }
0x17c0   : > { %12122 = vmatprep.subr.bf16.mxu0 %v6559_v9  ;;  %12718 = vmatprep.subr.bf16.mxu1 %v18354_v27  ;;  %v6859_v8 = vpop.permute.xlu1 %6858 }
0x17c3   : > { %12123 = vmatpush3.bf16.msra.mxu0 %v6543_v10  ;;  %12719 = vmatpush3.bf16.msra.mxu1 %v6575_v21  ;;  %v6871_v22 = vpop.permute.xlu0 %6870 }
0x17c4   : > { %12124 = vmatprep.subr.bf16.mxu0 %v6561_v14  ;;  %12720 = vmatprep.subr.bf16.mxu1 %v18354_v27  ;;  %v6861_v9 = vpop.permute.xlu1 %6860 }
0x17c7   : > { %12125 = vmatpush3.bf16.msra.mxu0 %v6545_v63  ;;  %12721 = vmatpush3.bf16.msra.mxu1 %v6577_v46  ;;  %v6873_v45 = vpop.permute.xlu0 %6872 }
0x17c8   : > { %12126 = vmatprep.subr.bf16.mxu0 %v6563_v23  ;;  %12722 = vmatprep.subr.bf16.mxu1 %v18354_v27  ;;  %v6863_v13 = vpop.permute.xlu1 %6862 }
0x17cb   : > { %12127 = vmatpush3.bf16.msra.mxu0 %v6547_v29  ;;  %12723 = vmatpush3.bf16.msra.mxu1 %v6579_v61 }
0x17cc   : > { %12128 = vmatprep.subr.bf16.mxu0 %v6565_v53  ;;  %12724 = vmatprep.subr.bf16.mxu1 %v18354_v27  ;;  %v6865_v21 = vpop.permute.xlu1 %6864 }
0x17cf   : > { %12129 = vmatpush3.bf16.msra.mxu0 %v6549_v47  ;;  %12725 = vmatpush3.bf16.msra.mxu1 %v6581_v40 }
0x17d0   : > { %12130 = vmatprep.subr.bf16.mxu0 %v6567_v0  ;;  %12726 = vmatprep.subr.bf16.mxu1 %v18354_v27  ;;  %v6609_v0 = vpop.permute.xlu1 %6608 }
0x17d3   : > { %12131 = vmatpush3.bf16.msra.mxu0 %v6551_v16  ;;  %12727 = vmatpush3.bf16.msra.mxu1 %v6583_v37 }
0x17d4   : > { %12147 = vmatprep.subr.bf16.mxu0 %v6710_v28  ;;  %12732 = vmatprep.subr.bf16.mxu1 %v18354_v27 }
0x17d6   : > { %6644 = vmatmul.mubr.bf16.vlgmr.msra.gmra.mrb[84].mxu0 %v15896_v15  ;;  %12729 = vmatmul.mubr.bf16.vlgmr.msra.gmra.mrb[100].mxu1 %v15899_v17 }
0x17d7   : > { %12148 = vmatpush3.bf16.msra.mxu0 %v6694_v41  ;;  %12733 = vmatpush3.bf16.msra.mxu1 %v6726_v31 }
0x17d8   : > { %12149 = vmatprep.subr.bf16.mxu0 %v6712_v20  ;;  %12734 = vmatprep.subr.bf16.mxu1 %v18354_v27 }
0x17d9   : > { %6800 = vmatprep.mubr.bf16.mxu0 %v15885_v6  ;;  %12748 = vmatprep.mubr.msk.bf16.mxu1 %vm14850_vm2, %v18354_v27 }
0x17db   : > { %12150 = vmatpush3.bf16.msra.mxu0 %v6696_v43  ;;  %12735 = vmatpush3.bf16.msra.mxu1 %v6728_v51 }
0x17dc   : > { %12151 = vmatprep.subr.bf16.mxu0 %v6714_v25  ;;  %12736 = vmatprep.subr.bf16.mxu1 %v18354_v27 }
0x17df   : > { %12152 = vmatpush3.bf16.msra.mxu0 %v6698_v18  ;;  %12737 = vmatpush3.bf16.msra.mxu1 %v6730_v12 }
0x17e0   : > { %12153 = vmatprep.subr.bf16.mxu0 %v6716_v35  ;;  %12738 = vmatprep.subr.bf16.mxu1 %v18354_v27 }
0x17e3   : > { %12154 = vmatpush3.bf16.msra.mxu0 %v6700_v48  ;;  %12739 = vmatpush3.bf16.msra.mxu1 %v6732_v32 }
0x17e4   : > { %12155 = vmatprep.subr.bf16.mxu0 %v6718_v62  ;;  %12740 = vmatprep.subr.bf16.mxu1 %v18354_v27 }
0x17e7   : > { %12156 = vmatpush3.bf16.msra.mxu0 %v6702_v57  ;;  %12741 = vmatpush3.bf16.msra.mxu1 %v6734_v39 }
0x17e8   : > { %12157 = vmatprep.subr.bf16.mxu0 %v6720_v30  ;;  %12742 = vmatprep.subr.bf16.mxu1 %v18354_v27 }
0x17eb   : > { %12158 = vmatpush3.bf16.msra.mxu0 %v6704_v56  ;;  %12743 = vmatpush3.bf16.msra.mxu1 %v6736_v5 }
0x17ec   : > { %12159 = vmatprep.subr.bf16.mxu0 %v6722_v49  ;;  %12744 = vmatprep.subr.bf16.mxu1 %v18354_v27 }
0x17ef   : > { %12160 = vmatpush3.bf16.msra.mxu0 %v6706_v50  ;;  %12745 = vmatpush3.bf16.msra.mxu1 %v6738_v7 }
0x17f0   : > { %12161 = vmatprep.subr.bf16.mxu0 %v6724_v36  ;;  %12746 = vmatprep.subr.bf16.mxu1 %v18354_v27 }
0x17f3   : > { %12162 = vmatpush3.bf16.msra.mxu0 %v6708_v52  ;;  %12747 = vmatpush3.bf16.msra.mxu1 %v6740_v55 }
0x17f4   : > { %12752 = vmatprep.subr.bf16.mxu1 %v18354_v27  ;;  %12178 = vmatprep.subr.bf16.mxu0 %v6867_v38 }
0x17f6   : > { %6801 = vmatmul.mubr.bf16.vlgmr.msra.gmra.mrb[88].mxu0 %v15896_v15  ;;  %12749 = vmatmul.mubr.bf16.vlgmr.msra.gmra.mrb[104].mxu1 %v15899_v17 }
0x17f7   : > { %6957 = vmatprep.mubr.bf16.mxu0 %v15885_v6  ;;  %12768 = vmatprep.mubr.msk.bf16.mxu1 %vm14850_vm2, %v18354_v27  ;;  %v6875_v6 = vpop.permute.xlu0 %6874 }
0x17f8   : > { %12179 = vmatpush3.bf16.msra.mxu0 %v6851_v42 }
0x17f9   : > { %12180 = vmatprep.subr.bf16.mxu0 %v6869_v60  ;;  %v6885_v60 = vpop.permute.xlu1 %6884 }
0x17fb   : > { %v6877_v10 = vpop.permute.xlu0 %6876 }
0x17fc   : > { %12181 = vmatpush3.bf16.msra.mxu0 %v6853_v1 }
0x17fd   : > { %12182 = vmatprep.subr.bf16.mxu0 %v6871_v22  ;;  %v6889_v22 = vpop.permute.xlu1 %6888 }
0x17ff   : > { %v6879_v14 = vpop.permute.xlu0 %6878 }
0x1800   : > { %12183 = vmatpush3.bf16.msra.mxu0 %v6855_v58 }
0x1801   : > { %12184 = vmatprep.subr.bf16.mxu0 %v6873_v45 }
0x1803   : > { %v6881_v63 = vpop.permute.xlu0 %6880 }
0x1804   : > { %12185 = vmatpush3.bf16.msra.mxu0 %v6857_v2 }
0x1805   : > { %12186 = vmatprep.subr.bf16.mxu0 %v6875_v6 }
0x1807   : > { %v6766_v25 = vpop.permute.xlu0 %6765 }
0x1808   : > { %12187 = vmatpush3.bf16.msra.mxu0 %v6859_v8  ;;  %v6893_v8 = vpop.permute.xlu1 %6892 }
0x1809   : > { %12188 = vmatprep.subr.bf16.mxu0 %v6877_v10 }
0x180b   : > { %v6883_v38 = vpop.permute.xlu0 %6882 }
0x180c   : > { %12189 = vmatpush3.bf16.msra.mxu0 %v6861_v9  ;;  %12753 = vmatpush3.bf16.msra.mxu1 %v6883_v38  ;;  %v6897_v6 = vpop.permute.xlu1 %6896 }
0x180d   : > { %12190 = vmatprep.subr.bf16.mxu0 %v6879_v14  ;;  %12754 = vmatprep.subr.bf16.mxu1 %v18354_v27 }
0x180f   : > { %v6887_v2 = vpop.permute.xlu0 %6886 }
0x1810   : > { %12191 = vmatpush3.bf16.msra.mxu0 %v6863_v13  ;;  %12755 = vmatpush3.bf16.msra.mxu1 %v6885_v60  ;;  %v7288_v60 = vlaneseq }
0x1811   : > { %12192 = vmatprep.subr.bf16.mxu0 %v6881_v63  ;;  %12756 = vmatprep.subr.bf16.mxu1 %v18354_v27 }
0x1814   : > { %12193 = vmatpush3.bf16.msra.mxu0 %v6865_v21  ;;  %12757 = vmatpush3.bf16.msra.mxu1 %v6887_v2  ;;  %v7289_v2 = vshrl.u32 %v7288_v60, 7 }
0x1815   : > { %12772 = vmatprep.subr.bf16.mxu0 %v18354_v27  ;;  %12758 = vmatprep.subr.bf16.mxu1 %v18354_v27 }
0x1817   : > { %6958 = vmatmul.mubr.bf16.vlgmr.msra.gmra.mrb[92].mxu0 %v15896_v15 }
0x1818   : > { %12774 = vmatprep.mubr.msk.bf16.mxu0 %vm14850_vm2, %v18354_v27  ;;  %12759 = vmatpush3.bf16.msra.mxu1 %v6889_v22  ;;  %v17491_v22 = vsub.s32 0, %v7289_v2 }
0x1819   : > { %12760 = vmatprep.subr.bf16.mxu1 %v18354_v27 }
0x1889   : > { %v6507_v23 = vpop.f32.mrb[96].mxu1 }
0x188a   : > { %v17437_v29 = vadd.f32 %v6507_v23, %v17281_v44  ;;  %v12710_v46 = vpop.f32.mrb[97].mxu1 }
0x188b   : > { %v6510_v53 = vpop.f32.mrb[98].mxu1 }
0x188c   : > { %v17440_v47 = vadd.f32 %v6510_v53, %v17284_v24  ;;  %v12711_v61 = vpop.f32.mrb[99].mxu1 }
0x18a9   : > { %v12132_v16 = vpop.f32.mrb[84].mxu0  ;;  %v6686_v40 = vpop.f32.mrb[100].mxu1 }
0x18aa   : > { %v12133_v28 = vpop.f32.mrb[85].mxu0  ;;  %v12730_v41 = vpop.f32.mrb[101].mxu1 }
0x18ab   : > { %v12134_v37 = vadd.f32 %v12133_v28, %v12132_v16  ;;  %v12135_v15 = vpop.f32.mrb[86].mxu0  ;;  %v6689_v20 = vpop.f32.mrb[102].mxu1 }
0x18ac   : > { %v12136_v54 = vpop.f32.mrb[87].mxu0  ;;  %v12731_v34 = vpop.f32.mrb[103].mxu1 }
0x18ad   : > { %v6646_v4 = vadd.f32 %v12134_v37, %v6609_v0  ;;  %v12137_v59 = vadd.f32 %v12136_v54, %v12135_v15 }
0x18af   : > { %v6687_v44 = vadd.f32 %v6686_v40, %v6646_v4  ;;  %v6649_v3 = vadd.f32 %v12137_v59, %v6609_v0  ;;  %v13408_v59 = vld [vmem:[%s15805_s21 + $0x1e0] ss:$12 sps:$4 sm:$0xff]  }
0x18b1   : > { %v6690_v43 = vadd.f32 %v6689_v20, %v6649_v3  ;;  %v13414_v3 = vld [vmem:[%s15805_s21 + $0x1fc] ss:$12 sps:$4 sm:$0xff]  }
0x18b3   : > { %v7007_v31 = vpack.c.bf16 %v6690_v43, %v6687_v44  ;;  %v13410_v44 = vld [vmem:[%s15805_s21 + $0x1e4] ss:$12 sps:$4 sm:$0xff]  }
0x18b4   : > { %v13412_v43 = vld [vmem:[%s15805_s21 + $0x1f8] ss:$12 sps:$4 sm:$0xff]  }
0x18c9   : > { %v12163_v24 = vpop.f32.mrb[88].mxu0  ;;  %v6843_v18 = vpop.f32.mrb[104].mxu1 }
0x18ca   : > { %v12164_v51 = vpop.f32.mrb[89].mxu0  ;;  %v12750_v35 = vpop.f32.mrb[105].mxu1 }
0x18cb   : > { %v12165_v48 = vadd.f32 %v12164_v51, %v12163_v24  ;;  %v12166_v12 = vpop.f32.mrb[90].mxu0  ;;  %v6846_v62 = vpop.f32.mrb[106].mxu1 }
0x18cc   : > { %v12167_v57 = vpop.f32.mrb[91].mxu0  ;;  %v12751_v32 = vpop.f32.mrb[107].mxu1 }
0x18cd   : > { %v6803_v30 = vadd.f32 %v12165_v48, %v6766_v25  ;;  %v12168_v56 = vadd.f32 %v12167_v57, %v12166_v12 }
0x18cf   : > { %v6844_v39 = vadd.f32 %v6843_v18, %v6803_v30  ;;  %v6806_v49 = vadd.f32 %v12168_v56, %v6766_v25  ;;  %v13416_v25 = vld [vmem:[%s15805_s21 + $0x210] ss:$12 sps:$4 sm:$0xff]  }
0x18d1   : > { %v6847_v50 = vadd.f32 %v6846_v62, %v6806_v49 }
0x18d3   : > { %v7008_v5 = vpack.c.bf16 %v6847_v50, %v6844_v39  ;;  %v13411_v39 = vld [vmem:[%s15805_s21 + $0x1e8] ss:$12 sps:$4 sm:$0xff]   ;;  %v13415_v50 = vld [vmem:[%s15805_s21 + $0x200] ss:$12 sps:$4 sm:$0xff]  }
0x18d5   : > { %v7013_v36 = vsel %vm2445_vm3, %v7008_v5, 0  ;;  %v13419_v5 = vld [vmem:[%s15805_s21 + $0x218] ss:$12 sps:$4 sm:$0xff]  }
0x18d6   : > { %12773 = vmatpush3.bf16.xpose.msra.mxu0 %v7013_v36  ;;  %v13422_v36 = vld [vmem:[%s15805_s21 + $0x22c] ss:$12 sps:$4 sm:$0xff]  }
0x18d7   : > { %7196 = vmatprep.subr.bf16.mxu0 %v13410_v44  ;;  %v13532_v44 = vld [vmem:[#allocation2 + $0x20] sm:$0xff] }
0x18dd   : > { %12775 = vmatmul.mubr.msk.bf16.vlgmr.msra.gmra.mrb[96].mxu0 %vm2445_vm3, %v7007_v31  ;;  %v13418_v31 = vld [vmem:[%s15805_s21 + $0x214] ss:$12 sps:$4 sm:$0xff]  }
0x18de   : > { %7228 = vmatprep.mubr.bf16.mxu0 %v14852_v11  ;;  %v6891_v11 = vpop.permute.xlu0 %6890  ;;  %7197 = vmatpush1.bf16.msra.mxu0 %v13408_v59 }
0x18df   : > { %12761 = vmatpush3.bf16.msra.mxu1 %v6891_v11  ;;  %7198 = vmatprep.subr.bf16.mxu0 %v13414_v3  ;;  %v17495_v11 = vsub.s32 1, %v7289_v2 }
0x18e0   : > { %12762 = vmatprep.subr.bf16.mxu1 %v18354_v27 }
0x18e2   : > { %v6895_v45 = vpop.permute.xlu0 %6894  ;;  %7199 = vmatpush1.bf16.msra.mxu0 %v13412_v43  ;;  %v13533_v43 = vld [vmem:[#allocation2 + $0x28] sm:$0xff] }
0x18e3   : > { %12763 = vmatpush3.bf16.msra.mxu1 %v6893_v8  ;;  %7200 = vmatprep.subr.bf16.mxu0 %v13418_v31  ;;  %v17497_v8 = vsub.s32 2, %v7289_v2 }
0x18e4   : > { %12764 = vmatprep.subr.bf16.mxu1 %v18354_v27 }
0x18e6   : > { %7201 = vmatpush1.bf16.msra.mxu0 %v13416_v25 }
0x18e7   : > { %12765 = vmatpush3.bf16.msra.mxu1 %v6895_v45  ;;  %7202 = vmatprep.subr.bf16.mxu0 %v13422_v36 }
0x18e8   : > { %12766 = vmatprep.subr.bf16.mxu1 %v18354_v27 }
0x18ea   : > { %v12194_v52 = vpop.f32.mrb[92].mxu0 }
0x18eb   : > { %v12195_v7 = vpop.f32.mrb[93].mxu0  ;;  %12767 = vmatpush3.bf16.msra.mxu1 %v6897_v6 }
0x18ec   : > { %v17445_v55 = vadd.f32 %v12195_v7, %v12194_v52  ;;  %v12197_v42 = vpop.f32.mrb[94].mxu0  ;;  %12778 = vmatprep.subr.bf16.mxu1 %v18354_v27  ;;  %v13420_v52 = vld [vmem:[%s15805_s21 + $0x228] ss:$12 sps:$4 sm:$0xff]   ;;  %v13423_v7 = vld [vmem:[%s15805_s21 + $0x230] ss:$12 sps:$4 sm:$0xff]  }
0x18ed   : > { %v12198_v1 = vpop.f32.mrb[95].mxu0  ;;  %7203 = vmatpush1.bf16.msra.mxu0 %v13420_v52 }
0x18ee   : > { %v17447_v58 = vadd.f32 %v12198_v1, %v12197_v42  ;;  %12769 = vmatmul.mubr.bf16.vlgmr.msra.gmra.mrb[108].mxu1 %v15899_v17 }
0x18ef   : > { %12780 = vmatprep.mubr.msk.bf16.mxu1 %vm14850_vm2, %v18354_v27 }
0x19b0   : > { %v7049_v9 = vpop.f32.mrb[96].mxu0 }
0x19b1   : > { %v7056_v10 = vmul.f32 0.125, %v7049_v9  ;;  %v12776_v13 = vpop.f32.mrb[97].mxu0 }
0x19b2   : > { %v7052_v14 = vpop.f32.mrb[98].mxu0 }
0x19b3   : > { %v7058_v63 = vadd.f32 %v17300_v33, %v7056_v10  ;;  %v7057_v21 = vmul.f32 0.125, %v7052_v14  ;;  %v12777_v23 = vpop.f32.mrb[99].mxu0 }
0x19b5   : > { %v7059_v46 = vadd.f32 %v17303_v19, %v7057_v21  ;;  %v7060_v53 = vsel %vm2497_vm4, %v7058_v63, -inf }
0x19b6   : > { %7061 = vmax.xlane.f32.xlu0 %v7060_v53 }
0x19b7   : > { %v7063_v61 = vsel %vm2497_vm4, %v7059_v46, -inf }
0x19b8   : > { %7064 = vmax.xlane.f32.xlu1 %v7063_v61 }
0x19c1   : > { %v7000_v20 = vpop.f32.mrb[108].mxu1 }
0x19c2   : > { %v12770_v54 = vpop.f32.mrb[109].mxu1 }
0x19c3   : > { %v7003_v34 = vpop.f32.mrb[110].mxu1 }
0x19c4   : > { %v12771_v4 = vpop.f32.mrb[111].mxu1 }
0x1a43   : > { %v7062_v17 = vpop.xlane.xlu0 %7061 }
0x1a44   : > { %v7066_v0 = vsub.f32 %v7058_v63, %v7062_v17  ;;  %v13528_v17 = vld [vmem:[#allocation2] sm:$0xff] }
0x1a45   : > { %v7065_v16 = vpop.xlane.xlu1 %7064 }
0x1a46   : > { %v7068_v40 = vmul.f32 1.442695, %v7066_v0  ;;  %v7067_v28 = vsub.f32 %v7059_v46, %v7065_v16 }
0x1a48   : > { %13464 = vpow2.f32 %v7068_v40  ;;  %v7070_v33 = vmul.f32 1.442695, %v7067_v28 }
0x1a4a   : > { %13466 = vpow2.f32 %v7070_v33 }
0x1a52   : > { %v13465_v41 = vpop.eup %13464 }
0x1a53   : > { %v7072_v19 = vsel %vm2497_vm4, %v13465_v41, 0.0 }
0x1a54   : > { %v13467_v37 = vpop.eup %13466  ;;  %7073 = vadd.xlane.f32.xlu0 %v7072_v19  ;;  %v13529_v19 = vld [vmem:[#allocation2 + $0x8] sm:$0xff] }
0x1a55   : > { %v7075_v15 = vsel %vm2497_vm4, %v13467_v37, 0.0 }
0x1a58   : > { %7076 = vadd.xlane.f32.xlu0 %v7075_v15 }
0x1a6e   : > { %6922 = vrot.lane.b32.xlu0 %v17295_v26, %s14851_s20 }
0x1ae1   : > { %v7074_v24 = vpop.xlane.xlu0 %7073 }
0x1ae2   : > { %13468 = vrcp.f32 %v7074_v24 }
0x1ae5   : > { %v7077_v18 = vpop.xlane.xlu0 %7076 }
0x1ae6   : > { %13470 = vrcp.f32 %v7077_v18 }
0x1ae9   : > { %v6923_v51 = vpop.permute.xlu0 %6922 }
0x1aea   : > { %v6960_v26 = vadd.f32 %v17445_v55, %v6923_v51  ;;  %v6963_v35 = vadd.f32 %v17447_v58, %v6923_v51 }
0x1aec   : > { %v7001_v48 = vadd.f32 %v7000_v20, %v6960_v26  ;;  %v7004_v12 = vadd.f32 %v7003_v34, %v6963_v35  ;;  %v13469_v62 = vpop.eup %13468  ;;  %v13530_v20 = vld [vmem:[#allocation2 + $0x10] sm:$0xff]  ;;  %v13531_v34 = vld [vmem:[#allocation2 + $0x18] sm:$0xff] }
0x1aed   : > { %v7079_v30 = vmul.f32 %v13469_v62, %v13465_v41 }
0x1aee   : > { %v7083_v57 = vpack.c.bf16 %v7004_v12, %v7001_v48 }
0x1af0   : > { %v13471_v32 = vpop.eup %13470  ;;  %12779 = vmatpush3.bf16.msra.mxu1 %v7083_v57 }
0x1af1   : > { %v7081_v56 = vmul.f32 %v13471_v32, %v13467_v37  ;;  %12784 = vmatprep.subr.bf16.mxu1 %v18354_v27 }
0x1af3   : > { %v7082_v49 = vpack.c.bf16 %v7081_v56, %v7079_v30 }
0x1af5   : > { %12781 = vmatmul.mubr.msk.bf16.vlgmr.msra.gmra.mrb[112].mxu1 %vm2497_vm4, %v7082_v49 }
0x1af6   : > { %12785 = vmatpush3.bf16.msra.mxu1 %v13411_v39  ;;  %12792 = vmatprep.mubr.msk.bf16.mxu1 %vm14850_vm2, %v18354_v27 }
0x1af7   : > { %12786 = vmatprep.subr.bf16.mxu1 %v18354_v27 }
0x1afa   : > { %12787 = vmatpush3.bf16.msra.mxu1 %v13415_v50 }
0x1afb   : > { %12788 = vmatprep.subr.bf16.mxu1 %v18354_v27 }
0x1afe   : > { %12789 = vmatpush3.bf16.msra.mxu1 %v13419_v5 }
0x1aff   : > { %12790 = vmatprep.subr.bf16.mxu1 %v18354_v27  ;;  %v7286_v27 = vld [vmem:[%s18355_s9] sm:$0x7] }
0x1b00   : > { %v7291_v45 = vrot.slane %v7286_v27, %v17491_v22  ;;  %v7295_v6 = vrot.slane %v7286_v27, %v17495_v11  ;;  %v7299_v9 = vrot.slane %v7286_v27, %v17497_v8 }
0x1b02   : > { %12791 = vmatpush3.bf16.msra.mxu1 %v13423_v7 }
0x1bc8   : > { %v7121_v55 = vpop.f32.mrb[112].mxu1 }
0x1bc9   : > { %v12782_v42 = vpop.f32.mrb[113].mxu1 }
0x1bca   : > { %v7124_v1 = vpop.f32.mrb[114].mxu1 }
0x1bcb   : > { %v7128_v58 = vpack.c.bf16 %v7124_v1, %v7121_v55  ;;  %v12783_v38 = vpop.f32.mrb[115].mxu1 }
0x1bcd   : > { %11306 = vmatmul.mubr.msk.bf16.vlgmr.msra.gmra.mrb[32].mxu0 %vm2445_vm3, %v7128_v58  ;;  %12793 = vmatmul.mubr.msk.bf16.vlgmr.msra.gmra.mrb[116].mxu1 %vm2445_vm3, %v7128_v58 }
0x1ca0   : > { %v7230_v10 = vpop.f32.mrb[32].mxu0  ;;  %v7273_v13 = vpop.f32.mrb[116].mxu1 }
0x1ca1   : > { %v7303_v14 = vadd.f32 %v7291_v45, %v7230_v10  ;;  %v7282_v63 = vadd.f32 %v7273_v13, %v17437_v29  ;;  %v7232_v21 = vpop.f32.mrb[33].mxu0  ;;  %v12794_v23 = vpop.f32.mrb[117].mxu1 }
0x1ca2   : > { %v7304_v46 = vadd.f32 %v7295_v6, %v7232_v21  ;;  %v7234_v53 = vpop.f32.mrb[34].mxu0  ;;  %v7276_v61 = vpop.f32.mrb[118].mxu1 }
0x1ca3   : > { %v7309_v0 = vadd.f32 %v13528_v17, %v7303_v14  ;;  %v7305_v16 = vadd.f32 %v7299_v9, %v7282_v63  ;;  %v7306_v40 = vadd.f32 %v7291_v45, %v7234_v53  ;;  %v7285_v28 = vadd.f32 %v7276_v61, %v17440_v47  ;;  %v7236_v33 = vpop.f32.mrb[35].mxu0  ;;  %v12795_v41 = vpop.f32.mrb[119].mxu1  ;;  %v7315_v45 = vld [vmem:[%s18356_s13] sm:$0x7] }
0x1ca4   : > { %v7310_v37 = vadd.f32 %v13529_v19, %v7304_v46  ;;  %v7307_v15 = vadd.f32 %v7295_v6, %v7236_v33  ;;  %v7316_v6 = vld [vmem:[%s1199_s16] sm:$0x7]  ;;  %v7372_v10 = vrot.slane %v7315_v45, %v17497_v8  ;;  %v7368_v13 = vrot.slane %v7315_v45, %v17495_v11 }
0x1ca5   : > { %v7311_v54 = vadd.f32 %v13530_v20, %v7305_v16  ;;  %v7312_v29 = vadd.f32 %v13531_v34, %v7306_v40  ;;  %v7308_v4 = vadd.f32 %v7299_v9, %v7285_v28  ;;  %v7364_v9 = vrot.slane %v7315_v45, %v17491_v22 }
0x1ca6   : > { %v7317_v59 = vadd.f32 %v7310_v37, %v7309_v0  ;;  %v7313_v3 = vadd.f32 %v13532_v44, %v7307_v15  ;;  %v7386_v63 = vrot.slane %v7316_v6, %v17491_v22  ;;  %v7394_v21 = vrot.slane %v7316_v6, %v17497_v8 }
0x1ca7   : > { %v7314_v31 = vadd.f32 %v13533_v43, %v7308_v4  ;;  %v7390_v23 = vrot.slane %v7316_v6, %v17495_v11 }
0x1ca8   : > { %v7321_v25 = vadd.f32 %v7313_v3, %v7312_v29  ;;  %v7318_v24 = vadd.f32 %v7317_v59, %v7311_v54 }
0x1caa   : > { %7319 = vadd.xlane.f32.xlu1 %v7318_v24  ;;  %v7322_v18 = vadd.f32 %v7321_v25, %v7314_v31 }
0x1cae   : > { %7323 = vadd.xlane.f32.xlu1 %v7322_v18 }
0x1d37   : > { %v7320_v47 = vpop.xlane.xlu1 %7319 }
0x1d38   : > { %v7326_v51 = vmul.f32 0.0026041667, %v7320_v47 }
0x1d3a   : > { %v7328_v26 = vsub.f32 %v7309_v0, %v7326_v51  ;;  %v7329_v35 = vsub.f32 %v7310_v37, %v7326_v51  ;;  %v7330_v48 = vsub.f32 %v7311_v54, %v7326_v51 }
0x1d3b   : > { %v7324_v12 = vpop.xlane.xlu1 %7323 }
0x1d3c   : > { %v7334_v62 = vmul.f32 %v7328_v26, %v7328_v26  ;;  %v7335_v57 = vmul.f32 %v7329_v35, %v7329_v35  ;;  %v7327_v32 = vmul.f32 0.0026041667, %v7324_v12  ;;  %v7336_v30 = vmul.f32 %v7330_v48, %v7330_v48 }
0x1d3e   : > { %v7331_v56 = vsub.f32 %v7312_v29, %v7327_v32  ;;  %v7332_v39 = vsub.f32 %v7313_v3, %v7327_v32  ;;  %v7333_v49 = vsub.f32 %v7314_v31, %v7327_v32  ;;  %v7340_v50 = vadd.f32 %v7335_v57, %v7334_v62 }
0x1d40   : > { %v7337_v5 = vmul.f32 %v7331_v56, %v7331_v56  ;;  %v7338_v36 = vmul.f32 %v7332_v39, %v7332_v39  ;;  %v7341_v52 = vadd.f32 %v7340_v50, %v7336_v30  ;;  %v7339_v7 = vmul.f32 %v7333_v49, %v7333_v49 }
0x1d42   : > { %7342 = vadd.xlane.f32.xlu1 %v7341_v52  ;;  %v7344_v55 = vadd.f32 %v7338_v36, %v7337_v5 }
0x1d44   : > { %v7345_v42 = vadd.f32 %v7344_v55, %v7339_v7 }
0x1d46   : > { %7346 = vadd.xlane.f32.xlu1 %v7345_v42 }
0x1dcf   : > { %v7343_v1 = vpop.xlane.xlu1 %7342 }
0x1dd0   : > { %v7348_v58 = vmul.f32 0.0026041667, %v7343_v1 }
0x1dd2   : > { %v7350_v38 = vadd.f32 1e-05, %v7348_v58 }
0x1dd3   : > { %v7347_v60 = vpop.xlane.xlu1 %7346 }
0x1dd4   : > { %13472 = vrsqrt.f32 %v7350_v38  ;;  %v7349_v2 = vmul.f32 0.0026041667, %v7347_v60 }
0x1dd6   : > { %v7351_v27 = vadd.f32 1e-05, %v7349_v2 }
0x1dd8   : > { %13474 = vrsqrt.f32 %v7351_v27 }
0x1dde   : > { %v13473_v14 = vpop.eup %13472 }
0x1ddf   : > { %v7354_v46 = vmul.f32 %v13473_v14, %v7328_v26  ;;  %v7355_v53 = vmul.f32 %v13473_v14, %v7329_v35  ;;  %v7356_v61 = vmul.f32 %v13473_v14, %v7330_v48 }
0x1de1   : > { %v7376_v17 = vmul.f32 %v7364_v9, %v7354_v46  ;;  %v7377_v0 = vmul.f32 %v7368_v13, %v7355_v53  ;;  %v7378_v16 = vmul.f32 %v7372_v10, %v7356_v61 }
0x1de2   : > { %v13475_v40 = vpop.eup %13474 }
0x1de3   : > { %v7398_v28 = vadd.f32 %v7386_v63, %v7376_v17  ;;  %v7399_v33 = vadd.f32 %v7390_v23, %v7377_v0  ;;  %v7400_v41 = vadd.f32 %v7394_v21, %v7378_v16  ;;  %v7357_v19 = vmul.f32 %v13475_v40, %v7331_v56 }
0x1de4   : > { %v7358_v37 = vmul.f32 %v13475_v40, %v7332_v39  ;;  %v7359_v15 = vmul.f32 %v13475_v40, %v7333_v49 }
0x1de5   : > { %7404 = vst [vmem:[#allocation2] sm:$0xff] %v7398_v28  ;;  %7405 = vst [vmem:[#allocation2 + $0x8] sm:$0xff] %v7399_v33  ;;  %v7379_v22 = vmul.f32 %v7364_v9, %v7357_v19 }
0x1de6   : > { %7406 = vst [vmem:[#allocation2 + $0x10] sm:$0xff] %v7400_v41  ;;  %v7380_v8 = vmul.f32 %v7368_v13, %v7358_v37  ;;  %v7381_v20 = vmul.f32 %v7372_v10, %v7359_v15 }
0x1de7   : > { %v7401_v11 = vadd.f32 %v7386_v63, %v7379_v22 }
0x1de8   : > { %v7402_v54 = vadd.f32 %v7390_v23, %v7380_v8  ;;  %v7403_v34 = vadd.f32 %v7394_v21, %v7381_v20 }
0x1de9   : > { %7407 = vst [vmem:[#allocation2 + $0x18] sm:$0xff] %v7401_v11 }
0x1dea   : > { %7408 = vst [vmem:[#allocation2 + $0x20] sm:$0xff] %v7402_v54  ;;  %7409 = vst [vmem:[#allocation2 + $0x28] sm:$0xff] %v7403_v34 }
0x1deb PF: > { %v13534_v29 = vld [vmem:[%s15821_s18 + $0x4] ss:$24 sps:$4 sm:$0xff]   ;;  %v13538_v59 = vld [vmem:[%s15821_s18] ss:$24 sps:$4 sm:$0xff]   ;;  %v13540_v3 = vld [vmem:[%s15821_s18 + $0x34] ss:$24 sps:$4 sm:$0xff]  }
0x1dec   : > { %v13536_v4 = vld [vmem:[%s15821_s18 + $0xc] ss:$24 sps:$4 sm:$0xff]   ;;  %8315 = vmatprep.subr.bf16.mxu0 %v13534_v29  ;;  %v13539_v44 = vld [vmem:[%s15821_s18 + $0x8] ss:$24 sps:$4 sm:$0xff]   ;;  %v13542_v43 = vld [vmem:[%s15821_s18 + $0x3c] ss:$24 sps:$4 sm:$0xff]  }
0x1ded   : > { %8401 = vmatprep.subr.bf16.mxu1 %v13536_v4  ;;  %8316 = vmatpush1.bf16.msra.mxu0 %v13538_v59  ;;  %v13544_v31 = vld [vmem:[%s15821_s18 + $0x30] ss:$24 sps:$4 sm:$0xff]   ;;  %v13546_v24 = vld [vmem:[%s15821_s18 + $0x64] ss:$24 sps:$4 sm:$0xff]   ;;  %v13550_v47 = vld [vmem:[%s15821_s18 + $0x60] ss:$24 sps:$4 sm:$0xff]  }
0x1dee   : > { %8402 = vmatpush1.bf16.msra.mxu1 %v13539_v44  ;;  %8317 = vmatprep.subr.bf16.mxu0 %v13540_v3  ;;  %v13545_v25 = vld [vmem:[%s15821_s18 + $0x38] ss:$24 sps:$4 sm:$0xff]   ;;  %v13548_v18 = vld [vmem:[%s15821_s18 + $0x6c] ss:$24 sps:$4 sm:$0xff]   ;;  %v13551_v51 = vld [vmem:[%s15821_s18 + $0x68] ss:$24 sps:$4 sm:$0xff]  }
0x1def   : > { %8403 = vmatprep.subr.bf16.mxu1 %v13542_v43  ;;  %v13552_v26 = vld [vmem:[%s15821_s18 + $0x94] ss:$24 sps:$4 sm:$0xff]   ;;  %v13556_v48 = vld [vmem:[%s15821_s18 + $0x90] ss:$24 sps:$4 sm:$0xff]   ;;  %v13558_v62 = vld [vmem:[%s15821_s18 + $0xc4] ss:$24 sps:$4 sm:$0xff]  }
0x1df0   : > { %v13554_v35 = vld [vmem:[%s15821_s18 + $0x9c] ss:$24 sps:$4 sm:$0xff]   ;;  %v13557_v12 = vld [vmem:[%s15821_s18 + $0x98] ss:$24 sps:$4 sm:$0xff]   ;;  %v13560_v57 = vld [vmem:[%s15821_s18 + $0xcc] ss:$24 sps:$4 sm:$0xff]  }
0x1df1   : > { %8318 = vmatpush1.bf16.msra.mxu0 %v13544_v31  ;;  %v13562_v32 = vld [vmem:[%s15821_s18 + $0xc0] ss:$24 sps:$4 sm:$0xff]   ;;  %v13564_v56 = vld [vmem:[%s15821_s18 + $0xf4] ss:$24 sps:$4 sm:$0xff]   ;;  %v13568_v49 = vld [vmem:[%s15821_s18 + $0xf0] ss:$24 sps:$4 sm:$0xff]  }
0x1df2   : > { %8404 = vmatpush1.bf16.msra.mxu1 %v13545_v25  ;;  %8319 = vmatprep.subr.bf16.mxu0 %v13546_v24  ;;  %v13563_v30 = vld [vmem:[%s15821_s18 + $0xc8] ss:$24 sps:$4 sm:$0xff]   ;;  %v13566_v39 = vld [vmem:[%s15821_s18 + $0xfc] ss:$24 sps:$4 sm:$0xff]   ;;  %v13569_v50 = vld [vmem:[%s15821_s18 + $0xf8] ss:$24 sps:$4 sm:$0xff]  }
0x1df3   : > { %8405 = vmatprep.subr.bf16.mxu1 %v13548_v18  ;;  %v13570_v5 = vld [vmem:[%s15821_s18 + $0x124] ss:$24 sps:$4 sm:$0xff]   ;;  %v13574_v52 = vld [vmem:[%s15821_s18 + $0x120] ss:$24 sps:$4 sm:$0xff]   ;;  %v13576_v55 = vld [vmem:[%s15821_s18 + $0x154] ss:$24 sps:$4 sm:$0xff]  }
0x1df4   : > { %v13572_v36 = vld [vmem:[%s15821_s18 + $0x12c] ss:$24 sps:$4 sm:$0xff]   ;;  %v13575_v7 = vld [vmem:[%s15821_s18 + $0x128] ss:$24 sps:$4 sm:$0xff]   ;;  %v13578_v42 = vld [vmem:[%s15821_s18 + $0x15c] ss:$24 sps:$4 sm:$0xff]  }
0x1df5   : > { %8320 = vmatpush1.bf16.msra.mxu0 %v13550_v47  ;;  %v13580_v1 = vld [vmem:[%s15821_s18 + $0x150] ss:$24 sps:$4 sm:$0xff]   ;;  %v13582_v38 = vld [vmem:[%s15821_s18 + $0x184] ss:$24 sps:$4 sm:$0xff]   ;;  %v13586_v2 = vld [vmem:[%s15821_s18 + $0x180] ss:$24 sps:$4 sm:$0xff]  }
0x1df6   : > { %8406 = vmatpush1.bf16.msra.mxu1 %v13551_v51  ;;  %8321 = vmatprep.subr.bf16.mxu0 %v13552_v26  ;;  %v13581_v58 = vld [vmem:[%s15821_s18 + $0x158] ss:$24 sps:$4 sm:$0xff]   ;;  %v13584_v60 = vld [vmem:[%s15821_s18 + $0x18c] ss:$24 sps:$4 sm:$0xff]   ;;  %v13587_v27 = vld [vmem:[%s15821_s18 + $0x188] ss:$24 sps:$4 sm:$0xff]  }
0x1df7   : > { %8407 = vmatprep.subr.bf16.mxu1 %v13554_v35  ;;  %v13588_v45 = vld [vmem:[%s15821_s18 + $0x1b4] ss:$24 sps:$4 sm:$0xff]   ;;  %v13592_v9 = vld [vmem:[%s15821_s18 + $0x1b0] ss:$24 sps:$4 sm:$0xff]   ;;  %v13594_v13 = vld [vmem:[%s15821_s18 + $0x1e4] ss:$24 sps:$4 sm:$0xff]  }
0x1df8   : > { %v13590_v6 = vld [vmem:[%s15821_s18 + $0x1bc] ss:$24 sps:$4 sm:$0xff]   ;;  %v13593_v10 = vld [vmem:[%s15821_s18 + $0x1b8] ss:$24 sps:$4 sm:$0xff]   ;;  %v13596_v14 = vld [vmem:[%s15821_s18 + $0x1ec] ss:$24 sps:$4 sm:$0xff]  }
0x1df9   : > { %8322 = vmatpush1.bf16.msra.mxu0 %v13556_v48  ;;  %v13598_v63 = vld [vmem:[%s15821_s18 + $0x1e0] ss:$24 sps:$4 sm:$0xff]   ;;  %v13600_v23 = vld [vmem:[%s15821_s18 + $0x214] ss:$24 sps:$4 sm:$0xff]   ;;  %v13604_v17 = vld [vmem:[%s15821_s18 + $0x210] ss:$24 sps:$4 sm:$0xff]  }
0x1dfa   : > { %8408 = vmatpush1.bf16.msra.mxu1 %v13557_v12  ;;  %8323 = vmatprep.subr.bf16.mxu0 %v13558_v62  ;;  %v13599_v21 = vld [vmem:[%s15821_s18 + $0x1e8] ss:$24 sps:$4 sm:$0xff]   ;;  %v13602_v46 = vld [vmem:[%s15821_s18 + $0x21c] ss:$24 sps:$4 sm:$0xff]   ;;  %v13605_v0 = vld [vmem:[%s15821_s18 + $0x218] ss:$24 sps:$4 sm:$0xff]  }
0x1dfb   : > { %8409 = vmatprep.subr.bf16.mxu1 %v13560_v57  ;;  %v17560_v53 = vld [vmem:[#allocation2 + $0x8] sm:$0xff]  ;;  %v17562_v61 = vld [vmem:[#allocation2 + $0x20] sm:$0xff]  ;;  %v13612_v19 = vld [vmem:[%s15821_s18 + $0x274] ss:$24 sps:$4 sm:$0xff]   ;;  %v14853_v62 = vmov 0  }
0x1dfc   : > { %v17568_v16 = vpack.c.bf16 %v17562_v61, %v17560_v53  ;;  %v13606_v40 = vld [vmem:[%s15821_s18 + $0x244] ss:$24 sps:$4 sm:$0xff]   ;;  %v13610_v33 = vld [vmem:[%s15821_s18 + $0x240] ss:$24 sps:$4 sm:$0xff]   ;;  %v13616_v15 = vld [vmem:[%s15821_s18 + $0x270] ss:$24 sps:$4 sm:$0xff]  }
0x1dfd   : > { %8324 = vmatpush1.bf16.msra.mxu0 %v13562_v32  ;;  %v13608_v28 = vld [vmem:[%s15821_s18 + $0x24c] ss:$24 sps:$4 sm:$0xff]   ;;  %v13611_v41 = vld [vmem:[%s15821_s18 + $0x248] ss:$24 sps:$4 sm:$0xff]   ;;  %v13614_v37 = vld [vmem:[%s15821_s18 + $0x27c] ss:$24 sps:$4 sm:$0xff]  }
0x1dfe   : > { %8410 = vmatpush1.bf16.msra.mxu1 %v13563_v30  ;;  %8325 = vmatprep.subr.bf16.mxu0 %v13564_v56  ;;  %v13617_v22 = vld [vmem:[%s15821_s18 + $0x278] ss:$24 sps:$4 sm:$0xff]   ;;  %v13618_v8 = vld [vmem:[%s15821_s18 + $0x2a4] ss:$24 sps:$4 sm:$0xff]   ;;  %v13623_v54 = vld [vmem:[%s15821_s18 + $0x2a8] ss:$24 sps:$4 sm:$0xff]  }
0x1dff   : > { %8411 = vmatprep.subr.bf16.mxu1 %v13566_v39  ;;  %8347 = vmatprep.mubr.bf16.mxu0 %v17568_v16  ;;  %v13620_v20 = vld [vmem:[%s15821_s18 + $0x2ac] ss:$24 sps:$4 sm:$0xff]   ;;  %v13622_v11 = vld [vmem:[%s15821_s18 + $0x2a0] ss:$24 sps:$4 sm:$0xff]   ;;  %v13626_v29 = vld [vmem:[%s15821_s18 + $0x2dc] ss:$24 sps:$4 sm:$0xff]  }
0x1e00   : > { %8433 = vmatprep.mubr.bf16.mxu1 %v17568_v16  ;;  %v13624_v34 = vld [vmem:[%s15821_s18 + $0x2d4] ss:$24 sps:$4 sm:$0xff]   ;;  %v13628_v4 = vld [vmem:[%s15821_s18 + $0x2d0] ss:$24 sps:$4 sm:$0xff]   ;;  %v13632_v44 = vld [vmem:[%s15821_s18 + $0x304] ss:$24 sps:$4 sm:$0xff]  }
0x1e01   : > { %8326 = vmatpush1.bf16.msra.mxu0 %v13568_v49  ;;  %v13629_v59 = vld [vmem:[%s15821_s18 + $0x2d8] ss:$24 sps:$4 sm:$0xff]   ;;  %v13635_v31 = vld [vmem:[%s15821_s18 + $0x30c] ss:$24 sps:$4 sm:$0xff]   ;;  %v13633_v18 = vld [vmem:[%s15821_s18 + $0x308] ss:$24 sps:$4 sm:$0xff]  }
0x1e02   : > { %8412 = vmatpush1.bf16.msra.mxu1 %v13569_v50  ;;  %8327 = vmatprep.subr.bf16.mxu0 %v13570_v5  ;;  %v17589_v3 = vld [vmem:[#allocation2] sm:$0xff]  ;;  %v17591_v43 = vld [vmem:[#allocation2 + $0x18] sm:$0xff]  ;;  %v13647_v12 = vld [vmem:[%s15821_s18 + $0x36c] ss:$24 sps:$4 sm:$0xff]  }
0x1e03   : > { %8413 = vmatprep.subr.bf16.mxu1 %v13572_v36  ;;  %v13630_v25 = vld [vmem:[%s15821_s18 + $0x300] ss:$24 sps:$4 sm:$0xff]   ;;  %v17597_v24 = vpack.c.bf16 %v17591_v43, %v17589_v3  ;;  %v13638_v47 = vld [vmem:[%s15821_s18 + $0x334] ss:$24 sps:$4 sm:$0xff]   ;;  %v13636_v26 = vld [vmem:[%s15821_s18 + $0x330] ss:$24 sps:$4 sm:$0xff]  }
0x1e04   : > { %v13641_v51 = vld [vmem:[%s15821_s18 + $0x33c] ss:$24 sps:$4 sm:$0xff]   ;;  %v13639_v35 = vld [vmem:[%s15821_s18 + $0x338] ss:$24 sps:$4 sm:$0xff]   ;;  %v13645_v32 = vld [vmem:[%s15821_s18 + $0x368] ss:$24 sps:$4 sm:$0xff]  }
0x1e05   : > { %8328 = vmatpush1.bf16.msra.mxu0 %v13574_v52  ;;  %v13644_v48 = vld [vmem:[%s15821_s18 + $0x364] ss:$24 sps:$4 sm:$0xff]   ;;  %v13642_v57 = vld [vmem:[%s15821_s18 + $0x360] ss:$24 sps:$4 sm:$0xff]   ;;  %v13650_v30 = vld [vmem:[%s15821_s18 + $0x394] ss:$24 sps:$4 sm:$0xff]  }
0x1e06   : > { %8414 = vmatpush1.bf16.msra.mxu1 %v13575_v7  ;;  %8329 = vmatprep.subr.bf16.mxu0 %v13576_v55  ;;  %v13653_v56 = vld [vmem:[%s15821_s18 + $0x39c] ss:$24 sps:$4 sm:$0xff]   ;;  %v13648_v39 = vld [vmem:[%s15821_s18 + $0x390] ss:$24 sps:$4 sm:$0xff]   ;;  %v13659_v5 = vld [vmem:[%s15821_s18 + $0x3cc] ss:$24 sps:$4 sm:$0xff]  }
0x1e07   : > { %8415 = vmatprep.subr.bf16.mxu1 %v13578_v42  ;;  %v13651_v49 = vld [vmem:[%s15821_s18 + $0x398] ss:$24 sps:$4 sm:$0xff]   ;;  %v13656_v50 = vld [vmem:[%s15821_s18 + $0x3c4] ss:$24 sps:$4 sm:$0xff]   ;;  %v13657_v52 = vld [vmem:[%s15821_s18 + $0x3c8] ss:$24 sps:$4 sm:$0xff]  }
0x1e08   : > { %v13654_v36 = vld [vmem:[%s15821_s18 + $0x3c0] ss:$24 sps:$4 sm:$0xff]   ;;  %v13662_v7 = vld [vmem:[%s15821_s18 + $0x3f4] ss:$24 sps:$4 sm:$0xff]   ;;  %v13660_v42 = vld [vmem:[%s15821_s18 + $0x3f0] ss:$24 sps:$4 sm:$0xff]  }
0x1e09   : > { %8330 = vmatpush1.bf16.msra.mxu0 %v13580_v1  ;;  %v13665_v55 = vld [vmem:[%s15821_s18 + $0x3fc] ss:$24 sps:$4 sm:$0xff]   ;;  %v13663_v1 = vld [vmem:[%s15821_s18 + $0x3f8] ss:$24 sps:$4 sm:$0xff]  }
0x1e0a   : > { %8416 = vmatpush1.bf16.msra.mxu1 %v13581_v58  ;;  %8331 = vmatprep.subr.bf16.mxu0 %v13582_v38  ;;  %v13668_v58 = vld [vmem:[%s15821_s18 + $0x424] ss:$24 sps:$4 sm:$0xff]  }
0x1e0b   : > { %8417 = vmatprep.subr.bf16.mxu1 %v13584_v60  ;;  %v13671_v38 = vld [vmem:[%s15821_s18 + $0x42c] ss:$24 sps:$4 sm:$0xff]   ;;  %v13666_v60 = vld [vmem:[%s15821_s18 + $0x420] ss:$24 sps:$4 sm:$0xff]  }
0x1e0d   : > { %8332 = vmatpush1.bf16.msra.mxu0 %v13586_v2  ;;  %v13669_v2 = vld [vmem:[%s15821_s18 + $0x428] ss:$24 sps:$4 sm:$0xff]  }
0x1e0e   : > { %8418 = vmatpush1.bf16.msra.mxu1 %v13587_v27  ;;  %8333 = vmatprep.subr.bf16.mxu0 %v13588_v45  ;;  %v13674_v27 = vld [vmem:[%s15821_s18 + $0x454] ss:$24 sps:$4 sm:$0xff]  }
0x1e0f   : > { %8419 = vmatprep.subr.bf16.mxu1 %v13590_v6  ;;  %v13677_v45 = vld [vmem:[%s15821_s18 + $0x45c] ss:$24 sps:$4 sm:$0xff]   ;;  %v13672_v6 = vld [vmem:[%s15821_s18 + $0x450] ss:$24 sps:$4 sm:$0xff]  }
0x1e11   : > { %8334 = vmatpush1.bf16.msra.mxu0 %v13592_v9  ;;  %v13675_v9 = vld [vmem:[%s15821_s18 + $0x458] ss:$24 sps:$4 sm:$0xff]  }
0x1e12   : > { %8420 = vmatpush1.bf16.msra.mxu1 %v13593_v10  ;;  %8335 = vmatprep.subr.bf16.mxu0 %v13594_v13  ;;  %v17632_v10 = vld [vmem:[#allocation2 + $0x10] sm:$0xff]  ;;  %v17634_v13 = vld [vmem:[#allocation2 + $0x28] sm:$0xff] }
0x1e13   : > { %8421 = vmatprep.subr.bf16.mxu1 %v13596_v14  ;;  %v13680_v14 = vld [vmem:[%s15821_s18 + $0x14] ss:$24 sps:$4 sm:$0xff]  }
0x1e15   : > { %8336 = vmatpush1.bf16.msra.mxu0 %v13598_v63  ;;  %v17639_v63 = vpack.c.bf16 %v17634_v13, %v17632_v10 }
0x1e16   : > { %8422 = vmatpush1.bf16.msra.mxu1 %v13599_v21  ;;  %8337 = vmatprep.subr.bf16.mxu0 %v13600_v23  ;;  %v13678_v21 = vld [vmem:[%s15821_s18 + $0x10] ss:$24 sps:$4 sm:$0xff]   ;;  %v13683_v23 = vld [vmem:[%s15821_s18 + $0x44] ss:$24 sps:$4 sm:$0xff]  }
0x1e17   : > { %8423 = vmatprep.subr.bf16.mxu1 %v13602_v46  ;;  %v13681_v46 = vld [vmem:[%s15821_s18 + $0x40] ss:$24 sps:$4 sm:$0xff]  }
0x1e19   : > { %8338 = vmatpush1.bf16.msra.mxu0 %v13604_v17  ;;  %v13750_v17 = vld [vmem:[%s15831_s10] ss:$12 sps:$4 sm:$0xff]  }
0x1e1a   : > { %8424 = vmatpush1.bf16.msra.mxu1 %v13605_v0  ;;  %8339 = vmatprep.subr.bf16.mxu0 %v13606_v40  ;;  %v13752_v0 = vld [vmem:[%s15831_s10 + $0x4] ss:$12 sps:$4 sm:$0xff]   ;;  %v13686_v40 = vld [vmem:[%s15821_s18 + $0x74] ss:$24 sps:$4 sm:$0xff]  }
0x1e1b   : > { %8425 = vmatprep.subr.bf16.mxu1 %v13608_v28  ;;  %v13753_v28 = vld [vmem:[%s15831_s10 + $0x18] ss:$12 sps:$4 sm:$0xff]  }
0x1e1d   : > { %8340 = vmatpush1.bf16.msra.mxu0 %v13610_v33  ;;  %v13755_v33 = vld [vmem:[%s15831_s10 + $0x1c] ss:$12 sps:$4 sm:$0xff]  }
0x1e1e   : > { %8426 = vmatpush1.bf16.msra.mxu1 %v13611_v41  ;;  %8341 = vmatprep.subr.bf16.mxu0 %v13612_v19  ;;  %v13684_v41 = vld [vmem:[%s15821_s18 + $0x70] ss:$24 sps:$4 sm:$0xff]   ;;  %v13689_v19 = vld [vmem:[%s15821_s18 + $0xa4] ss:$24 sps:$4 sm:$0xff]  }
0x1e1f   : > { %8427 = vmatprep.subr.bf16.mxu1 %v13614_v37  ;;  %v13687_v37 = vld [vmem:[%s15821_s18 + $0xa0] ss:$24 sps:$4 sm:$0xff]  }
0x1e21   : > { %8342 = vmatpush1.bf16.msra.mxu0 %v13616_v15  ;;  %v13690_v15 = vld [vmem:[%s15821_s18 + $0xd0] ss:$24 sps:$4 sm:$0xff]  }
0x1e22   : > { %8428 = vmatpush1.bf16.msra.mxu1 %v13617_v22  ;;  %8343 = vmatprep.subr.bf16.mxu0 %v13618_v8  ;;  %v13695_v22 = vld [vmem:[%s15821_s18 + $0x104] ss:$24 sps:$4 sm:$0xff]   ;;  %v13693_v8 = vld [vmem:[%s15821_s18 + $0x100] ss:$24 sps:$4 sm:$0xff]  }
0x1e23   : > { %8429 = vmatprep.subr.bf16.mxu1 %v13620_v20  ;;  %v13698_v20 = vld [vmem:[%s15821_s18 + $0x134] ss:$24 sps:$4 sm:$0xff]  }
0x1e25   : > { %8344 = vmatpush1.bf16.msra.mxu0 %v13622_v11  ;;  %v13696_v11 = vld [vmem:[%s15821_s18 + $0x130] ss:$24 sps:$4 sm:$0xff]  }
0x1e26   : > { %8430 = vmatpush1.bf16.msra.mxu1 %v13623_v54  ;;  %8345 = vmatprep.subr.bf16.mxu0 %v13624_v34  ;;  %v13701_v54 = vld [vmem:[%s15821_s18 + $0x164] ss:$24 sps:$4 sm:$0xff]   ;;  %v13699_v34 = vld [vmem:[%s15821_s18 + $0x160] ss:$24 sps:$4 sm:$0xff]  }
0x1e27   : > { %8431 = vmatprep.subr.bf16.mxu1 %v13626_v29  ;;  %v13704_v29 = vld [vmem:[%s15821_s18 + $0x194] ss:$24 sps:$4 sm:$0xff]  }
0x1e29   : > { %8346 = vmatpush1.bf16.msra.mxu0 %v13628_v4  ;;  %v13702_v4 = vld [vmem:[%s15821_s18 + $0x190] ss:$24 sps:$4 sm:$0xff]  }
0x1e2a   : > { %8432 = vmatpush1.bf16.msra.mxu1 %v13629_v59  ;;  %8358 = vmatprep.subr.bf16.mxu0 %v13632_v44  ;;  %v13707_v59 = vld [vmem:[%s15821_s18 + $0x1c4] ss:$24 sps:$4 sm:$0xff]   ;;  %v13705_v44 = vld [vmem:[%s15821_s18 + $0x1c0] ss:$24 sps:$4 sm:$0xff]  }
0x1e2b   : > { %8444 = vmatprep.subr.bf16.mxu1 %v13635_v31  ;;  %v13710_v31 = vld [vmem:[%s15821_s18 + $0x1f4] ss:$24 sps:$4 sm:$0xff]  }
0x1e2c   : > { %8348 = vmatmul.mubr.bf16.vlgmr.msra.gmra.mrb[0].mxu0 %v17597_v24 }
0x1e2d   : > { %8434 = vmatmul.mubr.bf16.vlgmr.msra.gmra.mrb[0].mxu1 %v17597_v24  ;;  %8359 = vmatpush1.bf16.msra.mxu0 %v13630_v25  ;;  %v13708_v25 = vld [vmem:[%s15821_s18 + $0x1f0] ss:$24 sps:$4 sm:$0xff]  }
0x1e2e   : > { %8445 = vmatpush1.bf16.msra.mxu1 %v13633_v18  ;;  %8360 = vmatprep.subr.bf16.mxu0 %v13638_v47  ;;  %v13713_v18 = vld [vmem:[%s15821_s18 + $0x224] ss:$24 sps:$4 sm:$0xff]   ;;  %v13711_v47 = vld [vmem:[%s15821_s18 + $0x220] ss:$24 sps:$4 sm:$0xff]  }
0x1e2f   : > { %8446 = vmatprep.subr.bf16.mxu1 %v13641_v51  ;;  %8390 = vmatprep.mubr.bf16.mxu0 %v14853_v62  ;;  %v13716_v51 = vld [vmem:[%s15821_s18 + $0x254] ss:$24 sps:$4 sm:$0xff]  }
0x1e30   : > { %8476 = vmatprep.mubr.bf16.mxu1 %v14853_v62 }
0x1e31   : > { %8361 = vmatpush1.bf16.msra.mxu0 %v13636_v26  ;;  %v13714_v26 = vld [vmem:[%s15821_s18 + $0x250] ss:$24 sps:$4 sm:$0xff]  }
0x1e32   : > { %8447 = vmatpush1.bf16.msra.mxu1 %v13639_v35  ;;  %8362 = vmatprep.subr.bf16.mxu0 %v13644_v48  ;;  %v13719_v35 = vld [vmem:[%s15821_s18 + $0x284] ss:$24 sps:$4 sm:$0xff]   ;;  %v13717_v48 = vld [vmem:[%s15821_s18 + $0x280] ss:$24 sps:$4 sm:$0xff]  }
0x1e33   : > { %8448 = vmatprep.subr.bf16.mxu1 %v13647_v12  ;;  %v13722_v12 = vld [vmem:[%s15821_s18 + $0x2b4] ss:$24 sps:$4 sm:$0xff]  }
0x1e35   : > { %8363 = vmatpush1.bf16.msra.mxu0 %v13642_v57  ;;  %v13720_v57 = vld [vmem:[%s15821_s18 + $0x2b0] ss:$24 sps:$4 sm:$0xff]  }
0x1e36   : > { %8449 = vmatpush1.bf16.msra.mxu1 %v13645_v32  ;;  %8364 = vmatprep.subr.bf16.mxu0 %v13650_v30  ;;  %v13725_v32 = vld [vmem:[%s15821_s18 + $0x2e4] ss:$24 sps:$4 sm:$0xff]   ;;  %v13723_v30 = vld [vmem:[%s15821_s18 + $0x2e0] ss:$24 sps:$4 sm:$0xff]  }
0x1e37   : > { %8450 = vmatprep.subr.bf16.mxu1 %v13653_v56  ;;  %v13728_v56 = vld [vmem:[%s15821_s18 + $0x314] ss:$24 sps:$4 sm:$0xff]  }
0x1e39   : > { %8365 = vmatpush1.bf16.msra.mxu0 %v13648_v39  ;;  %v13726_v39 = vld [vmem:[%s15821_s18 + $0x310] ss:$24 sps:$4 sm:$0xff]  }
0x1e3a   : > { %8451 = vmatpush1.bf16.msra.mxu1 %v13651_v49  ;;  %8366 = vmatprep.subr.bf16.mxu0 %v13656_v50  ;;  %v13731_v49 = vld [vmem:[%s15821_s18 + $0x344] ss:$24 sps:$4 sm:$0xff]   ;;  %v13729_v50 = vld [vmem:[%s15821_s18 + $0x340] ss:$24 sps:$4 sm:$0xff]  }
0x1e3b   : > { %8452 = vmatprep.subr.bf16.mxu1 %v13659_v5  ;;  %v13734_v5 = vld [vmem:[%s15821_s18 + $0x374] ss:$24 sps:$4 sm:$0xff]  }
0x1e3d   : > { %8367 = vmatpush1.bf16.msra.mxu0 %v13654_v36  ;;  %v13732_v36 = vld [vmem:[%s15821_s18 + $0x370] ss:$24 sps:$4 sm:$0xff]  }
0x1e3e   : > { %8453 = vmatpush1.bf16.msra.mxu1 %v13657_v52  ;;  %8368 = vmatprep.subr.bf16.mxu0 %v13662_v7  ;;  %v13737_v52 = vld [vmem:[%s15821_s18 + $0x3a4] ss:$24 sps:$4 sm:$0xff]   ;;  %v13735_v7 = vld [vmem:[%s15821_s18 + $0x3a0] ss:$24 sps:$4 sm:$0xff]  }
0x1e3f   : > { %8454 = vmatprep.subr.bf16.mxu1 %v13665_v55  ;;  %v13738_v55 = vld [vmem:[%s15821_s18 + $0x3d0] ss:$24 sps:$4 sm:$0xff]  }
0x1e41   : > { %8369 = vmatpush1.bf16.msra.mxu0 %v13660_v42  ;;  %v13741_v42 = vld [vmem:[%s15821_s18 + $0x400] ss:$24 sps:$4 sm:$0xff]  }
0x1e42   : > { %8455 = vmatpush1.bf16.msra.mxu1 %v13663_v1  ;;  %8370 = vmatprep.subr.bf16.mxu0 %v13668_v58  ;;  %v13746_v1 = vld [vmem:[%s15821_s18 + $0x434] ss:$24 sps:$4 sm:$0xff]  }
0x1e43   : > { %8456 = vmatprep.subr.bf16.mxu1 %v13671_v38  ;;  %v13758_v58 = vld [vmem:[%s15831_s10 + $0x34] ss:$12 sps:$4 sm:$0xff]   ;;  %v13756_v38 = vld [vmem:[%s15831_s10 + $0x30] ss:$12 sps:$4 sm:$0xff]  }
0x1e45   : > { %8371 = vmatpush1.bf16.msra.mxu0 %v13666_v60  ;;  %v13744_v60 = vld [vmem:[%s15821_s18 + $0x430] ss:$24 sps:$4 sm:$0xff]  }
0x1e46   : > { %8457 = vmatpush1.bf16.msra.mxu1 %v13669_v2  ;;  %8372 = vmatprep.subr.bf16.mxu0 %v13674_v27  ;;  %v13749_v2 = vld [vmem:[%s15821_s18 + $0x464] ss:$24 sps:$4 sm:$0xff]   ;;  %v13747_v27 = vld [vmem:[%s15821_s18 + $0x460] ss:$24 sps:$4 sm:$0xff]  }
0x1e47   : > { %8458 = vmatprep.subr.bf16.mxu1 %v13677_v45  ;;  %v13761_v45 = vld [vmem:[%s15831_s10 + $0x4c] ss:$12 sps:$4 sm:$0xff]  }
0x1e49   : > { %8373 = vmatpush1.bf16.msra.mxu0 %v13672_v6  ;;  %v13759_v6 = vld [vmem:[%s15831_s10 + $0x48] ss:$12 sps:$4 sm:$0xff]  }
0x1e4a   : > { %8459 = vmatpush1.bf16.msra.mxu1 %v13675_v9  ;;  %8487 = vmatprep.subr.bf16.mxu0 %v13680_v14  ;;  %v13764_v9 = vld [vmem:[%s15831_s10 + $0x64] ss:$12 sps:$4 sm:$0xff]   ;;  %v13762_v14 = vld [vmem:[%s15831_s10 + $0x60] ss:$12 sps:$4 sm:$0xff]  }
0x1e4b   : > { %9863 = vmatprep.subr.bf16.mxu1 %v13752_v0  ;;  %v13771_v0 = vld [vmem:[%s15831_s10 + $0xa8] ss:$12 sps:$4 sm:$0xff]  }
0x1e4c   : > { %8391 = vmatmul.mubr.bf16.vlgmr.msra.gmra.mrb[0].mxu0 %v17639_v63 }
0x1e4d   : > { %8477 = vmatmul.mubr.bf16.vlgmr.msra.gmra.mrb[0].mxu1 %v17639_v63  ;;  %8488 = vmatpush1.bf16.msra.mxu0 %v13678_v21  ;;  %v13767_v21 = vld [vmem:[%s15831_s10 + $0x7c] ss:$12 sps:$4 sm:$0xff]  }
0x1e4e   : > { %8519 = vmatprep.mubr.bf16.mxu0 %v17568_v16  ;;  %8489 = vmatprep.subr.bf16.mxu0 %v13683_v23  ;;  %v13692_v16 = vld [vmem:[%s15821_s18 + $0xd4] ss:$24 sps:$4 sm:$0xff]   ;;  %v13765_v23 = vld [vmem:[%s15831_s10 + $0x78] ss:$12 sps:$4 sm:$0xff]  }
0x1e4f   : > { %9864 = vmatpush1.bf16.msra.mxu1 %v13750_v17  ;;  %v13773_v17 = vld [vmem:[%s15831_s10 + $0xac] ss:$12 sps:$4 sm:$0xff]  }
0x1e50   : > { %9865 = vmatprep.subr.bf16.mxu1 %v13755_v33  ;;  %v13774_v33 = vld [vmem:[%s15831_s10 + $0xc0] ss:$12 sps:$4 sm:$0xff]  }
0x1e51   : > { %8490 = vmatpush1.bf16.msra.mxu0 %v13681_v46  ;;  %v13770_v46 = vld [vmem:[%s15831_s10 + $0x94] ss:$12 sps:$4 sm:$0xff]  }
0x1e52   : > { %8491 = vmatprep.subr.bf16.mxu0 %v13686_v40  ;;  %v13776_v40 = vld [vmem:[%s15831_s10 + $0xc4] ss:$12 sps:$4 sm:$0xff]  }
0x1e53   : > { %9866 = vmatpush1.bf16.msra.mxu1 %v13753_v28  ;;  %v13777_v28 = vld [vmem:[%s15831_s10 + $0xc8] ss:$12 sps:$4 sm:$0xff]  }
0x1e54   : > { %9867 = vmatprep.subr.bf16.mxu1 %v13758_v58 }
0x1e55   : > { %8492 = vmatpush1.bf16.msra.mxu0 %v13684_v41  ;;  %v13778_v41 = vld [vmem:[%s15831_s10 + $0x8] ss:$12 sps:$4 sm:$0xff]  }
0x1e56   : > { %8493 = vmatprep.subr.bf16.mxu0 %v13689_v19  ;;  %v13781_v19 = vld [vmem:[%s15831_s10 + $0xdc] ss:$12 sps:$4 sm:$0xff]  }
0x1e57   : > { %9868 = vmatpush1.bf16.msra.mxu1 %v13756_v38 }
0x1e58   : > { %9869 = vmatprep.subr.bf16.mxu1 %v13761_v45 }
0x1e59   : > { %8494 = vmatpush1.bf16.msra.mxu0 %v13687_v37  ;;  %v13782_v37 = vld [vmem:[%s15831_s10 + $0xe0] ss:$12 sps:$4 sm:$0xff]  }
0x1e5a   : > { %8495 = vmatprep.subr.bf16.mxu0 %v13692_v16  ;;  %v13779_v16 = vld [vmem:[%s15831_s10 + $0xd8] ss:$12 sps:$4 sm:$0xff]  }
0x1e5b   : > { %9870 = vmatpush1.bf16.msra.mxu1 %v13759_v6 }
0x1e5c   : > { %9871 = vmatprep.subr.bf16.mxu1 %v13764_v9 }
0x1e5d   : > { %8496 = vmatpush1.bf16.msra.mxu0 %v13690_v15  ;;  %v13783_v15 = vld [vmem:[%s15831_s10 + $0x20] ss:$12 sps:$4 sm:$0xff]  }
0x1e5e   : > { %8497 = vmatprep.subr.bf16.mxu0 %v13695_v22  ;;  %v13786_v22 = vld [vmem:[%s15831_s10 + $0xf4] ss:$12 sps:$4 sm:$0xff]  }
0x1e5f   : > { %9872 = vmatpush1.bf16.msra.mxu1 %v13762_v14 }
0x1e60   : > { %9873 = vmatprep.subr.bf16.mxu1 %v13767_v21 }
0x1e61   : > { %8498 = vmatpush1.bf16.msra.mxu0 %v13693_v8  ;;  %v13787_v8 = vld [vmem:[%s15831_s10 + $0xf8] ss:$12 sps:$4 sm:$0xff]  }
0x1e62   : > { %8499 = vmatprep.subr.bf16.mxu0 %v13698_v20  ;;  %v13784_v20 = vld [vmem:[%s15831_s10 + $0xf0] ss:$12 sps:$4 sm:$0xff]  }
0x1e63   : > { %9874 = vmatpush1.bf16.msra.mxu1 %v13765_v23 }
0x1e64   : > { %9875 = vmatprep.subr.bf16.mxu1 %v13770_v46 }
0x1e65   : > { %8500 = vmatpush1.bf16.msra.mxu0 %v13696_v11  ;;  %v13788_v11 = vld [vmem:[%s15831_s10 + $0x38] ss:$12 sps:$4 sm:$0xff]  }
0x1e66   : > { %8501 = vmatprep.subr.bf16.mxu0 %v13701_v54  ;;  %v13791_v54 = vld [vmem:[%s15831_s10 + $0x10c] ss:$12 sps:$4 sm:$0xff]  }
0x1e69   : > { %8502 = vmatpush1.bf16.msra.mxu0 %v13699_v34  ;;  %v13792_v34 = vld [vmem:[%s15831_s10 + $0x110] ss:$12 sps:$4 sm:$0xff]  }
0x1e6a   : > { %8503 = vmatprep.subr.bf16.mxu0 %v13704_v29  ;;  %v13789_v29 = vld [vmem:[%s15831_s10 + $0x108] ss:$12 sps:$4 sm:$0xff]  }
0x1e6d   : > { %8504 = vmatpush1.bf16.msra.mxu0 %v13702_v4  ;;  %v13793_v4 = vld [vmem:[%s15831_s10 + $0x50] ss:$12 sps:$4 sm:$0xff]  }
0x1e6e   : > { %8505 = vmatprep.subr.bf16.mxu0 %v13707_v59  ;;  %v13796_v59 = vld [vmem:[%s15831_s10 + $0x124] ss:$12 sps:$4 sm:$0xff]  }
0x1e71   : > { %8506 = vmatpush1.bf16.msra.mxu0 %v13705_v44  ;;  %v13797_v44 = vld [vmem:[%s15831_s10 + $0x128] ss:$12 sps:$4 sm:$0xff]  }
0x1e72   : > { %8507 = vmatprep.subr.bf16.mxu0 %v13710_v31  ;;  %v13794_v31 = vld [vmem:[%s15831_s10 + $0x120] ss:$12 sps:$4 sm:$0xff]  }
0x1e75   : > { %8508 = vmatpush1.bf16.msra.mxu0 %v13708_v25  ;;  %v13798_v25 = vld [vmem:[%s15831_s10 + $0x68] ss:$12 sps:$4 sm:$0xff]  }
0x1e76   : > { %8509 = vmatprep.subr.bf16.mxu0 %v13713_v18  ;;  %v13801_v18 = vld [vmem:[%s15831_s10 + $0x13c] ss:$12 sps:$4 sm:$0xff]  }
0x1e79   : > { %8510 = vmatpush1.bf16.msra.mxu0 %v13711_v47  ;;  %v13802_v47 = vld [vmem:[%s15831_s10 + $0x140] ss:$12 sps:$4 sm:$0xff]  }
0x1e7a   : > { %8511 = vmatprep.subr.bf16.mxu0 %v13716_v51  ;;  %v13799_v51 = vld [vmem:[%s15831_s10 + $0x138] ss:$12 sps:$4 sm:$0xff]  }
0x1e7d   : > { %8512 = vmatpush1.bf16.msra.mxu0 %v13714_v26  ;;  %v13803_v26 = vld [vmem:[%s15831_s10 + $0x80] ss:$12 sps:$4 sm:$0xff]  }
0x1e7e   : > { %8513 = vmatprep.subr.bf16.mxu0 %v13719_v35  ;;  %v13806_v35 = vld [vmem:[%s15831_s10 + $0x154] ss:$12 sps:$4 sm:$0xff]  }
0x1e81   : > { %8514 = vmatpush1.bf16.msra.mxu0 %v13717_v48  ;;  %v13807_v48 = vld [vmem:[%s15831_s10 + $0x158] ss:$12 sps:$4 sm:$0xff]  }
0x1e82   : > { %8515 = vmatprep.subr.bf16.mxu0 %v13722_v12  ;;  %v13804_v12 = vld [vmem:[%s15831_s10 + $0x150] ss:$12 sps:$4 sm:$0xff]  }
0x1e85   : > { %8516 = vmatpush1.bf16.msra.mxu0 %v13720_v57  ;;  %v13808_v57 = vld [vmem:[%s15831_s10 + $0x98] ss:$12 sps:$4 sm:$0xff]  }
0x1e86   : > { %8517 = vmatprep.subr.bf16.mxu0 %v13725_v32  ;;  %v13811_v32 = vld [vmem:[%s15831_s10 + $0x16c] ss:$12 sps:$4 sm:$0xff]  }
0x1e89   : > { %8518 = vmatpush1.bf16.msra.mxu0 %v13723_v30  ;;  %v13812_v30 = vld [vmem:[%s15831_s10 + $0x170] ss:$12 sps:$4 sm:$0xff]  }
0x1e8a   : > { %8530 = vmatprep.subr.bf16.mxu0 %v13728_v56  ;;  %v13809_v56 = vld [vmem:[%s15831_s10 + $0x168] ss:$12 sps:$4 sm:$0xff]  }
0x1e8c   : > { %8520 = vmatmul.mubr.bf16.vlgmr.msra.gmra.mrb[4].mxu0 %v17597_v24  ;;  %v13740_v24 = vld [vmem:[%s15821_s18 + $0x3d4] ss:$24 sps:$4 sm:$0xff]  }
0x1e8d   : > { %8531 = vmatpush1.bf16.msra.mxu0 %v13726_v39  ;;  %8562 = vmatprep.mubr.bf16.mxu0 %v14853_v62  ;;  %v13743_v62 = vld [vmem:[%s15821_s18 + $0x404] ss:$24 sps:$4 sm:$0xff]  }
0x1e8e   : > { %8532 = vmatprep.subr.bf16.mxu0 %v13731_v49  ;;  %v13813_v39 = vld [vmem:[%s15831_s10 + $0xb0] ss:$12 sps:$4 sm:$0xff]  }
0x1e8f   : > { %v13816_v49 = vld [vmem:[%s15831_s10 + $0x184] ss:$12 sps:$4 sm:$0xff]  }
0x1e91   : > { %8533 = vmatpush1.bf16.msra.mxu0 %v13729_v50  ;;  %v13817_v50 = vld [vmem:[%s15831_s10 + $0x248] ss:$12 sps:$4 sm:$0xff]  }
0x1e92   : > { %8534 = vmatprep.subr.bf16.mxu0 %v13734_v5  ;;  %v7565_v5 = vlaneseq }
0x1e95   : > { %8535 = vmatpush1.bf16.msra.mxu0 %v13732_v36  ;;  %v17744_v36 = vshrl.u32 %v7565_v5, 7 }
0x1e96   : > { %8536 = vmatprep.subr.bf16.mxu0 %v13737_v52 }
0x1e97   : > { %v17747_v52 = vsub.s32 0, %v17744_v36 }
0x1e99   : > { %8537 = vmatpush1.bf16.msra.mxu0 %v13735_v7  ;;  %v17750_v7 = vsub.s32 2, %v17744_v36 }
0x1e9a   : > { %8538 = vmatprep.subr.bf16.mxu0 %v13740_v24  ;;  %v17754_v24 = vld [vmem:[%s1217_s5] sm:$0x3f] }
0x1e9d   : > { %8539 = vmatpush1.bf16.msra.mxu0 %v13738_v55  ;;  %v17757_v55 = vsub.s32 1, %v17744_v36 }
0x1e9e   : > { %8540 = vmatprep.subr.bf16.mxu0 %v13743_v62  ;;  %v7579_v62 = vsub.s32 3, %v17744_v36 }
0x1e9f   : > { %v7572_v58 = vrot.slane %v17754_v24, %v17757_v55 }
0x1ea0   : > { %v7580_v38 = vrot.slane %v17754_v24, %v7579_v62 }
0x1ea1   : > { %8541 = vmatpush1.bf16.msra.mxu0 %v13741_v42  ;;  %v7568_v42 = vrot.slane %v17754_v24, %v17747_v52 }
0x1ea2   : > { %8542 = vmatprep.subr.bf16.mxu0 %v13746_v1  ;;  %v7576_v1 = vrot.slane %v17754_v24, %v17750_v7 }
0x1ea5   : > { %8543 = vmatpush1.bf16.msra.mxu0 %v13744_v60 }
0x1ea6   : > { %8544 = vmatprep.subr.bf16.mxu0 %v13749_v2 }
0x1ea9   : > { %8545 = vmatpush1.bf16.msra.mxu0 %v13747_v27 }
0x1eaa   : > { %12218 = vmatprep.subr.bf16.mxu0 %v13777_v28 }
0x1eac   : > { %8563 = vmatmul.mubr.bf16.vlgmr.msra.gmra.mrb[4].mxu0 %v17639_v63  ;;  %v13768_v63 = vld [vmem:[%s15831_s10 + $0x90] ss:$12 sps:$4 sm:$0xff]  }
0x1ead   : > { %9876 = vmatpush1.bf16.msra.mxu1 %v13768_v63  ;;  %12219 = vmatpush3.bf16.msra.mxu0 %v13778_v41 }
0x1eae   : > { %9877 = vmatprep.subr.bf16.mxu1 %v13773_v17  ;;  %12220 = vmatprep.subr.bf16.mxu0 %v13782_v37 }
0x1eb1   : > { %9878 = vmatpush1.bf16.msra.mxu1 %v13771_v0  ;;  %12221 = vmatpush3.bf16.msra.mxu0 %v13783_v15 }
0x1eb2   : > { %9879 = vmatprep.subr.bf16.mxu1 %v13776_v40  ;;  %12222 = vmatprep.subr.bf16.mxu0 %v13787_v8 }
0x1eb5   : > { %9880 = vmatpush1.bf16.msra.mxu1 %v13774_v33  ;;  %12223 = vmatpush3.bf16.msra.mxu0 %v13788_v11 }
0x1eb6   : > { %9881 = vmatprep.subr.bf16.mxu1 %v13781_v19  ;;  %12224 = vmatprep.subr.bf16.mxu0 %v13792_v34 }
0x1eb9   : > { %9882 = vmatpush1.bf16.msra.mxu1 %v13779_v16  ;;  %12225 = vmatpush3.bf16.msra.mxu0 %v13793_v4 }
0x1eba   : > { %9883 = vmatprep.subr.bf16.mxu1 %v13786_v22  ;;  %12226 = vmatprep.subr.bf16.mxu0 %v13797_v44 }
0x1ebd   : > { %9884 = vmatpush1.bf16.msra.mxu1 %v13784_v20  ;;  %12227 = vmatpush3.bf16.msra.mxu0 %v13798_v25 }
0x1ebe   : > { %9885 = vmatprep.subr.bf16.mxu1 %v13791_v54  ;;  %12228 = vmatprep.subr.bf16.mxu0 %v13802_v47 }
0x1ec1   : > { %9886 = vmatpush1.bf16.msra.mxu1 %v13789_v29  ;;  %12229 = vmatpush3.bf16.msra.mxu0 %v13803_v26 }
0x1ec2   : > { %9887 = vmatprep.subr.bf16.mxu1 %v13796_v59  ;;  %12230 = vmatprep.subr.bf16.mxu0 %v13807_v48 }
0x1ec5   : > { %9888 = vmatpush1.bf16.msra.mxu1 %v13794_v31  ;;  %12231 = vmatpush3.bf16.msra.mxu0 %v13808_v57 }
0x1ec6   : > { %9889 = vmatprep.subr.bf16.mxu1 %v13801_v18  ;;  %12232 = vmatprep.subr.bf16.mxu0 %v13812_v30 }
0x1ec9   : > { %9890 = vmatpush1.bf16.msra.mxu1 %v13799_v51  ;;  %12233 = vmatpush3.bf16.msra.mxu0 %v13813_v39 }
0x1eca   : > { %9891 = vmatprep.subr.bf16.mxu1 %v13806_v35  ;;  %12240 = vmatprep.subr.bf16.mxu0 %v13817_v50 }
0x1ecd   : > { %9892 = vmatpush1.bf16.msra.mxu1 %v13804_v12 }
0x1ece   : > { %9893 = vmatprep.subr.bf16.mxu1 %v13811_v32 }
0x1ed1   : > { %9894 = vmatpush1.bf16.msra.mxu1 %v13809_v56 }
0x1ed2   : > { %9906 = vmatprep.subr.bf16.mxu1 %v13816_v49 }
0x1f1f   : > { %v8392_v60 = vpop.f32.mrb[0].mxu0 }
0x1f20   : > { %v8478_v2 = vpop.f32.mrb[0].mxu1  ;;  %v17767_v27 = vadd.f32 %v8392_v60, %v7568_v42  ;;  %v8394_v6 = vpop.f32.mrb[1].mxu0 }
0x1f21   : > { %v17769_v45 = vadd.f32 %v8478_v2, %v7576_v1  ;;  %v8480_v9 = vpop.f32.mrb[1].mxu1  ;;  %v17771_v14 = vadd.f32 %v8394_v6, %v7572_v58  ;;  %v8396_v23 = vpop.f32.mrb[2].mxu0 }
0x1f22   : > { %v17773_v21 = vadd.f32 %v8480_v9, %v7580_v38  ;;  %v8482_v46 = vpop.f32.mrb[2].mxu1  ;;  %v17776_v63 = vmul.f32 0.70710677, %v17767_v27  ;;  %v8398_v11 = vpop.f32.mrb[3].mxu0  ;;  %v17791_v29 = vadd.f32 %v8396_v23, %v7568_v42 }
0x1f23   : > { %v17779_v17 = vmul.f32 0.70710677, %v17769_v45  ;;  %v17782_v0 = vmul.f32 0.70710677, %v17771_v14  ;;  %v8484_v54 = vpop.f32.mrb[3].mxu1  ;;  %v17793_v4 = vadd.f32 %v8482_v46, %v7576_v1  ;;  %v17798_v31 = vadd.f32 %v8398_v11, %v7572_v58 }
0x1f24   : > { %v17785_v40 = vmul.f32 0.70710677, %v17773_v21  ;;  %v8597_v28 = vand.u32 2147483647, %v17776_v63  ;;  %v17796_v44 = vmul.f32 0.70710677, %v17791_v29  ;;  %v17804_v51 = vadd.f32 %v8484_v54, %v7580_v38 }
0x1f25   : > { %v8599_v33 = vand.u32 2147483647, %v17779_v17  ;;  %v8598_v41 = vand.u32 2147483647, %v17782_v0  ;;  %v17801_v18 = vmul.f32 0.70710677, %v17793_v4 }
0x1f26   : > { %v8600_v19 = vand.u32 2147483647, %v17785_v40  ;;  %v8609_v37 = vmul.f32 0.3275911, %v8597_v28  ;;  %v8603_v47 = vand.u32 2147483647, %v17796_v44 }
0x1f27   : > { %v8611_v16 = vmul.f32 0.3275911, %v8599_v33  ;;  %v8610_v15 = vmul.f32 0.3275911, %v8598_v41  ;;  %v8767_v25 = vsub.f32 0.0, %v8599_v33  ;;  %v8765_v26 = vsub.f32 0.0, %v8597_v28 }
0x1f28   : > { %v8621_v22 = vadd.f32 1.0, %v8609_v37  ;;  %v8612_v20 = vmul.f32 0.3275911, %v8600_v19  ;;  %v8766_v35 = vsub.f32 0.0, %v8598_v41  ;;  %v8605_v48 = vand.u32 2147483647, %v17801_v18 }
0x1f29   : > { %v8623_v8 = vadd.f32 1.0, %v8611_v16  ;;  %v8622_v34 = vadd.f32 1.0, %v8610_v15  ;;  %v17808_v12 = vmul.f32 0.70710677, %v17798_v31  ;;  %v8768_v57 = vsub.f32 0.0, %v8600_v19 }
0x1f2a   : > { %13942 = vrcp.f32 %v8621_v22  ;;  %v8624_v59 = vadd.f32 1.0, %v8612_v20  ;;  %v8615_v32 = vmul.f32 0.3275911, %v8603_v47  ;;  %v8779_v30 = vmul.f32 %v8767_v25, %v8599_v33 }
0x1f2b   : > { %13944 = vrcp.f32 %v8623_v8  ;;  %v8617_v56 = vmul.f32 0.3275911, %v8605_v48  ;;  %v8604_v39 = vand.u32 2147483647, %v17808_v12  ;;  %v17812_v50 = vmul.f32 0.70710677, %v17804_v51 }
0x1f2c   : > { %13946 = vrcp.f32 %v8622_v34  ;;  %v8627_v49 = vadd.f32 1.0, %v8615_v32  ;;  %v8777_v5 = vmul.f32 %v8765_v26, %v8597_v28  ;;  %v8778_v62 = vmul.f32 %v8766_v35, %v8598_v41 }
0x1f2d   : > { %13948 = vrcp.f32 %v8624_v59  ;;  %v8629_v42 = vadd.f32 1.0, %v8617_v56  ;;  %v8616_v1 = vmul.f32 0.3275911, %v8604_v39  ;;  %v8780_v38 = vmul.f32 %v8768_v57, %v8600_v19 }
0x1f2e   : > { %13950 = vrcp.f32 %v8627_v49  ;;  %v8771_v60 = vsub.f32 0.0, %v8603_v47  ;;  %v17817_v2 = vand.u32 2147483647, %v17812_v50  ;;  %v8793_v23 = vmul.f32 1.442695, %v8779_v30 }
0x1f2f   : > { %13952 = vrcp.f32 %v8629_v42  ;;  %v8628_v46 = vadd.f32 1.0, %v8616_v1  ;;  %v8773_v33 = vsub.f32 0.0, %v8605_v48  ;;  %v8789_v16 = vmul.f32 1.442695, %v8777_v5 }
0x1f30   : > { %v8618_v41 = vmul.f32 0.3275911, %v17817_v2  ;;  %v8783_v22 = vmul.f32 %v8771_v60, %v8603_v47  ;;  %v8791_v54 = vmul.f32 1.442695, %v8778_v62  ;;  %v8795_v34 = vmul.f32 1.442695, %v8780_v38 }
0x1f31   : > { %13954 = vrcp.f32 %v8628_v46  ;;  %v8785_v26 = vmul.f32 %v8773_v33, %v8605_v48  ;;  %v8772_v35 = vsub.f32 0.0, %v8604_v39  ;;  %vm8837_vm5 = vcmp.lt.f32.partialorder %v17776_v63, 0.0 }
0x1f32   : > { %v8630_v8 = vadd.f32 1.0, %v8618_v41  ;;  %13956 = vpow2.f32 %v8793_v23  ;;  %v8801_v56 = vmul.f32 1.442695, %v8783_v22  ;;  %vm8839_vm6 = vcmp.lt.f32.partialorder %v17779_v17, 0.0 }
0x1f33   : > { %v8805_v48 = vmul.f32 1.442695, %v8785_v26  ;;  %v8784_v38 = vmul.f32 %v8772_v35, %v8604_v39  ;;  %vm8838_vm7 = vcmp.lt.f32.partialorder %v17782_v0, 0.0  ;;  %vm8843_vm8 = vcmp.lt.f32.partialorder %v17796_v44, 0.0 }
0x1f34   : > { %v17814_v58 = vpop.eup %13942  ;;  %13958 = vrcp.f32 %v8630_v8  ;;  %vm8845_vm9 = vcmp.lt.f32.partialorder %v17801_v18, 0.0  ;;  %vm8844_vm10 = vcmp.lt.f32.partialorder %v17808_v12, 0.0  ;;  %vm8840_vm11 = vcmp.lt.f32.partialorder %v17785_v40, 0.0 }
0x1f35   : > { %v17819_v6 = vpop.eup %13944  ;;  %v8657_v9 = vmul.f32 1.0614054, %v17814_v58  ;;  %13960 = vpow2.f32 %v8789_v16  ;;  %vm8846_vm12 = vcmp.lt.f32.partialorder %v17812_v50, 0.0  ;;  %v13819_v50 = vld [vmem:[%s15831_s10 + $0x198] ss:$12 sps:$4 sm:$0xff]  }
0x1f36   : > { %v8659_v28 = vmul.f32 1.0614054, %v17819_v6  ;;  %v17824_v19 = vpop.eup %13946  ;;  %13962 = vpow2.f32 %v8791_v54  ;;  %v8803_v54 = vmul.f32 1.442695, %v8784_v38 }
0x1f37   : > { %v8669_v37 = vadd.f32 -1.4531521, %v8657_v9  ;;  %v8658_v11 = vmul.f32 1.0614054, %v17824_v19  ;;  %v17828_v59 = vpop.eup %13948  ;;  %13964 = vpow2.f32 %v8795_v34 }
0x1f38   : > { %v8671_v15 = vadd.f32 -1.4531521, %v8659_v28  ;;  %v8660_v30 = vmul.f32 1.0614054, %v17828_v59  ;;  %v17834_v42 = vpop.eup %13950  ;;  %13966 = vpow2.f32 %v8801_v56 }
0x1f39   : > { %v8681_v20 = vmul.f32 %v17814_v58, %v8669_v37  ;;  %v8670_v32 = vadd.f32 -1.4531521, %v8658_v11  ;;  %v17837_v60 = vpop.eup %13952  ;;  %v8663_v28 = vmul.f32 1.0614054, %v17834_v42  ;;  %v8774_v37 = vsub.f32 0.0, %v17817_v2 }
0x1f3a   : > { %v8683_v25 = vmul.f32 %v17819_v6, %v8671_v15  ;;  %v8672_v62 = vadd.f32 -1.4531521, %v8660_v30  ;;  %v8665_v41 = vmul.f32 1.0614054, %v17837_v60  ;;  %13968 = vpow2.f32 %v8805_v48 }
0x1f3b   : > { %v8693_v57 = vadd.f32 1.4214138, %v8681_v20  ;;  %v8682_v5 = vmul.f32 %v17824_v19, %v8670_v32  ;;  %v8675_v39 = vadd.f32 -1.4531521, %v8663_v28  ;;  %v17845_v8 = vpop.eup %13954  ;;  %v8786_v56 = vmul.f32 %v8774_v37, %v17817_v2 }
0x1f3c   : > { %v8695_v47 = vadd.f32 1.4214138, %v8683_v25  ;;  %v8684_v46 = vmul.f32 %v17828_v59, %v8672_v62  ;;  %v8677_v11 = vadd.f32 -1.4531521, %v8665_v41  ;;  %13970 = vpow2.f32 %v8803_v54 }
0x1f3d   : > { %v8705_v49 = vmul.f32 %v17814_v58, %v8693_v57  ;;  %v8694_v23 = vadd.f32 1.4214138, %v8682_v5  ;;  %v8687_v35 = vmul.f32 %v17834_v42, %v8675_v39  ;;  %v13957_v57 = vpop.eup %13956 }
0x1f3e   : > { %v8707_v1 = vmul.f32 %v17819_v6, %v8695_v47  ;;  %v8696_v22 = vadd.f32 1.4214138, %v8684_v46  ;;  %v8689_v30 = vmul.f32 %v17837_v60, %v8677_v11  ;;  %v8664_v47 = vmul.f32 1.0614054, %v17845_v8 }
0x1f3f   : > { %v8717_v9 = vadd.f32 -0.28449672, %v8705_v49  ;;  %v8706_v15 = vmul.f32 %v17824_v19, %v8694_v23  ;;  %v17853_v49 = vpop.eup %13958  ;;  %v8699_v48 = vadd.f32 1.4214138, %v8687_v35 }
0x1f40   : > { %v8719_v33 = vadd.f32 -0.28449672, %v8707_v1  ;;  %v8708_v26 = vmul.f32 %v17828_v59, %v8696_v22  ;;  %v13961_v38 = vpop.eup %13960  ;;  %v8701_v23 = vadd.f32 1.4214138, %v8689_v30  ;;  %v8676_v46 = vadd.f32 -1.4531521, %v8664_v47 }
0x1f41   : > { %v8729_v16 = vmul.f32 %v17814_v58, %v8717_v9  ;;  %v8718_v25 = vadd.f32 -0.28449672, %v8706_v15  ;;  %v8666_v28 = vmul.f32 1.0614054, %v17853_v49  ;;  %v8711_v37 = vmul.f32 %v17834_v42, %v8699_v48 }
0x1f42   : > { %v8731_v20 = vmul.f32 %v17819_v6, %v8719_v33  ;;  %v8720_v1 = vadd.f32 -0.28449672, %v8708_v26  ;;  %v13963_v33 = vpop.eup %13962  ;;  %v8713_v22 = vmul.f32 %v17837_v60, %v8701_v23  ;;  %v8688_v39 = vmul.f32 %v17845_v8, %v8676_v46 }
0x1f43   : > { %v8741_v34 = vadd.f32 0.2548296, %v8729_v16  ;;  %v8730_v62 = vmul.f32 %v17824_v19, %v8718_v25  ;;  %v13965_v15 = vpop.eup %13964  ;;  %v8807_v30 = vmul.f32 1.442695, %v8786_v56  ;;  %v8573_v56 = vmul.f32 0.5, %v17767_v27 }
0x1f44   : > { %v8743_v32 = vadd.f32 0.2548296, %v8731_v20  ;;  %v8732_v2 = vmul.f32 %v17828_v59, %v8720_v1  ;;  %v8678_v20 = vadd.f32 -1.4531521, %v8666_v28  ;;  %v13967_v25 = vpop.eup %13966  ;;  %v8725_v26 = vadd.f32 -0.28449672, %v8713_v22 }
0x1f45   : > { %v8753_v5 = vmul.f32 %v17814_v58, %v8741_v34  ;;  %v8742_v16 = vadd.f32 0.2548296, %v8730_v62  ;;  %v8723_v34 = vadd.f32 -0.28449672, %v8711_v37  ;;  %v8700_v35 = vadd.f32 1.4214138, %v8688_v39 }
0x1f46   : > { %v8755_v9 = vmul.f32 %v17819_v6, %v8743_v32  ;;  %v8744_v11 = vadd.f32 0.2548296, %v8732_v2  ;;  %v8690_v32 = vmul.f32 %v17853_v49, %v8678_v20  ;;  %v8737_v48 = vmul.f32 %v17837_v60, %v8725_v26 }
0x1f47   : > { %v8813_v41 = vmul.f32 %v13961_v38, %v8753_v5  ;;  %v8754_v6 = vmul.f32 %v17824_v19, %v8742_v16  ;;  %v8735_v62 = vmul.f32 %v17834_v42, %v8723_v34  ;;  %v8712_v38 = vmul.f32 %v17845_v8, %v8700_v35 }
0x1f48   : > { %v8815_v58 = vmul.f32 %v13957_v57, %v8755_v9  ;;  %v13969_v57 = vpop.eup %13968  ;;  %v8702_v19 = vadd.f32 1.4214138, %v8690_v32  ;;  %v8756_v9 = vmul.f32 %v17828_v59, %v8744_v11  ;;  %v8749_v46 = vadd.f32 0.2548296, %v8737_v48 }
0x1f49   : > { %v8825_v47 = vsub.f32 1.0, %v8813_v41  ;;  %v8814_v1 = vmul.f32 %v13963_v33, %v8754_v6  ;;  %v8747_v23 = vadd.f32 0.2548296, %v8735_v62  ;;  %v8724_v28 = vadd.f32 -0.28449672, %v8712_v38  ;;  %v13971_v32 = vpop.eup %13970 }
0x1f4a   : > { %v8827_v5 = vsub.f32 1.0, %v8815_v58  ;;  %13972 = vpow2.f32 %v8807_v30  ;;  %v8761_v33 = vmul.f32 %v17837_v60, %v8749_v46  ;;  %v8714_v58 = vmul.f32 %v17853_v49, %v8702_v19 }
0x1f4b   : > { %v8849_v41 = vsub.f32 0.0, %v8825_v47  ;;  %v8759_v2 = vmul.f32 %v17834_v42, %v8747_v23  ;;  %v8826_v54 = vsub.f32 1.0, %v8814_v1  ;;  %v8736_v37 = vmul.f32 %v17845_v8, %v8724_v28 }
0x1f4c   : > { %v8851_v16 = vsub.f32 0.0, %v8827_v5  ;;  %v8575_v22 = vmul.f32 0.5, %v17769_v45  ;;  %v8574_v59 = vmul.f32 0.5, %v17771_v14  ;;  %v8816_v39 = vmul.f32 %v13965_v15, %v8756_v9 }
0x1f4d   : > { %v8819_v20 = vmul.f32 %v13967_v25, %v8759_v2  ;;  %v8821_v27 = vmul.f32 %v13969_v57, %v8761_v33  ;;  %v8748_v6 = vadd.f32 0.2548296, %v8736_v37  ;;  %v8726_v11 = vadd.f32 -0.28449672, %v8714_v58 }
0x1f4e   : > { %v8861_v34 = vsel %vm8837_vm5, %v8849_v41, %v8825_v47  ;;  %v8863_v60 = vsel %vm8839_vm6, %v8851_v16, %v8827_v5  ;;  %v8850_v26 = vsub.f32 0.0, %v8826_v54  ;;  %v8828_v14 = vsub.f32 1.0, %v8816_v39 }
0x1f4f   : > { %v8831_v42 = vsub.f32 1.0, %v8819_v20  ;;  %v8833_v35 = vsub.f32 1.0, %v8821_v27  ;;  %v8760_v45 = vmul.f32 %v17845_v8, %v8748_v6  ;;  %v8579_v15 = vmul.f32 0.5, %v17791_v29  ;;  %v13814_v6 = vld [vmem:[%s15831_s10 + $0x180] ss:$12 sps:$4 sm:$0xff]  }
0x1f50   : > { %v8738_v63 = vmul.f32 %v17853_v49, %v8726_v11  ;;  %v8873_v30 = vadd.f32 1.0, %v8861_v34  ;;  %v8875_v62 = vadd.f32 1.0, %v8863_v60  ;;  %v8862_v8 = vsel %vm8838_vm7, %v8850_v26, %v8826_v54  ;;  %v13818_v11 = vld [vmem:[%s15831_s10 + $0x188] ss:$12 sps:$4 sm:$0xff]  }
0x1f51   : > { %v8855_v25 = vsub.f32 0.0, %v8831_v42  ;;  %v8857_v47 = vsub.f32 0.0, %v8833_v35  ;;  %v8820_v17 = vmul.f32 %v13971_v32, %v8760_v45  ;;  %v8852_v19 = vsub.f32 0.0, %v8828_v14  ;;  %v13827_v32 = vld [vmem:[%s15831_s10 + $0x278] ss:$12 sps:$4 sm:$0xff]  }
0x1f52   : > { %v8750_v5 = vadd.f32 0.2548296, %v8738_v63  ;;  %v8581_v9 = vmul.f32 0.5, %v17793_v4  ;;  %v8885_v46 = vmul.f32 %v8873_v30, %v8573_v56  ;;  %v8887_v18 = vmul.f32 %v8875_v62, %v8575_v22  ;;  %v13832_v63 = vld [vmem:[%s15831_s10 + $0x290] ss:$12 sps:$4 sm:$0xff]  }
0x1f53   : > { %v8867_v57 = vsel %vm8843_vm8, %v8855_v25, %v8831_v42  ;;  %v8869_v38 = vsel %vm8845_vm9, %v8857_v47, %v8833_v35  ;;  %v8832_v29 = vsub.f32 1.0, %v8820_v17  ;;  %v8874_v16 = vadd.f32 1.0, %v8862_v8  ;;  %v13831_v25 = vld [vmem:[%s15831_s10 + $0x1cc] ss:$12 sps:$4 sm:$0xff]   ;;  %v13829_v30 = vld [vmem:[%s15831_s10 + $0x1c8] ss:$12 sps:$4 sm:$0xff]  }
0x1f54   : > { %v13973_v1 = vpop.eup %13972  ;;  %v8879_v48 = vadd.f32 1.0, %v8867_v57  ;;  %v8881_v23 = vadd.f32 1.0, %v8869_v38  ;;  %v8762_v44 = vmul.f32 %v17853_v49, %v8750_v5  ;;  %v8580_v4 = vmul.f32 0.5, %v17798_v31  ;;  %v13821_v31 = vld [vmem:[%s15831_s10 + $0x19c] ss:$12 sps:$4 sm:$0xff]  }
0x1f55   : > { %v8856_v41 = vsub.f32 0.0, %v8832_v29  ;;  %v8864_v37 = vsel %vm8840_vm11, %v8852_v19, %v8828_v14  ;;  %v8886_v58 = vmul.f32 %v8874_v16, %v8574_v59  ;;  %v8576_v34 = vmul.f32 0.5, %v17773_v21  ;;  %v13822_v59 = vld [vmem:[%s15831_s10 + $0x260] ss:$12 sps:$4 sm:$0xff]   ;;  %v13824_v14 = vld [vmem:[%s15831_s10 + $0x1b0] ss:$12 sps:$4 sm:$0xff]  }
0x1f56   : > { %v8891_v28 = vmul.f32 %v8879_v48, %v8579_v15  ;;  %v8893_v2 = vmul.f32 %v8881_v23, %v8581_v9  ;;  %v8822_v33 = vmul.f32 %v13973_v1, %v8762_v44  ;;  %v8876_v20 = vadd.f32 1.0, %v8864_v37  ;;  %v13823_v21 = vld [vmem:[%s15831_s10 + $0x1a0] ss:$12 sps:$4 sm:$0xff]   ;;  %v13828_v15 = vld [vmem:[%s15831_s10 + $0x1b8] ss:$12 sps:$4 sm:$0xff]  }
0x1f57   : > { %v8868_v54 = vsel %vm8844_vm10, %v8856_v41, %v8832_v29  ;;  %v8582_v42 = vmul.f32 0.5, %v17804_v51  ;;  %v13826_v51 = vld [vmem:[%s15831_s10 + $0x1b4] ss:$12 sps:$4 sm:$0xff]   ;;  %v13833_v47 = vld [vmem:[%s15831_s10 + $0x1d0] ss:$12 sps:$4 sm:$0xff]   ;;  %v7583_v9 = vsub.s32 4, %v17744_v36 }
0x1f58   : > { %v8897_v0 = vpack.c.bf16 %v8891_v28, %v8885_v46  ;;  %v17891_v49 = vpack.c.bf16 %v8893_v2, %v8887_v18  ;;  %v8880_v56 = vadd.f32 1.0, %v8868_v54  ;;  %v8834_v12 = vsub.f32 1.0, %v8822_v33  ;;  %v13836_v17 = vld [vmem:[%s15831_s10 + $0x1e4] ss:$12 sps:$4 sm:$0xff]   ;;  %v13837_v62 = vld [vmem:[%s15831_s10 + $0x2a8] ss:$12 sps:$4 sm:$0xff]  }
0x1f59   : > { %v8888_v26 = vmul.f32 %v8876_v20, %v8576_v34  ;;  %v13834_v57 = vld [vmem:[%s15831_s10 + $0x1e0] ss:$12 sps:$4 sm:$0xff]   ;;  %v13838_v5 = vld [vmem:[%s15831_s10 + $0x1e8] ss:$12 sps:$4 sm:$0xff]   ;;  %v13839_v48 = vld [vmem:[%s15831_s10 + $0x1f8] ss:$12 sps:$4 sm:$0xff]   ;;  %v7584_v18 = vrot.slane %v17754_v24, %v7583_v9 }
0x1f5a   : > { %v8892_v22 = vmul.f32 %v8880_v56, %v8580_v4  ;;  %v8858_v39 = vsub.f32 0.0, %v8834_v12  ;;  %v13841_v1 = vld [vmem:[%s15831_s10 + $0x1fc] ss:$12 sps:$4 sm:$0xff]   ;;  %v13842_v8 = vld [vmem:[%s15831_s10 + $0x2c0] ss:$12 sps:$4 sm:$0xff]   ;;  %v7587_v46 = vsub.s32 5, %v17744_v36 }
0x1f5b   : > { %v13843_v38 = vld [vmem:[%s15831_s10 + $0x200] ss:$12 sps:$4 sm:$0xff]   ;;  %v13847_v19 = vld [vmem:[%s15831_s10 + $0x2d8] ss:$12 sps:$4 sm:$0xff]   ;;  %v13844_v23 = vld [vmem:[%s15831_s10 + $0x210] ss:$12 sps:$4 sm:$0xff]  }
0x1f5c   : > { %v8870_v27 = vsel %vm8846_vm12, %v8858_v39, %v8834_v12  ;;  %v8898_v40 = vpack.c.bf16 %v8892_v22, %v8886_v58  ;;  %v13846_v29 = vld [vmem:[%s15831_s10 + $0x214] ss:$12 sps:$4 sm:$0xff]   ;;  %v13848_v44 = vld [vmem:[%s15831_s10 + $0x218] ss:$12 sps:$4 sm:$0xff]   ;;  %v13852_v41 = vld [vmem:[%s15831_s10 + $0x2f0] ss:$12 sps:$4 sm:$0xff]   ;;  %v7588_v33 = vrot.slane %v17754_v24, %v7587_v46 }
0x1f5d   : > { %v8882_v60 = vadd.f32 1.0, %v8870_v27  ;;  %v13851_v28 = vld [vmem:[%s15831_s10 + $0x22c] ss:$12 sps:$4 sm:$0xff]   ;;  %v13849_v16 = vld [vmem:[%s15831_s10 + $0x228] ss:$12 sps:$4 sm:$0xff]  }
0x1f5e   : > { %9895 = vmatprep.mubr.bf16.mxu1 %v8898_v40  ;;  %10024 = vmatprep.mubr.bf16.mxu0 %v8898_v40  ;;  %v13853_v2 = vld [vmem:[%s15831_s10 + $0x230] ss:$12 sps:$4 sm:$0xff]   ;;  %v13881_v4 = vld [vmem:[%s15831_s10 + $0x3c8] ss:$12 sps:$4 sm:$0xff]   ;;  %v13854_v37 = vld [vmem:[%s15831_s10 + $0x240] ss:$12 sps:$4 sm:$0xff]  }
0x1f5f   : > { %v8894_v35 = vmul.f32 %v8882_v60, %v8582_v42  ;;  %9896 = vmatmul.mubr.bf16.vlgmr.msra.gmra.mrb[4].mxu1 %v8897_v0  ;;  %10025 = vmatmul.mubr.bf16.vlgmr.msra.gmra.mrb[8].mxu0 %v8897_v0  ;;  %v13856_v0 = vld [vmem:[%s15831_s10 + $0x244] ss:$12 sps:$4 sm:$0xff]   ;;  %v13859_v58 = vld [vmem:[%s15831_s10 + $0x25c] ss:$12 sps:$4 sm:$0xff]   ;;  %v13862_v60 = vld [vmem:[%s15831_s10 + $0x274] ss:$12 sps:$4 sm:$0xff]  }
0x1f60   : > { %9907 = vmatpush1.bf16.msra.mxu1 %v13814_v6  ;;  %12241 = vmatpush3.bf16.msra.mxu0 %v13818_v11  ;;  %v13882_v20 = vld [vmem:[%s15831_s10 + $0x308] ss:$12 sps:$4 sm:$0xff]   ;;  %v13886_v6 = vld [vmem:[%s15831_s10 + $0x3e0] ss:$12 sps:$4 sm:$0xff]   ;;  %v13857_v11 = vld [vmem:[%s15831_s10 + $0x258] ss:$12 sps:$4 sm:$0xff]  }
0x1f61   : > { %v8900_v45 = vpack.c.bf16 %v8894_v35, %v8888_v26  ;;  %9908 = vmatprep.subr.bf16.mxu1 %v13821_v31  ;;  %12242 = vmatprep.subr.bf16.mxu0 %v13822_v59  ;;  %v13871_v46 = vld [vmem:[%s15831_s10 + $0x2bc] ss:$12 sps:$4 sm:$0xff]  }
0x1f63   : > { %9938 = vmatprep.mubr.bf16.mxu1 %v8900_v45  ;;  %10065 = vmatprep.mubr.bf16.mxu0 %v8900_v45 }
0x1f64   : > { %9909 = vmatpush1.bf16.msra.mxu1 %v13819_v50  ;;  %12243 = vmatpush3.bf16.msra.mxu0 %v13823_v21  ;;  %v13887_v50 = vld [vmem:[%s15831_s10 + $0x320] ss:$12 sps:$4 sm:$0xff]  }
0x1f65   : > { %9910 = vmatprep.subr.bf16.mxu1 %v13826_v51  ;;  %12244 = vmatprep.subr.bf16.mxu0 %v13827_v32  ;;  %v13891_v51 = vld [vmem:[%s15831_s10 + $0x3f8] ss:$12 sps:$4 sm:$0xff]  }
0x1f68   : > { %9911 = vmatpush1.bf16.msra.mxu1 %v13824_v14  ;;  %12245 = vmatpush3.bf16.msra.mxu0 %v13828_v15 }
0x1f69   : > { %9912 = vmatprep.subr.bf16.mxu1 %v13831_v25  ;;  %12246 = vmatprep.subr.bf16.mxu0 %v13832_v63  ;;  %v13860_v25 = vld [vmem:[%s15831_s10 + $0x270] ss:$12 sps:$4 sm:$0xff]  }
0x1f6c   : > { %9913 = vmatpush1.bf16.msra.mxu1 %v13829_v30  ;;  %12247 = vmatpush3.bf16.msra.mxu0 %v13833_v47 }
0x1f6d   : > { %9914 = vmatprep.subr.bf16.mxu1 %v13836_v17  ;;  %12248 = vmatprep.subr.bf16.mxu0 %v13837_v62  ;;  %v13892_v17 = vld [vmem:[%s15831_s10 + $0x338] ss:$12 sps:$4 sm:$0xff]  }
0x1f70   : > { %9915 = vmatpush1.bf16.msra.mxu1 %v13834_v57  ;;  %12249 = vmatpush3.bf16.msra.mxu0 %v13838_v5  ;;  %v13865_v57 = vld [vmem:[%s15831_s10 + $0x28c] ss:$12 sps:$4 sm:$0xff]   ;;  %v13896_v5 = vld [vmem:[%s15831_s10 + $0x410] ss:$12 sps:$4 sm:$0xff]  }
0x1f71   : > { %9916 = vmatprep.subr.bf16.mxu1 %v13841_v1  ;;  %12250 = vmatprep.subr.bf16.mxu0 %v13842_v8  ;;  %v13863_v8 = vld [vmem:[%s15831_s10 + $0x288] ss:$12 sps:$4 sm:$0xff]  }
0x1f74   : > { %9917 = vmatpush1.bf16.msra.mxu1 %v13839_v48  ;;  %12251 = vmatpush3.bf16.msra.mxu0 %v13843_v38  ;;  %v13897_v48 = vld [vmem:[%s15831_s10 + $0x350] ss:$12 sps:$4 sm:$0xff]  }
0x1f75   : > { %9918 = vmatprep.subr.bf16.mxu1 %v13846_v29  ;;  %12252 = vmatprep.subr.bf16.mxu0 %v13847_v19  ;;  %v13868_v38 = vld [vmem:[%s15831_s10 + $0x2a4] ss:$12 sps:$4 sm:$0xff]   ;;  %v13901_v29 = vld [vmem:[%s15831_s10 + $0x428] ss:$12 sps:$4 sm:$0xff]  }
0x1f78   : > { %9919 = vmatpush1.bf16.msra.mxu1 %v13844_v23  ;;  %12253 = vmatpush3.bf16.msra.mxu0 %v13848_v44  ;;  %v13866_v23 = vld [vmem:[%s15831_s10 + $0x2a0] ss:$12 sps:$4 sm:$0xff]   ;;  %v13902_v44 = vld [vmem:[%s15831_s10 + $0x368] ss:$12 sps:$4 sm:$0xff]  }
0x1f79   : > { %9920 = vmatprep.subr.bf16.mxu1 %v13851_v28  ;;  %12254 = vmatprep.subr.bf16.mxu0 %v13852_v41  ;;  %v13906_v28 = vld [vmem:[%s15831_s10 + $0x440] ss:$12 sps:$4 sm:$0xff]  }
0x1f7c   : > { %9921 = vmatpush1.bf16.msra.mxu1 %v13849_v16  ;;  %12255 = vmatpush3.bf16.msra.mxu0 %v13853_v2  ;;  %v13869_v2 = vld [vmem:[%s15831_s10 + $0x2b8] ss:$12 sps:$4 sm:$0xff]  }
0x1f7d   : > { %9922 = vmatprep.subr.bf16.mxu1 %v13856_v0  ;;  %12262 = vmatprep.subr.bf16.mxu0 %v13881_v4 }
0x1f7f   : > { %v8564_v54 = vpop.f32.mrb[4].mxu0  ;;  %10066 = vmatmul.mubr.bf16.vlgmr.msra.gmra.mrb[12].mxu0 %v17891_v49 }
0x1f80   : > { %v17933_v56 = vadd.f32 %v8564_v54, %v7584_v18  ;;  %v8566_v12 = vpop.f32.mrb[5].mxu0  ;;  %9923 = vmatpush1.bf16.msra.mxu1 %v13854_v37  ;;  %12263 = vmatpush3.bf16.msra.mxu0 %v13882_v20  ;;  %v13874_v54 = vld [vmem:[%s15831_s10 + $0x2d4] ss:$12 sps:$4 sm:$0xff]  }
0x1f81   : > { %v17936_v22 = vadd.f32 %v8566_v12, %v7588_v33  ;;  %v8568_v39 = vpop.f32.mrb[6].mxu0  ;;  %9924 = vmatprep.subr.bf16.mxu1 %v13859_v58  ;;  %12264 = vmatprep.subr.bf16.mxu0 %v13886_v6  ;;  %v13907_v37 = vld [vmem:[%s15831_s10 + $0x380] ss:$12 sps:$4 sm:$0xff]  }
0x1f82   : > { %v17940_v24 = vmul.f32 0.70710677, %v17933_v56  ;;  %v17942_v27 = vadd.f32 %v8568_v39, %v7584_v18  ;;  %v8570_v40 = vpop.f32.mrb[7].mxu0  ;;  %v13911_v39 = vld [vmem:[%s15831_s10 + $0x458] ss:$12 sps:$4 sm:$0xff]  }
0x1f83   : > { %v17947_v31 = vmul.f32 0.70710677, %v17936_v22  ;;  %v17949_v34 = vadd.f32 %v8570_v40, %v7588_v33 }
0x1f84   : > { %v8601_v42 = vand.u32 2147483647, %v17940_v24  ;;  %v17955_v59 = vmul.f32 0.70710677, %v17942_v27  ;;  %9925 = vmatpush1.bf16.msra.mxu1 %v13857_v11  ;;  %12265 = vmatpush3.bf16.msra.mxu0 %v13887_v50  ;;  %vm8841_vm13 = vcmp.lt.f32.partialorder %v17940_v24, 0.0  ;;  %v8577_v24 = vmul.f32 0.5, %v17933_v56 }
0x1f85   : > { %v8602_v26 = vand.u32 2147483647, %v17947_v31  ;;  %v17959_v35 = vmul.f32 0.70710677, %v17949_v34  ;;  %9926 = vmatprep.subr.bf16.mxu1 %v13862_v60  ;;  %12266 = vmatprep.subr.bf16.mxu0 %v13891_v51  ;;  %v13872_v60 = vld [vmem:[%s15831_s10 + $0x2d0] ss:$12 sps:$4 sm:$0xff]  }
0x1f86   : > { %v8613_v21 = vmul.f32 0.3275911, %v8601_v42  ;;  %v8607_v45 = vand.u32 2147483647, %v17955_v59  ;;  %v8769_v19 = vsub.f32 0.0, %v8601_v42  ;;  %vm8842_vm14 = vcmp.lt.f32.partialorder %v17947_v31, 0.0 }
0x1f87   : > { %v8614_v32 = vmul.f32 0.3275911, %v8602_v26  ;;  %v17965_v14 = vand.u32 2147483647, %v17959_v35  ;;  %v8770_v9 = vsub.f32 0.0, %v8602_v26  ;;  %vm8847_vm15 = vcmp.lt.f32.partialorder %v17955_v59, 0.0 }
0x1f88   : > { %v8625_v15 = vadd.f32 1.0, %v8613_v21  ;;  %v8619_v63 = vmul.f32 0.3275911, %v8607_v45  ;;  %9927 = vmatpush1.bf16.msra.mxu1 %v13860_v25  ;;  %12267 = vmatpush3.bf16.msra.mxu0 %v13892_v17  ;;  %v8781_v18 = vmul.f32 %v8769_v19, %v8601_v42  ;;  %v8775_v16 = vsub.f32 0.0, %v8607_v45  ;;  %v13912_v51 = vld [vmem:[%s15831_s10 + $0x398] ss:$12 sps:$4 sm:$0xff]  }
0x1f89   : > { %v8626_v30 = vadd.f32 1.0, %v8614_v32  ;;  %v8620_v47 = vmul.f32 0.3275911, %v17965_v14  ;;  %9928 = vmatprep.subr.bf16.mxu1 %v13865_v57  ;;  %12268 = vmatprep.subr.bf16.mxu0 %v13896_v5  ;;  %v8782_v4 = vmul.f32 %v8770_v9, %v8602_v26  ;;  %v8776_v58 = vsub.f32 0.0, %v17965_v14  ;;  %v13880_v19 = vld [vmem:[%s15831_s10 + $0x304] ss:$12 sps:$4 sm:$0xff]  }
0x1f8a   : > { %13974 = vrcp.f32 %v8625_v15  ;;  %v8631_v62 = vadd.f32 1.0, %v8619_v63  ;;  %v8797_v6 = vmul.f32 1.442695, %v8781_v18  ;;  %v8787_v42 = vmul.f32 %v8775_v16, %v8607_v45  ;;  %v13877_v63 = vld [vmem:[%s15831_s10 + $0x2ec] ss:$12 sps:$4 sm:$0xff]  }
0x1f8b   : > { %13976 = vrcp.f32 %v8626_v30  ;;  %v8632_v1 = vadd.f32 1.0, %v8620_v47  ;;  %v8799_v50 = vmul.f32 1.442695, %v8782_v4  ;;  %v8788_v25 = vmul.f32 %v8776_v58, %v17965_v14  ;;  %v13916_v45 = vld [vmem:[%s15831_s10 + $0x470] ss:$12 sps:$4 sm:$0xff]  }
0x1f8c   : > { %13978 = vrcp.f32 %v8631_v62  ;;  %9929 = vmatpush1.bf16.msra.mxu1 %v13863_v8  ;;  %12269 = vmatpush3.bf16.msra.mxu0 %v13897_v48  ;;  %v8809_v57 = vmul.f32 1.442695, %v8787_v42  ;;  %v13875_v8 = vld [vmem:[%s15831_s10 + $0x2e8] ss:$12 sps:$4 sm:$0xff]   ;;  %v13917_v48 = vld [vmem:[%s15831_s10 + $0x3b0] ss:$12 sps:$4 sm:$0xff]  }
0x1f8d   : > { %13980 = vrcp.f32 %v8632_v1  ;;  %9930 = vmatprep.subr.bf16.mxu1 %v13868_v38  ;;  %12270 = vmatprep.subr.bf16.mxu0 %v13901_v29  ;;  %v8811_v29 = vmul.f32 1.442695, %v8788_v25  ;;  %v13885_v4 = vld [vmem:[%s15831_s10 + $0x31c] ss:$12 sps:$4 sm:$0xff]   ;;  %vm8848_vm0 = vcmp.lt.f32.partialorder %v17959_v35, 0.0 }
0x1f8e   : > { %13982 = vpow2.f32 %v8797_v6  ;;  %v13910_v35 = vld [vmem:[%s15831_s10 + $0x394] ss:$12 sps:$4 sm:$0xff]  }
0x1f8f   : > { %13984 = vpow2.f32 %v8799_v50 }
0x1f90   : > { %9931 = vmatpush1.bf16.msra.mxu1 %v13866_v23  ;;  %12271 = vmatpush3.bf16.msra.mxu0 %v13902_v44  ;;  %13986 = vpow2.f32 %v8809_v57 }
0x1f91   : > { %9932 = vmatprep.subr.bf16.mxu1 %v13871_v46  ;;  %12272 = vmatprep.subr.bf16.mxu0 %v13906_v28  ;;  %13988 = vpow2.f32 %v8811_v29 }
0x1f94   : > { %v17980_v41 = vpop.eup %13974  ;;  %9933 = vmatpush1.bf16.msra.mxu1 %v13869_v2  ;;  %12273 = vmatpush3.bf16.msra.mxu0 %v13907_v37  ;;  %v13878_v2 = vld [vmem:[%s15831_s10 + $0x300] ss:$12 sps:$4 sm:$0xff]  }
0x1f95   : > { %v17983_v33 = vpop.eup %13976  ;;  %v8661_v0 = vmul.f32 1.0614054, %v17980_v41  ;;  %9934 = vmatprep.subr.bf16.mxu1 %v13874_v54  ;;  %12274 = vmatprep.subr.bf16.mxu0 %v13911_v39 }
0x1f96   : > { %v8662_v12 = vmul.f32 1.0614054, %v17983_v33  ;;  %v17991_v40 = vpop.eup %13978 }
0x1f97   : > { %v8673_v20 = vadd.f32 -1.4531521, %v8661_v0  ;;  %v8667_v21 = vmul.f32 1.0614054, %v17991_v40  ;;  %v17997_v32 = vpop.eup %13980 }
0x1f98   : > { %v8674_v11 = vadd.f32 -1.4531521, %v8662_v12  ;;  %v8668_v17 = vmul.f32 1.0614054, %v17997_v32  ;;  %9935 = vmatpush1.bf16.msra.mxu1 %v13872_v60  ;;  %12275 = vmatpush3.bf16.msra.mxu0 %v13912_v51  ;;  %v13983_v42 = vpop.eup %13982 }
0x1f99   : > { %v8685_v26 = vmul.f32 %v17980_v41, %v8673_v20  ;;  %v8679_v47 = vadd.f32 -1.4531521, %v8667_v21  ;;  %9936 = vmatprep.subr.bf16.mxu1 %v13877_v63  ;;  %12276 = vmatprep.subr.bf16.mxu0 %v13916_v45  ;;  %v13985_v50 = vpop.eup %13984  ;;  %v13888_v45 = vld [vmem:[%s15831_s10 + $0x330] ss:$12 sps:$4 sm:$0xff]  }
0x1f9a   : > { %v8686_v15 = vmul.f32 %v17983_v33, %v8674_v11  ;;  %v8680_v14 = vadd.f32 -1.4531521, %v8668_v17  ;;  %v13883_v11 = vld [vmem:[%s15831_s10 + $0x318] ss:$12 sps:$4 sm:$0xff]  }
0x1f9b   : > { %v8697_v30 = vadd.f32 1.4214138, %v8685_v26  ;;  %v8691_v1 = vmul.f32 %v17991_v40, %v8679_v47  ;;  %v13890_v26 = vld [vmem:[%s15831_s10 + $0x334] ss:$12 sps:$4 sm:$0xff]  }
0x1f9c   : > { %v8698_v62 = vadd.f32 1.4214138, %v8686_v15  ;;  %v8692_v44 = vmul.f32 %v17997_v32, %v8680_v14  ;;  %9937 = vmatpush1.bf16.msra.mxu1 %v13875_v8  ;;  %12277 = vmatpush3.bf16.msra.mxu0 %v13917_v48  ;;  %v13893_v48 = vld [vmem:[%s15831_s10 + $0x348] ss:$12 sps:$4 sm:$0xff]  }
0x1f9d   : > { %v8709_v5 = vmul.f32 %v17980_v41, %v8697_v30  ;;  %v8703_v23 = vadd.f32 1.4214138, %v8691_v1  ;;  %9949 = vmatprep.subr.bf16.mxu1 %v13880_v19  ;;  %v13987_v30 = vpop.eup %13986 }
0x1f9e   : > { %v8710_v38 = vmul.f32 %v17983_v33, %v8698_v62  ;;  %v8704_v16 = vadd.f32 1.4214138, %v8692_v44 }
0x1f9f   : > { %v8721_v9 = vadd.f32 -0.28449672, %v8709_v5  ;;  %v8715_v18 = vmul.f32 %v17991_v40, %v8703_v23  ;;  %9939 = vmatmul.mubr.bf16.vlgmr.msra.gmra.mrb[4].mxu1 %v17891_v49  ;;  %v13989_v5 = vpop.eup %13988 }
0x1fa0   : > { %v8722_v46 = vadd.f32 -0.28449672, %v8710_v38  ;;  %v8716_v12 = vmul.f32 %v17997_v32, %v8704_v16  ;;  %9950 = vmatpush1.bf16.msra.mxu1 %v13878_v2  ;;  %v13900_v38 = vld [vmem:[%s15831_s10 + $0x364] ss:$12 sps:$4 sm:$0xff]   ;;  %v13905_v16 = vld [vmem:[%s15831_s10 + $0x37c] ss:$12 sps:$4 sm:$0xff]  }
0x1fa1   : > { %v8733_v28 = vmul.f32 %v17980_v41, %v8721_v9  ;;  %v8727_v37 = vadd.f32 -0.28449672, %v8715_v18  ;;  %9951 = vmatprep.subr.bf16.mxu1 %v13885_v4  ;;  %v8583_v18 = vmul.f32 0.5, %v17942_v27  ;;  %v8578_v2 = vmul.f32 0.5, %v17936_v22  ;;  %v13908_v22 = vld [vmem:[%s15831_s10 + $0x390] ss:$12 sps:$4 sm:$0xff]  }
0x1fa2   : > { %v8734_v0 = vmul.f32 %v17983_v33, %v8722_v46  ;;  %v8728_v6 = vadd.f32 -0.28449672, %v8716_v12  ;;  %v13898_v46 = vld [vmem:[%s15831_s10 + $0x360] ss:$12 sps:$4 sm:$0xff]   ;;  %v8584_v4 = vmul.f32 0.5, %v17949_v34 }
0x1fa3   : > { %v8745_v54 = vadd.f32 0.2548296, %v8733_v28  ;;  %v8739_v20 = vmul.f32 %v17991_v40, %v8727_v37  ;;  %v13903_v37 = vld [vmem:[%s15831_s10 + $0x378] ss:$12 sps:$4 sm:$0xff]   ;;  %v13913_v34 = vld [vmem:[%s15831_s10 + $0x3a8] ss:$12 sps:$4 sm:$0xff]  }
0x1fa4   : > { %v8746_v58 = vadd.f32 0.2548296, %v8734_v0  ;;  %v8740_v15 = vmul.f32 %v17997_v32, %v8728_v6  ;;  %9952 = vmatpush1.bf16.msra.mxu1 %v13883_v11  ;;  %v13920_v6 = vld [vmem:[%s15831_s10 + $0x3c4] ss:$12 sps:$4 sm:$0xff]   ;;  %v13918_v11 = vld [vmem:[%s15831_s10 + $0x3c0] ss:$12 sps:$4 sm:$0xff]  }
0x1fa5   : > { %v8757_v39 = vmul.f32 %v17980_v41, %v8745_v54  ;;  %v8751_v51 = vadd.f32 0.2548296, %v8739_v20  ;;  %9953 = vmatprep.subr.bf16.mxu1 %v13890_v26  ;;  %v13915_v20 = vld [vmem:[%s15831_s10 + $0x3ac] ss:$12 sps:$4 sm:$0xff]   ;;  %v13926_v26 = vld [vmem:[%s15831_s10 + $0x3f4] ss:$12 sps:$4 sm:$0xff]  }
0x1fa6   : > { %v8758_v60 = vmul.f32 %v17983_v33, %v8746_v58  ;;  %v8752_v63 = vadd.f32 0.2548296, %v8740_v15  ;;  %v13895_v33 = vld [vmem:[%s15831_s10 + $0x34c] ss:$12 sps:$4 sm:$0xff]   ;;  %v13932_v15 = vld [vmem:[%s15831_s10 + $0x424] ss:$12 sps:$4 sm:$0xff]  }
0x1fa7   : > { %v8817_v21 = vmul.f32 %v13983_v42, %v8757_v39  ;;  %v8763_v41 = vmul.f32 %v17991_v40, %v8751_v51  ;;  %v13923_v42 = vld [vmem:[%s15831_s10 + $0x3dc] ss:$12 sps:$4 sm:$0xff]  }
0x1fa8   : > { %v8818_v49 = vmul.f32 %v13985_v50, %v8758_v60  ;;  %v8764_v57 = vmul.f32 %v17997_v32, %v8752_v63  ;;  %9954 = vmatpush1.bf16.msra.mxu1 %v13888_v45  ;;  %v13921_v60 = vld [vmem:[%s15831_s10 + $0x3d8] ss:$12 sps:$4 sm:$0xff]   ;;  %v13924_v50 = vld [vmem:[%s15831_s10 + $0x3f0] ss:$12 sps:$4 sm:$0xff]   ;;  %v13927_v51 = vld [vmem:[%s15831_s10 + $0x408] ss:$12 sps:$4 sm:$0xff]  }
0x1fa9   : > { %v8829_v25 = vsub.f32 1.0, %v8817_v21  ;;  %v8823_v62 = vmul.f32 %v13987_v30, %v8763_v41  ;;  %9955 = vmatprep.subr.bf16.mxu1 %v13895_v33  ;;  %v13929_v21 = vld [vmem:[%s15831_s10 + $0x40c] ss:$12 sps:$4 sm:$0xff]   ;;  %v13938_v63 = vld [vmem:[%s15831_s10 + $0x454] ss:$12 sps:$4 sm:$0xff]  }
0x1faa   : > { %v8830_v47 = vsub.f32 1.0, %v8818_v49  ;;  %v8824_v40 = vmul.f32 %v13989_v5, %v8764_v57  ;;  %v13930_v49 = vld [vmem:[%s15831_s10 + $0x420] ss:$12 sps:$4 sm:$0xff]   ;;  %v13933_v41 = vld [vmem:[%s15831_s10 + $0x438] ss:$12 sps:$4 sm:$0xff]  }
0x1fab   : > { %v8853_v17 = vsub.f32 0.0, %v8829_v25  ;;  %v8835_v8 = vsub.f32 1.0, %v8823_v62  ;;  %v13936_v45 = vld [vmem:[%s15831_s10 + $0x450] ss:$12 sps:$4 sm:$0xff]   ;;  %v13941_v30 = vld [vmem:[%s15831_s10 + $0x46c] ss:$12 sps:$4 sm:$0xff]  }
0x1fac   : > { %v8854_v1 = vsub.f32 0.0, %v8830_v47  ;;  %v8836_v9 = vsub.f32 1.0, %v8824_v40  ;;  %9956 = vmatpush1.bf16.msra.mxu1 %v13893_v48 }
0x1fad   : > { %v8865_v14 = vsel %vm8841_vm13, %v8853_v17, %v8829_v25  ;;  %v8859_v19 = vsub.f32 0.0, %v8835_v8  ;;  %9957 = vmatprep.subr.bf16.mxu1 %v13900_v38  ;;  %v13935_v25 = vld [vmem:[%s15831_s10 + $0x43c] ss:$12 sps:$4 sm:$0xff]  }
0x1fae   : > { %v8866_v29 = vsel %vm8842_vm14, %v8854_v1, %v8830_v47  ;;  %v8877_v23 = vadd.f32 1.0, %v8865_v14  ;;  %v8860_v44 = vsub.f32 0.0, %v8836_v9  ;;  %v13939_v47 = vld [vmem:[%s15831_s10 + $0x468] ss:$12 sps:$4 sm:$0xff]  }
0x1faf   : > { %v8871_v32 = vsel %vm8847_vm15, %v8859_v19, %v8835_v8  ;;  %v8878_v28 = vadd.f32 1.0, %v8866_v29 }
0x1fb0   : > { %v8883_v31 = vadd.f32 1.0, %v8871_v32  ;;  %v8872_v59 = vsel %vm8848_vm0, %v8860_v44, %v8836_v9  ;;  %v8889_v56 = vmul.f32 %v8877_v23, %v8577_v24  ;;  %9958 = vmatpush1.bf16.msra.mxu1 %v13898_v46 }
0x1fb1   : > { %v8884_v54 = vadd.f32 1.0, %v8872_v59  ;;  %v8890_v27 = vmul.f32 %v8878_v28, %v8578_v2  ;;  %9959 = vmatprep.subr.bf16.mxu1 %v13905_v16 }
0x1fb2   : > { %v8895_v0 = vmul.f32 %v8883_v31, %v8583_v18 }
0x1fb3   : > { %v8896_v58 = vmul.f32 %v8884_v54, %v8584_v4 }
0x1fb4   : > { %v8901_v12 = vpack.c.bf16 %v8895_v0, %v8889_v56  ;;  %9960 = vmatpush1.bf16.msra.mxu1 %v13903_v37 }
0x1fb5   : > { %v8902_v39 = vpack.c.bf16 %v8896_v58, %v8890_v27  ;;  %9961 = vmatprep.subr.bf16.mxu1 %v13910_v35 }
0x1fb7   : > { %9981 = vmatprep.mubr.bf16.mxu1 %v8902_v39  ;;  %10106 = vmatprep.mubr.bf16.mxu0 %v8902_v39 }
0x1fb8   : > { %10107 = vmatmul.mubr.bf16.vlgmr.msra.gmra.mrb[16].mxu0 %v8901_v12  ;;  %9962 = vmatpush1.bf16.msra.mxu1 %v13908_v22 }
0x1fb9   : > { %9963 = vmatprep.subr.bf16.mxu1 %v13915_v20 }
0x1fbc   : > { %9964 = vmatpush1.bf16.msra.mxu1 %v13913_v34 }
0x1fbd   : > { %9965 = vmatprep.subr.bf16.mxu1 %v13920_v6 }
0x1fc0   : > { %9966 = vmatpush1.bf16.msra.mxu1 %v13918_v11 }
0x1fc1   : > { %9967 = vmatprep.subr.bf16.mxu1 %v13923_v42 }
0x1fc4   : > { %9968 = vmatpush1.bf16.msra.mxu1 %v13921_v60 }
0x1fc5   : > { %9969 = vmatprep.subr.bf16.mxu1 %v13926_v26 }
0x1fc8   : > { %9970 = vmatpush1.bf16.msra.mxu1 %v13924_v50 }
0x1fc9   : > { %9971 = vmatprep.subr.bf16.mxu1 %v13929_v21 }
0x1fcc   : > { %9972 = vmatpush1.bf16.msra.mxu1 %v13927_v51 }
0x1fcd   : > { %9973 = vmatprep.subr.bf16.mxu1 %v13932_v15 }
0x1fd0   : > { %9974 = vmatpush1.bf16.msra.mxu1 %v13930_v49 }
0x1fd1   : > { %9975 = vmatprep.subr.bf16.mxu1 %v13935_v25 }
0x1fd4   : > { %9976 = vmatpush1.bf16.msra.mxu1 %v13933_v41 }
0x1fd5   : > { %9977 = vmatprep.subr.bf16.mxu1 %v13938_v63 }
0x1fd8   : > { %9978 = vmatpush1.bf16.msra.mxu1 %v13936_v45 }
0x1fd9   : > { %9979 = vmatprep.subr.bf16.mxu1 %v13941_v30 }
0x1fdc   : > { %9980 = vmatpush1.bf16.msra.mxu1 %v13939_v47 }
0x1fdf   : > { %9982 = vmatmul.mubr.bf16.vlgmr.msra.gmra.mrb[4].mxu1 %v8901_v12 }
0x2032   : > { %v12234_v33 = vpop.f32.mrb[8].mxu0 }
0x2033   : > { %v12235_v17 = vpop.f32.mrb[9].mxu0 }
0x2034   : > { %v12236_v62 = vadd.f32 %v12235_v17, %v12234_v33  ;;  %v12237_v57 = vpop.f32.mrb[10].mxu0 }
0x2035   : > { %v12238_v5 = vpop.f32.mrb[11].mxu0 }
0x2036   : > { %v12239_v1 = vadd.f32 %v12238_v5, %v12237_v57 }
0x2052   : > { %v12256_v14 = vpop.f32.mrb[12].mxu0 }
0x2053   : > { %v12257_v8 = vpop.f32.mrb[13].mxu0 }
0x2054   : > { %v12258_v40 = vadd.f32 %v12257_v8, %v12256_v14  ;;  %v12259_v48 = vpop.f32.mrb[14].mxu0 }
0x2055   : > { %v12260_v38 = vpop.f32.mrb[15].mxu0 }
0x2056   : > { %v10068_v29 = vadd.f32 %v12258_v40, %v12236_v62  ;;  %v12261_v19 = vadd.f32 %v12260_v38, %v12259_v48 }
0x2058   : > { %v10071_v9 = vadd.f32 %v12261_v19, %v12239_v1 }
0x208b   : > { %v12278_v23 = vpop.f32.mrb[16].mxu0 }
0x208c   : > { %v12279_v24 = vpop.f32.mrb[17].mxu0 }
0x208d   : > { %v12280_v32 = vadd.f32 %v12279_v24, %v12278_v23  ;;  %v12281_v44 = vpop.f32.mrb[18].mxu0 }
0x208e   : > { %v12282_v46 = vpop.f32.mrb[19].mxu0 }
0x208f   : > { %v10109_v28 = vadd.f32 %v12280_v32, %v10068_v29  ;;  %v12283_v18 = vadd.f32 %v12282_v46, %v12281_v44 }
0x2091   : > { %v10112_v31 = vadd.f32 %v12283_v18, %v10071_v9  ;;  %10120 = vst [vmem:[#allocation3 + $0x10] sm:$0xff] (!%p10986_p2), %v10109_v28 }
0x2093   : > { %10123 = vst [vmem:[#allocation3 + $0x28] sm:$0xff] (!%p10986_p2), %v10112_v31 }
0x20af   : > { %10117 = sbr.rel (%p10986_p2) target bundleno = 8375 (0x20b7), region = 216 }
0x20b2   : > { %v9983_v16 = vpop.f32.mrb[4].mxu1 }
0x20b3   : > { %v9985_v2 = vpop.f32.mrb[5].mxu1  ;;  %10118 = vst [vmem:[#allocation3] sm:$0xff] (!%p10986_p2), %v9983_v16 }
0x20b4   : > { %v9987_v59 = vpop.f32.mrb[6].mxu1  ;;  %10119 = vst [vmem:[#allocation3 + $0x8] sm:$0xff] (!%p10986_p2), %v9985_v2 }
0x20b5   : > { %v9989_v56 = vpop.f32.mrb[7].mxu1  ;;  %10121 = vst [vmem:[#allocation3 + $0x18] sm:$0xff] (!%p10986_p2), %v9987_v59 }
0x20b6   : > { %10122 = vst [vmem:[#allocation3 + $0x20] sm:$0xff] %v9989_v56 }
0x20b7 PF: > { %s18358_s26 = sld [smem:[#allocation57_spill]] }
0x20bd   : > { %p11597_p11 = scmp.le.s32.totalorder %s18358_s26, 0 }
0x20be   : > { %v10128_v0 = vld [vmem:[#allocation3] sm:$0xff] (!%p11597_p11)  ;;  %v10129_v4 = vld [vmem:[#allocation3 + $0x8] sm:$0xff] (!%p11597_p11)  ;;  %v10130_v54 = vld [vmem:[#allocation3 + $0x10] sm:$0xff] (!%p11597_p11) }
0x20bf   : > { %10127 = sbr.rel (%p11597_p11) target bundleno = 8390 (0x20c6), region = 220  ;;  %v10134_v37 = vadd.f32 (!%p11597_p11), %v10128_v0, %v9983_v16  ;;  %v10135_v27 = vadd.f32 (!%p11597_p11), %v10129_v4, %v9985_v2  ;;  %v10136_v12 = vadd.f32 (!%p11597_p11), %v10130_v54, %v10109_v28  ;;  %v10131_v58 = vld [vmem:[#allocation3 + $0x18] sm:$0xff] (!%p11597_p11)  ;;  %v10132_v35 = vld [vmem:[#allocation3 + $0x20] sm:$0xff] (!%p11597_p11)  ;;  %v10133_v39 = vld [vmem:[#allocation3 + $0x28] sm:$0xff] (!%p11597_p11) }
0x20c0   : > { %v10137_v22 = vadd.f32 (!%p11597_p11), %v10131_v58, %v9987_v59  ;;  %v10138_v20 = vadd.f32 (!%p11597_p11), %v10132_v35, %v9989_v56  ;;  %v10139_v34 = vadd.f32 (!%p11597_p11), %v10133_v39, %v10112_v31 }
0x20c1   : > { %10140 = vst [vmem:[#allocation3] sm:$0xff] (!%p11597_p11), %v10134_v37  ;;  %10141 = vst [vmem:[#allocation3 + $0x8] sm:$0xff] (!%p11597_p11), %v10135_v27 }
0x20c2   : > { %10142 = vst [vmem:[#allocation3 + $0x10] sm:$0xff] (!%p11597_p11), %v10136_v12  ;;  %10143 = vst [vmem:[#allocation3 + $0x18] sm:$0xff] (!%p11597_p11), %v10137_v22 }
0x20c3   : > { %10144 = vst [vmem:[#allocation3 + $0x20] sm:$0xff] (!%p11597_p11), %v10138_v20  ;;  %10145 = vst [vmem:[#allocation3 + $0x28] sm:$0xff] (!%p11597_p11), %v10139_v34 }
0x20c6 PF: > { %s18359_s25 = sld [smem:[#allocation57_spill]] }
0x20cc   : > { %p10146_p4 = scmp.eq.s32.totalorder %s18359_s25, 1  ;;  %p11598_p7 = scmp.ne.s32.totalorder %s18359_s25, 1 }
0x20cd   : > { %v10150_v6 = vld [vmem:[#allocation3] sm:$0xff] (!%p11598_p7)  ;;  %v10151_v11 = vld [vmem:[#allocation3 + $0x8] sm:$0xff] (!%p11598_p7)  ;;  %v10152_v42 = vld [vmem:[#allocation3 + $0x10] sm:$0xff] (!%p11598_p7) }
0x20ce   : > { %10149 = sbr.rel (%p11598_p7) target bundleno = 8728 (0x2218), region = 224  ;;  %v10156_v60 = vadd.f32 (!%p11598_p7), %v10150_v6, %v17589_v3  ;;  %v10157_v26 = vadd.f32 (!%p11598_p7), %v10151_v11, %v17560_v53  ;;  %v10158_v50 = vadd.f32 (!%p11598_p7), %v10152_v42, %v17632_v10  ;;  %v10162_v21 = vld [vmem:[%s1235_s23] sm:$0x7] (!%p11598_p7)  ;;  %v10153_v51 = vld [vmem:[#allocation3 + $0x18] sm:$0xff] (!%p11598_p7)  ;;  %v10185_v27 = vld [vmem:[%s1244_s30] sm:$0x7] (!%p11598_p7) }
0x20cf   : > { %v10154_v15 = vld [vmem:[#allocation3 + $0x20] sm:$0xff] (!%p11598_p7)  ;;  %v10167_v49 = vrot.slane (!%p11598_p7), %v10162_v21, %v17747_v52  ;;  %v10171_v25 = vrot.slane (!%p11598_p7), %v10162_v21, %v17757_v55  ;;  %v10175_v41 = vrot.slane (!%p11598_p7), %v10162_v21, %v17750_v7  ;;  %v10155_v63 = vld [vmem:[#allocation3 + $0x28] sm:$0xff] (!%p11598_p7)  ;;  %v10159_v45 = vadd.f32 (!%p11598_p7), %v10153_v51, %v17591_v43  ;;  %v10186_v12 = vld [vmem:[%s1253_s15] sm:$0x7] (!%p11598_p7) }
0x20d0   : > { %v10160_v30 = vadd.f32 (!%p11598_p7), %v10154_v15, %v17562_v61  ;;  %v10161_v3 = vadd.f32 (!%p11598_p7), %v10155_v63, %v17634_v13  ;;  %v10234_v58 = vrot.slane (!%p11598_p7), %v10185_v27, %v17747_v52  ;;  %v10238_v35 = vrot.slane (!%p11598_p7), %v10185_v27, %v17757_v55 }
0x20d1   : > { %v10179_v53 = vadd.f32 (!%p11598_p7), %v10167_v49, %v10156_v60  ;;  %v10180_v47 = vadd.f32 (!%p11598_p7), %v10171_v25, %v10157_v26  ;;  %v10181_v10 = vadd.f32 (!%p11598_p7), %v10175_v41, %v10158_v50  ;;  %v10182_v33 = vadd.f32 (!%p11598_p7), %v10167_v49, %v10159_v45 }
0x20d2   : > { %v10183_v17 = vadd.f32 (!%p11598_p7), %v10171_v25, %v10160_v30  ;;  %v10184_v57 = vadd.f32 (!%p11598_p7), %v10175_v41, %v10161_v3  ;;  %v10242_v39 = vrot.slane (!%p11598_p7), %v10185_v27, %v17750_v7  ;;  %v10256_v20 = vrot.slane (!%p11598_p7), %v10186_v12, %v17747_v52 }
0x20d3   : > { %v10187_v62 = vadd.f32 (!%p11598_p7), %v10180_v47, %v10179_v53  ;;  %v10260_v34 = vrot.slane (!%p11598_p7), %v10186_v12, %v17757_v55  ;;  %v10264_v6 = vrot.slane (!%p11598_p7), %v10186_v12, %v17750_v7 }
0x20d4   : > { %v10191_v5 = vadd.f32 (!%p11598_p7), %v10183_v17, %v10182_v33 }
0x20d5   : > { %v10188_v1 = vadd.f32 %v10187_v62, %v10181_v10 }
0x20d6   : > { %v10192_v14 = vadd.f32 %v10191_v5, %v10184_v57 }
0x20d7   : > { %10189 = vadd.xlane.f32.xlu0 %v10188_v1 }
0x20db   : > { %10193 = vadd.xlane.f32.xlu0 %v10192_v14 }
0x2164   : > { %v10190_v8 = vpop.xlane.xlu0 %10189 }
0x2165   : > { %v10196_v40 = vmul.f32 0.0026041667, %v10190_v8 }
0x2167   : > { %v10198_v48 = vsub.f32 %v10179_v53, %v10196_v40  ;;  %v10199_v43 = vsub.f32 %v10180_v47, %v10196_v40  ;;  %v10200_v38 = vsub.f32 %v10181_v10, %v10196_v40 }
0x2168   : > { %v10194_v61 = vpop.xlane.xlu0 %10193 }
0x2169   : > { %v10197_v29 = vmul.f32 0.0026041667, %v10194_v61  ;;  %v10204_v13 = vmul.f32 %v10198_v48, %v10198_v48  ;;  %v10205_v19 = vmul.f32 %v10199_v43, %v10199_v43  ;;  %v10206_v9 = vmul.f32 %v10200_v38, %v10200_v38 }
0x216b   : > { %v10201_v23 = vsub.f32 %v10182_v33, %v10197_v29  ;;  %v10202_v24 = vsub.f32 %v10183_v17, %v10197_v29  ;;  %v10203_v32 = vsub.f32 %v10184_v57, %v10197_v29  ;;  %v10210_v44 = vadd.f32 %v10205_v19, %v10204_v13 }
0x216d   : > { %v10211_v46 = vadd.f32 %v10210_v44, %v10206_v9  ;;  %v10207_v28 = vmul.f32 %v10201_v23, %v10201_v23  ;;  %v10208_v18 = vmul.f32 %v10202_v24, %v10202_v24  ;;  %v10209_v31 = vmul.f32 %v10203_v32, %v10203_v32 }
0x216f   : > { %10212 = vadd.xlane.f32.xlu1 %v10211_v46  ;;  %v10214_v16 = vadd.f32 %v10208_v18, %v10207_v28 }
0x2171   : > { %v10215_v2 = vadd.f32 %v10214_v16, %v10209_v31 }
0x2173   : > { %10216 = vadd.xlane.f32.xlu1 %v10215_v2 }
0x21fc   : > { %v10213_v59 = vpop.xlane.xlu1 %10212 }
0x21fd   : > { %v10218_v56 = vmul.f32 0.0026041667, %v10213_v59 }
0x21ff   : > { %v10220_v0 = vadd.f32 1e-05, %v10218_v56 }
0x2200   : > { %v10217_v4 = vpop.xlane.xlu1 %10216 }
0x2201   : > { %13990 = vrsqrt.f32 %v10220_v0  ;;  %v10219_v54 = vmul.f32 0.0026041667, %v10217_v4 }
0x2203   : > { %v10221_v37 = vadd.f32 1e-05, %v10219_v54 }
0x2205   : > { %13992 = vrsqrt.f32 %v10221_v37 }
0x220b   : > { %v13991_v22 = vpop.eup %13990 }
0x220c   : > { %v10224_v11 = vmul.f32 %v13991_v22, %v10198_v48  ;;  %v10225_v42 = vmul.f32 %v13991_v22, %v10199_v43  ;;  %v10226_v60 = vmul.f32 %v13991_v22, %v10200_v38 }
0x220e   : > { %v10246_v26 = vmul.f32 %v10234_v58, %v10224_v11  ;;  %v10247_v50 = vmul.f32 %v10238_v35, %v10225_v42  ;;  %v10248_v21 = vmul.f32 %v10242_v39, %v10226_v60 }
0x220f   : > { %v13993_v51 = vpop.eup %13992 }
0x2210   : > { %v10268_v15 = vadd.f32 %v10256_v20, %v10246_v26  ;;  %v10269_v49 = vadd.f32 %v10260_v34, %v10247_v50  ;;  %v10270_v25 = vadd.f32 %v10264_v6, %v10248_v21  ;;  %v10227_v41 = vmul.f32 %v13993_v51, %v10201_v23 }
0x2211   : > { %v10228_v63 = vmul.f32 %v13993_v51, %v10202_v24  ;;  %v10229_v45 = vmul.f32 %v13993_v51, %v10203_v32 }
0x2212   : > { %10274 = vst [vmem:[#allocation2] sm:$0xff] %v10268_v15  ;;  %10275 = vst [vmem:[#allocation2 + $0x8] sm:$0xff] %v10269_v49  ;;  %v10249_v30 = vmul.f32 %v10234_v58, %v10227_v41 }
0x2213   : > { %10276 = vst [vmem:[#allocation2 + $0x10] sm:$0xff] %v10270_v25  ;;  %v10250_v3 = vmul.f32 %v10238_v35, %v10228_v63  ;;  %v10251_v53 = vmul.f32 %v10242_v39, %v10229_v45 }
0x2214   : > { %v10271_v47 = vadd.f32 %v10256_v20, %v10249_v30 }
0x2215   : > { %v10272_v10 = vadd.f32 %v10260_v34, %v10250_v3  ;;  %v10273_v33 = vadd.f32 %v10264_v6, %v10251_v53 }
0x2216   : > { %10277 = vst [vmem:[#allocation2 + $0x18] sm:$0xff] %v10271_v47 }
0x2217   : > { %10278 = vst [vmem:[#allocation2 + $0x20] sm:$0xff] %v10272_v10  ;;  %10279 = vst [vmem:[#allocation2 + $0x28] sm:$0xff] %v10273_v33 }
0x2218 PF: > { %s18360_s12 = sld [smem:[#allocation58_spill]] }
0x221e   : > { %p10280_p3 = scmp.eq.s32.totalorder %s18360_s12, 1 }
0x2220   : > { %p10281_p10 = pnand %p10280_p3, %p10146_p4 }
0x2221   : > { %v10288_v17 = vld [vmem:[#allocation2 + $0x18] sm:$0xff] (!%p10281_p10)  ;;  %v10289_v62 = vld [vmem:[#allocation2 + $0x20] sm:$0xff] (!%p10281_p10)  ;;  %v10290_v57 = vld [vmem:[#allocation2 + $0x28] sm:$0xff] (!%p10281_p10)  ;;  %vm10466_vm1 = vcmask (!%p10281_p10), 1041409   ;;  %vm10468_vm2 = vcmask (!%p10281_p10), 1043459   ;;  %vm10470_vm3 = vcmask (!%p10281_p10), 1045509  }
0x2222   : > { %10284 = sbr.rel (%p10281_p10) target bundleno = 9087 (0x237f), region = 228  ;;  %v10297_v5 = vadd.f32 (!%p10281_p10), %v10289_v62, %v10288_v17  ;;  %v10285_v1 = vld [vmem:[#allocation2] sm:$0xff] (!%p10281_p10)  ;;  %v10286_v14 = vld [vmem:[#allocation2 + $0x8] sm:$0xff] (!%p10281_p10)  ;;  %v10287_v8 = vld [vmem:[#allocation2 + $0x10] sm:$0xff] (!%p10281_p10)  ;;  %vm10472_vm4 = vcmask (!%p10281_p10), 1047559  }
0x2223   : > { %v10293_v40 = vadd.f32 (!%p10281_p10), %v10286_v14, %v10285_v1  ;;  %v10291_v39 = vld [vmem:[#allocation37] sm:$0x7] (!%p10281_p10)  ;;  %v10292_v22 = vld [vmem:[#allocation39] sm:$0x7] (!%p10281_p10) }
0x2224   : > { %v10298_v48 = vadd.f32 (!%p10281_p10), %v10297_v5, %v10290_v57  ;;  %v10340_v20 = vrot.slane (!%p10281_p10), %v10291_v39, %v17747_v52  ;;  %v10344_v34 = vrot.slane (!%p10281_p10), %v10291_v39, %v17757_v55  ;;  %v10348_v6 = vrot.slane (!%p10281_p10), %v10291_v39, %v17750_v7 }
0x2225   : > { %v10294_v43 = vadd.f32 (!%p10281_p10), %v10293_v40, %v10287_v8  ;;  %v10362_v42 = vrot.slane (!%p10281_p10), %v10292_v22, %v17747_v52  ;;  %v10366_v60 = vrot.slane (!%p10281_p10), %v10292_v22, %v17757_v55  ;;  %v10370_v26 = vrot.slane (!%p10281_p10), %v10292_v22, %v17750_v7 }
0x2226   : > { %10299 = vadd.xlane.f32.xlu0 (!%p10281_p10), %v10298_v48 }
0x222a   : > { %10295 = vadd.xlane.f32.xlu0 %v10294_v43 }
0x22b3   : > { %v10300_v38 = vpop.xlane.xlu0 %10299 }
0x22b4   : > { %v10303_v61 = vmul.f32 0.0026041667, %v10300_v38 }
0x22b6   : > { %v10307_v29 = vsub.f32 %v10288_v17, %v10303_v61  ;;  %v10308_v13 = vsub.f32 %v10289_v62, %v10303_v61  ;;  %v10309_v19 = vsub.f32 %v10290_v57, %v10303_v61  ;;  %v14854_v61 = vmov 1983009808  }
0x22b7   : > { %v10296_v9 = vpop.xlane.xlu0 %10295 }
0x22b8   : > { %v10302_v23 = vmul.f32 0.0026041667, %v10296_v9  ;;  %v10313_v24 = vmul.f32 %v10307_v29, %v10307_v29  ;;  %v10314_v32 = vmul.f32 %v10308_v13, %v10308_v13  ;;  %v10315_v44 = vmul.f32 %v10309_v19, %v10309_v19 }
0x22ba   : > { %v10304_v46 = vsub.f32 %v10285_v1, %v10302_v23  ;;  %v10305_v28 = vsub.f32 %v10286_v14, %v10302_v23  ;;  %v10306_v18 = vsub.f32 %v10287_v8, %v10302_v23  ;;  %v10320_v31 = vadd.f32 %v10314_v32, %v10313_v24 }
0x22bc   : > { %v10321_v16 = vadd.f32 %v10320_v31, %v10315_v44  ;;  %v10310_v2 = vmul.f32 %v10304_v46, %v10304_v46  ;;  %v10311_v59 = vmul.f32 %v10305_v28, %v10305_v28  ;;  %v10312_v56 = vmul.f32 %v10306_v18, %v10306_v18 }
0x22be   : > { %10322 = vadd.xlane.f32.xlu1 %v10321_v16  ;;  %v10316_v0 = vadd.f32 %v10311_v59, %v10310_v2 }
0x22c0   : > { %v10317_v4 = vadd.f32 %v10316_v0, %v10312_v56 }
0x22c2   : > { %10318 = vadd.xlane.f32.xlu1 %v10317_v4 }
0x234b   : > { %v10323_v54 = vpop.xlane.xlu1 %10322 }
0x234c   : > { %v10325_v37 = vmul.f32 0.0026041667, %v10323_v54 }
0x234e   : > { %v10327_v27 = vadd.f32 1e-05, %v10325_v37 }
0x234f   : > { %v10319_v12 = vpop.xlane.xlu1 %10318 }
0x2350   : > { %13994 = vrsqrt.f32 %v10327_v27  ;;  %v10324_v58 = vmul.f32 0.0026041667, %v10319_v12 }
0x2352   : > { %v10326_v35 = vadd.f32 1e-05, %v10324_v58 }
0x2354   : > { %13996 = vrsqrt.f32 %v10326_v35 }
0x235a   : > { %v13995_v11 = vpop.eup %13994 }
0x235b   : > { %v10333_v50 = vmul.f32 %v13995_v11, %v10307_v29  ;;  %v10334_v21 = vmul.f32 %v13995_v11, %v10308_v13  ;;  %v10335_v51 = vmul.f32 %v13995_v11, %v10309_v19  ;;  %v10431_v29 = vunpack.c.l.s4 %v14854_v61 }
0x235d   : > { %v10355_v15 = vmul.f32 %v10340_v20, %v10333_v50  ;;  %v10356_v49 = vmul.f32 %v10344_v34, %v10334_v21  ;;  %v10357_v25 = vmul.f32 %v10348_v6, %v10335_v51  ;;  %v10432_v2 = vunpack.c.0.s8 %v10431_v29 }
0x235e   : > { %v13997_v41 = vpop.eup %13996 }
0x235f   : > { %v10377_v63 = vadd.f32 %v10362_v42, %v10355_v15  ;;  %v10378_v45 = vadd.f32 %v10366_v60, %v10356_v49  ;;  %v10379_v30 = vadd.f32 %v10370_v26, %v10357_v25  ;;  %v10330_v3 = vmul.f32 %v13997_v41, %v10304_v46 }
0x2360   : > { %v10331_v53 = vmul.f32 %v13997_v41, %v10305_v28  ;;  %v10332_v47 = vmul.f32 %v13997_v41, %v10306_v18  ;;  %v10435_v22 = vsub.s32 %v10432_v2, %v17744_v36 }
0x2361   : > { %v10398_v10 = vrot.slane %v10377_v63, 4  ;;  %v10404_v33 = vrot.slane %v10378_v45, 4  ;;  %v10410_v52 = vrot.slane %v10379_v30, 4  ;;  %v10352_v17 = vmul.f32 %v10340_v20, %v10330_v3 }
0x2362   : > { %v10353_v55 = vmul.f32 %v10344_v34, %v10331_v53  ;;  %v10354_v62 = vmul.f32 %v10348_v6, %v10332_v47 }
0x2363   : > { %v10399_v7 = vadd.f32 %v10398_v10, %v10377_v63  ;;  %v10405_v57 = vadd.f32 %v10404_v33, %v10378_v45  ;;  %v10411_v5 = vadd.f32 %v10410_v52, %v10379_v30  ;;  %v10374_v1 = vadd.f32 %v10362_v42, %v10352_v17 }
0x2364   : > { %v10375_v14 = vadd.f32 %v10366_v60, %v10353_v55  ;;  %v10376_v8 = vadd.f32 %v10370_v26, %v10354_v62 }
0x2365   : > { %v10400_v40 = vrot.slane %v10399_v7, 2  ;;  %v10406_v48 = vrot.slane %v10405_v57, 2  ;;  %v10412_v43 = vrot.slane %v10411_v5, 2  ;;  %v10380_v38 = vrot.slane %v10374_v1, 4 }
0x2366   : > { %v10386_v13 = vrot.slane %v10375_v14, 4  ;;  %v10392_v19 = vrot.slane %v10376_v8, 4 }
0x2367   : > { %v10401_v9 = vadd.f32 %v10400_v40, %v10399_v7  ;;  %v10407_v23 = vadd.f32 %v10406_v48, %v10405_v57  ;;  %v10413_v24 = vadd.f32 %v10412_v43, %v10411_v5  ;;  %v10381_v32 = vadd.f32 %v10380_v38, %v10374_v1 }
0x2368   : > { %v10387_v44 = vadd.f32 %v10386_v13, %v10375_v14  ;;  %v10393_v46 = vadd.f32 %v10392_v19, %v10376_v8 }
0x2369   : > { %v10402_v28 = vrot.slane %v10401_v9, 1  ;;  %v10408_v18 = vrot.slane %v10407_v23, 1  ;;  %v10414_v31 = vrot.slane %v10413_v24, 1  ;;  %v10382_v16 = vrot.slane %v10381_v32, 2 }
0x236a   : > { %v10388_v59 = vrot.slane %v10387_v44, 2  ;;  %v10394_v56 = vrot.slane %v10393_v46, 2 }
0x236b   : > { %v10403_v0 = vadd.f32 %v10402_v28, %v10401_v9  ;;  %v10409_v4 = vadd.f32 %v10408_v18, %v10407_v23  ;;  %v10415_v54 = vadd.f32 %v10414_v31, %v10413_v24  ;;  %v10383_v37 = vadd.f32 %v10382_v16, %v10381_v32 }
0x236c   : > { %v10389_v27 = vadd.f32 %v10388_v59, %v10387_v44  ;;  %v10395_v12 = vadd.f32 %v10394_v56, %v10393_v46 }
0x236d   : > { %v10420_v58 = vmul.f32 0.125, %v10403_v0  ;;  %v10421_v35 = vmul.f32 0.125, %v10409_v4  ;;  %v10384_v39 = vrot.slane %v10383_v37, 1  ;;  %v10422_v20 = vmul.f32 0.125, %v10415_v54 }
0x236e   : > { %v10390_v34 = vrot.slane %v10389_v27, 1  ;;  %v10396_v6 = vrot.slane %v10395_v12, 1 }
0x236f   : > { %v10445_v11 = vcombine.low %v10420_v58, %v10421_v35  ;;  %v10385_v42 = vadd.f32 %v10384_v39, %v10383_v37  ;;  %v10459_v51 = vrot.slane %v10422_v20, %v10435_v22 }
0x2370   : > { %v10391_v60 = vadd.f32 %v10390_v34, %v10389_v27  ;;  %v10397_v26 = vadd.f32 %v10396_v6, %v10395_v12 }
0x2371   : > { %v10452_v50 = vrot.slane %v10445_v11, %v10435_v22  ;;  %v10417_v21 = vmul.f32 0.125, %v10385_v42 }
0x2372   : > { %v10418_v15 = vmul.f32 0.125, %v10391_v60  ;;  %v10419_v49 = vmul.f32 0.125, %v10397_v26 }
0x2373   : > { %v10460_v25 = vcombine.low %v10452_v50, %v10459_v51 }
0x2374   : > { %v10429_v41 = vcombine.low %v10417_v21, %v10418_v15  ;;  %v10443_v45 = vrot.slane %v10419_v49, %v10435_v22 }
0x2375   : > { %v10465_v30 = vrot.slane %v10460_v25, 7 }
0x2376   : > { %v10436_v63 = vrot.slane %v10429_v41, %v10435_v22 }
0x2378   : > { %v10444_v36 = vcombine.low %v10436_v63, %v10443_v45 }
0x237a   : > { %v10467_v3 = vsel %vm10466_vm1, %v10465_v30, %v10444_v36 }
0x237b   : > { %v10469_v53 = vsel %vm10468_vm2, %v10465_v30, %v10467_v3 }
0x237c   : > { %v10471_v47 = vsel %vm10470_vm3, %v10465_v30, %v10469_v53 }
0x237d   : > { %v10473_v10 = vsel %vm10472_vm4, %v10465_v30, %v10471_v47 }
0x237e   : > { %10475 = vst [vmem:[#allocation40] sm:$0x3f] %v10473_v10 }
0x237f PF: > { %s18362_s2 = sld [smem:[#allocation59_spill]]  ;;  %s14855_s28 = smov [#allocation40]  }
0x2380   : > { %s10483_s21 = sshll.u32 %s14855_s28, 4  ;;  %s10484_s21 = int_to_ptr.vmem [resolvable:$true] %s10483_s21 }
0x2381   : > { %s14642_s8 = scalar_lea.vmem %s10484_s21, 96  ;;  %p14649_p6 = scmp.lt.s32.totalorder %s10484_s21, %s10484_s21 }
0x2382   : > { %p14643_p13 = scmp.ne.s32.totalorder %s10484_s21, %s14642_s8  ;;  %p14650_p0 = scmp.lt.s32.totalorder %s14642_s8, %s14642_s8 }
0x2384   : > { %p14651_p12 = por %p14650_p0, %p14649_p6 }
0x2385   : > { %p12986_p9 = scmp.eq.s32.totalorder %s18362_s2, 3 }
0x2387   : > { %p14644_p8 = pnand %p14643_p13, %p12986_p9 }
0x2389   : > { %p14645_p5 = pneg %p14644_p8 }
0x238b   : > { %p14652_p1 = pnand %p14651_p12, %p14645_p5 }
0x238d   : > { %14655 = shalt.err (!%p14652_p1)
}
0x238e   : > { %s18363_s5 = sld [smem:[#allocation90_spill]] }
0x2394   : > { %s18364_s23 = smov %s18363_s5  ;;  %s14656_s4 = scalar_lea.hbm %s18363_s5, 96 }
0x2395   : > { %p14657_p2 = scmp.ne.s32.totalorder %s18364_s23, %s14656_s4  ;;  %p14662_p7 = scmp.lt.u32.totalorder %s14656_s4, %s18364_s23 }
0x2397   : > { %p14658_p11 = pnand %p14657_p2, %p12986_p9 }
0x2399   : > { %p14659_p4 = pneg %p14658_p11 }
0x239b   : > { %p14664_p3 = pnand %p14662_p7, %p14659_p4 }
0x239d   : > { %14667 = shalt.err (!%p14664_p3)
}
0x239e   : > { %12946 = dma.vmem_to_hbm [thread:$0]  (%p12986_p9), %s10484_s21, 96, %s18364_s23, [#allocation6]  }
0x239f   : > { %14765 = dma.done.wait (%p12986_p9), [#allocation6], 96  }
0x23a0   : > { %14767 = vsyncadd (%p12986_p9), [#allocation6], 4294967200 }
0x23a1 PF: > { %s62_s7 = sadd.s32 1, %s14810_s7   ;;  %s18365_s4 = sld [smem:[#allocation55_spill]] }
0x23a2   : > { %p59_p10 = scmp.ge.s32.totalorder %s62_s7, 6   ;;  %s18366_s9 = sld [smem:[#allocation64_spill]] }
0x23a3   : > { %s18367_s25 = sld [smem:[#allocation56_spill]]  ;;  %s18368_s13 = sld [smem:[#allocation63_spill]] }
0x23a4   : > { %s18369_s10 = sld [smem:[#allocation60_spill]]  ;;  %s18370_s12 = sld [smem:[#allocation61_spill]] }
0x23a5   : > { %s18371_s30 = smov %s14778_s24  ;;  %s18373_s5 = smov %s14790_s1 }
0x23a6   : > { %s18375_s26 = smov %s14802_s6  ;;  %s18376_s2 = smov %s14806_s27 }
0x23a7   :  { %61 = sbr.rel (!%p59_p10) target bundleno = 51 (0x33), region = 381 }
0x23a8   : > { %s18372_s24 = smov %s18366_s9 }
0x23a9   : > { %s18374_s1 = smov %s18368_s13 }
0x23aa   : > { %s18377_s6 = smov %s18369_s10  ;;  %s18378_s27 = smov %s18370_s12 }
0x23ae   :  { %10496 = vsyncpa [#allocation5], 1 }
0x23af   :  { %10498 = vsyncpa [#allocation5 + $0x1], 1 }
0x23b0   :  { %10499 = vsyncpa [#allocation8], 1 }
0x23b1   :  { %10500 = vsyncpa [#allocation11], 1 }
0x23b2   :  { %10501 = vsyncpa [#allocation14], 1 }
0x23b3   :  { %10503 = vsyncpa [#allocation14 + $0x1], 1 }
0x23b4   :  { %10504 = vsyncpa [#allocation17], 1 }
0x23b5   :  { %10506 = vsyncpa [#allocation17 + $0x1], 1 }
0x23b6   :  { %10507 = vsyncpa [#allocation20], 1 }
0x23b7   :  { %10509 = vsyncpa [#allocation20 + $0x1], 1 }
0x23b8   :  { %10510 = vsyncpa [#allocation23], 1 }
0x23b9   :  { %10512 = vsyncpa [#allocation23 + $0x1], 1 }
0x23ba   :  { %10513 = vsyncpa [#allocation26], 1 }
0x23bb   :  { %10515 = vsyncpa [#allocation26 + $0x1], 1 }
0x23bc   :  { %10516 = vsyncpa [#allocation29], 1 }
0x23bd   :  { %10518 = vsyncpa [#allocation29 + $0x1], 1 }
0x23be   :  { %10519 = vsyncpa [#allocation32], 1 }
0x23bf   :  { %10521 = vsyncpa [#allocation32 + $0x1], 1 }
0x23c0   :  { %10522 = vsyncpa [#allocation35], 1 }
0x23c1   :  { %10524 = vsyncpa [#allocation35 + $0x1], 1 }
0x23c2   :  { %10525 = vsyncpa [#allocation38], 1 }
0x23c3   :  { %10526 = vsyncpa [#allocation6], 1 }
0x23c4   :  { %10528 = vsyncpa [#allocation6 + $0x1], 1 }

</bundles_post_ra>
